<compile_context>
chip_gen: v7x
topology: tpu7x:2x2x1
jax: 0.10.0
libtpu: 0.0.40
codegen_flags: <defaults>
</compile_context>

<pallas_src>
import jax
import jax.numpy as jnp
import numpy as np
from jax.experimental import pallas as pl
from jax.experimental.pallas import tpu as pltpu

EMB = 128
HID = 512
NLAYERS = 3
K0 = 256          # padded layer-0 input width: [emb(128) | cond | zeros]


def _round_up(x, m):
    return (x + m - 1) // m * m


def multigru_kernel(x_ref, h_in_ref, w_ih0_ref, w_ih12_ref, w_hh_ref, b_ref,
                    w_out_ref, b_out_ref, logits_ref, h_out_ref, h_scr):
    t = pl.program_id(0)

    # Initialize the VMEM-resident hidden-state carry from the input state.
    @pl.when(t == 0)
    def _():
        h_scr[...] = h_in_ref[...]

    x = x_ref[0]                                   # (B, K0) bf16, this token
    for layer in range(NLAYERS):
        w_ih = w_ih0_ref[...] if layer == 0 else w_ih12_ref[layer - 1]
        b_all = b_ref[layer]                       # (2, 3*HID) f32
        h_prev = h_scr[layer]                      # (B, HID) f32

        # gi / gh are independent -> MXU pipelines both (bf16 in, f32 acc).
        gi = jnp.dot(x, w_ih, preferred_element_type=jnp.float32) + b_all[0:1, :]
        gh = jnp.dot(h_prev.astype(jnp.bfloat16), w_hh_ref[layer],
                     preferred_element_type=jnp.float32) + b_all[1:2, :]

        r = jax.nn.sigmoid(gi[:, 0 * HID:1 * HID] + gh[:, 0 * HID:1 * HID])
        z = jax.nn.sigmoid(gi[:, 1 * HID:2 * HID] + gh[:, 1 * HID:2 * HID])
        n = jnp.tanh(gi[:, 2 * HID:3 * HID] + r * gh[:, 2 * HID:3 * HID])
        h_new = (1.0 - z) * n + z * h_prev

        h_scr[layer] = h_new
        x = h_new.astype(jnp.bfloat16)             # input of next layer

    # Per-step logits (lane-dense, padded vocab).
    logits_ref[0] = (jnp.dot(x, w_out_ref[...],
                             preferred_element_type=jnp.float32)
                     + b_out_ref[...])

    # Write the hidden state back to HBM only once, after the last token.
    @pl.when(t == pl.num_programs(0) - 1)
    def _():
        h_out_ref[...] = h_scr[...]


def init_params(key, voc_size, cond_dim):
    """Deterministic synthetic parameters (PyTorch shapes, stored transposed, f32)."""
    ks = jax.random.split(key, 16)
    s = 0.05

    def rnd(k, shape):
        return (s * jax.random.normal(k, shape)).astype(jnp.float32)

    p = {
        "embedding": rnd(ks[0], (voc_size, EMB)),
        "w_cond": rnd(ks[1], (cond_dim, EMB)),        # Linear(cond_dim,128).weight.T
        "b_cond": rnd(ks[2], (1, EMB)),
        "w_out": rnd(ks[3], (HID, voc_size)),         # Linear(512,voc).weight.T
        "b_out": rnd(ks[4], (1, voc_size)),
    }
    in_dims = (EMB, HID, HID)
    for i in range(3):
        kk = jax.random.split(ks[5 + i], 4)
        p[f"w_ih{i+1}"] = rnd(kk[0], (in_dims[i], 3 * HID))   # GRUCell.weight_ih.T
        p[f"w_hh{i+1}"] = rnd(kk[1], (HID, 3 * HID))          # GRUCell.weight_hh.T
        p[f"b_ih{i+1}"] = rnd(kk[2], (1, 3 * HID))
        p[f"b_hh{i+1}"] = rnd(kk[3], (1, 3 * HID))
    return p


def pack_params(params):
    """One-time offline packing: fold cond proj into layer-0, stack, pad voc, cast bf16."""
    cond_dim = params["w_cond"].shape[0]
    voc = params["w_out"].shape[1]
    vocp = _round_up(max(voc, 128), 128)
    assert EMB + cond_dim <= K0, "cond_dim too large for the 256-wide folded input"

    w_ih1 = params["w_ih1"]                                    # (128, 1536)
    w_ih0 = jnp.concatenate([
        w_ih1,
        params["w_cond"] @ w_ih1,                              # (cond_dim, 1536)
        jnp.zeros((K0 - EMB - cond_dim, 3 * HID), jnp.float32),
    ], axis=0)                                                 # (256, 1536)
    b_ih0 = params["b_ih1"] + params["b_cond"] @ w_ih1         # (1, 1536)

    w_ih12 = jnp.stack([params["w_ih2"], params["w_ih3"]]
                       ).astype(jnp.bfloat16)                  # (2, 512, 1536)
    w_hh = jnp.stack([params["w_hh1"], params["w_hh2"], params["w_hh3"]]
                     ).astype(jnp.bfloat16)                    # (3, 512, 1536)
    b = jnp.stack([
        jnp.concatenate([b_ih0, params["b_hh1"]], axis=0),
        jnp.concatenate([params["b_ih2"], params["b_hh2"]], axis=0),
        jnp.concatenate([params["b_ih3"], params["b_hh3"]], axis=0),
    ])                                                         # (3, 2, 1536) f32

    w_out = jnp.zeros((HID, vocp), jnp.float32).at[:, :voc].set(
        params["w_out"]).astype(jnp.bfloat16)                  # (512, vocp) bf16
    b_out = jnp.zeros((1, vocp), jnp.float32).at[:, :voc].set(params["b_out"])

    return {
        "embedding": params["embedding"],                      # (voc, 128) f32
        "w_ih0": w_ih0.astype(jnp.bfloat16),                   # (256, 1536) bf16
        "w_ih12": w_ih12,
        "w_hh": w_hh,
        "b": b,
        "w_out": w_out,
        "b_out": b_out,
    }


@jax.jit
def _multigru_seq(tokens, h, cond, packed):
    """tokens: (T,B) int32, h: (3,B,512) f32, cond: (B,cond_dim) f32.
    Returns (logits_padded (T,B,vocp) f32, h_out (3,B,512) f32)."""
    T, B = tokens.shape
    cond_dim = cond.shape[1]
    vocp = packed["w_out"].shape[1]

    # Embedding lookup (data-dependent gather) + cond concat: tiny JAX glue,
    # streamed per-step as (1,B,K0) blocks (~8 KB/step).
    emb = jnp.take(packed["embedding"], tokens.reshape(-1), axis=0)
    emb = emb.reshape(T, B, EMB)
    cond_b = jnp.broadcast_to(cond[None].astype(jnp.float32), (T, B, cond_dim))
    pad = jnp.zeros((T, B, K0 - EMB - cond_dim), jnp.float32)
    x0 = jnp.concatenate([emb, cond_b, pad], axis=-1).astype(jnp.bfloat16)

    in_specs = [
        pl.BlockSpec((1, B, K0), lambda t: (t, 0, 0)),              # x0[t]
        pl.BlockSpec((NLAYERS, B, HID), lambda t: (0, 0, 0)),       # h_in (resident)
        pl.BlockSpec((K0, 3 * HID), lambda t: (0, 0)),              # w_ih0 (resident)
        pl.BlockSpec((2, HID, 3 * HID), lambda t: (0, 0, 0)),       # w_ih layers 1-2
        pl.BlockSpec((NLAYERS, HID, 3 * HID), lambda t: (0, 0, 0)), # w_hh
        pl.BlockSpec((NLAYERS, 2, 3 * HID), lambda t: (0, 0, 0)),   # biases
        pl.BlockSpec((HID, vocp), lambda t: (0, 0)),                # w_out
        pl.BlockSpec((1, vocp), lambda t: (0, 0)),                  # b_out
    ]
    out_specs = (
        pl.BlockSpec((1, B, vocp), lambda t: (t, 0, 0)),            # logits[t]
        pl.BlockSpec((NLAYERS, B, HID), lambda t: (0, 0, 0)),       # h_out (final)
    )

    logits, h_out = pl.pallas_call(
        multigru_kernel,
        out_shape=(
            jax.ShapeDtypeStruct((T, B, vocp), jnp.float32),
            jax.ShapeDtypeStruct((NLAYERS, B, HID), jnp.float32),
        ),
        grid_spec=pltpu.PrefetchScalarGridSpec(
            num_scalar_prefetch=0,
            grid=(T,),
            in_specs=in_specs,
            out_specs=out_specs,
            scratch_shapes=[pltpu.VMEM((NLAYERS, B, HID), jnp.float32)],
        ),
        compiler_params=pltpu.CompilerParams(
            dimension_semantics=("arbitrary",),   # token steps are serially dependent
            vmem_limit_bytes=32 * 1024 * 1024),
    )(x0, h, packed["w_ih0"], packed["w_ih12"], packed["w_hh"], packed["b"],
      packed["w_out"], packed["b_out"])
    return logits, h_out


def multigru_forward(x_tokens, h, cond, packed, voc):
    """Single-step forward, exactly the original module's forward signature."""
    logits, h_out = _multigru_seq(x_tokens[None, :], h, cond, packed)
    return logits[0, :, :voc], h_out


def multigru_forward_seq(tokens, h, cond, packed, voc):
    """Teacher-forced multi-token forward; weights stay VMEM-resident across steps."""
    logits, h_out = _multigru_seq(tokens, h, cond, packed)
    return logits[:, :, :voc], h_out


# ---------------------------------------------------------------------------
# References for verification.
# ---------------------------------------------------------------------------
def multigru_reference_packed(tokens, h, cond, packed, voc):
    """Mirrors the kernel math exactly (same bf16 weights, folded cond, padded voc)."""
    T, B = tokens.shape
    cond_dim = cond.shape[1]
    logits_all = []
    for t in range(T):
        emb = jnp.take(packed["embedding"], tokens[t], axis=0)
        x = jnp.concatenate(
            [emb, cond, jnp.zeros((B, K0 - EMB - cond_dim), jnp.float32)],
            axis=-1).astype(jnp.bfloat16)
        h_new = []
        for l in range(NLAYERS):
            w_ih = packed["w_ih0"] if l == 0 else packed["w_ih12"][l - 1]
            gi = jnp.dot(x, w_ih, preferred_element_type=jnp.float32) + packed["b"][l, 0:1]
            gh = jnp.dot(h[l].astype(jnp.bfloat16), packed["w_hh"][l],
                         preferred_element_type=jnp.float32) + packed["b"][l, 1:2]
            r = jax.nn.sigmoid(gi[:, :HID] + gh[:, :HID])
            z = jax.nn.sigmoid(gi[:, HID:2 * HID] + gh[:, HID:2 * HID])
            n = jnp.tanh(gi[:, 2 * HID:] + r * gh[:, 2 * HID:])
            hl = (1.0 - z) * n + z * h[l]
            h_new.append(hl)
            x = hl.astype(jnp.bfloat16)
        h = jnp.stack(h_new)
        logits_all.append(jnp.dot(x, packed["w_out"],
                                  preferred_element_type=jnp.float32) + packed["b_out"])
    return jnp.stack(logits_all)[:, :, :voc], h


def multigru_reference_f32(tokens, h, cond, params):
    """PyTorch-faithful full-f32 forward (semantics check, loose tolerance)."""
    def gru_cell(x, hh, w_ih, w_hh, b_ih, b_hh):
        gi = x @ w_ih + b_ih
        gh = hh @ w_hh + b_hh
        r = jax.nn.sigmoid(gi[:, :HID] + gh[:, :HID])
        z = jax.nn.sigmoid(gi[:, HID:2 * HID] + gh[:, HID:2 * HID])
        n = jnp.tanh(gi[:, 2 * HID:] + r * gh[:, 2 * HID:])
        return (1.0 - z) * n + z * hh

    T = tokens.shape[0]
    logits_all = []
    for t in range(T):
        x = jnp.take(params["embedding"], tokens[t], axis=0)
        x = x + cond @ params["w_cond"] + params["b_cond"]
        h_new = []
        for i in range(3):
            x = gru_cell(x, h[i], params[f"w_ih{i+1}"], params[f"w_hh{i+1}"],
                         params[f"b_ih{i+1}"], params[f"b_hh{i+1}"])
            h_new.append(x)
        h = jnp.stack(h_new)
        logits_all.append(x @ params["w_out"] + params["b_out"])
    return jnp.stack(logits_all), h


if __name__ == "__main__":
    VOC = 32
    COND_DIM = 16
    B = 8
    T = 4

    key = jax.random.PRNGKey(0)
    k_par, k_tok, k_h, k_cond = jax.random.split(key, 4)

    params = init_params(k_par, VOC, COND_DIM)
    packed = pack_params(params)

    tokens = jax.random.randint(k_tok, (T, B), 0, VOC, dtype=jnp.int32)
    h0 = 0.1 * jax.random.normal(k_h, (NLAYERS, B, HID), dtype=jnp.float32)
    cond = jax.random.normal(k_cond, (B, COND_DIM), dtype=jnp.float32)

    # --- Single-step call (exact semantics of the original module forward). ---
    logits1, h1 = multigru_forward(tokens[0], h0, cond, packed, VOC)
    jax.block_until_ready((logits1, h1))
    ref_l1, ref_h1 = multigru_reference_packed(tokens[:1], h0, cond, packed, VOC)
    np.testing.assert_allclose(np.asarray(logits1), np.asarray(ref_l1[0]),
                               rtol=5e-3, atol=5e-3)
    np.testing.assert_allclose(np.asarray(h1), np.asarray(ref_h1),
                               rtol=5e-3, atol=5e-3)

    # --- Multi-token decode: weights stay VMEM-resident across all T steps. ---
    logits_seq, h_seq = multigru_forward_seq(tokens, h0, cond, packed, VOC)
    jax.block_until_ready((logits_seq, h_seq))

    # 1) Kernel-exactness check: reference mirrors the kernel's bf16 math.
    ref_logits, ref_h = multigru_reference_packed(tokens, h0, cond, packed, VOC)
    np.testing.assert_allclose(np.asarray(logits_seq), np.asarray(ref_logits),
                               rtol=5e-3, atol=5e-3)
    np.testing.assert_allclose(np.asarray(h_seq), np.asarray(ref_h),
                               rtol=5e-3, atol=5e-3)

    # 2) Semantics check vs. full-f32 PyTorch-faithful forward (loose tol:
    #    only bf16 weight/activation quantization separates the two).
    f32_logits, f32_h = multigru_reference_f32(tokens, h0, cond, params)
    np.testing.assert_allclose(np.asarray(logits_seq), np.asarray(f32_logits),
                               rtol=5e-2, atol=5e-2)
    np.testing.assert_allclose(np.asarray(h_seq), np.asarray(f32_h),
                               rtol=5e-2, atol=5e-2)

    print("KERNEL_OK")
</pallas_src>

<mosaic_0001>
module attributes {stable_mosaic.version = 11 : i64} {
  func.func @multigru_kernel(%arg0: i32, %arg1: memref<1x8x256xbf16, #tpu.memory_space<vmem>>, %arg2: memref<3x8x512xf32, #tpu.memory_space<vmem>>, %arg3: memref<256x1536xbf16, #tpu.memory_space<vmem>>, %arg4: memref<2x512x1536xbf16, #tpu.memory_space<vmem>>, %arg5: memref<3x512x1536xbf16, #tpu.memory_space<vmem>>, %arg6: memref<3x2x1536xf32, #tpu.memory_space<vmem>>, %arg7: memref<512x128xbf16, #tpu.memory_space<vmem>>, %arg8: memref<1x128xf32, #tpu.memory_space<vmem>>, %arg9: memref<1x8x128xf32, #tpu.memory_space<vmem>>, %arg10: memref<3x8x512xf32, #tpu.memory_space<vmem>>, %arg11: memref<3x8x512xf32, #tpu.memory_space<vmem>>) attributes {dimension_semantics = [#tpu.dimension_semantics<arbitrary>], iteration_bounds = array<i64: 1>, scalar_prefetch = 0 : i64, scratch_operands = 1 : i64, tpu.core_type = #tpu.core_type<tc>, window_params = [{transform_indices = @transform_0, window_bounds = array<i64: 1, 8, 256>}, {pipeline_mode = #tpu.pipeline_mode<synchronous>, transform_indices = @transform_1, window_bounds = array<i64: 3, 8, 512>}, {pipeline_mode = #tpu.pipeline_mode<synchronous>, transform_indices = @transform_2, window_bounds = array<i64: 256, 1536>}, {pipeline_mode = #tpu.pipeline_mode<synchronous>, transform_indices = @transform_3, window_bounds = array<i64: 2, 512, 1536>}, {pipeline_mode = #tpu.pipeline_mode<synchronous>, transform_indices = @transform_4, window_bounds = array<i64: 3, 512, 1536>}, {pipeline_mode = #tpu.pipeline_mode<synchronous>, transform_indices = @transform_5, window_bounds = array<i64: 3, 2, 1536>}, {pipeline_mode = #tpu.pipeline_mode<synchronous>, transform_indices = @transform_6, window_bounds = array<i64: 512, 128>}, {pipeline_mode = #tpu.pipeline_mode<synchronous>, transform_indices = @transform_7, window_bounds = array<i64: 1, 128>}, {transform_indices = @transform_8, window_bounds = array<i64: 1, 8, 128>}, {pipeline_mode = #tpu.pipeline_mode<synchronous>, transform_indices = @transform_9, window_bounds = array<i64: 3, 8, 512>}]} {
    %c0_i32 = arith.constant 0 : i32
    %0 = arith.cmpi eq, %arg0, %c0_i32 : i32
    %1 = arith.extui %0 : i1 to i32
    %c0_i32_0 = arith.constant 0 : i32
    %2 = arith.cmpi ne, %1, %c0_i32_0 : i32
    scf.if %2 {
      %c0_69 = arith.constant 0 : index
      %c0_70 = arith.constant 0 : index
      %c0_71 = arith.constant 0 : index
      %156 = vector.load %arg2[%c0_69, %c0_70, %c0_71] : memref<3x8x512xf32, #tpu.memory_space<vmem>>, vector<3x8x512xf32>
      %c0_72 = arith.constant 0 : index
      %c0_73 = arith.constant 0 : index
      %c0_74 = arith.constant 0 : index
      %157 = vector.load %arg11[%c0_72, %c0_73, %c0_74] : memref<3x8x512xf32, #tpu.memory_space<vmem>>, vector<3x8x512xf32>
      tpu.vector_store %arg11[%c0_72, %c0_73, %c0_74], %156 {strides = array<i32>} : memref<3x8x512xf32, #tpu.memory_space<vmem>>, vector<3x8x512xf32>,
    } else {
    }
    %c0 = arith.constant 0 : index
    %c0_1 = arith.constant 0 : index
    %c0_2 = arith.constant 0 : index
    %3 = vector.load %arg1[%c0, %c0_1, %c0_2] : memref<1x8x256xbf16, #tpu.memory_space<vmem>>, vector<1x8x256xbf16>
    %4 = vector.shape_cast %3 : vector<1x8x256xbf16> to vector<8x256xbf16>
    %c0_3 = arith.constant 0 : index
    %c0_4 = arith.constant 0 : index
    %5 = vector.load %arg3[%c0_3, %c0_4] : memref<256x1536xbf16, #tpu.memory_space<vmem>>, vector<256x1536xbf16>
    %c0_5 = arith.constant 0 : index
    %c0_6 = arith.constant 0 : index
    %c0_7 = arith.constant 0 : index
    %6 = vector.load %arg6[%c0_5, %c0_6, %c0_7] : memref<3x2x1536xf32, #tpu.memory_space<vmem>>, vector<1x2x1536xf32>
    %7 = vector.shape_cast %6 : vector<1x2x1536xf32> to vector<2x1536xf32>
    %c0_8 = arith.constant 0 : index
    %c0_9 = arith.constant 0 : index
    %c0_10 = arith.constant 0 : index
    %8 = vector.load %arg11[%c0_8, %c0_9, %c0_10] : memref<3x8x512xf32, #tpu.memory_space<vmem>>, vector<1x8x512xf32>
    %9 = vector.shape_cast %8 : vector<1x8x512xf32> to vector<8x512xf32>
    %cst = arith.constant dense<0.000000e+00> : vector<8x1536xf32>
    %10 = tpu.matmul %4, %5, %cst {dimension_numbers = #tpu.dot_dimension_numbers<[1], [0], [0], [1], [0, 0, 1, 1], [], []>} : vector<8x256xbf16>, vector<256x1536xbf16>, vector<8x1536xf32> -> vector<8x1536xf32>
    %11 = vector.extract_strided_slice %7 {offsets = [0, 0], sizes = [1, 1536], strides = [1, 1]} : vector<2x1536xf32> to vector<1x1536xf32>
    %12 = vector.broadcast %11 : vector<1x1536xf32> to vector<8x1536xf32>
    %13 = arith.addf %10, %12 : vector<8x1536xf32>
    %14 = arith.truncf %9 : vector<8x512xf32> to vector<8x512xbf16>
    %c0_11 = arith.constant 0 : index
    %c0_12 = arith.constant 0 : index
    %c0_13 = arith.constant 0 : index
    %15 = vector.load %arg5[%c0_11, %c0_12, %c0_13] : memref<3x512x1536xbf16, #tpu.memory_space<vmem>>, vector<1x512x1536xbf16>
    %16 = vector.shape_cast %15 : vector<1x512x1536xbf16> to vector<512x1536xbf16>
    %cst_14 = arith.constant dense<0.000000e+00> : vector<8x1536xf32>
    %17 = tpu.matmul %14, %16, %cst_14 {dimension_numbers = #tpu.dot_dimension_numbers<[1], [0], [0], [1], [0, 0, 1, 1], [], []>} : vector<8x512xbf16>, vector<512x1536xbf16>, vector<8x1536xf32> -> vector<8x1536xf32>
    %18 = vector.extract_strided_slice %7 {offsets = [1, 0], sizes = [1, 1536], strides = [1, 1]} : vector<2x1536xf32> to vector<1x1536xf32>
    %19 = vector.broadcast %18 : vector<1x1536xf32> to vector<8x1536xf32>
    %20 = arith.addf %17, %19 : vector<8x1536xf32>
    %21 = vector.extract_strided_slice %13 {offsets = [0, 0], sizes = [8, 512], strides = [1, 1]} : vector<8x1536xf32> to vector<8x512xf32>
    %22 = vector.extract_strided_slice %20 {offsets = [0, 0], sizes = [8, 512], strides = [1, 1]} : vector<8x1536xf32> to vector<8x512xf32>
    %23 = arith.addf %21, %22 : vector<8x512xf32>
    %24 = arith.negf %23 : vector<8x512xf32>
    %25 = math.exp %24 : vector<8x512xf32>
    %cst_15 = arith.constant 1.000000e+00 : f32
    %26 = vector.broadcast %cst_15 : f32 to vector<8x512xf32>
    %27 = arith.addf %26, %25 : vector<8x512xf32>
    %28 = arith.divf %26, %27 : vector<8x512xf32>
    %29 = vector.extract_strided_slice %13 {offsets = [0, 512], sizes = [8, 512], strides = [1, 1]} : vector<8x1536xf32> to vector<8x512xf32>
    %30 = vector.extract_strided_slice %20 {offsets = [0, 512], sizes = [8, 512], strides = [1, 1]} : vector<8x1536xf32> to vector<8x512xf32>
    %31 = arith.addf %29, %30 : vector<8x512xf32>
    %32 = arith.negf %31 : vector<8x512xf32>
    %33 = math.exp %32 : vector<8x512xf32>
    %cst_16 = arith.constant 1.000000e+00 : f32
    %34 = vector.broadcast %cst_16 : f32 to vector<8x512xf32>
    %35 = arith.addf %34, %33 : vector<8x512xf32>
    %36 = arith.divf %34, %35 : vector<8x512xf32>
    %37 = vector.extract_strided_slice %13 {offsets = [0, 1024], sizes = [8, 512], strides = [1, 1]} : vector<8x1536xf32> to vector<8x512xf32>
    %38 = vector.extract_strided_slice %20 {offsets = [0, 1024], sizes = [8, 512], strides = [1, 1]} : vector<8x1536xf32> to vector<8x512xf32>
    %39 = arith.mulf %28, %38 : vector<8x512xf32>
    %40 = arith.addf %37, %39 : vector<8x512xf32>
    %41 = math.tanh %40 : vector<8x512xf32>
    %cst_17 = arith.constant 1.000000e+00 : f32
    %42 = vector.broadcast %cst_17 : f32 to vector<8x512xf32>
    %43 = arith.subf %42, %36 : vector<8x512xf32>
    %44 = arith.mulf %43, %41 : vector<8x512xf32>
    %45 = arith.mulf %36, %9 : vector<8x512xf32>
    %46 = arith.addf %44, %45 : vector<8x512xf32>
    %c0_18 = arith.constant 0 : index
    %c0_19 = arith.constant 0 : index
    %c0_20 = arith.constant 0 : index
    %47 = vector.load %arg11[%c0_18, %c0_19, %c0_20] : memref<3x8x512xf32, #tpu.memory_space<vmem>>, vector<1x8x512xf32>
    %48 = vector.shape_cast %47 : vector<1x8x512xf32> to vector<8x512xf32>
    %49 = vector.shape_cast %46 : vector<8x512xf32> to vector<1x8x512xf32>
    tpu.vector_store %arg11[%c0_18, %c0_19, %c0_20], %49 {strides = array<i32>} : memref<3x8x512xf32, #tpu.memory_space<vmem>>, vector<1x8x512xf32>,
    %50 = arith.truncf %46 : vector<8x512xf32> to vector<8x512xbf16>
    %c0_21 = arith.constant 0 : index
    %c0_22 = arith.constant 0 : index
    %c0_23 = arith.constant 0 : index
    %51 = vector.load %arg4[%c0_21, %c0_22, %c0_23] : memref<2x512x1536xbf16, #tpu.memory_space<vmem>>, vector<1x512x1536xbf16>
    %52 = vector.shape_cast %51 : vector<1x512x1536xbf16> to vector<512x1536xbf16>
    %c1 = arith.constant 1 : index
    %c0_24 = arith.constant 0 : index
    %c0_25 = arith.constant 0 : index
    %53 = vector.load %arg6[%c1, %c0_24, %c0_25] : memref<3x2x1536xf32, #tpu.memory_space<vmem>>, vector<1x2x1536xf32>
    %54 = vector.shape_cast %53 : vector<1x2x1536xf32> to vector<2x1536xf32>
    %c1_26 = arith.constant 1 : index
    %c0_27 = arith.constant 0 : index
    %c0_28 = arith.constant 0 : index
    %55 = vector.load %arg11[%c1_26, %c0_27, %c0_28] : memref<3x8x512xf32, #tpu.memory_space<vmem>>, vector<1x8x512xf32>
    %56 = vector.shape_cast %55 : vector<1x8x512xf32> to vector<8x512xf32>
    %cst_29 = arith.constant dense<0.000000e+00> : vector<8x1536xf32>
    %57 = tpu.matmul %50, %52, %cst_29 {dimension_numbers = #tpu.dot_dimension_numbers<[1], [0], [0], [1], [0, 0, 1, 1], [], []>} : vector<8x512xbf16>, vector<512x1536xbf16>, vector<8x1536xf32> -> vector<8x1536xf32>
    %58 = vector.extract_strided_slice %54 {offsets = [0, 0], sizes = [1, 1536], strides = [1, 1]} : vector<2x1536xf32> to vector<1x1536xf32>
    %59 = vector.broadcast %58 : vector<1x1536xf32> to vector<8x1536xf32>
    %60 = arith.addf %57, %59 : vector<8x1536xf32>
    %61 = arith.truncf %56 : vector<8x512xf32> to vector<8x512xbf16>
    %c1_30 = arith.constant 1 : index
    %c0_31 = arith.constant 0 : index
    %c0_32 = arith.constant 0 : index
    %62 = vector.load %arg5[%c1_30, %c0_31, %c0_32] : memref<3x512x1536xbf16, #tpu.memory_space<vmem>>, vector<1x512x1536xbf16>
    %63 = vector.shape_cast %62 : vector<1x512x1536xbf16> to vector<512x1536xbf16>
    %cst_33 = arith.constant dense<0.000000e+00> : vector<8x1536xf32>
    %64 = tpu.matmul %61, %63, %cst_33 {dimension_numbers = #tpu.dot_dimension_numbers<[1], [0], [0], [1], [0, 0, 1, 1], [], []>} : vector<8x512xbf16>, vector<512x1536xbf16>, vector<8x1536xf32> -> vector<8x1536xf32>
    %65 = vector.extract_strided_slice %54 {offsets = [1, 0], sizes = [1, 1536], strides = [1, 1]} : vector<2x1536xf32> to vector<1x1536xf32>
    %66 = vector.broadcast %65 : vector<1x1536xf32> to vector<8x1536xf32>
    %67 = arith.addf %64, %66 : vector<8x1536xf32>
    %68 = vector.extract_strided_slice %60 {offsets = [0, 0], sizes = [8, 512], strides = [1, 1]} : vector<8x1536xf32> to vector<8x512xf32>
    %69 = vector.extract_strided_slice %67 {offsets = [0, 0], sizes = [8, 512], strides = [1, 1]} : vector<8x1536xf32> to vector<8x512xf32>
    %70 = arith.addf %68, %69 : vector<8x512xf32>
    %71 = arith.negf %70 : vector<8x512xf32>
    %72 = math.exp %71 : vector<8x512xf32>
    %cst_34 = arith.constant 1.000000e+00 : f32
    %73 = vector.broadcast %cst_34 : f32 to vector<8x512xf32>
    %74 = arith.addf %73, %72 : vector<8x512xf32>
    %75 = arith.divf %73, %74 : vector<8x512xf32>
    %76 = vector.extract_strided_slice %60 {offsets = [0, 512], sizes = [8, 512], strides = [1, 1]} : vector<8x1536xf32> to vector<8x512xf32>
    %77 = vector.extract_strided_slice %67 {offsets = [0, 512], sizes = [8, 512], strides = [1, 1]} : vector<8x1536xf32> to vector<8x512xf32>
    %78 = arith.addf %76, %77 : vector<8x512xf32>
    %79 = arith.negf %78 : vector<8x512xf32>
    %80 = math.exp %79 : vector<8x512xf32>
    %cst_35 = arith.constant 1.000000e+00 : f32
    %81 = vector.broadcast %cst_35 : f32 to vector<8x512xf32>
    %82 = arith.addf %81, %80 : vector<8x512xf32>
    %83 = arith.divf %81, %82 : vector<8x512xf32>
    %84 = vector.extract_strided_slice %60 {offsets = [0, 1024], sizes = [8, 512], strides = [1, 1]} : vector<8x1536xf32> to vector<8x512xf32>
    %85 = vector.extract_strided_slice %67 {offsets = [0, 1024], sizes = [8, 512], strides = [1, 1]} : vector<8x1536xf32> to vector<8x512xf32>
    %86 = arith.mulf %75, %85 : vector<8x512xf32>
    %87 = arith.addf %84, %86 : vector<8x512xf32>
    %88 = math.tanh %87 : vector<8x512xf32>
    %cst_36 = arith.constant 1.000000e+00 : f32
    %89 = vector.broadcast %cst_36 : f32 to vector<8x512xf32>
    %90 = arith.subf %89, %83 : vector<8x512xf32>
    %91 = arith.mulf %90, %88 : vector<8x512xf32>
    %92 = arith.mulf %83, %56 : vector<8x512xf32>
    %93 = arith.addf %91, %92 : vector<8x512xf32>
    %c1_37 = arith.constant 1 : index
    %c0_38 = arith.constant 0 : index
    %c0_39 = arith.constant 0 : index
    %94 = vector.load %arg11[%c1_37, %c0_38, %c0_39] : memref<3x8x512xf32, #tpu.memory_space<vmem>>, vector<1x8x512xf32>
    %95 = vector.shape_cast %94 : vector<1x8x512xf32> to vector<8x512xf32>
    %96 = vector.shape_cast %93 : vector<8x512xf32> to vector<1x8x512xf32>
    tpu.vector_store %arg11[%c1_37, %c0_38, %c0_39], %96 {strides = array<i32>} : memref<3x8x512xf32, #tpu.memory_space<vmem>>, vector<1x8x512xf32>,
    %97 = arith.truncf %93 : vector<8x512xf32> to vector<8x512xbf16>
    %c1_40 = arith.constant 1 : index
    %c0_41 = arith.constant 0 : index
    %c0_42 = arith.constant 0 : index
    %98 = vector.load %arg4[%c1_40, %c0_41, %c0_42] : memref<2x512x1536xbf16, #tpu.memory_space<vmem>>, vector<1x512x1536xbf16>
    %99 = vector.shape_cast %98 : vector<1x512x1536xbf16> to vector<512x1536xbf16>
    %c2 = arith.constant 2 : index
    %c0_43 = arith.constant 0 : index
    %c0_44 = arith.constant 0 : index
    %100 = vector.load %arg6[%c2, %c0_43, %c0_44] : memref<3x2x1536xf32, #tpu.memory_space<vmem>>, vector<1x2x1536xf32>
    %101 = vector.shape_cast %100 : vector<1x2x1536xf32> to vector<2x1536xf32>
    %c2_45 = arith.constant 2 : index
    %c0_46 = arith.constant 0 : index
    %c0_47 = arith.constant 0 : index
    %102 = vector.load %arg11[%c2_45, %c0_46, %c0_47] : memref<3x8x512xf32, #tpu.memory_space<vmem>>, vector<1x8x512xf32>
    %103 = vector.shape_cast %102 : vector<1x8x512xf32> to vector<8x512xf32>
    %cst_48 = arith.constant dense<0.000000e+00> : vector<8x1536xf32>
    %104 = tpu.matmul %97, %99, %cst_48 {dimension_numbers = #tpu.dot_dimension_numbers<[1], [0], [0], [1], [0, 0, 1, 1], [], []>} : vector<8x512xbf16>, vector<512x1536xbf16>, vector<8x1536xf32> -> vector<8x1536xf32>
    %105 = vector.extract_strided_slice %101 {offsets = [0, 0], sizes = [1, 1536], strides = [1, 1]} : vector<2x1536xf32> to vector<1x1536xf32>
    %106 = vector.broadcast %105 : vector<1x1536xf32> to vector<8x1536xf32>
    %107 = arith.addf %104, %106 : vector<8x1536xf32>
    %108 = arith.truncf %103 : vector<8x512xf32> to vector<8x512xbf16>
    %c2_49 = arith.constant 2 : index
    %c0_50 = arith.constant 0 : index
    %c0_51 = arith.constant 0 : index
    %109 = vector.load %arg5[%c2_49, %c0_50, %c0_51] : memref<3x512x1536xbf16, #tpu.memory_space<vmem>>, vector<1x512x1536xbf16>
    %110 = vector.shape_cast %109 : vector<1x512x1536xbf16> to vector<512x1536xbf16>
    %cst_52 = arith.constant dense<0.000000e+00> : vector<8x1536xf32>
    %111 = tpu.matmul %108, %110, %cst_52 {dimension_numbers = #tpu.dot_dimension_numbers<[1], [0], [0], [1], [0, 0, 1, 1], [], []>} : vector<8x512xbf16>, vector<512x1536xbf16>, vector<8x1536xf32> -> vector<8x1536xf32>
    %112 = vector.extract_strided_slice %101 {offsets = [1, 0], sizes = [1, 1536], strides = [1, 1]} : vector<2x1536xf32> to vector<1x1536xf32>
    %113 = vector.broadcast %112 : vector<1x1536xf32> to vector<8x1536xf32>
    %114 = arith.addf %111, %113 : vector<8x1536xf32>
    %115 = vector.extract_strided_slice %107 {offsets = [0, 0], sizes = [8, 512], strides = [1, 1]} : vector<8x1536xf32> to vector<8x512xf32>
    %116 = vector.extract_strided_slice %114 {offsets = [0, 0], sizes = [8, 512], strides = [1, 1]} : vector<8x1536xf32> to vector<8x512xf32>
    %117 = arith.addf %115, %116 : vector<8x512xf32>
    %118 = arith.negf %117 : vector<8x512xf32>
    %119 = math.exp %118 : vector<8x512xf32>
    %cst_53 = arith.constant 1.000000e+00 : f32
    %120 = vector.broadcast %cst_53 : f32 to vector<8x512xf32>
    %121 = arith.addf %120, %119 : vector<8x512xf32>
    %122 = arith.divf %120, %121 : vector<8x512xf32>
    %123 = vector.extract_strided_slice %107 {offsets = [0, 512], sizes = [8, 512], strides = [1, 1]} : vector<8x1536xf32> to vector<8x512xf32>
    %124 = vector.extract_strided_slice %114 {offsets = [0, 512], sizes = [8, 512], strides = [1, 1]} : vector<8x1536xf32> to vector<8x512xf32>
    %125 = arith.addf %123, %124 : vector<8x512xf32>
    %126 = arith.negf %125 : vector<8x512xf32>
    %127 = math.exp %126 : vector<8x512xf32>
    %cst_54 = arith.constant 1.000000e+00 : f32
    %128 = vector.broadcast %cst_54 : f32 to vector<8x512xf32>
    %129 = arith.addf %128, %127 : vector<8x512xf32>
    %130 = arith.divf %128, %129 : vector<8x512xf32>
    %131 = vector.extract_strided_slice %107 {offsets = [0, 1024], sizes = [8, 512], strides = [1, 1]} : vector<8x1536xf32> to vector<8x512xf32>
    %132 = vector.extract_strided_slice %114 {offsets = [0, 1024], sizes = [8, 512], strides = [1, 1]} : vector<8x1536xf32> to vector<8x512xf32>
    %133 = arith.mulf %122, %132 : vector<8x512xf32>
    %134 = arith.addf %131, %133 : vector<8x512xf32>
    %135 = math.tanh %134 : vector<8x512xf32>
    %cst_55 = arith.constant 1.000000e+00 : f32
    %136 = vector.broadcast %cst_55 : f32 to vector<8x512xf32>
    %137 = arith.subf %136, %130 : vector<8x512xf32>
    %138 = arith.mulf %137, %135 : vector<8x512xf32>
    %139 = arith.mulf %130, %103 : vector<8x512xf32>
    %140 = arith.addf %138, %139 : vector<8x512xf32>
    %c2_56 = arith.constant 2 : index
    %c0_57 = arith.constant 0 : index
    %c0_58 = arith.constant 0 : index
    %141 = vector.load %arg11[%c2_56, %c0_57, %c0_58] : memref<3x8x512xf32, #tpu.memory_space<vmem>>, vector<1x8x512xf32>
    %142 = vector.shape_cast %141 : vector<1x8x512xf32> to vector<8x512xf32>
    %143 = vector.shape_cast %140 : vector<8x512xf32> to vector<1x8x512xf32>
    tpu.vector_store %arg11[%c2_56, %c0_57, %c0_58], %143 {strides = array<i32>} : memref<3x8x512xf32, #tpu.memory_space<vmem>>, vector<1x8x512xf32>,
    %144 = arith.truncf %140 : vector<8x512xf32> to vector<8x512xbf16>
    %c0_59 = arith.constant 0 : index
    %c0_60 = arith.constant 0 : index
    %145 = vector.load %arg7[%c0_59, %c0_60] : memref<512x128xbf16, #tpu.memory_space<vmem>>, vector<512x128xbf16>
    %cst_61 = arith.constant dense<0.000000e+00> : vector<8x128xf32>
    %146 = tpu.matmul %144, %145, %cst_61 {dimension_numbers = #tpu.dot_dimension_numbers<[1], [0], [0], [1], [0, 0, 1, 1], [], []>} : vector<8x512xbf16>, vector<512x128xbf16>, vector<8x128xf32> -> vector<8x128xf32>
    %c0_62 = arith.constant 0 : index
    %c0_63 = arith.constant 0 : index
    %147 = vector.load %arg8[%c0_62, %c0_63] : memref<1x128xf32, #tpu.memory_space<vmem>>, vector<1x128xf32>
    %148 = vector.broadcast %147 : vector<1x128xf32> to vector<8x128xf32>
    %149 = arith.addf %146, %148 : vector<8x128xf32>
    %c0_64 = arith.constant 0 : index
    %c0_65 = arith.constant 0 : index
    %c0_66 = arith.constant 0 : index
    %150 = vector.load %arg9[%c0_64, %c0_65, %c0_66] : memref<1x8x128xf32, #tpu.memory_space<vmem>>, vector<1x8x128xf32>
    %151 = vector.shape_cast %150 : vector<1x8x128xf32> to vector<8x128xf32>
    %152 = vector.shape_cast %149 : vector<8x128xf32> to vector<1x8x128xf32>
    tpu.vector_store %arg9[%c0_64, %c0_65, %c0_66], %152 {strides = array<i32>} : memref<1x8x128xf32, #tpu.memory_space<vmem>>, vector<1x8x128xf32>,
    %c0_i32_67 = arith.constant 0 : i32
    %153 = arith.cmpi eq, %arg0, %c0_i32_67 : i32
    %154 = arith.extui %153 : i1 to i32
    %c0_i32_68 = arith.constant 0 : i32
    %155 = arith.cmpi ne, %154, %c0_i32_68 : i32
    scf.if %155 {
      %c0_69 = arith.constant 0 : index
      %c0_70 = arith.constant 0 : index
      %c0_71 = arith.constant 0 : index
      %156 = vector.load %arg11[%c0_69, %c0_70, %c0_71] : memref<3x8x512xf32, #tpu.memory_space<vmem>>, vector<3x8x512xf32>
      %c0_72 = arith.constant 0 : index
      %c0_73 = arith.constant 0 : index
      %c0_74 = arith.constant 0 : index
      %157 = vector.load %arg10[%c0_72, %c0_73, %c0_74] : memref<3x8x512xf32, #tpu.memory_space<vmem>>, vector<3x8x512xf32>
      tpu.vector_store %arg10[%c0_72, %c0_73, %c0_74], %156 {strides = array<i32>} : memref<3x8x512xf32, #tpu.memory_space<vmem>>, vector<3x8x512xf32>,
    } else {
    }
    return
  }
  func.func @transform_0(%arg0: i32) -> (i32, i32, i32) {
    %c0_i32 = arith.constant 0 : i32
    %c0_i32_0 = arith.constant 0 : i32
    %c0_i32_1 = arith.constant 0 : i32
    return %arg0, %c0_i32, %c0_i32_0 : i32, i32, i32
  }
  func.func @transform_1(%arg0: i32) -> (i32, i32, i32) {
    %c0_i32 = arith.constant 0 : i32
    %c0_i32_0 = arith.constant 0 : i32
    %c0_i32_1 = arith.constant 0 : i32
    %c0_i32_2 = arith.constant 0 : i32
    return %c0_i32, %c0_i32_0, %c0_i32_1 : i32, i32, i32
  }
  func.func @transform_2(%arg0: i32) -> (i32, i32) {
    %c0_i32 = arith.constant 0 : i32
    %c0_i32_0 = arith.constant 0 : i32
    %c0_i32_1 = arith.constant 0 : i32
    return %c0_i32, %c0_i32_0 : i32, i32
  }
  func.func @transform_3(%arg0: i32) -> (i32, i32, i32) {
    %c0_i32 = arith.constant 0 : i32
    %c0_i32_0 = arith.constant 0 : i32
    %c0_i32_1 = arith.constant 0 : i32
    %c0_i32_2 = arith.constant 0 : i32
    return %c0_i32, %c0_i32_0, %c0_i32_1 : i32, i32, i32
  }
  func.func @transform_4(%arg0: i32) -> (i32, i32, i32) {
    %c0_i32 = arith.constant 0 : i32
    %c0_i32_0 = arith.constant 0 : i32
    %c0_i32_1 = arith.constant 0 : i32
    %c0_i32_2 = arith.constant 0 : i32
    return %c0_i32, %c0_i32_0, %c0_i32_1 : i32, i32, i32
  }
  func.func @transform_5(%arg0: i32) -> (i32, i32, i32) {
    %c0_i32 = arith.constant 0 : i32
    %c0_i32_0 = arith.constant 0 : i32
    %c0_i32_1 = arith.constant 0 : i32
    %c0_i32_2 = arith.constant 0 : i32
    return %c0_i32, %c0_i32_0, %c0_i32_1 : i32, i32, i32
  }
  func.func @transform_6(%arg0: i32) -> (i32, i32) {
    %c0_i32 = arith.constant 0 : i32
    %c0_i32_0 = arith.constant 0 : i32
    %c0_i32_1 = arith.constant 0 : i32
    return %c0_i32, %c0_i32_0 : i32, i32
  }
  func.func @transform_7(%arg0: i32) -> (i32, i32) {
    %c0_i32 = arith.constant 0 : i32
    %c0_i32_0 = arith.constant 0 : i32
    %c0_i32_1 = arith.constant 0 : i32
    return %c0_i32, %c0_i32_0 : i32, i32
  }
  func.func @transform_8(%arg0: i32) -> (i32, i32, i32) {
    %c0_i32 = arith.constant 0 : i32
    %c0_i32_0 = arith.constant 0 : i32
    %c0_i32_1 = arith.constant 0 : i32
    return %arg0, %c0_i32, %c0_i32_0 : i32, i32, i32
  }
  func.func @transform_9(%arg0: i32) -> (i32, i32, i32) {
    %c0_i32 = arith.constant 0 : i32
    %c0_i32_0 = arith.constant 0 : i32
    %c0_i32_1 = arith.constant 0 : i32
    %c0_i32_2 = arith.constant 0 : i32
    return %c0_i32, %c0_i32_0, %c0_i32_1 : i32, i32, i32
  }
}

</mosaic_0001>

<bundles_post_ra>
// kernel: _multigru_seq.1
= control target key start
LH: loop header
LB: loop body
LE: loop exit
PB: predicated region body
PF: predicated region fallthrough
CT: control target
= control target key end

     0   :  { %15 = vsyncpa [#allocation4], 0  ;;  %s23575_s0 = inlined_call_operand.vmem [shape: bf16[1,8,256], index: 0, kind: input, shape index: {}]   ;;  %s23576_s1 = inlined_call_operand.hbm [shape: f32[3,8,512], index: 1, kind: input, shape index: {}]   ;;  %s23577_s2 = inlined_call_operand.hbm [shape: bf16[256,1536], index: 2, kind: input, shape index: {}]   ;;  %s23578_s3 = inlined_call_operand.hbm [shape: bf16[2,512,1536], index: 3, kind: input, shape index: {}]   ;;  %s23579_s4 = inlined_call_operand.hbm [shape: bf16[3,512,1536], index: 4, kind: input, shape index: {}]   ;;  %s23580_s5 = inlined_call_operand.hbm [shape: f32[3,2,1536], index: 5, kind: input, shape index: {}]   ;;  %s23581_s6 = inlined_call_operand.hbm [shape: bf16[512,128], index: 6, kind: input, shape index: {}]   ;;  %s23582_s7 = inlined_call_operand.hbm [shape: f32[1,128], index: 7, kind: input, shape index: {}]   ;;  %s23583_s8 = inlined_call_operand.hbm [shape: f32[1,8,128], index: 8, kind: output, shape index: {0}]   ;;  %s23584_s9 = inlined_call_operand.hbm [shape: f32[3,8,512], index: 9, kind: output, shape index: {1}]  }
   0x1   :  { %16 = vsyncpa [#allocation7], 0 }
   0x2   :  { %17 = vsyncpa [#allocation10], 0 }
   0x3   :  { %18 = vsyncpa [#allocation13], 0 }
   0x4   :  { %19 = vsyncpa [#allocation5], 0 }
   0x5   :  { %20 = vsyncpa [#allocation17], 0  ;;  %s22909_s30 = smov [#allocation6]   ;;  %s22699_s13 = scalar_lea.hbm %s23577_s2, 24576 }
   0x6   :  { %s40_s10 = sshll.u32 %s22909_s30, 4  ;;  %p22700_p0 = scmp.ne.s32.totalorder %s23577_s2, %s22699_s13  ;;  %s41_s10 = int_to_ptr.vmem [resolvable:$true] %s40_s10 }
   0x7   :  { %p22703_p1 = scmp.lt.u32.totalorder %s22699_s13, %s23577_s2 }
   0x9   :  { %p22705_p2 = pnand %p22703_p1, %p22700_p0 }
   0xb   :  { %22708 = shalt.err (!%p22705_p2)
}
   0xc   :  { %s22709_s18 = scalar_lea.vmem %s41_s10, 24576  ;;  %p22714_p4 = scmp.lt.s32.totalorder %s41_s10, %s41_s10 }
   0xd   :  { %p22710_p3 = scmp.ne.s32.totalorder %s41_s10, %s22709_s18  ;;  %p22715_p5 = scmp.lt.s32.totalorder %s22709_s18, %s22709_s18 }
   0xf   :  { %p22716_p6 = por %p22715_p5, %p22714_p4 }
  0x11   :  { %p22717_p7 = pnand %p22716_p6, %p22710_p3 }
  0x13   :  { %22720 = shalt.err (!%p22717_p7)
}
  0x14   :  { %s22910_s19 = smov 768   ;;  %s22911_s20 = smov 48  }
  0x15   :  { %46 = dma.hbm_to_vmem [thread:$0]  %s23577_s2, 24576, %s41_s10, [#allocation7], %s22910_s19, %s22910_s19, %s22911_s20  }
  0x16   :  { %s22912_s23 = smov [#allocation9]   ;;  %s22913_s25 = smov [#allocation12]  }
  0x17   :  { %s64_s24 = sshll.u32 %s22912_s23, 4  ;;  %s88_s26 = sshll.u32 %s22913_s25, 4  ;;  %s65_s24 = int_to_ptr.vmem [resolvable:$true] %s64_s24  ;;  %s89_s26 = int_to_ptr.vmem [resolvable:$true] %s88_s26 }
  0x18   :  { %s22721_s29 = scalar_lea.hbm %s23579_s4, 147456 }
  0x19   :  { %p22722_p8 = scmp.ne.s32.totalorder %s23579_s4, %s22721_s29  ;;  %p22725_p9 = scmp.lt.u32.totalorder %s22721_s29, %s23579_s4 }
  0x1b   :  { %p22727_p10 = pnand %p22725_p9, %p22722_p8 }
  0x1d   :  { %22730 = shalt.err (!%p22727_p10)
}
  0x1e   :  { %s22731_s2 = scalar_lea.vmem %s65_s24, 147456  ;;  %p22736_p12 = scmp.lt.s32.totalorder %s65_s24, %s65_s24 }
  0x1f   :  { %p22732_p11 = scmp.ne.s32.totalorder %s65_s24, %s22731_s2  ;;  %p22737_p13 = scmp.lt.s32.totalorder %s22731_s2, %s22731_s2 }
  0x21   :  { %p22738_p0 = por %p22737_p13, %p22736_p12 }
  0x23   :  { %p22739_p1 = pnand %p22738_p0, %p22732_p11 }
  0x25   :  { %22742 = shalt.err (!%p22739_p1)
}
  0x26   :  { %70 = dma.hbm_to_vmem [thread:$0]  %s23579_s4, 147456, %s65_s24, [#allocation10], %s22910_s19, %s22910_s19, %s22911_s20  }
  0x27   :  { %s22743_s17 = scalar_lea.hbm %s23581_s6, 4096 }
  0x28   :  { %p22744_p2 = scmp.ne.s32.totalorder %s23581_s6, %s22743_s17  ;;  %p22747_p3 = scmp.lt.u32.totalorder %s22743_s17, %s23581_s6 }
  0x2a   :  { %p22749_p4 = pnand %p22747_p3, %p22744_p2 }
  0x2c   :  { %22752 = shalt.err (!%p22749_p4)
}
  0x2d   :  { %s22753_s25 = scalar_lea.vmem %s89_s26, 4096  ;;  %p22758_p6 = scmp.lt.s32.totalorder %s89_s26, %s89_s26 }
  0x2e   :  { %p22754_p5 = scmp.ne.s32.totalorder %s89_s26, %s22753_s25  ;;  %p22759_p7 = scmp.lt.s32.totalorder %s22753_s25, %s22753_s25 }
  0x30   :  { %p22760_p8 = por %p22759_p7, %p22758_p6 }
  0x32   :  { %p22761_p9 = pnand %p22760_p8, %p22754_p5 }
  0x34   :  { %22764 = shalt.err (!%p22761_p9)
}
  0x35   :  { %s22914_s4 = smov 64   ;;  %s22915_s24 = smov 4  }
  0x36   :  { %94 = dma.hbm_to_vmem [thread:$0]  %s23581_s6, 4096, %s89_s26, [#allocation13], %s22914_s4, %s22914_s4, %s22915_s24  }
  0x37   :  { %s22916_s29 = smov [#allocation3]   ;;  %s22765_s13 = scalar_lea.hbm %s23576_s1, 1536 }
  0x38   :  { %s28_s30 = sshll.u32 %s22916_s29, 4  ;;  %p22766_p10 = scmp.ne.s32.totalorder %s23576_s1, %s22765_s13  ;;  %s29_s30 = int_to_ptr.vmem [resolvable:$true] %s28_s30 }
  0x39   :  { %p22769_p11 = scmp.lt.u32.totalorder %s22765_s13, %s23576_s1 }
  0x3b   :  { %p22771_p12 = pnand %p22769_p11, %p22766_p10 }
  0x3d   :  { %22774 = shalt.err (!%p22771_p12)
}
  0x3e   :  { %s22775_s16 = scalar_lea.vmem %s29_s30, 1536  ;;  %p22780_p0 = scmp.lt.s32.totalorder %s29_s30, %s29_s30 }
  0x3f   :  { %p22776_p13 = scmp.ne.s32.totalorder %s29_s30, %s22775_s16  ;;  %p22781_p1 = scmp.lt.s32.totalorder %s22775_s16, %s22775_s16 }
  0x41   :  { %p22782_p2 = por %p22781_p1, %p22780_p0 }
  0x43   :  { %p22783_p3 = pnand %p22782_p2, %p22776_p13 }
  0x45   :  { %22786 = shalt.err (!%p22783_p3)
}
  0x46   :  { %s22917_s6 = smov 512   ;;  %s22918_s26 = smov 32  }
  0x47   :  { %34 = dma.hbm_to_vmem [thread:$0]  %s23576_s1, 1536, %s29_s30, [#allocation4], %s22917_s6, %s22917_s6, %s22918_s26  }
  0x48   :  { %s22919_s21 = smov [#allocation8]   ;;  %s22920_s23 = smov [#allocation11]  }
  0x49   :  { %s52_s22 = sshll.u32 %s22919_s21, 4  ;;  %s76_s25 = sshll.u32 %s22920_s23, 4  ;;  %s53_s22 = int_to_ptr.vmem [resolvable:$true] %s52_s22  ;;  %s23033_s25 = int_to_ptr.vmem [resolvable:$true] %s76_s25 }
  0x4a   :  { %s22787_s27 = scalar_lea.hbm %s23578_s3, 98304 }
  0x4b   :  { %p22788_p4 = scmp.ne.s32.totalorder %s23578_s3, %s22787_s27  ;;  %p22791_p5 = scmp.lt.u32.totalorder %s22787_s27, %s23578_s3 }
  0x4d   :  { %p22793_p6 = pnand %p22791_p5, %p22788_p4 }
  0x4f   :  { %22796 = shalt.err (!%p22793_p6)
}
  0x50   :  { %s22797_s1 = scalar_lea.vmem %s53_s22, 98304  ;;  %p22802_p8 = scmp.lt.s32.totalorder %s53_s22, %s53_s22 }
  0x51   :  { %p22798_p7 = scmp.ne.s32.totalorder %s53_s22, %s22797_s1  ;;  %p22803_p9 = scmp.lt.s32.totalorder %s22797_s1, %s22797_s1 }
  0x53   :  { %p22804_p10 = por %p22803_p9, %p22802_p8 }
  0x55   :  { %p22805_p11 = pnand %p22804_p10, %p22798_p7 }
  0x57   :  { %22808 = shalt.err (!%p22805_p11)
}
  0x58   :  { %58 = dma.hbm_to_vmem [thread:$0]  %s23578_s3, 98304, %s53_s22, [#allocation7], %s22910_s19, %s22910_s19, %s22911_s20  }
  0x59   :  { %s22809_s14 = scalar_lea.hbm %s23580_s5, 1152 }
  0x5a   :  { %p22810_p12 = scmp.ne.s32.totalorder %s23580_s5, %s22809_s14  ;;  %p22813_p13 = scmp.lt.u32.totalorder %s22809_s14, %s23580_s5 }
  0x5c   :  { %p22815_p0 = pnand %p22813_p13, %p22810_p12 }
  0x5e   :  { %22818 = shalt.err (!%p22815_p0)
}
  0x5f   :  { %s22819_s21 = scalar_lea.vmem %s23033_s25, 1152  ;;  %p22824_p2 = scmp.lt.s32.totalorder %s23033_s25, %s23033_s25 }
  0x60   :  { %p22820_p1 = scmp.ne.s32.totalorder %s23033_s25, %s22819_s21  ;;  %p22825_p3 = scmp.lt.s32.totalorder %s22819_s21, %s22819_s21 }
  0x62   :  { %p22826_p4 = por %p22825_p3, %p22824_p2 }
  0x64   :  { %p22827_p5 = pnand %p22826_p4, %p22820_p1 }
  0x66   :  { %22830 = shalt.err (!%p22827_p5)
}
  0x67   :  { %s22921_s3 = smov 384   ;;  %s22922_s19 = smov 24  }
  0x68   :  { %82 = dma.hbm_to_vmem [thread:$0]  %s23580_s5, 1152, %s23033_s25, [#allocation10], %s22921_s3, %s22921_s3, %s22922_s19  }
  0x69   :  { %s22923_s23 = smov [#allocation14]   ;;  %s22831_s28 = scalar_lea.hbm %s23582_s7, 16 }
  0x6a   :  { %s101_s4 = sshll.u32 %s22923_s23, 4  ;;  %p22832_p6 = scmp.ne.s32.totalorder %s23582_s7, %s22831_s28  ;;  %s102_s4 = int_to_ptr.vmem [resolvable:$true] %s101_s4 }
  0x6b   :  { %p22835_p7 = scmp.lt.u32.totalorder %s22831_s28, %s23582_s7 }
  0x6d   :  { %p22837_p8 = pnand %p22835_p7, %p22832_p6 }
  0x6f   :  { %22840 = shalt.err (!%p22837_p8)
}
  0x70   :  { %s22841_s30 = scalar_lea.vmem %s102_s4, 16  ;;  %s22845_s5 = scalar_lea.vmem %s102_s4, 32 }
  0x71   :  { %p22842_p9 = scmp.ne.s32.totalorder %s102_s4, %s22841_s30  ;;  %p22846_p10 = scmp.lt.s32.totalorder %s102_s4, %s102_s4 }
  0x72   :  { %p22847_p11 = scmp.lt.s32.totalorder %s22845_s5, %s22841_s30 }
  0x74   :  { %p22848_p12 = por %p22847_p11, %p22846_p10 }
  0x76   :  { %p22849_p13 = pnand %p22848_p12, %p22842_p9 }
  0x78   :  { %22852 = shalt.err (!%p22849_p13)
}
  0x79   :  { %104 = dma.hbm_to_vmem [thread:$0]  %s23582_s7, 16, %s102_s4, [#allocation13]  }
  0x7a   :  { %22897 = dma.done.wait [#allocation4], 1536  }
  0x7b   :  { %22898 = vsyncadd [#allocation4], 4294965760 }
  0x7c   :  { %22899 = dma.done.wait [#allocation7], 122880  }
  0x7d   :  { %22900 = vsyncadd [#allocation7], 4294844416 }
  0x7e   :  { %22901 = dma.done.wait [#allocation10], 148608  }
  0x7f   :  { %22902 = vsyncadd [#allocation10], 4294818688 }
  0x80   :  { %22903 = dma.done.wait [#allocation13], 4112  }
  0x81   :  { %22904 = vsyncadd [#allocation13], 4294963184  ;;  %v19363_v0 = vld [vmem:[#allocation6 + $0x4] ss:$48 sps:$4 sm:$0xff]   ;;  %v19365_v1 = vld [vmem:[#allocation6 + $0xc] ss:$48 sps:$4 sm:$0xff]  }
  0x82   :  { %1433 = vmatprep.subr.bf16.mxu0 %v19363_v0  ;;  %v19367_v2 = vld [vmem:[#allocation6] ss:$48 sps:$4 sm:$0xff]   ;;  %v19368_v3 = vld [vmem:[#allocation6 + $0x8] ss:$48 sps:$4 sm:$0xff]   ;;  %1474 = vmatprep.subr.bf16.mxu1 %v19365_v1  ;;  %v19369_v4 = vld [vmem:[#allocation6 + $0x64] ss:$48 sps:$4 sm:$0xff]  }
  0x83   :  { %1434 = vmatpush1.bf16.msra.mxu0 %v19367_v2  ;;  %1475 = vmatpush1.bf16.msra.mxu1 %v19368_v3  ;;  %v19371_v5 = vld [vmem:[#allocation6 + $0x6c] ss:$48 sps:$4 sm:$0xff]   ;;  %v19373_v6 = vld [vmem:[#allocation6 + $0x60] ss:$48 sps:$4 sm:$0xff]   ;;  %v19374_v7 = vld [vmem:[#allocation6 + $0x68] ss:$48 sps:$4 sm:$0xff]  }
  0x84   :  { %1435 = vmatprep.subr.bf16.mxu0 %v19369_v4  ;;  %1476 = vmatprep.subr.bf16.mxu1 %v19371_v5  ;;  %v19375_v8 = vld [vmem:[#allocation6 + $0xc4] ss:$48 sps:$4 sm:$0xff]   ;;  %v19377_v9 = vld [vmem:[#allocation6 + $0xcc] ss:$48 sps:$4 sm:$0xff]   ;;  %v19379_v10 = vld [vmem:[#allocation6 + $0xc0] ss:$48 sps:$4 sm:$0xff]  }
  0x85   :  { %v19380_v11 = vld [vmem:[#allocation6 + $0xc8] ss:$48 sps:$4 sm:$0xff]   ;;  %v19381_v12 = vld [vmem:[#allocation6 + $0x124] ss:$48 sps:$4 sm:$0xff]   ;;  %v19383_v13 = vld [vmem:[#allocation6 + $0x12c] ss:$48 sps:$4 sm:$0xff]  }
  0x86   :  { %v19385_v14 = vld [vmem:[#allocation6 + $0x120] ss:$48 sps:$4 sm:$0xff]   ;;  %v19386_v15 = vld [vmem:[#allocation6 + $0x128] ss:$48 sps:$4 sm:$0xff]   ;;  %v19387_v16 = vld [vmem:[#allocation6 + $0x184] ss:$48 sps:$4 sm:$0xff]  }
  0x87   :  { %1436 = vmatpush1.bf16.msra.mxu0 %v19373_v6  ;;  %1477 = vmatpush1.bf16.msra.mxu1 %v19374_v7  ;;  %v19389_v17 = vld [vmem:[#allocation6 + $0x18c] ss:$48 sps:$4 sm:$0xff]   ;;  %v19391_v18 = vld [vmem:[#allocation6 + $0x180] ss:$48 sps:$4 sm:$0xff]   ;;  %v19392_v19 = vld [vmem:[#allocation6 + $0x188] ss:$48 sps:$4 sm:$0xff]  }
  0x88   :  { %1437 = vmatprep.subr.bf16.mxu0 %v19375_v8  ;;  %1478 = vmatprep.subr.bf16.mxu1 %v19377_v9  ;;  %v19393_v20 = vld [vmem:[#allocation6 + $0x1e4] ss:$48 sps:$4 sm:$0xff]   ;;  %v19395_v21 = vld [vmem:[#allocation6 + $0x1ec] ss:$48 sps:$4 sm:$0xff]   ;;  %v19397_v22 = vld [vmem:[#allocation6 + $0x1e0] ss:$48 sps:$4 sm:$0xff]  }
  0x89   :  { %v19398_v23 = vld [vmem:[#allocation6 + $0x1e8] ss:$48 sps:$4 sm:$0xff]   ;;  %v19399_v24 = vld [vmem:[#allocation6 + $0x244] ss:$48 sps:$4 sm:$0xff]   ;;  %v19401_v25 = vld [vmem:[#allocation6 + $0x24c] ss:$48 sps:$4 sm:$0xff]  }
  0x8a   :  { %v19403_v26 = vld [vmem:[#allocation6 + $0x240] ss:$48 sps:$4 sm:$0xff]   ;;  %v19404_v27 = vld [vmem:[#allocation6 + $0x248] ss:$48 sps:$4 sm:$0xff]   ;;  %v19405_v28 = vld [vmem:[#allocation6 + $0x2a4] ss:$48 sps:$4 sm:$0xff]  }
  0x8b   :  { %1438 = vmatpush1.bf16.msra.mxu0 %v19379_v10  ;;  %1479 = vmatpush1.bf16.msra.mxu1 %v19380_v11  ;;  %v19407_v29 = vld [vmem:[#allocation6 + $0x2ac] ss:$48 sps:$4 sm:$0xff]   ;;  %v19409_v30 = vld [vmem:[#allocation6 + $0x2a0] ss:$48 sps:$4 sm:$0xff]   ;;  %v19410_v31 = vld [vmem:[#allocation6 + $0x2a8] ss:$48 sps:$4 sm:$0xff]  }
  0x8c   :  { %1439 = vmatprep.subr.bf16.mxu0 %v19381_v12  ;;  %1480 = vmatprep.subr.bf16.mxu1 %v19383_v13  ;;  %v19411_v32 = vld [vmem:[#allocation6 + $0x304] ss:$48 sps:$4 sm:$0xff]   ;;  %v19413_v33 = vld [vmem:[#allocation6 + $0x30c] ss:$48 sps:$4 sm:$0xff]   ;;  %v19415_v34 = vld [vmem:[#allocation6 + $0x300] ss:$48 sps:$4 sm:$0xff]  }
  0x8d   :  { %v19416_v35 = vld [vmem:[#allocation6 + $0x308] ss:$48 sps:$4 sm:$0xff]   ;;  %v19417_v36 = vld [vmem:[#allocation6 + $0x364] ss:$48 sps:$4 sm:$0xff]   ;;  %v19419_v37 = vld [vmem:[#allocation6 + $0x36c] ss:$48 sps:$4 sm:$0xff]  }
  0x8e   :  { %v19421_v38 = vld [vmem:[#allocation6 + $0x360] ss:$48 sps:$4 sm:$0xff]   ;;  %v19422_v39 = vld [vmem:[#allocation6 + $0x368] ss:$48 sps:$4 sm:$0xff]   ;;  %v19423_v40 = vld [vmem:[#allocation6 + $0x3c4] ss:$48 sps:$4 sm:$0xff]  }
  0x8f   :  { %1440 = vmatpush1.bf16.msra.mxu0 %v19385_v14  ;;  %1481 = vmatpush1.bf16.msra.mxu1 %v19386_v15  ;;  %v19425_v41 = vld [vmem:[#allocation6 + $0x3cc] ss:$48 sps:$4 sm:$0xff]   ;;  %v19427_v42 = vld [vmem:[#allocation6 + $0x3c0] ss:$48 sps:$4 sm:$0xff]   ;;  %v19428_v43 = vld [vmem:[#allocation6 + $0x3c8] ss:$48 sps:$4 sm:$0xff]  }
  0x90   :  { %1441 = vmatprep.subr.bf16.mxu0 %v19387_v16  ;;  %1482 = vmatprep.subr.bf16.mxu1 %v19389_v17  ;;  %v19429_v44 = vld [vmem:[#allocation6 + $0x424] ss:$48 sps:$4 sm:$0xff]   ;;  %v19431_v45 = vld [vmem:[#allocation6 + $0x42c] ss:$48 sps:$4 sm:$0xff]   ;;  %v19433_v47 = vld [vmem:[#allocation6 + $0x420] ss:$48 sps:$4 sm:$0xff]  }
  0x91   :  { %v155_v46 = vld [vmem:[%s23575_s0] sm:$0xff]  ;;  %v19434_v49 = vld [vmem:[#allocation6 + $0x428] ss:$48 sps:$4 sm:$0xff]   ;;  %v19437_v51 = vld [vmem:[#allocation6 + $0x48c] ss:$48 sps:$4 sm:$0xff]   ;;  %s22924_s0 = smov [#allocation16]  }
  0x92   :  { %v23082_v48 = vcombine.high %v155_v46, %v155_v46  ;;  %v19435_v50 = vld [vmem:[#allocation6 + $0x484] ss:$48 sps:$4 sm:$0xff]   ;;  %v19439_v52 = vld [vmem:[#allocation6 + $0x480] ss:$48 sps:$4 sm:$0xff]   ;;  %v19440_v53 = vld [vmem:[#allocation6 + $0x488] ss:$48 sps:$4 sm:$0xff]   ;;  %v23086_v5 = vcombine.low %v155_v46, %v155_v46 }
  0x93   :  { %1442 = vmatpush1.bf16.msra.mxu0 %v19391_v18  ;;  %1483 = vmatpush1.bf16.msra.mxu1 %v19392_v19  ;;  %v19441_v54 = vld [vmem:[#allocation6 + $0x4e4] ss:$48 sps:$4 sm:$0xff]   ;;  %v19443_v55 = vld [vmem:[#allocation6 + $0x4ec] ss:$48 sps:$4 sm:$0xff]   ;;  %v19445_v56 = vld [vmem:[#allocation6 + $0x4e0] ss:$48 sps:$4 sm:$0xff]  }
  0x94   :  { %1443 = vmatprep.subr.bf16.mxu0 %v19393_v20  ;;  %1484 = vmatprep.subr.bf16.mxu1 %v19395_v21  ;;  %v19446_v57 = vld [vmem:[#allocation6 + $0x4e8] ss:$48 sps:$4 sm:$0xff]   ;;  %v19447_v58 = vld [vmem:[#allocation6 + $0x544] ss:$48 sps:$4 sm:$0xff]   ;;  %v19449_v59 = vld [vmem:[#allocation6 + $0x54c] ss:$48 sps:$4 sm:$0xff]  }
  0x95   :  { %1465 = vmatprep.mubr.bf16.mxu0 %v23082_v48  ;;  %1506 = vmatprep.mubr.bf16.mxu1 %v23082_v48  ;;  %v19451_v60 = vld [vmem:[#allocation6 + $0x540] ss:$48 sps:$4 sm:$0xff]   ;;  %v19452_v61 = vld [vmem:[#allocation6 + $0x548] ss:$48 sps:$4 sm:$0xff]   ;;  %v19453_v62 = vld [vmem:[#allocation6 + $0x5a4] ss:$48 sps:$4 sm:$0xff]  }
  0x96   :  { %v19455_v63 = vld [vmem:[#allocation6 + $0x5ac] ss:$48 sps:$4 sm:$0xff]   ;;  %v19457_v0 = vld [vmem:[#allocation6 + $0x5a0] ss:$48 sps:$4 sm:$0xff]   ;;  %v19458_v1 = vld [vmem:[#allocation6 + $0x5a8] ss:$48 sps:$4 sm:$0xff]  }
  0x97   :  { %1444 = vmatpush1.bf16.msra.mxu0 %v19397_v22  ;;  %1485 = vmatpush1.bf16.msra.mxu1 %v19398_v23  ;;  %v19462_v2 = vld [vmem:[#allocation6 + $0x14] ss:$48 sps:$4 sm:$0xff]   ;;  %v19465_v3 = vld [vmem:[#allocation6 + $0x1c] ss:$48 sps:$4 sm:$0xff]   ;;  %v19460_v4 = vld [vmem:[#allocation6 + $0x10] ss:$48 sps:$4 sm:$0xff]  }
  0x98   :  { %1445 = vmatprep.subr.bf16.mxu0 %v19399_v24  ;;  %1486 = vmatprep.subr.bf16.mxu1 %v19401_v25  ;;  %v19463_v6 = vld [vmem:[#allocation6 + $0x18] ss:$48 sps:$4 sm:$0xff]   ;;  %v19469_v7 = vld [vmem:[#allocation6 + $0x74] ss:$48 sps:$4 sm:$0xff]   ;;  %v19472_v8 = vld [vmem:[#allocation6 + $0x7c] ss:$48 sps:$4 sm:$0xff]  }
  0x99   :  { %v19467_v9 = vld [vmem:[#allocation6 + $0x70] ss:$48 sps:$4 sm:$0xff]   ;;  %v19470_v10 = vld [vmem:[#allocation6 + $0x78] ss:$48 sps:$4 sm:$0xff]   ;;  %v19475_v11 = vld [vmem:[#allocation6 + $0xd4] ss:$48 sps:$4 sm:$0xff]  }
  0x9a   :  { %v19478_v12 = vld [vmem:[#allocation6 + $0xdc] ss:$48 sps:$4 sm:$0xff]   ;;  %v19473_v13 = vld [vmem:[#allocation6 + $0xd0] ss:$48 sps:$4 sm:$0xff]   ;;  %v19476_v14 = vld [vmem:[#allocation6 + $0xd8] ss:$48 sps:$4 sm:$0xff]  }
  0x9b   :  { %1446 = vmatpush1.bf16.msra.mxu0 %v19403_v26  ;;  %1487 = vmatpush1.bf16.msra.mxu1 %v19404_v27  ;;  %v19481_v15 = vld [vmem:[#allocation6 + $0x134] ss:$48 sps:$4 sm:$0xff]   ;;  %v19484_v16 = vld [vmem:[#allocation6 + $0x13c] ss:$48 sps:$4 sm:$0xff]   ;;  %v19479_v17 = vld [vmem:[#allocation6 + $0x130] ss:$48 sps:$4 sm:$0xff]  }
  0x9c   :  { %1447 = vmatprep.subr.bf16.mxu0 %v19405_v28  ;;  %1488 = vmatprep.subr.bf16.mxu1 %v19407_v29  ;;  %v19482_v18 = vld [vmem:[#allocation6 + $0x138] ss:$48 sps:$4 sm:$0xff]   ;;  %v19487_v19 = vld [vmem:[#allocation6 + $0x194] ss:$48 sps:$4 sm:$0xff]   ;;  %v19490_v20 = vld [vmem:[#allocation6 + $0x19c] ss:$48 sps:$4 sm:$0xff]  }
  0x9d   :  { %v19485_v21 = vld [vmem:[#allocation6 + $0x190] ss:$48 sps:$4 sm:$0xff]   ;;  %v19488_v22 = vld [vmem:[#allocation6 + $0x198] ss:$48 sps:$4 sm:$0xff]   ;;  %v19493_v23 = vld [vmem:[#allocation6 + $0x1f4] ss:$48 sps:$4 sm:$0xff]  }
  0x9e   :  { %v19496_v24 = vld [vmem:[#allocation6 + $0x1fc] ss:$48 sps:$4 sm:$0xff]   ;;  %v19491_v25 = vld [vmem:[#allocation6 + $0x1f0] ss:$48 sps:$4 sm:$0xff]   ;;  %v19494_v26 = vld [vmem:[#allocation6 + $0x1f8] ss:$48 sps:$4 sm:$0xff]  }
  0x9f   :  { %1448 = vmatpush1.bf16.msra.mxu0 %v19409_v30  ;;  %1489 = vmatpush1.bf16.msra.mxu1 %v19410_v31  ;;  %v19499_v27 = vld [vmem:[#allocation6 + $0x254] ss:$48 sps:$4 sm:$0xff]   ;;  %v19502_v28 = vld [vmem:[#allocation6 + $0x25c] ss:$48 sps:$4 sm:$0xff]   ;;  %v19497_v29 = vld [vmem:[#allocation6 + $0x250] ss:$48 sps:$4 sm:$0xff]  }
  0xa0   :  { %1449 = vmatprep.subr.bf16.mxu0 %v19411_v32  ;;  %1490 = vmatprep.subr.bf16.mxu1 %v19413_v33  ;;  %v19500_v30 = vld [vmem:[#allocation6 + $0x258] ss:$48 sps:$4 sm:$0xff]   ;;  %v19505_v31 = vld [vmem:[#allocation6 + $0x2b4] ss:$48 sps:$4 sm:$0xff]   ;;  %v19508_v32 = vld [vmem:[#allocation6 + $0x2bc] ss:$48 sps:$4 sm:$0xff]  }
  0xa1   :  { %v19503_v33 = vld [vmem:[#allocation6 + $0x2b0] ss:$48 sps:$4 sm:$0xff]   ;;  %v19524_v46 = vld [vmem:[#allocation6 + $0x3d8] ss:$48 sps:$4 sm:$0xff]   ;;  %s16900_s10 = sshll.u32 %s22924_s0, 4  ;;  %s16901_s10 = int_to_ptr.vmem [resolvable:$true] %s16900_s10 }
  0xa2   :  { %s22853_s14 = scalar_lea.vmem %s16901_s10, 1536  ;;  %p22858_p1 = scmp.lt.s32.totalorder %s16901_s10, %s16901_s10 }
  0xa3   :  { %1450 = vmatpush1.bf16.msra.mxu0 %v19415_v34  ;;  %1491 = vmatpush1.bf16.msra.mxu1 %v19416_v35  ;;  %v19506_v34 = vld [vmem:[#allocation6 + $0x2b8] ss:$48 sps:$4 sm:$0xff]   ;;  %v19511_v35 = vld [vmem:[#allocation6 + $0x314] ss:$48 sps:$4 sm:$0xff]   ;;  %p22854_p0 = scmp.ne.s32.totalorder %s16901_s10, %s22853_s14  ;;  %p22859_p2 = scmp.lt.s32.totalorder %s22853_s14, %s22853_s14 }
  0xa4   :  { %1451 = vmatprep.subr.bf16.mxu0 %v19417_v36  ;;  %1492 = vmatprep.subr.bf16.mxu1 %v19419_v37  ;;  %v19514_v36 = vld [vmem:[#allocation6 + $0x31c] ss:$48 sps:$4 sm:$0xff]   ;;  %v19509_v37 = vld [vmem:[#allocation6 + $0x310] ss:$48 sps:$4 sm:$0xff]  }
  0xa5   :  { %p22860_p3 = por %p22859_p2, %p22858_p1 }
  0xa7   :  { %1452 = vmatpush1.bf16.msra.mxu0 %v19421_v38  ;;  %1493 = vmatpush1.bf16.msra.mxu1 %v19422_v39  ;;  %v19512_v38 = vld [vmem:[#allocation6 + $0x318] ss:$48 sps:$4 sm:$0xff]   ;;  %v19517_v39 = vld [vmem:[#allocation6 + $0x374] ss:$48 sps:$4 sm:$0xff]   ;;  %p22861_p4 = pnand %p22860_p3, %p22854_p0 }
  0xa8   :  { %1453 = vmatprep.subr.bf16.mxu0 %v19423_v40  ;;  %1494 = vmatprep.subr.bf16.mxu1 %v19425_v41  ;;  %v19520_v40 = vld [vmem:[#allocation6 + $0x37c] ss:$48 sps:$4 sm:$0xff]   ;;  %v19515_v41 = vld [vmem:[#allocation6 + $0x370] ss:$48 sps:$4 sm:$0xff]  }
  0xab   :  { %1454 = vmatpush1.bf16.msra.mxu0 %v19427_v42  ;;  %1495 = vmatpush1.bf16.msra.mxu1 %v19428_v43  ;;  %v19518_v42 = vld [vmem:[#allocation6 + $0x378] ss:$48 sps:$4 sm:$0xff]   ;;  %v19523_v43 = vld [vmem:[#allocation6 + $0x3d4] ss:$48 sps:$4 sm:$0xff]  }
  0xac   :  { %1455 = vmatprep.subr.bf16.mxu0 %v19429_v44  ;;  %1496 = vmatprep.subr.bf16.mxu1 %v19431_v45  ;;  %v19526_v44 = vld [vmem:[#allocation6 + $0x3dc] ss:$48 sps:$4 sm:$0xff]   ;;  %v19521_v45 = vld [vmem:[#allocation6 + $0x3d0] ss:$48 sps:$4 sm:$0xff]  }
  0xaf   :  { %1456 = vmatpush1.bf16.msra.mxu0 %v19433_v47  ;;  %1497 = vmatpush1.bf16.msra.mxu1 %v19434_v49  ;;  %v19529_v47 = vld [vmem:[#allocation6 + $0x434] ss:$48 sps:$4 sm:$0xff]   ;;  %v19532_v49 = vld [vmem:[#allocation6 + $0x43c] ss:$48 sps:$4 sm:$0xff]  }
  0xb0   :  { %1457 = vmatprep.subr.bf16.mxu0 %v19435_v50  ;;  %1498 = vmatprep.subr.bf16.mxu1 %v19437_v51  ;;  %v19527_v50 = vld [vmem:[#allocation6 + $0x430] ss:$48 sps:$4 sm:$0xff]   ;;  %v19530_v51 = vld [vmem:[#allocation6 + $0x438] ss:$48 sps:$4 sm:$0xff]  }
  0xb3   :  { %1458 = vmatpush1.bf16.msra.mxu0 %v19439_v52  ;;  %1499 = vmatpush1.bf16.msra.mxu1 %v19440_v53  ;;  %v19535_v52 = vld [vmem:[#allocation6 + $0x494] ss:$48 sps:$4 sm:$0xff]   ;;  %v19538_v53 = vld [vmem:[#allocation6 + $0x49c] ss:$48 sps:$4 sm:$0xff]  }
  0xb4   :  { %1459 = vmatprep.subr.bf16.mxu0 %v19441_v54  ;;  %1500 = vmatprep.subr.bf16.mxu1 %v19443_v55  ;;  %v19533_v54 = vld [vmem:[#allocation6 + $0x490] ss:$48 sps:$4 sm:$0xff]   ;;  %v19536_v55 = vld [vmem:[#allocation6 + $0x498] ss:$48 sps:$4 sm:$0xff]  }
  0xb7   :  { %1460 = vmatpush1.bf16.msra.mxu0 %v19445_v56  ;;  %1501 = vmatpush1.bf16.msra.mxu1 %v19446_v57  ;;  %v19541_v56 = vld [vmem:[#allocation6 + $0x4f4] ss:$48 sps:$4 sm:$0xff]   ;;  %v19544_v57 = vld [vmem:[#allocation6 + $0x4fc] ss:$48 sps:$4 sm:$0xff]  }
  0xb8   :  { %1461 = vmatprep.subr.bf16.mxu0 %v19447_v58  ;;  %1502 = vmatprep.subr.bf16.mxu1 %v19449_v59  ;;  %v19539_v58 = vld [vmem:[#allocation6 + $0x4f0] ss:$48 sps:$4 sm:$0xff]   ;;  %v19542_v59 = vld [vmem:[#allocation6 + $0x4f8] ss:$48 sps:$4 sm:$0xff]  }
  0xbb   :  { %1462 = vmatpush1.bf16.msra.mxu0 %v19451_v60  ;;  %1503 = vmatpush1.bf16.msra.mxu1 %v19452_v61  ;;  %v19547_v60 = vld [vmem:[#allocation6 + $0x554] ss:$48 sps:$4 sm:$0xff]   ;;  %v19550_v61 = vld [vmem:[#allocation6 + $0x55c] ss:$48 sps:$4 sm:$0xff]  }
  0xbc   :  { %1463 = vmatprep.subr.bf16.mxu0 %v19453_v62  ;;  %1504 = vmatprep.subr.bf16.mxu1 %v19455_v63  ;;  %v19545_v62 = vld [vmem:[#allocation6 + $0x550] ss:$48 sps:$4 sm:$0xff]   ;;  %v19548_v63 = vld [vmem:[#allocation6 + $0x558] ss:$48 sps:$4 sm:$0xff]  }
  0xbf   :  { %1464 = vmatpush1.bf16.msra.mxu0 %v19457_v0  ;;  %1505 = vmatpush1.bf16.msra.mxu1 %v19458_v1  ;;  %v19553_v0 = vld [vmem:[#allocation6 + $0x5b4] ss:$48 sps:$4 sm:$0xff]   ;;  %v19556_v1 = vld [vmem:[#allocation6 + $0x5bc] ss:$48 sps:$4 sm:$0xff]  }
  0xc0   :  { %1515 = vmatprep.subr.bf16.mxu0 %v19462_v2  ;;  %1556 = vmatprep.subr.bf16.mxu1 %v19465_v3  ;;  %v19551_v2 = vld [vmem:[#allocation6 + $0x5b0] ss:$48 sps:$4 sm:$0xff]   ;;  %v19554_v3 = vld [vmem:[#allocation6 + $0x5b8] ss:$48 sps:$4 sm:$0xff]  }
  0xc2   :  { %1466 = vmatmul.mubr.bf16.vlgmr.msra.gmra.mrb[0].mxu0 %v23086_v5  ;;  %1507 = vmatmul.mubr.bf16.vlgmr.msra.gmra.mrb[0].mxu1 %v23086_v5 }
  0xc3   :  { %1516 = vmatpush1.bf16.msra.mxu0 %v19460_v4  ;;  %1557 = vmatpush1.bf16.msra.mxu1 %v19463_v6  ;;  %v19559_v4 = vld [vmem:[#allocation6 + $0x24] ss:$48 sps:$4 sm:$0xff]   ;;  %v19562_v6 = vld [vmem:[#allocation6 + $0x2c] ss:$48 sps:$4 sm:$0xff]  }
  0xc4   :  { %1517 = vmatprep.subr.bf16.mxu0 %v19469_v7  ;;  %1558 = vmatprep.subr.bf16.mxu1 %v19472_v8  ;;  %v19557_v7 = vld [vmem:[#allocation6 + $0x20] ss:$48 sps:$4 sm:$0xff]   ;;  %v19560_v8 = vld [vmem:[#allocation6 + $0x28] ss:$48 sps:$4 sm:$0xff]  }
  0xc5   :  { %1547 = vmatprep.mubr.bf16.mxu0 %v23082_v48  ;;  %1588 = vmatprep.mubr.bf16.mxu1 %v23082_v48 }
  0xc7   :  { %1518 = vmatpush1.bf16.msra.mxu0 %v19467_v9  ;;  %1559 = vmatpush1.bf16.msra.mxu1 %v19470_v10  ;;  %v19565_v9 = vld [vmem:[#allocation6 + $0x84] ss:$48 sps:$4 sm:$0xff]   ;;  %v19568_v10 = vld [vmem:[#allocation6 + $0x8c] ss:$48 sps:$4 sm:$0xff]  }
  0xc8   :  { %1519 = vmatprep.subr.bf16.mxu0 %v19475_v11  ;;  %1560 = vmatprep.subr.bf16.mxu1 %v19478_v12  ;;  %v19563_v11 = vld [vmem:[#allocation6 + $0x80] ss:$48 sps:$4 sm:$0xff]   ;;  %v19566_v12 = vld [vmem:[#allocation6 + $0x88] ss:$48 sps:$4 sm:$0xff]  }
  0xcb   :  { %1520 = vmatpush1.bf16.msra.mxu0 %v19473_v13  ;;  %1561 = vmatpush1.bf16.msra.mxu1 %v19476_v14  ;;  %v19571_v13 = vld [vmem:[#allocation6 + $0xe4] ss:$48 sps:$4 sm:$0xff]   ;;  %v19574_v14 = vld [vmem:[#allocation6 + $0xec] ss:$48 sps:$4 sm:$0xff]  }
  0xcc   :  { %1521 = vmatprep.subr.bf16.mxu0 %v19481_v15  ;;  %1562 = vmatprep.subr.bf16.mxu1 %v19484_v16  ;;  %v19569_v15 = vld [vmem:[#allocation6 + $0xe0] ss:$48 sps:$4 sm:$0xff]   ;;  %v19572_v16 = vld [vmem:[#allocation6 + $0xe8] ss:$48 sps:$4 sm:$0xff]  }
  0xcf   :  { %1522 = vmatpush1.bf16.msra.mxu0 %v19479_v17  ;;  %1563 = vmatpush1.bf16.msra.mxu1 %v19482_v18  ;;  %v19577_v17 = vld [vmem:[#allocation6 + $0x144] ss:$48 sps:$4 sm:$0xff]   ;;  %v19580_v18 = vld [vmem:[#allocation6 + $0x14c] ss:$48 sps:$4 sm:$0xff]  }
  0xd0   :  { %1523 = vmatprep.subr.bf16.mxu0 %v19487_v19  ;;  %1564 = vmatprep.subr.bf16.mxu1 %v19490_v20  ;;  %v19575_v19 = vld [vmem:[#allocation6 + $0x140] ss:$48 sps:$4 sm:$0xff]   ;;  %v19578_v20 = vld [vmem:[#allocation6 + $0x148] ss:$48 sps:$4 sm:$0xff]  }
  0xd3   :  { %1524 = vmatpush1.bf16.msra.mxu0 %v19485_v21  ;;  %1565 = vmatpush1.bf16.msra.mxu1 %v19488_v22  ;;  %v19583_v21 = vld [vmem:[#allocation6 + $0x1a4] ss:$48 sps:$4 sm:$0xff]   ;;  %v19586_v22 = vld [vmem:[#allocation6 + $0x1ac] ss:$48 sps:$4 sm:$0xff]  }
  0xd4   :  { %1525 = vmatprep.subr.bf16.mxu0 %v19493_v23  ;;  %1566 = vmatprep.subr.bf16.mxu1 %v19496_v24  ;;  %v19581_v23 = vld [vmem:[#allocation6 + $0x1a0] ss:$48 sps:$4 sm:$0xff]   ;;  %v19589_v24 = vld [vmem:[#allocation6 + $0x204] ss:$48 sps:$4 sm:$0xff]  }
  0xd7   :  { %1526 = vmatpush1.bf16.msra.mxu0 %v19491_v25  ;;  %1567 = vmatpush1.bf16.msra.mxu1 %v19494_v26  ;;  %v19592_v25 = vld [vmem:[#allocation6 + $0x20c] ss:$48 sps:$4 sm:$0xff]   ;;  %v19587_v26 = vld [vmem:[#allocation6 + $0x200] ss:$48 sps:$4 sm:$0xff]  }
  0xd8   :  { %1527 = vmatprep.subr.bf16.mxu0 %v19499_v27  ;;  %1568 = vmatprep.subr.bf16.mxu1 %v19502_v28  ;;  %v19590_v27 = vld [vmem:[#allocation6 + $0x208] ss:$48 sps:$4 sm:$0xff]   ;;  %v19595_v28 = vld [vmem:[#allocation6 + $0x264] ss:$48 sps:$4 sm:$0xff]  }
  0xdb   :  { %1528 = vmatpush1.bf16.msra.mxu0 %v19497_v29  ;;  %1569 = vmatpush1.bf16.msra.mxu1 %v19500_v30  ;;  %v19598_v29 = vld [vmem:[#allocation6 + $0x26c] ss:$48 sps:$4 sm:$0xff]   ;;  %v19593_v30 = vld [vmem:[#allocation6 + $0x260] ss:$48 sps:$4 sm:$0xff]  }
  0xdc   :  { %1529 = vmatprep.subr.bf16.mxu0 %v19505_v31  ;;  %1570 = vmatprep.subr.bf16.mxu1 %v19508_v32  ;;  %v19596_v31 = vld [vmem:[#allocation6 + $0x268] ss:$48 sps:$4 sm:$0xff]   ;;  %v19601_v32 = vld [vmem:[#allocation6 + $0x2c4] ss:$48 sps:$4 sm:$0xff]  }
  0xdf   :  { %1530 = vmatpush1.bf16.msra.mxu0 %v19503_v33  ;;  %1571 = vmatpush1.bf16.msra.mxu1 %v19506_v34  ;;  %v19604_v33 = vld [vmem:[#allocation6 + $0x2cc] ss:$48 sps:$4 sm:$0xff]   ;;  %v19599_v34 = vld [vmem:[#allocation6 + $0x2c0] ss:$48 sps:$4 sm:$0xff]  }
  0xe0   :  { %1531 = vmatprep.subr.bf16.mxu0 %v19511_v35  ;;  %1572 = vmatprep.subr.bf16.mxu1 %v19514_v36  ;;  %v19602_v35 = vld [vmem:[#allocation6 + $0x2c8] ss:$48 sps:$4 sm:$0xff]   ;;  %v19607_v36 = vld [vmem:[#allocation6 + $0x324] ss:$48 sps:$4 sm:$0xff]  }
  0xe3   :  { %1532 = vmatpush1.bf16.msra.mxu0 %v19509_v37  ;;  %1573 = vmatpush1.bf16.msra.mxu1 %v19512_v38  ;;  %v19610_v37 = vld [vmem:[#allocation6 + $0x32c] ss:$48 sps:$4 sm:$0xff]   ;;  %v19605_v38 = vld [vmem:[#allocation6 + $0x320] ss:$48 sps:$4 sm:$0xff]  }
  0xe4   :  { %1533 = vmatprep.subr.bf16.mxu0 %v19517_v39  ;;  %1574 = vmatprep.subr.bf16.mxu1 %v19520_v40  ;;  %v19608_v39 = vld [vmem:[#allocation6 + $0x328] ss:$48 sps:$4 sm:$0xff]   ;;  %v19613_v40 = vld [vmem:[#allocation6 + $0x384] ss:$48 sps:$4 sm:$0xff]  }
  0xe7   :  { %1534 = vmatpush1.bf16.msra.mxu0 %v19515_v41  ;;  %1575 = vmatpush1.bf16.msra.mxu1 %v19518_v42  ;;  %v19616_v41 = vld [vmem:[#allocation6 + $0x38c] ss:$48 sps:$4 sm:$0xff]   ;;  %v19611_v42 = vld [vmem:[#allocation6 + $0x380] ss:$48 sps:$4 sm:$0xff]  }
  0xe8   :  { %1535 = vmatprep.subr.bf16.mxu0 %v19523_v43  ;;  %1576 = vmatprep.subr.bf16.mxu1 %v19526_v44  ;;  %v19614_v43 = vld [vmem:[#allocation6 + $0x388] ss:$48 sps:$4 sm:$0xff]   ;;  %v19619_v44 = vld [vmem:[#allocation6 + $0x3e4] ss:$48 sps:$4 sm:$0xff]  }
  0xeb   :  { %1536 = vmatpush1.bf16.msra.mxu0 %v19521_v45  ;;  %1577 = vmatpush1.bf16.msra.mxu1 %v19524_v46  ;;  %v19622_v45 = vld [vmem:[#allocation6 + $0x3ec] ss:$48 sps:$4 sm:$0xff]   ;;  %v19617_v46 = vld [vmem:[#allocation6 + $0x3e0] ss:$48 sps:$4 sm:$0xff]  }
  0xec   :  { %1537 = vmatprep.subr.bf16.mxu0 %v19529_v47  ;;  %1578 = vmatprep.subr.bf16.mxu1 %v19532_v49  ;;  %v19620_v47 = vld [vmem:[#allocation6 + $0x3e8] ss:$48 sps:$4 sm:$0xff]   ;;  %v19625_v49 = vld [vmem:[#allocation6 + $0x444] ss:$48 sps:$4 sm:$0xff]  }
  0xef   :  { %1538 = vmatpush1.bf16.msra.mxu0 %v19527_v50  ;;  %1579 = vmatpush1.bf16.msra.mxu1 %v19530_v51  ;;  %v19628_v50 = vld [vmem:[#allocation6 + $0x44c] ss:$48 sps:$4 sm:$0xff]   ;;  %v19623_v51 = vld [vmem:[#allocation6 + $0x440] ss:$48 sps:$4 sm:$0xff]  }
  0xf0   :  { %1539 = vmatprep.subr.bf16.mxu0 %v19535_v52  ;;  %1580 = vmatprep.subr.bf16.mxu1 %v19538_v53  ;;  %v19626_v52 = vld [vmem:[#allocation6 + $0x448] ss:$48 sps:$4 sm:$0xff]   ;;  %v19631_v53 = vld [vmem:[#allocation6 + $0x4a4] ss:$48 sps:$4 sm:$0xff]  }
  0xf3   :  { %1540 = vmatpush1.bf16.msra.mxu0 %v19533_v54  ;;  %1581 = vmatpush1.bf16.msra.mxu1 %v19536_v55  ;;  %v19634_v54 = vld [vmem:[#allocation6 + $0x4ac] ss:$48 sps:$4 sm:$0xff]   ;;  %v19629_v55 = vld [vmem:[#allocation6 + $0x4a0] ss:$48 sps:$4 sm:$0xff]  }
  0xf4   :  { %1541 = vmatprep.subr.bf16.mxu0 %v19541_v56  ;;  %1582 = vmatprep.subr.bf16.mxu1 %v19544_v57  ;;  %v19632_v56 = vld [vmem:[#allocation6 + $0x4a8] ss:$48 sps:$4 sm:$0xff]   ;;  %v19637_v57 = vld [vmem:[#allocation6 + $0x504] ss:$48 sps:$4 sm:$0xff]  }
  0xf7   :  { %1542 = vmatpush1.bf16.msra.mxu0 %v19539_v58  ;;  %1583 = vmatpush1.bf16.msra.mxu1 %v19542_v59  ;;  %v19640_v58 = vld [vmem:[#allocation6 + $0x50c] ss:$48 sps:$4 sm:$0xff]   ;;  %v19635_v59 = vld [vmem:[#allocation6 + $0x500] ss:$48 sps:$4 sm:$0xff]  }
  0xf8   :  { %1543 = vmatprep.subr.bf16.mxu0 %v19547_v60  ;;  %1584 = vmatprep.subr.bf16.mxu1 %v19550_v61  ;;  %v19638_v60 = vld [vmem:[#allocation6 + $0x508] ss:$48 sps:$4 sm:$0xff]   ;;  %v19643_v61 = vld [vmem:[#allocation6 + $0x564] ss:$48 sps:$4 sm:$0xff]  }
  0xfb   :  { %1544 = vmatpush1.bf16.msra.mxu0 %v19545_v62  ;;  %1585 = vmatpush1.bf16.msra.mxu1 %v19548_v63  ;;  %v19646_v62 = vld [vmem:[#allocation6 + $0x56c] ss:$48 sps:$4 sm:$0xff]   ;;  %v19641_v63 = vld [vmem:[#allocation6 + $0x560] ss:$48 sps:$4 sm:$0xff]  }
  0xfc   :  { %1545 = vmatprep.subr.bf16.mxu0 %v19553_v0  ;;  %1586 = vmatprep.subr.bf16.mxu1 %v19556_v1  ;;  %v19644_v0 = vld [vmem:[#allocation6 + $0x568] ss:$48 sps:$4 sm:$0xff]   ;;  %v19649_v1 = vld [vmem:[#allocation6 + $0x5c4] ss:$48 sps:$4 sm:$0xff]  }
  0xff   :  { %1546 = vmatpush1.bf16.msra.mxu0 %v19551_v2  ;;  %1587 = vmatpush1.bf16.msra.mxu1 %v19554_v3  ;;  %v19652_v2 = vld [vmem:[#allocation6 + $0x5cc] ss:$48 sps:$4 sm:$0xff]   ;;  %v19647_v3 = vld [vmem:[#allocation6 + $0x5c0] ss:$48 sps:$4 sm:$0xff]  }
 0x100   :  { %1597 = vmatprep.subr.bf16.mxu0 %v19559_v4  ;;  %1638 = vmatprep.subr.bf16.mxu1 %v19562_v6  ;;  %v19650_v4 = vld [vmem:[#allocation6 + $0x5c8] ss:$48 sps:$4 sm:$0xff]   ;;  %v19655_v6 = vld [vmem:[#allocation9 + $0x4] ss:$48 sps:$4 sm:$0xff]  }
 0x102   :  { %1548 = vmatmul.mubr.bf16.vlgmr.msra.gmra.mrb[4].mxu0 %v23086_v5  ;;  %1589 = vmatmul.mubr.bf16.vlgmr.msra.gmra.mrb[4].mxu1 %v23086_v5 }
 0x103   :  { %1598 = vmatpush1.bf16.msra.mxu0 %v19557_v7  ;;  %1639 = vmatpush1.bf16.msra.mxu1 %v19560_v8  ;;  %v19658_v7 = vld [vmem:[#allocation9 + $0xc] ss:$48 sps:$4 sm:$0xff]   ;;  %v19653_v8 = vld [vmem:[#allocation9] ss:$48 sps:$4 sm:$0xff]  }
 0x104   :  { %1599 = vmatprep.subr.bf16.mxu0 %v19565_v9  ;;  %1640 = vmatprep.subr.bf16.mxu1 %v19568_v10  ;;  %v132_v9 = vld [vmem:[#allocation3 + $0x8] sm:$0xff] }
 0x105   :  { %1629 = vmatprep.mubr.bf16.mxu0 %v23082_v48  ;;  %1670 = vmatprep.mubr.bf16.mxu1 %v23082_v48  ;;  %v19584_v48 = vld [vmem:[#allocation6 + $0x1a8] ss:$48 sps:$4 sm:$0xff]  }
 0x106   :  { %v19656_v10 = vld [vmem:[#allocation9 + $0x8] ss:$48 sps:$4 sm:$0xff]  }
 0x107   :  { %1600 = vmatpush1.bf16.msra.mxu0 %v19563_v11  ;;  %1641 = vmatpush1.bf16.msra.mxu1 %v19566_v12  ;;  %v19661_v11 = vld [vmem:[#allocation9 + $0x64] ss:$48 sps:$4 sm:$0xff]   ;;  %v19664_v12 = vld [vmem:[#allocation9 + $0x6c] ss:$48 sps:$4 sm:$0xff]  }
 0x108   :  { %1601 = vmatprep.subr.bf16.mxu0 %v19571_v13  ;;  %1642 = vmatprep.subr.bf16.mxu1 %v19574_v14  ;;  %v23096_v13 = vpack.c.bf16 %v132_v9, %v132_v9  ;;  %v19659_v14 = vld [vmem:[#allocation9 + $0x60] ss:$48 sps:$4 sm:$0xff]   ;;  %v19751_v9 = vld [vmem:[#allocation9 + $0x604] ss:$48 sps:$4 sm:$0xff]  }
 0x10b   :  { %1602 = vmatpush1.bf16.msra.mxu0 %v19569_v15  ;;  %1643 = vmatpush1.bf16.msra.mxu1 %v19572_v16  ;;  %v19662_v15 = vld [vmem:[#allocation9 + $0x68] ss:$48 sps:$4 sm:$0xff]   ;;  %v19667_v16 = vld [vmem:[#allocation9 + $0xc4] ss:$48 sps:$4 sm:$0xff]  }
 0x10c   :  { %1603 = vmatprep.subr.bf16.mxu0 %v19577_v17  ;;  %1644 = vmatprep.subr.bf16.mxu1 %v19580_v18  ;;  %v19670_v17 = vld [vmem:[#allocation9 + $0xcc] ss:$48 sps:$4 sm:$0xff]   ;;  %v19665_v18 = vld [vmem:[#allocation9 + $0xc0] ss:$48 sps:$4 sm:$0xff]  }
 0x10f   :  { %1604 = vmatpush1.bf16.msra.mxu0 %v19575_v19  ;;  %1645 = vmatpush1.bf16.msra.mxu1 %v19578_v20  ;;  %v19668_v19 = vld [vmem:[#allocation9 + $0xc8] ss:$48 sps:$4 sm:$0xff]   ;;  %v19673_v20 = vld [vmem:[#allocation9 + $0x124] ss:$48 sps:$4 sm:$0xff]  }
 0x110   :  { %1605 = vmatprep.subr.bf16.mxu0 %v19583_v21  ;;  %1646 = vmatprep.subr.bf16.mxu1 %v19586_v22  ;;  %v19671_v21 = vld [vmem:[#allocation9 + $0x120] ss:$48 sps:$4 sm:$0xff]   ;;  %v19674_v22 = vld [vmem:[#allocation9 + $0x128] ss:$48 sps:$4 sm:$0xff]  }
 0x113   :  { %1606 = vmatpush1.bf16.msra.mxu0 %v19581_v23  ;;  %1647 = vmatpush1.bf16.msra.mxu1 %v19584_v48  ;;  %v19679_v23 = vld [vmem:[#allocation9 + $0x184] ss:$48 sps:$4 sm:$0xff]   ;;  %v19682_v48 = vld [vmem:[#allocation9 + $0x18c] ss:$48 sps:$4 sm:$0xff]  }
 0x114   :  { %1607 = vmatprep.subr.bf16.mxu0 %v19589_v24  ;;  %1648 = vmatprep.subr.bf16.mxu1 %v19592_v25  ;;  %v19677_v24 = vld [vmem:[#allocation9 + $0x180] ss:$48 sps:$4 sm:$0xff]   ;;  %v19680_v25 = vld [vmem:[#allocation9 + $0x188] ss:$48 sps:$4 sm:$0xff]  }
 0x117   :  { %1608 = vmatpush1.bf16.msra.mxu0 %v19587_v26  ;;  %1649 = vmatpush1.bf16.msra.mxu1 %v19590_v27  ;;  %v19685_v26 = vld [vmem:[#allocation9 + $0x1e4] ss:$48 sps:$4 sm:$0xff]   ;;  %v19688_v27 = vld [vmem:[#allocation9 + $0x1ec] ss:$48 sps:$4 sm:$0xff]  }
 0x118   :  { %1609 = vmatprep.subr.bf16.mxu0 %v19595_v28  ;;  %1650 = vmatprep.subr.bf16.mxu1 %v19598_v29  ;;  %v19683_v28 = vld [vmem:[#allocation9 + $0x1e0] ss:$48 sps:$4 sm:$0xff]   ;;  %v19686_v29 = vld [vmem:[#allocation9 + $0x1e8] ss:$48 sps:$4 sm:$0xff]  }
 0x11b   :  { %1610 = vmatpush1.bf16.msra.mxu0 %v19593_v30  ;;  %1651 = vmatpush1.bf16.msra.mxu1 %v19596_v31  ;;  %v19691_v30 = vld [vmem:[#allocation9 + $0x244] ss:$48 sps:$4 sm:$0xff]   ;;  %v19694_v31 = vld [vmem:[#allocation9 + $0x24c] ss:$48 sps:$4 sm:$0xff]  }
 0x11c   :  { %1611 = vmatprep.subr.bf16.mxu0 %v19601_v32  ;;  %1652 = vmatprep.subr.bf16.mxu1 %v19604_v33  ;;  %v19689_v32 = vld [vmem:[#allocation9 + $0x240] ss:$48 sps:$4 sm:$0xff]   ;;  %v19692_v33 = vld [vmem:[#allocation9 + $0x248] ss:$48 sps:$4 sm:$0xff]  }
 0x11f   :  { %1612 = vmatpush1.bf16.msra.mxu0 %v19599_v34  ;;  %1653 = vmatpush1.bf16.msra.mxu1 %v19602_v35  ;;  %v19697_v34 = vld [vmem:[#allocation9 + $0x2a4] ss:$48 sps:$4 sm:$0xff]   ;;  %v19700_v35 = vld [vmem:[#allocation9 + $0x2ac] ss:$48 sps:$4 sm:$0xff]  }
 0x120   :  { %1613 = vmatprep.subr.bf16.mxu0 %v19607_v36  ;;  %1654 = vmatprep.subr.bf16.mxu1 %v19610_v37  ;;  %v19695_v36 = vld [vmem:[#allocation9 + $0x2a0] ss:$48 sps:$4 sm:$0xff]   ;;  %v19698_v37 = vld [vmem:[#allocation9 + $0x2a8] ss:$48 sps:$4 sm:$0xff]  }
 0x123   :  { %1614 = vmatpush1.bf16.msra.mxu0 %v19605_v38  ;;  %1655 = vmatpush1.bf16.msra.mxu1 %v19608_v39  ;;  %v19703_v38 = vld [vmem:[#allocation9 + $0x304] ss:$48 sps:$4 sm:$0xff]   ;;  %v19706_v39 = vld [vmem:[#allocation9 + $0x30c] ss:$48 sps:$4 sm:$0xff]  }
 0x124   :  { %1615 = vmatprep.subr.bf16.mxu0 %v19613_v40  ;;  %1656 = vmatprep.subr.bf16.mxu1 %v19616_v41  ;;  %v19701_v40 = vld [vmem:[#allocation9 + $0x300] ss:$48 sps:$4 sm:$0xff]   ;;  %v19704_v41 = vld [vmem:[#allocation9 + $0x308] ss:$48 sps:$4 sm:$0xff]  }
 0x127   :  { %1616 = vmatpush1.bf16.msra.mxu0 %v19611_v42  ;;  %1657 = vmatpush1.bf16.msra.mxu1 %v19614_v43  ;;  %v19709_v42 = vld [vmem:[#allocation9 + $0x364] ss:$48 sps:$4 sm:$0xff]   ;;  %v19712_v43 = vld [vmem:[#allocation9 + $0x36c] ss:$48 sps:$4 sm:$0xff]  }
 0x128   :  { %1617 = vmatprep.subr.bf16.mxu0 %v19619_v44  ;;  %1658 = vmatprep.subr.bf16.mxu1 %v19622_v45  ;;  %v19707_v44 = vld [vmem:[#allocation9 + $0x360] ss:$48 sps:$4 sm:$0xff]   ;;  %v19710_v45 = vld [vmem:[#allocation9 + $0x368] ss:$48 sps:$4 sm:$0xff]  }
 0x12b   :  { %1618 = vmatpush1.bf16.msra.mxu0 %v19617_v46  ;;  %1659 = vmatpush1.bf16.msra.mxu1 %v19620_v47  ;;  %v19715_v46 = vld [vmem:[#allocation9 + $0x3c4] ss:$48 sps:$4 sm:$0xff]   ;;  %v19718_v47 = vld [vmem:[#allocation9 + $0x3cc] ss:$48 sps:$4 sm:$0xff]  }
 0x12c   :  { %1619 = vmatprep.subr.bf16.mxu0 %v19625_v49  ;;  %1660 = vmatprep.subr.bf16.mxu1 %v19628_v50  ;;  %v19713_v49 = vld [vmem:[#allocation9 + $0x3c0] ss:$48 sps:$4 sm:$0xff]   ;;  %v19716_v50 = vld [vmem:[#allocation9 + $0x3c8] ss:$48 sps:$4 sm:$0xff]  }
 0x12f   :  { %1620 = vmatpush1.bf16.msra.mxu0 %v19623_v51  ;;  %1661 = vmatpush1.bf16.msra.mxu1 %v19626_v52  ;;  %v19721_v51 = vld [vmem:[#allocation9 + $0x424] ss:$48 sps:$4 sm:$0xff]   ;;  %v19724_v52 = vld [vmem:[#allocation9 + $0x42c] ss:$48 sps:$4 sm:$0xff]  }
 0x130   :  { %1621 = vmatprep.subr.bf16.mxu0 %v19631_v53  ;;  %1662 = vmatprep.subr.bf16.mxu1 %v19634_v54  ;;  %v19719_v53 = vld [vmem:[#allocation9 + $0x420] ss:$48 sps:$4 sm:$0xff]   ;;  %v19722_v54 = vld [vmem:[#allocation9 + $0x428] ss:$48 sps:$4 sm:$0xff]  }
 0x133   :  { %1622 = vmatpush1.bf16.msra.mxu0 %v19629_v55  ;;  %1663 = vmatpush1.bf16.msra.mxu1 %v19632_v56  ;;  %v19727_v55 = vld [vmem:[#allocation9 + $0x484] ss:$48 sps:$4 sm:$0xff]   ;;  %v19730_v56 = vld [vmem:[#allocation9 + $0x48c] ss:$48 sps:$4 sm:$0xff]  }
 0x134   :  { %1623 = vmatprep.subr.bf16.mxu0 %v19637_v57  ;;  %1664 = vmatprep.subr.bf16.mxu1 %v19640_v58  ;;  %v19725_v57 = vld [vmem:[#allocation9 + $0x480] ss:$48 sps:$4 sm:$0xff]   ;;  %v19728_v58 = vld [vmem:[#allocation9 + $0x488] ss:$48 sps:$4 sm:$0xff]  }
 0x137   :  { %1624 = vmatpush1.bf16.msra.mxu0 %v19635_v59  ;;  %1665 = vmatpush1.bf16.msra.mxu1 %v19638_v60  ;;  %v19733_v59 = vld [vmem:[#allocation9 + $0x4e4] ss:$48 sps:$4 sm:$0xff]   ;;  %v19736_v60 = vld [vmem:[#allocation9 + $0x4ec] ss:$48 sps:$4 sm:$0xff]  }
 0x138   :  { %1625 = vmatprep.subr.bf16.mxu0 %v19643_v61  ;;  %1666 = vmatprep.subr.bf16.mxu1 %v19646_v62  ;;  %v19731_v61 = vld [vmem:[#allocation9 + $0x4e0] ss:$48 sps:$4 sm:$0xff]   ;;  %v19734_v62 = vld [vmem:[#allocation9 + $0x4e8] ss:$48 sps:$4 sm:$0xff]  }
 0x13b   :  { %1626 = vmatpush1.bf16.msra.mxu0 %v19641_v63  ;;  %1667 = vmatpush1.bf16.msra.mxu1 %v19644_v0  ;;  %v19739_v63 = vld [vmem:[#allocation9 + $0x544] ss:$48 sps:$4 sm:$0xff]   ;;  %v19742_v0 = vld [vmem:[#allocation9 + $0x54c] ss:$48 sps:$4 sm:$0xff]  }
 0x13c   :  { %1627 = vmatprep.subr.bf16.mxu0 %v19649_v1  ;;  %1668 = vmatprep.subr.bf16.mxu1 %v19652_v2  ;;  %v19737_v1 = vld [vmem:[#allocation9 + $0x540] ss:$48 sps:$4 sm:$0xff]   ;;  %v19740_v2 = vld [vmem:[#allocation9 + $0x548] ss:$48 sps:$4 sm:$0xff]  }
 0x13f   :  { %1628 = vmatpush1.bf16.msra.mxu0 %v19647_v3  ;;  %1669 = vmatpush1.bf16.msra.mxu1 %v19650_v4  ;;  %v19745_v3 = vld [vmem:[#allocation9 + $0x5a4] ss:$48 sps:$4 sm:$0xff]   ;;  %v19748_v4 = vld [vmem:[#allocation9 + $0x5ac] ss:$48 sps:$4 sm:$0xff]  }
 0x140   :  { %4095 = vmatprep.subr.bf16.mxu0 %v19655_v6  ;;  %4177 = vmatprep.subr.bf16.mxu1 %v19658_v7  ;;  %v19743_v6 = vld [vmem:[#allocation9 + $0x5a0] ss:$48 sps:$4 sm:$0xff]   ;;  %v19746_v7 = vld [vmem:[#allocation9 + $0x5a8] ss:$48 sps:$4 sm:$0xff]  }
 0x142   :  { %1630 = vmatmul.mubr.bf16.vlgmr.msra.gmra.mrb[8].mxu0 %v23086_v5  ;;  %1671 = vmatmul.mubr.bf16.vlgmr.msra.gmra.mrb[8].mxu1 %v23086_v5  ;;  %v19676_v5 = vld [vmem:[#allocation9 + $0x12c] ss:$48 sps:$4 sm:$0xff]  }
 0x143   :  { %4096 = vmatpush1.bf16.msra.mxu0 %v19653_v8  ;;  %4178 = vmatpush1.bf16.msra.mxu1 %v19656_v10  ;;  %v131_v8 = vld [vmem:[#allocation3] sm:$0xff]  ;;  %v19754_v10 = vld [vmem:[#allocation9 + $0x60c] ss:$48 sps:$4 sm:$0xff]  }
 0x144   :  { %4097 = vmatprep.subr.bf16.mxu0 %v19661_v11  ;;  %4179 = vmatprep.subr.bf16.mxu1 %v19664_v12  ;;  %v19749_v11 = vld [vmem:[#allocation9 + $0x600] ss:$48 sps:$4 sm:$0xff]   ;;  %v23102_v12 = vpack.c.bf16 %v131_v8, %v131_v8  ;;  %v19836_v8 = vld [vmem:[#allocation9 + $0xb48] ss:$48 sps:$4 sm:$0xff]  }
 0x145   :  { %4127 = vmatprep.mubr.bf16.mxu0 %v23096_v13  ;;  %4209 = vmatprep.mubr.bf16.mxu1 %v23096_v13 }
 0x147   :  { %4098 = vmatpush1.bf16.msra.mxu0 %v19659_v14  ;;  %4180 = vmatpush1.bf16.msra.mxu1 %v19662_v15  ;;  %v134_v14 = vld [vmem:[#allocation3 + $0x18] sm:$0xff] }
 0x148   :  { %4099 = vmatprep.subr.bf16.mxu0 %v19667_v16  ;;  %4181 = vmatprep.subr.bf16.mxu1 %v19670_v17  ;;  %v19752_v15 = vld [vmem:[#allocation9 + $0x608] ss:$48 sps:$4 sm:$0xff]   ;;  %v19757_v16 = vld [vmem:[#allocation9 + $0x664] ss:$48 sps:$4 sm:$0xff]   ;;  %v19760_v17 = vld [vmem:[#allocation9 + $0x66c] ss:$48 sps:$4 sm:$0xff]  }
 0x14b   :  { %4100 = vmatpush1.bf16.msra.mxu0 %v19665_v18  ;;  %4182 = vmatpush1.bf16.msra.mxu1 %v19668_v19  ;;  %v23104_v18 = vpack.c.bf16 %v134_v14, %v134_v14  ;;  %v19755_v19 = vld [vmem:[#allocation9 + $0x660] ss:$48 sps:$4 sm:$0xff]   ;;  %v19842_v14 = vld [vmem:[#allocation9 + $0xba8] ss:$48 sps:$4 sm:$0xff]  }
 0x14c   :  { %4101 = vmatprep.subr.bf16.mxu0 %v19673_v20  ;;  %4183 = vmatprep.subr.bf16.mxu1 %v19676_v5  ;;  %v19758_v20 = vld [vmem:[#allocation9 + $0x668] ss:$48 sps:$4 sm:$0xff]   ;;  %v19763_v5 = vld [vmem:[#allocation9 + $0x6c4] ss:$48 sps:$4 sm:$0xff]  }
 0x14f   :  { %4102 = vmatpush1.bf16.msra.mxu0 %v19671_v21  ;;  %4184 = vmatpush1.bf16.msra.mxu1 %v19674_v22  ;;  %v19766_v21 = vld [vmem:[#allocation9 + $0x6cc] ss:$48 sps:$4 sm:$0xff]   ;;  %v19761_v22 = vld [vmem:[#allocation9 + $0x6c0] ss:$48 sps:$4 sm:$0xff]  }
 0x150   :  { %4103 = vmatprep.subr.bf16.mxu0 %v19679_v23  ;;  %4185 = vmatprep.subr.bf16.mxu1 %v19682_v48  ;;  %v19764_v23 = vld [vmem:[#allocation9 + $0x6c8] ss:$48 sps:$4 sm:$0xff]   ;;  %v19769_v48 = vld [vmem:[#allocation9 + $0x724] ss:$48 sps:$4 sm:$0xff]  }
 0x153   :  { %4104 = vmatpush1.bf16.msra.mxu0 %v19677_v24  ;;  %4186 = vmatpush1.bf16.msra.mxu1 %v19680_v25  ;;  %v19772_v24 = vld [vmem:[#allocation9 + $0x72c] ss:$48 sps:$4 sm:$0xff]   ;;  %v19767_v25 = vld [vmem:[#allocation9 + $0x720] ss:$48 sps:$4 sm:$0xff]  }
 0x154   :  { %4105 = vmatprep.subr.bf16.mxu0 %v19685_v26  ;;  %4187 = vmatprep.subr.bf16.mxu1 %v19688_v27  ;;  %v19770_v26 = vld [vmem:[#allocation9 + $0x728] ss:$48 sps:$4 sm:$0xff]   ;;  %v19775_v27 = vld [vmem:[#allocation9 + $0x784] ss:$48 sps:$4 sm:$0xff]  }
 0x157   :  { %4106 = vmatpush1.bf16.msra.mxu0 %v19683_v28  ;;  %4188 = vmatpush1.bf16.msra.mxu1 %v19686_v29  ;;  %v19778_v28 = vld [vmem:[#allocation9 + $0x78c] ss:$48 sps:$4 sm:$0xff]   ;;  %v19773_v29 = vld [vmem:[#allocation9 + $0x780] ss:$48 sps:$4 sm:$0xff]  }
 0x158   :  { %4107 = vmatprep.subr.bf16.mxu0 %v19691_v30  ;;  %4189 = vmatprep.subr.bf16.mxu1 %v19694_v31  ;;  %v19776_v30 = vld [vmem:[#allocation9 + $0x788] ss:$48 sps:$4 sm:$0xff]   ;;  %v19781_v31 = vld [vmem:[#allocation9 + $0x7e4] ss:$48 sps:$4 sm:$0xff]  }
 0x15b   :  { %4108 = vmatpush1.bf16.msra.mxu0 %v19689_v32  ;;  %4190 = vmatpush1.bf16.msra.mxu1 %v19692_v33  ;;  %v19784_v32 = vld [vmem:[#allocation9 + $0x7ec] ss:$48 sps:$4 sm:$0xff]   ;;  %v19779_v33 = vld [vmem:[#allocation9 + $0x7e0] ss:$48 sps:$4 sm:$0xff]  }
 0x15c   :  { %4109 = vmatprep.subr.bf16.mxu0 %v19697_v34  ;;  %4191 = vmatprep.subr.bf16.mxu1 %v19700_v35  ;;  %v19782_v34 = vld [vmem:[#allocation9 + $0x7e8] ss:$48 sps:$4 sm:$0xff]   ;;  %v19787_v35 = vld [vmem:[#allocation9 + $0x844] ss:$48 sps:$4 sm:$0xff]  }
 0x15f   :  { %4110 = vmatpush1.bf16.msra.mxu0 %v19695_v36  ;;  %4192 = vmatpush1.bf16.msra.mxu1 %v19698_v37  ;;  %v19790_v36 = vld [vmem:[#allocation9 + $0x84c] ss:$48 sps:$4 sm:$0xff]   ;;  %v19785_v37 = vld [vmem:[#allocation9 + $0x840] ss:$48 sps:$4 sm:$0xff]  }
 0x160   :  { %4111 = vmatprep.subr.bf16.mxu0 %v19703_v38  ;;  %4193 = vmatprep.subr.bf16.mxu1 %v19706_v39  ;;  %v19788_v38 = vld [vmem:[#allocation9 + $0x848] ss:$48 sps:$4 sm:$0xff]   ;;  %v19793_v39 = vld [vmem:[#allocation9 + $0x8a4] ss:$48 sps:$4 sm:$0xff]  }
 0x163   :  { %4112 = vmatpush1.bf16.msra.mxu0 %v19701_v40  ;;  %4194 = vmatpush1.bf16.msra.mxu1 %v19704_v41  ;;  %v19796_v40 = vld [vmem:[#allocation9 + $0x8ac] ss:$48 sps:$4 sm:$0xff]   ;;  %v19791_v41 = vld [vmem:[#allocation9 + $0x8a0] ss:$48 sps:$4 sm:$0xff]  }
 0x164   :  { %4113 = vmatprep.subr.bf16.mxu0 %v19709_v42  ;;  %4195 = vmatprep.subr.bf16.mxu1 %v19712_v43  ;;  %v19794_v42 = vld [vmem:[#allocation9 + $0x8a8] ss:$48 sps:$4 sm:$0xff]   ;;  %v19799_v43 = vld [vmem:[#allocation9 + $0x904] ss:$48 sps:$4 sm:$0xff]  }
 0x167   :  { %4114 = vmatpush1.bf16.msra.mxu0 %v19707_v44  ;;  %4196 = vmatpush1.bf16.msra.mxu1 %v19710_v45  ;;  %v19802_v44 = vld [vmem:[#allocation9 + $0x90c] ss:$48 sps:$4 sm:$0xff]   ;;  %v19797_v45 = vld [vmem:[#allocation9 + $0x900] ss:$48 sps:$4 sm:$0xff]  }
 0x168   :  { %4115 = vmatprep.subr.bf16.mxu0 %v19715_v46  ;;  %4197 = vmatprep.subr.bf16.mxu1 %v19718_v47  ;;  %v19800_v46 = vld [vmem:[#allocation9 + $0x908] ss:$48 sps:$4 sm:$0xff]   ;;  %v19805_v47 = vld [vmem:[#allocation9 + $0x964] ss:$48 sps:$4 sm:$0xff]  }
 0x16b   :  { %4116 = vmatpush1.bf16.msra.mxu0 %v19713_v49  ;;  %4198 = vmatpush1.bf16.msra.mxu1 %v19716_v50  ;;  %v19808_v49 = vld [vmem:[#allocation9 + $0x96c] ss:$48 sps:$4 sm:$0xff]   ;;  %v19803_v50 = vld [vmem:[#allocation9 + $0x960] ss:$48 sps:$4 sm:$0xff]  }
 0x16c   :  { %4117 = vmatprep.subr.bf16.mxu0 %v19721_v51  ;;  %4199 = vmatprep.subr.bf16.mxu1 %v19724_v52  ;;  %v19806_v51 = vld [vmem:[#allocation9 + $0x968] ss:$48 sps:$4 sm:$0xff]   ;;  %v19811_v52 = vld [vmem:[#allocation9 + $0x9c4] ss:$48 sps:$4 sm:$0xff]  }
 0x16f   :  { %4118 = vmatpush1.bf16.msra.mxu0 %v19719_v53  ;;  %4200 = vmatpush1.bf16.msra.mxu1 %v19722_v54  ;;  %v19814_v53 = vld [vmem:[#allocation9 + $0x9cc] ss:$48 sps:$4 sm:$0xff]   ;;  %v19809_v54 = vld [vmem:[#allocation9 + $0x9c0] ss:$48 sps:$4 sm:$0xff]  }
 0x170   :  { %4119 = vmatprep.subr.bf16.mxu0 %v19727_v55  ;;  %4201 = vmatprep.subr.bf16.mxu1 %v19730_v56  ;;  %v19812_v55 = vld [vmem:[#allocation9 + $0x9c8] ss:$48 sps:$4 sm:$0xff]   ;;  %v19817_v56 = vld [vmem:[#allocation9 + $0xa24] ss:$48 sps:$4 sm:$0xff]  }
 0x173   :  { %4120 = vmatpush1.bf16.msra.mxu0 %v19725_v57  ;;  %4202 = vmatpush1.bf16.msra.mxu1 %v19728_v58  ;;  %v19820_v57 = vld [vmem:[#allocation9 + $0xa2c] ss:$48 sps:$4 sm:$0xff]   ;;  %v19815_v58 = vld [vmem:[#allocation9 + $0xa20] ss:$48 sps:$4 sm:$0xff]  }
 0x174   :  { %4121 = vmatprep.subr.bf16.mxu0 %v19733_v59  ;;  %4203 = vmatprep.subr.bf16.mxu1 %v19736_v60  ;;  %v19818_v59 = vld [vmem:[#allocation9 + $0xa28] ss:$48 sps:$4 sm:$0xff]   ;;  %v19823_v60 = vld [vmem:[#allocation9 + $0xa84] ss:$48 sps:$4 sm:$0xff]  }
 0x177   :  { %4122 = vmatpush1.bf16.msra.mxu0 %v19731_v61  ;;  %4204 = vmatpush1.bf16.msra.mxu1 %v19734_v62  ;;  %v19826_v61 = vld [vmem:[#allocation9 + $0xa8c] ss:$48 sps:$4 sm:$0xff]   ;;  %v19821_v62 = vld [vmem:[#allocation9 + $0xa80] ss:$48 sps:$4 sm:$0xff]  }
 0x178   :  { %4123 = vmatprep.subr.bf16.mxu0 %v19739_v63  ;;  %4205 = vmatprep.subr.bf16.mxu1 %v19742_v0  ;;  %v19824_v63 = vld [vmem:[#allocation9 + $0xa88] ss:$48 sps:$4 sm:$0xff]   ;;  %v19829_v0 = vld [vmem:[#allocation9 + $0xae4] ss:$48 sps:$4 sm:$0xff]  }
 0x17b   :  { %4124 = vmatpush1.bf16.msra.mxu0 %v19737_v1  ;;  %4206 = vmatpush1.bf16.msra.mxu1 %v19740_v2  ;;  %v19832_v1 = vld [vmem:[#allocation9 + $0xaec] ss:$48 sps:$4 sm:$0xff]   ;;  %v19827_v2 = vld [vmem:[#allocation9 + $0xae0] ss:$48 sps:$4 sm:$0xff]  }
 0x17c   :  { %4125 = vmatprep.subr.bf16.mxu0 %v19745_v3  ;;  %4207 = vmatprep.subr.bf16.mxu1 %v19748_v4  ;;  %v19830_v3 = vld [vmem:[#allocation9 + $0xae8] ss:$48 sps:$4 sm:$0xff]   ;;  %v19835_v4 = vld [vmem:[#allocation9 + $0xb44] ss:$48 sps:$4 sm:$0xff]  }
 0x17f   :  { %4126 = vmatpush1.bf16.msra.mxu0 %v19743_v6  ;;  %4208 = vmatpush1.bf16.msra.mxu1 %v19746_v7  ;;  %v19838_v6 = vld [vmem:[#allocation9 + $0xb4c] ss:$48 sps:$4 sm:$0xff]   ;;  %v19833_v7 = vld [vmem:[#allocation9 + $0xb40] ss:$48 sps:$4 sm:$0xff]  }
 0x180   :  { %4136 = vmatprep.subr.bf16.mxu0 %v19751_v9  ;;  %4218 = vmatprep.subr.bf16.mxu1 %v19754_v10  ;;  %v19841_v9 = vld [vmem:[#allocation9 + $0xba4] ss:$48 sps:$4 sm:$0xff]   ;;  %v19844_v10 = vld [vmem:[#allocation9 + $0xbac] ss:$48 sps:$4 sm:$0xff]  }
 0x182   :  { %4128 = vmatmul.mubr.bf16.vlgmr.msra.gmra.mrb[0].mxu0 %v23102_v12  ;;  %4210 = vmatmul.mubr.bf16.vlgmr.msra.gmra.mrb[0].mxu1 %v23102_v12 }
 0x183   :  { %4137 = vmatpush1.bf16.msra.mxu0 %v19749_v11  ;;  %4219 = vmatpush1.bf16.msra.mxu1 %v19752_v15  ;;  %v19839_v11 = vld [vmem:[#allocation9 + $0xba0] ss:$48 sps:$4 sm:$0xff]  }
 0x184   :  { %4138 = vmatprep.subr.bf16.mxu0 %v19757_v16  ;;  %4220 = vmatprep.subr.bf16.mxu1 %v19760_v17  ;;  %v133_v15 = vld [vmem:[#allocation3 + $0x10] sm:$0xff]  ;;  %v19850_v17 = vld [vmem:[#allocation9 + $0x1c] ss:$48 sps:$4 sm:$0xff]  }
 0x185   :  { %4168 = vmatprep.mubr.bf16.mxu0 %v23104_v18  ;;  %4250 = vmatprep.mubr.bf16.mxu1 %v23104_v18  ;;  %v19847_v16 = vld [vmem:[#allocation9 + $0x14] ss:$48 sps:$4 sm:$0xff]  }
 0x187   :  { %4139 = vmatpush1.bf16.msra.mxu0 %v19755_v19  ;;  %4221 = vmatpush1.bf16.msra.mxu1 %v19758_v20  ;;  %v19845_v19 = vld [vmem:[#allocation9 + $0x10] ss:$48 sps:$4 sm:$0xff]   ;;  %v19848_v20 = vld [vmem:[#allocation9 + $0x18] ss:$48 sps:$4 sm:$0xff]  }
 0x188   :  { %4140 = vmatprep.subr.bf16.mxu0 %v19763_v5  ;;  %4222 = vmatprep.subr.bf16.mxu1 %v19766_v21  ;;  %v23110_v5 = vpack.c.bf16 %v133_v15, %v133_v15  ;;  %v19853_v21 = vld [vmem:[#allocation9 + $0x74] ss:$48 sps:$4 sm:$0xff]   ;;  %v19932_v15 = vld [vmem:[#allocation9 + $0x558] ss:$48 sps:$4 sm:$0xff]  }
 0x18b   :  { %4141 = vmatpush1.bf16.msra.mxu0 %v19761_v22  ;;  %4223 = vmatpush1.bf16.msra.mxu1 %v19764_v23  ;;  %v19856_v22 = vld [vmem:[#allocation9 + $0x7c] ss:$48 sps:$4 sm:$0xff]   ;;  %v19851_v23 = vld [vmem:[#allocation9 + $0x70] ss:$48 sps:$4 sm:$0xff]  }
 0x18c   :  { %4142 = vmatprep.subr.bf16.mxu0 %v19769_v48  ;;  %4224 = vmatprep.subr.bf16.mxu1 %v19772_v24  ;;  %v19854_v48 = vld [vmem:[#allocation9 + $0x78] ss:$48 sps:$4 sm:$0xff]   ;;  %v19859_v24 = vld [vmem:[#allocation9 + $0xd4] ss:$48 sps:$4 sm:$0xff]  }
 0x18f   :  { %4143 = vmatpush1.bf16.msra.mxu0 %v19767_v25  ;;  %4225 = vmatpush1.bf16.msra.mxu1 %v19770_v26  ;;  %v19862_v25 = vld [vmem:[#allocation9 + $0xdc] ss:$48 sps:$4 sm:$0xff]   ;;  %v19857_v26 = vld [vmem:[#allocation9 + $0xd0] ss:$48 sps:$4 sm:$0xff]  }
 0x190   :  { %4144 = vmatprep.subr.bf16.mxu0 %v19775_v27  ;;  %4226 = vmatprep.subr.bf16.mxu1 %v19778_v28  ;;  %v19860_v27 = vld [vmem:[#allocation9 + $0xd8] ss:$48 sps:$4 sm:$0xff]   ;;  %v19865_v28 = vld [vmem:[#allocation9 + $0x134] ss:$48 sps:$4 sm:$0xff]  }
 0x193   :  { %4145 = vmatpush1.bf16.msra.mxu0 %v19773_v29  ;;  %4227 = vmatpush1.bf16.msra.mxu1 %v19776_v30  ;;  %v19868_v29 = vld [vmem:[#allocation9 + $0x13c] ss:$48 sps:$4 sm:$0xff]   ;;  %v19863_v30 = vld [vmem:[#allocation9 + $0x130] ss:$48 sps:$4 sm:$0xff]  }
 0x194   :  { %4146 = vmatprep.subr.bf16.mxu0 %v19781_v31  ;;  %4228 = vmatprep.subr.bf16.mxu1 %v19784_v32  ;;  %v19866_v31 = vld [vmem:[#allocation9 + $0x138] ss:$48 sps:$4 sm:$0xff]   ;;  %v19871_v32 = vld [vmem:[#allocation9 + $0x194] ss:$48 sps:$4 sm:$0xff]  }
 0x197   :  { %4147 = vmatpush1.bf16.msra.mxu0 %v19779_v33  ;;  %4229 = vmatpush1.bf16.msra.mxu1 %v19782_v34  ;;  %v19874_v33 = vld [vmem:[#allocation9 + $0x19c] ss:$48 sps:$4 sm:$0xff]   ;;  %v19869_v34 = vld [vmem:[#allocation9 + $0x190] ss:$48 sps:$4 sm:$0xff]  }
 0x198   :  { %4148 = vmatprep.subr.bf16.mxu0 %v19787_v35  ;;  %4230 = vmatprep.subr.bf16.mxu1 %v19790_v36  ;;  %v19872_v35 = vld [vmem:[#allocation9 + $0x198] ss:$48 sps:$4 sm:$0xff]   ;;  %v19877_v36 = vld [vmem:[#allocation9 + $0x1f4] ss:$48 sps:$4 sm:$0xff]  }
 0x19b   :  { %4149 = vmatpush1.bf16.msra.mxu0 %v19785_v37  ;;  %4231 = vmatpush1.bf16.msra.mxu1 %v19788_v38  ;;  %v19880_v37 = vld [vmem:[#allocation9 + $0x1fc] ss:$48 sps:$4 sm:$0xff]   ;;  %v19875_v38 = vld [vmem:[#allocation9 + $0x1f0] ss:$48 sps:$4 sm:$0xff]  }
 0x19c   :  { %4150 = vmatprep.subr.bf16.mxu0 %v19793_v39  ;;  %4232 = vmatprep.subr.bf16.mxu1 %v19796_v40  ;;  %v19878_v39 = vld [vmem:[#allocation9 + $0x1f8] ss:$48 sps:$4 sm:$0xff]   ;;  %v19883_v40 = vld [vmem:[#allocation9 + $0x254] ss:$48 sps:$4 sm:$0xff]  }
 0x19f   :  { %4151 = vmatpush1.bf16.msra.mxu0 %v19791_v41  ;;  %4233 = vmatpush1.bf16.msra.mxu1 %v19794_v42  ;;  %v19886_v41 = vld [vmem:[#allocation9 + $0x25c] ss:$48 sps:$4 sm:$0xff]   ;;  %v19881_v42 = vld [vmem:[#allocation9 + $0x250] ss:$48 sps:$4 sm:$0xff]  }
 0x1a0   :  { %4152 = vmatprep.subr.bf16.mxu0 %v19799_v43  ;;  %4234 = vmatprep.subr.bf16.mxu1 %v19802_v44  ;;  %v19884_v43 = vld [vmem:[#allocation9 + $0x258] ss:$48 sps:$4 sm:$0xff]   ;;  %v19889_v44 = vld [vmem:[#allocation9 + $0x2b4] ss:$48 sps:$4 sm:$0xff]  }
 0x1a3   :  { %4153 = vmatpush1.bf16.msra.mxu0 %v19797_v45  ;;  %4235 = vmatpush1.bf16.msra.mxu1 %v19800_v46  ;;  %v19892_v45 = vld [vmem:[#allocation9 + $0x2bc] ss:$48 sps:$4 sm:$0xff]   ;;  %v19887_v46 = vld [vmem:[#allocation9 + $0x2b0] ss:$48 sps:$4 sm:$0xff]  }
 0x1a4   :  { %4154 = vmatprep.subr.bf16.mxu0 %v19805_v47  ;;  %4236 = vmatprep.subr.bf16.mxu1 %v19808_v49  ;;  %v19890_v47 = vld [vmem:[#allocation9 + $0x2b8] ss:$48 sps:$4 sm:$0xff]   ;;  %v19895_v49 = vld [vmem:[#allocation9 + $0x314] ss:$48 sps:$4 sm:$0xff]  }
 0x1a7   :  { %4155 = vmatpush1.bf16.msra.mxu0 %v19803_v50  ;;  %4237 = vmatpush1.bf16.msra.mxu1 %v19806_v51  ;;  %v19898_v50 = vld [vmem:[#allocation9 + $0x31c] ss:$48 sps:$4 sm:$0xff]   ;;  %v19893_v51 = vld [vmem:[#allocation9 + $0x310] ss:$48 sps:$4 sm:$0xff]  }
 0x1a8   :  { %4156 = vmatprep.subr.bf16.mxu0 %v19811_v52  ;;  %4238 = vmatprep.subr.bf16.mxu1 %v19814_v53  ;;  %v19896_v52 = vld [vmem:[#allocation9 + $0x318] ss:$48 sps:$4 sm:$0xff]   ;;  %v19901_v53 = vld [vmem:[#allocation9 + $0x374] ss:$48 sps:$4 sm:$0xff]  }
 0x1ab   :  { %4157 = vmatpush1.bf16.msra.mxu0 %v19809_v54  ;;  %4239 = vmatpush1.bf16.msra.mxu1 %v19812_v55  ;;  %v19904_v54 = vld [vmem:[#allocation9 + $0x37c] ss:$48 sps:$4 sm:$0xff]   ;;  %v19899_v55 = vld [vmem:[#allocation9 + $0x370] ss:$48 sps:$4 sm:$0xff]  }
 0x1ac   :  { %4158 = vmatprep.subr.bf16.mxu0 %v19817_v56  ;;  %4240 = vmatprep.subr.bf16.mxu1 %v19820_v57  ;;  %v19902_v56 = vld [vmem:[#allocation9 + $0x378] ss:$48 sps:$4 sm:$0xff]   ;;  %v19907_v57 = vld [vmem:[#allocation9 + $0x3d4] ss:$48 sps:$4 sm:$0xff]  }
 0x1af   :  { %4159 = vmatpush1.bf16.msra.mxu0 %v19815_v58  ;;  %4241 = vmatpush1.bf16.msra.mxu1 %v19818_v59  ;;  %v19910_v58 = vld [vmem:[#allocation9 + $0x3dc] ss:$48 sps:$4 sm:$0xff]   ;;  %v19905_v59 = vld [vmem:[#allocation9 + $0x3d0] ss:$48 sps:$4 sm:$0xff]  }
 0x1b0   :  { %4160 = vmatprep.subr.bf16.mxu0 %v19823_v60  ;;  %4242 = vmatprep.subr.bf16.mxu1 %v19826_v61  ;;  %v19908_v60 = vld [vmem:[#allocation9 + $0x3d8] ss:$48 sps:$4 sm:$0xff]   ;;  %v19913_v61 = vld [vmem:[#allocation9 + $0x434] ss:$48 sps:$4 sm:$0xff]  }
 0x1b3   :  { %4161 = vmatpush1.bf16.msra.mxu0 %v19821_v62  ;;  %4243 = vmatpush1.bf16.msra.mxu1 %v19824_v63  ;;  %v19916_v62 = vld [vmem:[#allocation9 + $0x43c] ss:$48 sps:$4 sm:$0xff]   ;;  %v19911_v63 = vld [vmem:[#allocation9 + $0x430] ss:$48 sps:$4 sm:$0xff]  }
 0x1b4   :  { %4162 = vmatprep.subr.bf16.mxu0 %v19829_v0  ;;  %4244 = vmatprep.subr.bf16.mxu1 %v19832_v1  ;;  %v19914_v0 = vld [vmem:[#allocation9 + $0x438] ss:$48 sps:$4 sm:$0xff]   ;;  %v19919_v1 = vld [vmem:[#allocation9 + $0x494] ss:$48 sps:$4 sm:$0xff]  }
 0x1b7   :  { %4163 = vmatpush1.bf16.msra.mxu0 %v19827_v2  ;;  %4245 = vmatpush1.bf16.msra.mxu1 %v19830_v3  ;;  %v19922_v2 = vld [vmem:[#allocation9 + $0x49c] ss:$48 sps:$4 sm:$0xff]   ;;  %v19917_v3 = vld [vmem:[#allocation9 + $0x490] ss:$48 sps:$4 sm:$0xff]  }
 0x1b8   :  { %4164 = vmatprep.subr.bf16.mxu0 %v19835_v4  ;;  %4246 = vmatprep.subr.bf16.mxu1 %v19838_v6  ;;  %v19920_v4 = vld [vmem:[#allocation9 + $0x498] ss:$48 sps:$4 sm:$0xff]   ;;  %v19925_v6 = vld [vmem:[#allocation9 + $0x4f4] ss:$48 sps:$4 sm:$0xff]  }
 0x1bb   :  { %4165 = vmatpush1.bf16.msra.mxu0 %v19833_v7  ;;  %4247 = vmatpush1.bf16.msra.mxu1 %v19836_v8  ;;  %v19928_v7 = vld [vmem:[#allocation9 + $0x4fc] ss:$48 sps:$4 sm:$0xff]   ;;  %v19923_v8 = vld [vmem:[#allocation9 + $0x4f0] ss:$48 sps:$4 sm:$0xff]  }
 0x1bc   :  { %4166 = vmatprep.subr.bf16.mxu0 %v19841_v9  ;;  %4248 = vmatprep.subr.bf16.mxu1 %v19844_v10  ;;  %v19926_v9 = vld [vmem:[#allocation9 + $0x4f8] ss:$48 sps:$4 sm:$0xff]   ;;  %v19931_v10 = vld [vmem:[#allocation9 + $0x554] ss:$48 sps:$4 sm:$0xff]  }
 0x1bf   :  { %4167 = vmatpush1.bf16.msra.mxu0 %v19839_v11  ;;  %4249 = vmatpush1.bf16.msra.mxu1 %v19842_v14  ;;  %v19934_v11 = vld [vmem:[#allocation9 + $0x55c] ss:$48 sps:$4 sm:$0xff]   ;;  %v19929_v14 = vld [vmem:[#allocation9 + $0x550] ss:$48 sps:$4 sm:$0xff]  }
 0x1c0   :  { %4259 = vmatprep.subr.bf16.mxu0 %v19847_v16  ;;  %4341 = vmatprep.subr.bf16.mxu1 %v19850_v17  ;;  %v19937_v16 = vld [vmem:[#allocation9 + $0x5b4] ss:$48 sps:$4 sm:$0xff]   ;;  %v19940_v17 = vld [vmem:[#allocation9 + $0x5bc] ss:$48 sps:$4 sm:$0xff]  }
 0x1c2   :  { %4169 = vmatmul.mubr.bf16.vlgmr.msra.gmra.mrb[0].mxu0 %v23110_v5  ;;  %4251 = vmatmul.mubr.bf16.vlgmr.msra.gmra.mrb[0].mxu1 %v23110_v5 }
 0x1c3   :  { %4260 = vmatpush1.bf16.msra.mxu0 %v19845_v19  ;;  %4342 = vmatpush1.bf16.msra.mxu1 %v19848_v20  ;;  %v19935_v19 = vld [vmem:[#allocation9 + $0x5b0] ss:$48 sps:$4 sm:$0xff]   ;;  %v19938_v20 = vld [vmem:[#allocation9 + $0x5b8] ss:$48 sps:$4 sm:$0xff]  }
 0x1c4   :  { %4261 = vmatprep.subr.bf16.mxu0 %v19853_v21  ;;  %4343 = vmatprep.subr.bf16.mxu1 %v19856_v22  ;;  %v19943_v21 = vld [vmem:[#allocation9 + $0x614] ss:$48 sps:$4 sm:$0xff]   ;;  %v19946_v22 = vld [vmem:[#allocation9 + $0x61c] ss:$48 sps:$4 sm:$0xff]  }
 0x1c5   :  { %4291 = vmatprep.mubr.bf16.mxu0 %v23096_v13  ;;  %4373 = vmatprep.mubr.bf16.mxu1 %v23096_v13 }
 0x1c7   :  { %4262 = vmatpush1.bf16.msra.mxu0 %v19851_v23  ;;  %4344 = vmatpush1.bf16.msra.mxu1 %v19854_v48  ;;  %v19941_v23 = vld [vmem:[#allocation9 + $0x610] ss:$48 sps:$4 sm:$0xff]   ;;  %v19944_v48 = vld [vmem:[#allocation9 + $0x618] ss:$48 sps:$4 sm:$0xff]  }
 0x1c8   :  { %4263 = vmatprep.subr.bf16.mxu0 %v19859_v24  ;;  %4345 = vmatprep.subr.bf16.mxu1 %v19862_v25  ;;  %v19949_v24 = vld [vmem:[#allocation9 + $0x674] ss:$48 sps:$4 sm:$0xff]   ;;  %v19952_v25 = vld [vmem:[#allocation9 + $0x67c] ss:$48 sps:$4 sm:$0xff]  }
 0x1cb   :  { %4264 = vmatpush1.bf16.msra.mxu0 %v19857_v26  ;;  %4346 = vmatpush1.bf16.msra.mxu1 %v19860_v27  ;;  %v19947_v26 = vld [vmem:[#allocation9 + $0x670] ss:$48 sps:$4 sm:$0xff]   ;;  %v19950_v27 = vld [vmem:[#allocation9 + $0x678] ss:$48 sps:$4 sm:$0xff]  }
 0x1cc   :  { %4265 = vmatprep.subr.bf16.mxu0 %v19865_v28  ;;  %4347 = vmatprep.subr.bf16.mxu1 %v19868_v29  ;;  %v19955_v28 = vld [vmem:[#allocation9 + $0x6d4] ss:$48 sps:$4 sm:$0xff]   ;;  %v19958_v29 = vld [vmem:[#allocation9 + $0x6dc] ss:$48 sps:$4 sm:$0xff]  }
 0x1cf   :  { %4266 = vmatpush1.bf16.msra.mxu0 %v19863_v30  ;;  %4348 = vmatpush1.bf16.msra.mxu1 %v19866_v31  ;;  %v19953_v30 = vld [vmem:[#allocation9 + $0x6d0] ss:$48 sps:$4 sm:$0xff]   ;;  %v19956_v31 = vld [vmem:[#allocation9 + $0x6d8] ss:$48 sps:$4 sm:$0xff]  }
 0x1d0   :  { %4267 = vmatprep.subr.bf16.mxu0 %v19871_v32  ;;  %4349 = vmatprep.subr.bf16.mxu1 %v19874_v33  ;;  %v19961_v32 = vld [vmem:[#allocation9 + $0x734] ss:$48 sps:$4 sm:$0xff]   ;;  %v19964_v33 = vld [vmem:[#allocation9 + $0x73c] ss:$48 sps:$4 sm:$0xff]  }
 0x1d3   :  { %4268 = vmatpush1.bf16.msra.mxu0 %v19869_v34  ;;  %4350 = vmatpush1.bf16.msra.mxu1 %v19872_v35  ;;  %v19959_v34 = vld [vmem:[#allocation9 + $0x730] ss:$48 sps:$4 sm:$0xff]   ;;  %v19962_v35 = vld [vmem:[#allocation9 + $0x738] ss:$48 sps:$4 sm:$0xff]  }
 0x1d4   :  { %4269 = vmatprep.subr.bf16.mxu0 %v19877_v36  ;;  %4351 = vmatprep.subr.bf16.mxu1 %v19880_v37  ;;  %v19967_v36 = vld [vmem:[#allocation9 + $0x794] ss:$48 sps:$4 sm:$0xff]   ;;  %v19970_v37 = vld [vmem:[#allocation9 + $0x79c] ss:$48 sps:$4 sm:$0xff]  }
 0x1d7   :  { %4270 = vmatpush1.bf16.msra.mxu0 %v19875_v38  ;;  %4352 = vmatpush1.bf16.msra.mxu1 %v19878_v39  ;;  %v19965_v38 = vld [vmem:[#allocation9 + $0x790] ss:$48 sps:$4 sm:$0xff]   ;;  %v19968_v39 = vld [vmem:[#allocation9 + $0x798] ss:$48 sps:$4 sm:$0xff]  }
 0x1d8   :  { %4271 = vmatprep.subr.bf16.mxu0 %v19883_v40  ;;  %4353 = vmatprep.subr.bf16.mxu1 %v19886_v41  ;;  %v19973_v40 = vld [vmem:[#allocation9 + $0x7f4] ss:$48 sps:$4 sm:$0xff]   ;;  %v19976_v41 = vld [vmem:[#allocation9 + $0x7fc] ss:$48 sps:$4 sm:$0xff]  }
 0x1db   :  { %4272 = vmatpush1.bf16.msra.mxu0 %v19881_v42  ;;  %4354 = vmatpush1.bf16.msra.mxu1 %v19884_v43  ;;  %v19971_v42 = vld [vmem:[#allocation9 + $0x7f0] ss:$48 sps:$4 sm:$0xff]   ;;  %v19974_v43 = vld [vmem:[#allocation9 + $0x7f8] ss:$48 sps:$4 sm:$0xff]  }
 0x1dc   :  { %4273 = vmatprep.subr.bf16.mxu0 %v19889_v44  ;;  %4355 = vmatprep.subr.bf16.mxu1 %v19892_v45  ;;  %v19979_v44 = vld [vmem:[#allocation9 + $0x854] ss:$48 sps:$4 sm:$0xff]   ;;  %v19982_v45 = vld [vmem:[#allocation9 + $0x85c] ss:$48 sps:$4 sm:$0xff]  }
 0x1df   :  { %4274 = vmatpush1.bf16.msra.mxu0 %v19887_v46  ;;  %4356 = vmatpush1.bf16.msra.mxu1 %v19890_v47 }
 0x1e0   :  { %4275 = vmatprep.subr.bf16.mxu0 %v19895_v49  ;;  %4357 = vmatprep.subr.bf16.mxu1 %v19898_v50  ;;  %v19977_v50 = vld [vmem:[#allocation9 + $0x850] ss:$48 sps:$4 sm:$0xff]  }
 0x1e3   :  { %4276 = vmatpush1.bf16.msra.mxu0 %v19893_v51  ;;  %4358 = vmatpush1.bf16.msra.mxu1 %v19896_v52  ;;  %v19980_v51 = vld [vmem:[#allocation9 + $0x858] ss:$48 sps:$4 sm:$0xff]  }
 0x1e4   :  { %4277 = vmatprep.subr.bf16.mxu0 %v19901_v53  ;;  %4359 = vmatprep.subr.bf16.mxu1 %v19904_v54  ;;  %v19985_v54 = vld [vmem:[#allocation9 + $0x8b4] ss:$48 sps:$4 sm:$0xff]  }
 0x1e7   :  { %4278 = vmatpush1.bf16.msra.mxu0 %v19899_v55  ;;  %4360 = vmatpush1.bf16.msra.mxu1 %v19902_v56  ;;  %v19988_v55 = vld [vmem:[#allocation9 + $0x8bc] ss:$48 sps:$4 sm:$0xff]  }
 0x1e8   :  { %4279 = vmatprep.subr.bf16.mxu0 %v19907_v57  ;;  %4361 = vmatprep.subr.bf16.mxu1 %v19910_v58 }
 0x1eb   :  { %4280 = vmatpush1.bf16.msra.mxu0 %v19905_v59  ;;  %4362 = vmatpush1.bf16.msra.mxu1 %v19908_v60  ;;  %v19983_v59 = vld [vmem:[#allocation9 + $0x8b0] ss:$48 sps:$4 sm:$0xff]   ;;  %v19986_v60 = vld [vmem:[#allocation9 + $0x8b8] ss:$48 sps:$4 sm:$0xff]  }
 0x1ec   :  { %4281 = vmatprep.subr.bf16.mxu0 %v19913_v61  ;;  %4363 = vmatprep.subr.bf16.mxu1 %v19916_v62  ;;  %v19991_v61 = vld [vmem:[#allocation9 + $0x914] ss:$48 sps:$4 sm:$0xff]   ;;  %v19994_v62 = vld [vmem:[#allocation9 + $0x91c] ss:$48 sps:$4 sm:$0xff]  }
 0x1ef   :  { %4282 = vmatpush1.bf16.msra.mxu0 %v19911_v63  ;;  %4364 = vmatpush1.bf16.msra.mxu1 %v19914_v0  ;;  %v19989_v63 = vld [vmem:[#allocation9 + $0x910] ss:$48 sps:$4 sm:$0xff]   ;;  %v19992_v0 = vld [vmem:[#allocation9 + $0x918] ss:$48 sps:$4 sm:$0xff]  }
 0x1f0   :  { %4283 = vmatprep.subr.bf16.mxu0 %v19919_v1  ;;  %4365 = vmatprep.subr.bf16.mxu1 %v19922_v2  ;;  %v19997_v1 = vld [vmem:[#allocation9 + $0x974] ss:$48 sps:$4 sm:$0xff]   ;;  %v20000_v2 = vld [vmem:[#allocation9 + $0x97c] ss:$48 sps:$4 sm:$0xff]  }
 0x1f3   :  { %4284 = vmatpush1.bf16.msra.mxu0 %v19917_v3  ;;  %4366 = vmatpush1.bf16.msra.mxu1 %v19920_v4  ;;  %v19995_v3 = vld [vmem:[#allocation9 + $0x970] ss:$48 sps:$4 sm:$0xff]   ;;  %v19998_v4 = vld [vmem:[#allocation9 + $0x978] ss:$48 sps:$4 sm:$0xff]  }
 0x1f4   :  { %4285 = vmatprep.subr.bf16.mxu0 %v19925_v6  ;;  %4367 = vmatprep.subr.bf16.mxu1 %v19928_v7  ;;  %v20003_v6 = vld [vmem:[#allocation9 + $0x9d4] ss:$48 sps:$4 sm:$0xff]   ;;  %v20006_v7 = vld [vmem:[#allocation9 + $0x9dc] ss:$48 sps:$4 sm:$0xff]  }
 0x1f7   :  { %4286 = vmatpush1.bf16.msra.mxu0 %v19923_v8  ;;  %4368 = vmatpush1.bf16.msra.mxu1 %v19926_v9  ;;  %v20001_v8 = vld [vmem:[#allocation9 + $0x9d0] ss:$48 sps:$4 sm:$0xff]   ;;  %v20004_v9 = vld [vmem:[#allocation9 + $0x9d8] ss:$48 sps:$4 sm:$0xff]  }
 0x1f8   :  { %4287 = vmatprep.subr.bf16.mxu0 %v19931_v10  ;;  %4369 = vmatprep.subr.bf16.mxu1 %v19934_v11  ;;  %v20009_v10 = vld [vmem:[#allocation9 + $0xa34] ss:$48 sps:$4 sm:$0xff]   ;;  %v20012_v11 = vld [vmem:[#allocation9 + $0xa3c] ss:$48 sps:$4 sm:$0xff]  }
 0x1fb   :  { %4288 = vmatpush1.bf16.msra.mxu0 %v19929_v14  ;;  %4370 = vmatpush1.bf16.msra.mxu1 %v19932_v15  ;;  %v20007_v14 = vld [vmem:[#allocation9 + $0xa30] ss:$48 sps:$4 sm:$0xff]   ;;  %v20010_v15 = vld [vmem:[#allocation9 + $0xa38] ss:$48 sps:$4 sm:$0xff]  }
 0x1fc   :  { %4289 = vmatprep.subr.bf16.mxu0 %v19937_v16  ;;  %4371 = vmatprep.subr.bf16.mxu1 %v19940_v17  ;;  %v20015_v16 = vld [vmem:[#allocation9 + $0xa94] ss:$48 sps:$4 sm:$0xff]   ;;  %v20018_v17 = vld [vmem:[#allocation9 + $0xa9c] ss:$48 sps:$4 sm:$0xff]  }
 0x1ff   :  { %4290 = vmatpush1.bf16.msra.mxu0 %v19935_v19  ;;  %4372 = vmatpush1.bf16.msra.mxu1 %v19938_v20  ;;  %v20013_v19 = vld [vmem:[#allocation9 + $0xa90] ss:$48 sps:$4 sm:$0xff]   ;;  %v20016_v20 = vld [vmem:[#allocation9 + $0xa98] ss:$48 sps:$4 sm:$0xff]  }
 0x200   :  { %4300 = vmatprep.subr.bf16.mxu0 %v19943_v21  ;;  %4382 = vmatprep.subr.bf16.mxu1 %v19946_v22  ;;  %v20021_v21 = vld [vmem:[#allocation9 + $0xaf4] ss:$48 sps:$4 sm:$0xff]   ;;  %v20024_v22 = vld [vmem:[#allocation9 + $0xafc] ss:$48 sps:$4 sm:$0xff]  }
 0x202   :  { %4292 = vmatmul.mubr.bf16.vlgmr.msra.gmra.mrb[4].mxu0 %v23102_v12  ;;  %4374 = vmatmul.mubr.bf16.vlgmr.msra.gmra.mrb[4].mxu1 %v23102_v12 }
 0x203   :  { %4301 = vmatpush1.bf16.msra.mxu0 %v19941_v23  ;;  %4383 = vmatpush1.bf16.msra.mxu1 %v19944_v48  ;;  %v20019_v23 = vld [vmem:[#allocation9 + $0xaf0] ss:$48 sps:$4 sm:$0xff]   ;;  %v20022_v48 = vld [vmem:[#allocation9 + $0xaf8] ss:$48 sps:$4 sm:$0xff]  }
 0x204   :  { %4302 = vmatprep.subr.bf16.mxu0 %v19949_v24  ;;  %4384 = vmatprep.subr.bf16.mxu1 %v19952_v25  ;;  %v20027_v24 = vld [vmem:[#allocation9 + $0xb54] ss:$48 sps:$4 sm:$0xff]   ;;  %v20030_v25 = vld [vmem:[#allocation9 + $0xb5c] ss:$48 sps:$4 sm:$0xff]  }
 0x205   :  { %4332 = vmatprep.mubr.bf16.mxu0 %v23104_v18  ;;  %4414 = vmatprep.mubr.bf16.mxu1 %v23104_v18 }
 0x207   :  { %4303 = vmatpush1.bf16.msra.mxu0 %v19947_v26  ;;  %4385 = vmatpush1.bf16.msra.mxu1 %v19950_v27  ;;  %v20025_v26 = vld [vmem:[#allocation9 + $0xb50] ss:$48 sps:$4 sm:$0xff]   ;;  %v20028_v27 = vld [vmem:[#allocation9 + $0xb58] ss:$48 sps:$4 sm:$0xff]  }
 0x208   :  { %4304 = vmatprep.subr.bf16.mxu0 %v19955_v28  ;;  %4386 = vmatprep.subr.bf16.mxu1 %v19958_v29  ;;  %v20033_v28 = vld [vmem:[#allocation9 + $0xbb4] ss:$48 sps:$4 sm:$0xff]   ;;  %v20036_v29 = vld [vmem:[#allocation9 + $0xbbc] ss:$48 sps:$4 sm:$0xff]  }
 0x20b   :  { %4305 = vmatpush1.bf16.msra.mxu0 %v19953_v30  ;;  %4387 = vmatpush1.bf16.msra.mxu1 %v19956_v31  ;;  %v20031_v30 = vld [vmem:[#allocation9 + $0xbb0] ss:$48 sps:$4 sm:$0xff]   ;;  %v20034_v31 = vld [vmem:[#allocation9 + $0xbb8] ss:$48 sps:$4 sm:$0xff]  }
 0x20c   :  { %4306 = vmatprep.subr.bf16.mxu0 %v19961_v32  ;;  %4388 = vmatprep.subr.bf16.mxu1 %v19964_v33  ;;  %v20039_v32 = vld [vmem:[#allocation9 + $0x24] ss:$48 sps:$4 sm:$0xff]   ;;  %v20042_v33 = vld [vmem:[#allocation9 + $0x2c] ss:$48 sps:$4 sm:$0xff]  }
 0x20f   :  { %4307 = vmatpush1.bf16.msra.mxu0 %v19959_v34  ;;  %4389 = vmatpush1.bf16.msra.mxu1 %v19962_v35  ;;  %v20037_v34 = vld [vmem:[#allocation9 + $0x20] ss:$48 sps:$4 sm:$0xff]   ;;  %v20040_v35 = vld [vmem:[#allocation9 + $0x28] ss:$48 sps:$4 sm:$0xff]  }
 0x210   :  { %4308 = vmatprep.subr.bf16.mxu0 %v19967_v36  ;;  %4390 = vmatprep.subr.bf16.mxu1 %v19970_v37  ;;  %v20045_v36 = vld [vmem:[#allocation9 + $0x84] ss:$48 sps:$4 sm:$0xff]   ;;  %v20048_v37 = vld [vmem:[#allocation9 + $0x8c] ss:$48 sps:$4 sm:$0xff]  }
 0x213   :  { %4309 = vmatpush1.bf16.msra.mxu0 %v19965_v38  ;;  %4391 = vmatpush1.bf16.msra.mxu1 %v19968_v39  ;;  %v20043_v38 = vld [vmem:[#allocation9 + $0x80] ss:$48 sps:$4 sm:$0xff]   ;;  %v20046_v39 = vld [vmem:[#allocation9 + $0x88] ss:$48 sps:$4 sm:$0xff]  }
 0x214   :  { %4310 = vmatprep.subr.bf16.mxu0 %v19973_v40  ;;  %4392 = vmatprep.subr.bf16.mxu1 %v19976_v41  ;;  %v20051_v40 = vld [vmem:[#allocation9 + $0xe4] ss:$48 sps:$4 sm:$0xff]   ;;  %v20054_v41 = vld [vmem:[#allocation9 + $0xec] ss:$48 sps:$4 sm:$0xff]  }
 0x215   :  { %v23120_v46 = vpop.f32.mrb[8].mxu0  ;;  %v23122_v47 = vpop.f32.mrb[8].mxu1 }
 0x216   :  { %v23124_v49 = vpop.f32.mrb[9].mxu0  ;;  %v23126_v52 = vpop.f32.mrb[9].mxu1 }
 0x217   :  { %v1635_v53 = vpop.f32.mrb[10].mxu0  ;;  %4311 = vmatpush1.bf16.msra.mxu0 %v19971_v42  ;;  %4393 = vmatpush1.bf16.msra.mxu1 %v19974_v43  ;;  %v1676_v56 = vpop.f32.mrb[10].mxu1  ;;  %v20049_v42 = vld [vmem:[#allocation9 + $0xe0] ss:$48 sps:$4 sm:$0xff]   ;;  %v20052_v43 = vld [vmem:[#allocation9 + $0xe8] ss:$48 sps:$4 sm:$0xff]  }
 0x218   :  { %v1636_v57 = vpop.f32.mrb[11].mxu0  ;;  %4312 = vmatprep.subr.bf16.mxu0 %v19979_v44  ;;  %4394 = vmatprep.subr.bf16.mxu1 %v19982_v45  ;;  %v1677_v58 = vpop.f32.mrb[11].mxu1  ;;  %v20057_v44 = vld [vmem:[#allocation9 + $0x144] ss:$48 sps:$4 sm:$0xff]   ;;  %v20060_v45 = vld [vmem:[#allocation9 + $0x14c] ss:$48 sps:$4 sm:$0xff]  }
 0x219   :  { %v20063_v53 = vld [vmem:[#allocation9 + $0x1a4] ss:$48 sps:$4 sm:$0xff]   ;;  %v20064_v56 = vld [vmem:[#allocation9 + $0x1a8] ss:$48 sps:$4 sm:$0xff]   ;;  %v20072_v58 = vld [vmem:[#allocation9 + $0x20c] ss:$48 sps:$4 sm:$0xff]  }
 0x21a   :  { %v20069_v57 = vld [vmem:[#allocation9 + $0x204] ss:$48 sps:$4 sm:$0xff]  }
 0x21b   :  { %4313 = vmatpush1.bf16.msra.mxu0 %v19977_v50  ;;  %4395 = vmatpush1.bf16.msra.mxu1 %v19980_v51  ;;  %v20055_v50 = vld [vmem:[#allocation9 + $0x140] ss:$48 sps:$4 sm:$0xff]   ;;  %v20058_v51 = vld [vmem:[#allocation9 + $0x148] ss:$48 sps:$4 sm:$0xff]  }
 0x21c   :  { %4314 = vmatprep.subr.bf16.mxu0 %v19985_v54  ;;  %4396 = vmatprep.subr.bf16.mxu1 %v19988_v55  ;;  %v20066_v54 = vld [vmem:[#allocation9 + $0x1ac] ss:$48 sps:$4 sm:$0xff]   ;;  %v20061_v55 = vld [vmem:[#allocation9 + $0x1a0] ss:$48 sps:$4 sm:$0xff]  }
 0x21f   :  { %4315 = vmatpush1.bf16.msra.mxu0 %v19983_v59  ;;  %4397 = vmatpush1.bf16.msra.mxu1 %v19986_v60  ;;  %v20070_v59 = vld [vmem:[#allocation9 + $0x208] ss:$48 sps:$4 sm:$0xff]   ;;  %v20075_v60 = vld [vmem:[#allocation9 + $0x264] ss:$48 sps:$4 sm:$0xff]  }
 0x220   :  { %4316 = vmatprep.subr.bf16.mxu0 %v19991_v61  ;;  %4398 = vmatprep.subr.bf16.mxu1 %v19994_v62  ;;  %v20078_v61 = vld [vmem:[#allocation9 + $0x26c] ss:$48 sps:$4 sm:$0xff]   ;;  %v20073_v62 = vld [vmem:[#allocation9 + $0x260] ss:$48 sps:$4 sm:$0xff]  }
 0x223   :  { %4317 = vmatpush1.bf16.msra.mxu0 %v19989_v63  ;;  %4399 = vmatpush1.bf16.msra.mxu1 %v19992_v0  ;;  %v20076_v63 = vld [vmem:[#allocation9 + $0x268] ss:$48 sps:$4 sm:$0xff]   ;;  %v20081_v0 = vld [vmem:[#allocation9 + $0x2c4] ss:$48 sps:$4 sm:$0xff]  }
 0x224   :  { %4318 = vmatprep.subr.bf16.mxu0 %v19997_v1  ;;  %4400 = vmatprep.subr.bf16.mxu1 %v20000_v2  ;;  %v20084_v1 = vld [vmem:[#allocation9 + $0x2cc] ss:$48 sps:$4 sm:$0xff]   ;;  %v20079_v2 = vld [vmem:[#allocation9 + $0x2c0] ss:$48 sps:$4 sm:$0xff]  }
 0x227   :  { %4319 = vmatpush1.bf16.msra.mxu0 %v19995_v3  ;;  %4401 = vmatpush1.bf16.msra.mxu1 %v19998_v4  ;;  %v20082_v3 = vld [vmem:[#allocation9 + $0x2c8] ss:$48 sps:$4 sm:$0xff]   ;;  %v20087_v4 = vld [vmem:[#allocation9 + $0x324] ss:$48 sps:$4 sm:$0xff]  }
 0x228   :  { %4320 = vmatprep.subr.bf16.mxu0 %v20003_v6  ;;  %4402 = vmatprep.subr.bf16.mxu1 %v20006_v7  ;;  %v20090_v6 = vld [vmem:[#allocation9 + $0x32c] ss:$48 sps:$4 sm:$0xff]   ;;  %v20085_v7 = vld [vmem:[#allocation9 + $0x320] ss:$48 sps:$4 sm:$0xff]  }
 0x22b   :  { %4321 = vmatpush1.bf16.msra.mxu0 %v20001_v8  ;;  %4403 = vmatpush1.bf16.msra.mxu1 %v20004_v9  ;;  %v20088_v8 = vld [vmem:[#allocation9 + $0x328] ss:$48 sps:$4 sm:$0xff]   ;;  %v20093_v9 = vld [vmem:[#allocation9 + $0x384] ss:$48 sps:$4 sm:$0xff]  }
 0x22c   :  { %4322 = vmatprep.subr.bf16.mxu0 %v20009_v10  ;;  %4404 = vmatprep.subr.bf16.mxu1 %v20012_v11  ;;  %v20096_v10 = vld [vmem:[#allocation9 + $0x38c] ss:$48 sps:$4 sm:$0xff]   ;;  %v20091_v11 = vld [vmem:[#allocation9 + $0x380] ss:$48 sps:$4 sm:$0xff]  }
 0x22f   :  { %4323 = vmatpush1.bf16.msra.mxu0 %v20007_v14  ;;  %4405 = vmatpush1.bf16.msra.mxu1 %v20010_v15  ;;  %v20094_v14 = vld [vmem:[#allocation9 + $0x388] ss:$48 sps:$4 sm:$0xff]   ;;  %v20099_v15 = vld [vmem:[#allocation9 + $0x3e4] ss:$48 sps:$4 sm:$0xff]  }
 0x230   :  { %4324 = vmatprep.subr.bf16.mxu0 %v20015_v16  ;;  %4406 = vmatprep.subr.bf16.mxu1 %v20018_v17  ;;  %v20102_v16 = vld [vmem:[#allocation9 + $0x3ec] ss:$48 sps:$4 sm:$0xff]   ;;  %v20097_v17 = vld [vmem:[#allocation9 + $0x3e0] ss:$48 sps:$4 sm:$0xff]  }
 0x233   :  { %4325 = vmatpush1.bf16.msra.mxu0 %v20013_v19  ;;  %4407 = vmatpush1.bf16.msra.mxu1 %v20016_v20  ;;  %v20100_v19 = vld [vmem:[#allocation9 + $0x3e8] ss:$48 sps:$4 sm:$0xff]   ;;  %v20105_v20 = vld [vmem:[#allocation9 + $0x444] ss:$48 sps:$4 sm:$0xff]  }
 0x234   :  { %4326 = vmatprep.subr.bf16.mxu0 %v20021_v21  ;;  %4408 = vmatprep.subr.bf16.mxu1 %v20024_v22  ;;  %v20108_v21 = vld [vmem:[#allocation9 + $0x44c] ss:$48 sps:$4 sm:$0xff]   ;;  %v20103_v22 = vld [vmem:[#allocation9 + $0x440] ss:$48 sps:$4 sm:$0xff]  }
 0x237   :  { %4327 = vmatpush1.bf16.msra.mxu0 %v20019_v23  ;;  %4409 = vmatpush1.bf16.msra.mxu1 %v20022_v48  ;;  %v20106_v23 = vld [vmem:[#allocation9 + $0x448] ss:$48 sps:$4 sm:$0xff]   ;;  %v20111_v48 = vld [vmem:[#allocation9 + $0x4a4] ss:$48 sps:$4 sm:$0xff]  }
 0x238   :  { %4328 = vmatprep.subr.bf16.mxu0 %v20027_v24  ;;  %4410 = vmatprep.subr.bf16.mxu1 %v20030_v25  ;;  %v20114_v24 = vld [vmem:[#allocation9 + $0x4ac] ss:$48 sps:$4 sm:$0xff]   ;;  %v20109_v25 = vld [vmem:[#allocation9 + $0x4a0] ss:$48 sps:$4 sm:$0xff]  }
 0x23b   :  { %4329 = vmatpush1.bf16.msra.mxu0 %v20025_v26  ;;  %4411 = vmatpush1.bf16.msra.mxu1 %v20028_v27  ;;  %v20112_v26 = vld [vmem:[#allocation9 + $0x4a8] ss:$48 sps:$4 sm:$0xff]   ;;  %v20117_v27 = vld [vmem:[#allocation9 + $0x504] ss:$48 sps:$4 sm:$0xff]  }
 0x23c   :  { %4330 = vmatprep.subr.bf16.mxu0 %v20033_v28  ;;  %4412 = vmatprep.subr.bf16.mxu1 %v20036_v29  ;;  %v20120_v28 = vld [vmem:[#allocation9 + $0x50c] ss:$48 sps:$4 sm:$0xff]   ;;  %v20115_v29 = vld [vmem:[#allocation9 + $0x500] ss:$48 sps:$4 sm:$0xff]  }
 0x23f   :  { %4331 = vmatpush1.bf16.msra.mxu0 %v20031_v30  ;;  %4413 = vmatpush1.bf16.msra.mxu1 %v20034_v31  ;;  %v20118_v30 = vld [vmem:[#allocation9 + $0x508] ss:$48 sps:$4 sm:$0xff]   ;;  %v20123_v31 = vld [vmem:[#allocation9 + $0x564] ss:$48 sps:$4 sm:$0xff]  }
 0x240   :  { %4423 = vmatprep.subr.bf16.mxu0 %v20039_v32  ;;  %4505 = vmatprep.subr.bf16.mxu1 %v20042_v33  ;;  %v20126_v32 = vld [vmem:[#allocation9 + $0x56c] ss:$48 sps:$4 sm:$0xff]   ;;  %v20121_v33 = vld [vmem:[#allocation9 + $0x560] ss:$48 sps:$4 sm:$0xff]  }
 0x242   :  { %4333 = vmatmul.mubr.bf16.vlgmr.msra.gmra.mrb[4].mxu0 %v23110_v5  ;;  %4415 = vmatmul.mubr.bf16.vlgmr.msra.gmra.mrb[4].mxu1 %v23110_v5 }
 0x243   :  { %4424 = vmatpush1.bf16.msra.mxu0 %v20037_v34  ;;  %4506 = vmatpush1.bf16.msra.mxu1 %v20040_v35  ;;  %v20124_v34 = vld [vmem:[#allocation9 + $0x568] ss:$48 sps:$4 sm:$0xff]   ;;  %v20129_v35 = vld [vmem:[#allocation9 + $0x5c4] ss:$48 sps:$4 sm:$0xff]  }
 0x244   :  { %4425 = vmatprep.subr.bf16.mxu0 %v20045_v36  ;;  %4507 = vmatprep.subr.bf16.mxu1 %v20048_v37  ;;  %v20132_v36 = vld [vmem:[#allocation9 + $0x5cc] ss:$48 sps:$4 sm:$0xff]   ;;  %v20127_v37 = vld [vmem:[#allocation9 + $0x5c0] ss:$48 sps:$4 sm:$0xff]  }
 0x245   :  { %4455 = vmatprep.mubr.bf16.mxu0 %v23096_v13  ;;  %4537 = vmatprep.mubr.bf16.mxu1 %v23096_v13  ;;  %v20067_v13 = vld [vmem:[#allocation9 + $0x200] ss:$48 sps:$4 sm:$0xff]  }
 0x247   :  { %4426 = vmatpush1.bf16.msra.mxu0 %v20043_v38  ;;  %4508 = vmatpush1.bf16.msra.mxu1 %v20046_v39  ;;  %v20130_v38 = vld [vmem:[#allocation9 + $0x5c8] ss:$48 sps:$4 sm:$0xff]   ;;  %v20135_v39 = vld [vmem:[#allocation9 + $0x624] ss:$48 sps:$4 sm:$0xff]  }
 0x248   :  { %4427 = vmatprep.subr.bf16.mxu0 %v20051_v40  ;;  %4509 = vmatprep.subr.bf16.mxu1 %v20054_v41  ;;  %v20138_v40 = vld [vmem:[#allocation9 + $0x62c] ss:$48 sps:$4 sm:$0xff]   ;;  %v20133_v41 = vld [vmem:[#allocation9 + $0x620] ss:$48 sps:$4 sm:$0xff]  }
 0x24b   :  { %4428 = vmatpush1.bf16.msra.mxu0 %v20049_v42  ;;  %4510 = vmatpush1.bf16.msra.mxu1 %v20052_v43  ;;  %v20136_v42 = vld [vmem:[#allocation9 + $0x628] ss:$48 sps:$4 sm:$0xff]   ;;  %v20141_v43 = vld [vmem:[#allocation9 + $0x684] ss:$48 sps:$4 sm:$0xff]  }
 0x24c   :  { %4429 = vmatprep.subr.bf16.mxu0 %v20057_v44  ;;  %4511 = vmatprep.subr.bf16.mxu1 %v20060_v45  ;;  %v20144_v44 = vld [vmem:[#allocation9 + $0x68c] ss:$48 sps:$4 sm:$0xff]   ;;  %v20139_v45 = vld [vmem:[#allocation9 + $0x680] ss:$48 sps:$4 sm:$0xff]  }
 0x24f   :  { %4430 = vmatpush1.bf16.msra.mxu0 %v20055_v50  ;;  %4512 = vmatpush1.bf16.msra.mxu1 %v20058_v51  ;;  %v20142_v50 = vld [vmem:[#allocation9 + $0x688] ss:$48 sps:$4 sm:$0xff]   ;;  %v20147_v51 = vld [vmem:[#allocation9 + $0x6e4] ss:$48 sps:$4 sm:$0xff]  }
 0x250   :  { %4431 = vmatprep.subr.bf16.mxu0 %v20063_v53  ;;  %4513 = vmatprep.subr.bf16.mxu1 %v20066_v54  ;;  %v20150_v53 = vld [vmem:[#allocation9 + $0x6ec] ss:$48 sps:$4 sm:$0xff]   ;;  %v20145_v54 = vld [vmem:[#allocation9 + $0x6e0] ss:$48 sps:$4 sm:$0xff]  }
 0x253   :  { %4432 = vmatpush1.bf16.msra.mxu0 %v20061_v55  ;;  %4514 = vmatpush1.bf16.msra.mxu1 %v20064_v56  ;;  %v20148_v55 = vld [vmem:[#allocation9 + $0x6e8] ss:$48 sps:$4 sm:$0xff]   ;;  %v20153_v56 = vld [vmem:[#allocation9 + $0x744] ss:$48 sps:$4 sm:$0xff]  }
 0x254   :  { %4433 = vmatprep.subr.bf16.mxu0 %v20069_v57  ;;  %4515 = vmatprep.subr.bf16.mxu1 %v20072_v58  ;;  %v20156_v57 = vld [vmem:[#allocation9 + $0x74c] ss:$48 sps:$4 sm:$0xff]   ;;  %v20151_v58 = vld [vmem:[#allocation9 + $0x740] ss:$48 sps:$4 sm:$0xff]  }
 0x257   :  { %4434 = vmatpush1.bf16.msra.mxu0 %v20067_v13  ;;  %4516 = vmatpush1.bf16.msra.mxu1 %v20070_v59  ;;  %v20159_v13 = vld [vmem:[#allocation9 + $0x7a4] ss:$48 sps:$4 sm:$0xff]   ;;  %v20162_v59 = vld [vmem:[#allocation9 + $0x7ac] ss:$48 sps:$4 sm:$0xff]  }
 0x258   :  { %4435 = vmatprep.subr.bf16.mxu0 %v20075_v60  ;;  %4517 = vmatprep.subr.bf16.mxu1 %v20078_v61  ;;  %v20157_v60 = vld [vmem:[#allocation9 + $0x7a0] ss:$48 sps:$4 sm:$0xff]   ;;  %v20160_v61 = vld [vmem:[#allocation9 + $0x7a8] ss:$48 sps:$4 sm:$0xff]  }
 0x25b   :  { %4436 = vmatpush1.bf16.msra.mxu0 %v20073_v62  ;;  %4518 = vmatpush1.bf16.msra.mxu1 %v20076_v63  ;;  %v20165_v62 = vld [vmem:[#allocation9 + $0x804] ss:$48 sps:$4 sm:$0xff]   ;;  %v20168_v63 = vld [vmem:[#allocation9 + $0x80c] ss:$48 sps:$4 sm:$0xff]  }
 0x25c   :  { %4437 = vmatprep.subr.bf16.mxu0 %v20081_v0  ;;  %4519 = vmatprep.subr.bf16.mxu1 %v20084_v1  ;;  %v20166_v0 = vld [vmem:[#allocation9 + $0x808] ss:$48 sps:$4 sm:$0xff]   ;;  %v20171_v1 = vld [vmem:[#allocation9 + $0x864] ss:$48 sps:$4 sm:$0xff]  }
 0x25f   :  { %4438 = vmatpush1.bf16.msra.mxu0 %v20079_v2  ;;  %4520 = vmatpush1.bf16.msra.mxu1 %v20082_v3  ;;  %v20174_v2 = vld [vmem:[#allocation9 + $0x86c] ss:$48 sps:$4 sm:$0xff]  }
 0x260   :  { %4439 = vmatprep.subr.bf16.mxu0 %v20087_v4  ;;  %4521 = vmatprep.subr.bf16.mxu1 %v20090_v6  ;;  %v20169_v6 = vld [vmem:[#allocation9 + $0x860] ss:$48 sps:$4 sm:$0xff]  }
 0x263   :  { %4440 = vmatpush1.bf16.msra.mxu0 %v20085_v7  ;;  %4522 = vmatpush1.bf16.msra.mxu1 %v20088_v8  ;;  %v20172_v7 = vld [vmem:[#allocation9 + $0x868] ss:$48 sps:$4 sm:$0xff]  }
 0x264   :  { %4441 = vmatprep.subr.bf16.mxu0 %v20093_v9  ;;  %4523 = vmatprep.subr.bf16.mxu1 %v20096_v10 }
 0x267   :  { %4442 = vmatpush1.bf16.msra.mxu0 %v20091_v11  ;;  %4524 = vmatpush1.bf16.msra.mxu1 %v20094_v14 }
 0x268   :  { %4443 = vmatprep.subr.bf16.mxu0 %v20099_v15  ;;  %4525 = vmatprep.subr.bf16.mxu1 %v20102_v16  ;;  %v20177_v16 = vld [vmem:[#allocation9 + $0x8c4] ss:$48 sps:$4 sm:$0xff]  }
 0x26b   :  { %4444 = vmatpush1.bf16.msra.mxu0 %v20097_v17  ;;  %4526 = vmatpush1.bf16.msra.mxu1 %v20100_v19  ;;  %v20180_v17 = vld [vmem:[#allocation9 + $0x8cc] ss:$48 sps:$4 sm:$0xff]   ;;  %v20175_v19 = vld [vmem:[#allocation9 + $0x8c0] ss:$48 sps:$4 sm:$0xff]  }
 0x26c   :  { %4445 = vmatprep.subr.bf16.mxu0 %v20105_v20  ;;  %4527 = vmatprep.subr.bf16.mxu1 %v20108_v21  ;;  %v20178_v20 = vld [vmem:[#allocation9 + $0x8c8] ss:$48 sps:$4 sm:$0xff]   ;;  %v20183_v21 = vld [vmem:[#allocation9 + $0x924] ss:$48 sps:$4 sm:$0xff]  }
 0x26f   :  { %4446 = vmatpush1.bf16.msra.mxu0 %v20103_v22  ;;  %4528 = vmatpush1.bf16.msra.mxu1 %v20106_v23  ;;  %v20186_v22 = vld [vmem:[#allocation9 + $0x92c] ss:$48 sps:$4 sm:$0xff]   ;;  %v20181_v23 = vld [vmem:[#allocation9 + $0x920] ss:$48 sps:$4 sm:$0xff]  }
 0x270   :  { %4447 = vmatprep.subr.bf16.mxu0 %v20111_v48  ;;  %4529 = vmatprep.subr.bf16.mxu1 %v20114_v24  ;;  %v20184_v48 = vld [vmem:[#allocation9 + $0x928] ss:$48 sps:$4 sm:$0xff]   ;;  %v20189_v24 = vld [vmem:[#allocation9 + $0x984] ss:$48 sps:$4 sm:$0xff]  }
 0x273   :  { %4448 = vmatpush1.bf16.msra.mxu0 %v20109_v25  ;;  %4530 = vmatpush1.bf16.msra.mxu1 %v20112_v26  ;;  %v20192_v25 = vld [vmem:[#allocation9 + $0x98c] ss:$48 sps:$4 sm:$0xff]   ;;  %v20187_v26 = vld [vmem:[#allocation9 + $0x980] ss:$48 sps:$4 sm:$0xff]  }
 0x274   :  { %4449 = vmatprep.subr.bf16.mxu0 %v20117_v27  ;;  %4531 = vmatprep.subr.bf16.mxu1 %v20120_v28  ;;  %v20190_v27 = vld [vmem:[#allocation9 + $0x988] ss:$48 sps:$4 sm:$0xff]   ;;  %v20195_v28 = vld [vmem:[#allocation9 + $0x9e4] ss:$48 sps:$4 sm:$0xff]  }
 0x277   :  { %4450 = vmatpush1.bf16.msra.mxu0 %v20115_v29  ;;  %4532 = vmatpush1.bf16.msra.mxu1 %v20118_v30  ;;  %v20198_v29 = vld [vmem:[#allocation9 + $0x9ec] ss:$48 sps:$4 sm:$0xff]   ;;  %v20193_v30 = vld [vmem:[#allocation9 + $0x9e0] ss:$48 sps:$4 sm:$0xff]  }
 0x278   :  { %4451 = vmatprep.subr.bf16.mxu0 %v20123_v31  ;;  %4533 = vmatprep.subr.bf16.mxu1 %v20126_v32  ;;  %v20196_v31 = vld [vmem:[#allocation9 + $0x9e8] ss:$48 sps:$4 sm:$0xff]   ;;  %v20201_v32 = vld [vmem:[#allocation9 + $0xa44] ss:$48 sps:$4 sm:$0xff]  }
 0x27b   :  { %4452 = vmatpush1.bf16.msra.mxu0 %v20121_v33  ;;  %4534 = vmatpush1.bf16.msra.mxu1 %v20124_v34  ;;  %v20204_v33 = vld [vmem:[#allocation9 + $0xa4c] ss:$48 sps:$4 sm:$0xff]   ;;  %v20199_v34 = vld [vmem:[#allocation9 + $0xa40] ss:$48 sps:$4 sm:$0xff]  }
 0x27c   :  { %4453 = vmatprep.subr.bf16.mxu0 %v20129_v35  ;;  %4535 = vmatprep.subr.bf16.mxu1 %v20132_v36  ;;  %v20202_v35 = vld [vmem:[#allocation9 + $0xa48] ss:$48 sps:$4 sm:$0xff]   ;;  %v20207_v36 = vld [vmem:[#allocation9 + $0xaa4] ss:$48 sps:$4 sm:$0xff]  }
 0x27f   :  { %4454 = vmatpush1.bf16.msra.mxu0 %v20127_v37  ;;  %4536 = vmatpush1.bf16.msra.mxu1 %v20130_v38  ;;  %v20210_v37 = vld [vmem:[#allocation9 + $0xaac] ss:$48 sps:$4 sm:$0xff]   ;;  %v20205_v38 = vld [vmem:[#allocation9 + $0xaa0] ss:$48 sps:$4 sm:$0xff]  }
 0x280   :  { %4464 = vmatprep.subr.bf16.mxu0 %v20135_v39  ;;  %4546 = vmatprep.subr.bf16.mxu1 %v20138_v40  ;;  %v20208_v39 = vld [vmem:[#allocation9 + $0xaa8] ss:$48 sps:$4 sm:$0xff]   ;;  %v20213_v40 = vld [vmem:[#allocation9 + $0xb04] ss:$48 sps:$4 sm:$0xff]  }
 0x282   :  { %4456 = vmatmul.mubr.bf16.vlgmr.msra.gmra.mrb[12].mxu0 %v23102_v12  ;;  %4538 = vmatmul.mubr.bf16.vlgmr.msra.gmra.mrb[12].mxu1 %v23102_v12  ;;  %v20154_v12 = vld [vmem:[#allocation9 + $0x748] ss:$48 sps:$4 sm:$0xff]  }
 0x283   :  { %4465 = vmatpush1.bf16.msra.mxu0 %v20133_v41  ;;  %4547 = vmatpush1.bf16.msra.mxu1 %v20136_v42  ;;  %v20216_v41 = vld [vmem:[#allocation9 + $0xb0c] ss:$48 sps:$4 sm:$0xff]   ;;  %v20211_v42 = vld [vmem:[#allocation9 + $0xb00] ss:$48 sps:$4 sm:$0xff]  }
 0x284   :  { %4466 = vmatprep.subr.bf16.mxu0 %v20141_v43  ;;  %4548 = vmatprep.subr.bf16.mxu1 %v20144_v44  ;;  %v20214_v43 = vld [vmem:[#allocation9 + $0xb08] ss:$48 sps:$4 sm:$0xff]   ;;  %v20219_v44 = vld [vmem:[#allocation9 + $0xb64] ss:$48 sps:$4 sm:$0xff]  }
 0x285   :  { %4496 = vmatprep.mubr.bf16.mxu0 %v23104_v18  ;;  %4578 = vmatprep.mubr.bf16.mxu1 %v23104_v18  ;;  %v20163_v18 = vld [vmem:[#allocation9 + $0x800] ss:$48 sps:$4 sm:$0xff]  }
 0x287   :  { %4467 = vmatpush1.bf16.msra.mxu0 %v20139_v45  ;;  %4549 = vmatpush1.bf16.msra.mxu1 %v20142_v50  ;;  %v20222_v45 = vld [vmem:[#allocation9 + $0xb6c] ss:$48 sps:$4 sm:$0xff]   ;;  %v20217_v50 = vld [vmem:[#allocation9 + $0xb60] ss:$48 sps:$4 sm:$0xff]  }
 0x288   :  { %4468 = vmatprep.subr.bf16.mxu0 %v20147_v51  ;;  %4550 = vmatprep.subr.bf16.mxu1 %v20150_v53  ;;  %v20220_v51 = vld [vmem:[#allocation9 + $0xb68] ss:$48 sps:$4 sm:$0xff]   ;;  %v20225_v53 = vld [vmem:[#allocation9 + $0xbc4] ss:$48 sps:$4 sm:$0xff]  }
 0x28b   :  { %4469 = vmatpush1.bf16.msra.mxu0 %v20145_v54  ;;  %4551 = vmatpush1.bf16.msra.mxu1 %v20148_v55  ;;  %v20228_v54 = vld [vmem:[#allocation9 + $0xbcc] ss:$48 sps:$4 sm:$0xff]   ;;  %v20223_v55 = vld [vmem:[#allocation9 + $0xbc0] ss:$48 sps:$4 sm:$0xff]  }
 0x28c   :  { %4470 = vmatprep.subr.bf16.mxu0 %v20153_v56  ;;  %4552 = vmatprep.subr.bf16.mxu1 %v20156_v57  ;;  %v20226_v56 = vld [vmem:[#allocation9 + $0xbc8] ss:$48 sps:$4 sm:$0xff]   ;;  %v20231_v57 = vld [vmem:[#allocation8 + $0x4] ss:$48 sps:$4 sm:$0xff]  }
 0x28f   :  { %4471 = vmatpush1.bf16.msra.mxu0 %v20151_v58  ;;  %4553 = vmatpush1.bf16.msra.mxu1 %v20154_v12  ;;  %v20234_v58 = vld [vmem:[#allocation8 + $0xc] ss:$48 sps:$4 sm:$0xff]   ;;  %v20229_v12 = vld [vmem:[#allocation8] ss:$48 sps:$4 sm:$0xff]  }
 0x290   :  { %4472 = vmatprep.subr.bf16.mxu0 %v20159_v13  ;;  %4554 = vmatprep.subr.bf16.mxu1 %v20162_v59  ;;  %v20232_v13 = vld [vmem:[#allocation8 + $0x8] ss:$48 sps:$4 sm:$0xff]   ;;  %v20237_v59 = vld [vmem:[#allocation8 + $0x64] ss:$48 sps:$4 sm:$0xff]  }
 0x293   :  { %4473 = vmatpush1.bf16.msra.mxu0 %v20157_v60  ;;  %4555 = vmatpush1.bf16.msra.mxu1 %v20160_v61  ;;  %v20240_v60 = vld [vmem:[#allocation8 + $0x6c] ss:$48 sps:$4 sm:$0xff]   ;;  %v20235_v61 = vld [vmem:[#allocation8 + $0x60] ss:$48 sps:$4 sm:$0xff]  }
 0x294   :  { %4474 = vmatprep.subr.bf16.mxu0 %v20165_v62  ;;  %4556 = vmatprep.subr.bf16.mxu1 %v20168_v63  ;;  %v20238_v62 = vld [vmem:[#allocation8 + $0x68] ss:$48 sps:$4 sm:$0xff]   ;;  %v20243_v63 = vld [vmem:[#allocation8 + $0xc4] ss:$48 sps:$4 sm:$0xff]  }
 0x295   :  { %v23136_v3 = vpop.f32.mrb[0].mxu0  ;;  %v23138_v4 = vpop.f32.mrb[0].mxu1 }
 0x296   :  { %v23140_v8 = vpop.f32.mrb[1].mxu0  ;;  %v23142_v9 = vpop.f32.mrb[1].mxu1 }
 0x297   :  { %v4174_v10 = vpop.f32.mrb[2].mxu0  ;;  %v4256_v11 = vpop.f32.mrb[2].mxu1  ;;  %4475 = vmatpush1.bf16.msra.mxu0 %v20163_v18  ;;  %4557 = vmatpush1.bf16.msra.mxu1 %v20166_v0  ;;  %v20246_v18 = vld [vmem:[#allocation8 + $0xcc] ss:$48 sps:$4 sm:$0xff]   ;;  %v20241_v0 = vld [vmem:[#allocation8 + $0xc0] ss:$48 sps:$4 sm:$0xff]  }
 0x298   :  { %v4175_v14 = vpop.f32.mrb[3].mxu0  ;;  %v4257_v15 = vpop.f32.mrb[3].mxu1  ;;  %4476 = vmatprep.subr.bf16.mxu0 %v20171_v1  ;;  %4558 = vmatprep.subr.bf16.mxu1 %v20174_v2  ;;  %v20244_v1 = vld [vmem:[#allocation8 + $0xc8] ss:$48 sps:$4 sm:$0xff]   ;;  %v20249_v2 = vld [vmem:[#allocation8 + $0x124] ss:$48 sps:$4 sm:$0xff]  }
 0x299   :  { %v20250_v10 = vld [vmem:[#allocation8 + $0x128] ss:$48 sps:$4 sm:$0xff]   ;;  %v20255_v11 = vld [vmem:[#allocation8 + $0x184] ss:$48 sps:$4 sm:$0xff]   ;;  %v20258_v14 = vld [vmem:[#allocation8 + $0x18c] ss:$48 sps:$4 sm:$0xff]  }
 0x29a   :  { %v20256_v15 = vld [vmem:[#allocation8 + $0x188] ss:$48 sps:$4 sm:$0xff]  }
 0x29b   :  { %4477 = vmatpush1.bf16.msra.mxu0 %v20169_v6  ;;  %4559 = vmatpush1.bf16.msra.mxu1 %v20172_v7  ;;  %v20252_v6 = vld [vmem:[#allocation8 + $0x12c] ss:$48 sps:$4 sm:$0xff]   ;;  %v20247_v7 = vld [vmem:[#allocation8 + $0x120] ss:$48 sps:$4 sm:$0xff]  }
 0x29c   :  { %4478 = vmatprep.subr.bf16.mxu0 %v20177_v16  ;;  %4560 = vmatprep.subr.bf16.mxu1 %v20180_v17  ;;  %v20261_v16 = vld [vmem:[#allocation8 + $0x1e4] ss:$48 sps:$4 sm:$0xff]   ;;  %v20264_v17 = vld [vmem:[#allocation8 + $0x1ec] ss:$48 sps:$4 sm:$0xff]  }
 0x29f   :  { %4479 = vmatpush1.bf16.msra.mxu0 %v20175_v19  ;;  %4561 = vmatpush1.bf16.msra.mxu1 %v20178_v20  ;;  %v20259_v19 = vld [vmem:[#allocation8 + $0x1e0] ss:$48 sps:$4 sm:$0xff]   ;;  %v20262_v20 = vld [vmem:[#allocation8 + $0x1e8] ss:$48 sps:$4 sm:$0xff]  }
 0x2a0   :  { %4480 = vmatprep.subr.bf16.mxu0 %v20183_v21  ;;  %4562 = vmatprep.subr.bf16.mxu1 %v20186_v22  ;;  %v20267_v21 = vld [vmem:[#allocation8 + $0x244] ss:$48 sps:$4 sm:$0xff]   ;;  %v20270_v22 = vld [vmem:[#allocation8 + $0x24c] ss:$48 sps:$4 sm:$0xff]  }
 0x2a3   :  { %4481 = vmatpush1.bf16.msra.mxu0 %v20181_v23  ;;  %4563 = vmatpush1.bf16.msra.mxu1 %v20184_v48  ;;  %v20265_v23 = vld [vmem:[#allocation8 + $0x240] ss:$48 sps:$4 sm:$0xff]   ;;  %v20268_v48 = vld [vmem:[#allocation8 + $0x248] ss:$48 sps:$4 sm:$0xff]  }
 0x2a4   :  { %4482 = vmatprep.subr.bf16.mxu0 %v20189_v24  ;;  %4564 = vmatprep.subr.bf16.mxu1 %v20192_v25  ;;  %v20273_v24 = vld [vmem:[#allocation8 + $0x2a4] ss:$48 sps:$4 sm:$0xff]   ;;  %v20276_v25 = vld [vmem:[#allocation8 + $0x2ac] ss:$48 sps:$4 sm:$0xff]  }
 0x2a7   :  { %4483 = vmatpush1.bf16.msra.mxu0 %v20187_v26  ;;  %4565 = vmatpush1.bf16.msra.mxu1 %v20190_v27  ;;  %v20271_v26 = vld [vmem:[#allocation8 + $0x2a0] ss:$48 sps:$4 sm:$0xff]   ;;  %v20274_v27 = vld [vmem:[#allocation8 + $0x2a8] ss:$48 sps:$4 sm:$0xff]  }
 0x2a8   :  { %4484 = vmatprep.subr.bf16.mxu0 %v20195_v28  ;;  %4566 = vmatprep.subr.bf16.mxu1 %v20198_v29  ;;  %v20279_v28 = vld [vmem:[#allocation8 + $0x304] ss:$48 sps:$4 sm:$0xff]   ;;  %v20282_v29 = vld [vmem:[#allocation8 + $0x30c] ss:$48 sps:$4 sm:$0xff]  }
 0x2ab   :  { %4485 = vmatpush1.bf16.msra.mxu0 %v20193_v30  ;;  %4567 = vmatpush1.bf16.msra.mxu1 %v20196_v31  ;;  %v20277_v30 = vld [vmem:[#allocation8 + $0x300] ss:$48 sps:$4 sm:$0xff]   ;;  %v20280_v31 = vld [vmem:[#allocation8 + $0x308] ss:$48 sps:$4 sm:$0xff]  }
 0x2ac   :  { %4486 = vmatprep.subr.bf16.mxu0 %v20201_v32  ;;  %4568 = vmatprep.subr.bf16.mxu1 %v20204_v33  ;;  %v20285_v32 = vld [vmem:[#allocation8 + $0x364] ss:$48 sps:$4 sm:$0xff]   ;;  %v20288_v33 = vld [vmem:[#allocation8 + $0x36c] ss:$48 sps:$4 sm:$0xff]  }
 0x2af   :  { %4487 = vmatpush1.bf16.msra.mxu0 %v20199_v34  ;;  %4569 = vmatpush1.bf16.msra.mxu1 %v20202_v35  ;;  %v20283_v34 = vld [vmem:[#allocation8 + $0x360] ss:$48 sps:$4 sm:$0xff]   ;;  %v20286_v35 = vld [vmem:[#allocation8 + $0x368] ss:$48 sps:$4 sm:$0xff]  }
 0x2b0   :  { %4488 = vmatprep.subr.bf16.mxu0 %v20207_v36  ;;  %4570 = vmatprep.subr.bf16.mxu1 %v20210_v37 }
 0x2b3   :  { %4489 = vmatpush1.bf16.msra.mxu0 %v20205_v38  ;;  %4571 = vmatpush1.bf16.msra.mxu1 %v20208_v39 }
 0x2b4   :  { %4490 = vmatprep.subr.bf16.mxu0 %v20213_v40  ;;  %4572 = vmatprep.subr.bf16.mxu1 %v20216_v41  ;;  %v20291_v40 = vld [vmem:[#allocation8 + $0x3c4] ss:$48 sps:$4 sm:$0xff]   ;;  %v20294_v41 = vld [vmem:[#allocation8 + $0x3cc] ss:$48 sps:$4 sm:$0xff]  }
 0x2b7   :  { %4491 = vmatpush1.bf16.msra.mxu0 %v20211_v42  ;;  %4573 = vmatpush1.bf16.msra.mxu1 %v20214_v43 }
 0x2b8   :  { %4492 = vmatprep.subr.bf16.mxu0 %v20219_v44  ;;  %4574 = vmatprep.subr.bf16.mxu1 %v20222_v45  ;;  %v20289_v44 = vld [vmem:[#allocation8 + $0x3c0] ss:$48 sps:$4 sm:$0xff]   ;;  %v20292_v45 = vld [vmem:[#allocation8 + $0x3c8] ss:$48 sps:$4 sm:$0xff]  }
 0x2bb   :  { %4493 = vmatpush1.bf16.msra.mxu0 %v20217_v50  ;;  %4575 = vmatpush1.bf16.msra.mxu1 %v20220_v51 }
 0x2bc   :  { %4494 = vmatprep.subr.bf16.mxu0 %v20225_v53  ;;  %4576 = vmatprep.subr.bf16.mxu1 %v20228_v54  ;;  %v20297_v53 = vld [vmem:[#allocation8 + $0x424] ss:$48 sps:$4 sm:$0xff]   ;;  %v20300_v54 = vld [vmem:[#allocation8 + $0x42c] ss:$48 sps:$4 sm:$0xff]  }
 0x2bf   :  { %4495 = vmatpush1.bf16.msra.mxu0 %v20223_v55  ;;  %4577 = vmatpush1.bf16.msra.mxu1 %v20226_v56  ;;  %v20295_v55 = vld [vmem:[#allocation8 + $0x420] ss:$48 sps:$4 sm:$0xff]   ;;  %v20298_v56 = vld [vmem:[#allocation8 + $0x428] ss:$48 sps:$4 sm:$0xff]  }
 0x2c0   :  { %7103 = vmatprep.subr.bf16.mxu0 %v20231_v57  ;;  %7185 = vmatprep.subr.bf16.mxu1 %v20234_v58  ;;  %v20303_v57 = vld [vmem:[#allocation8 + $0x484] ss:$48 sps:$4 sm:$0xff]   ;;  %v20306_v58 = vld [vmem:[#allocation8 + $0x48c] ss:$48 sps:$4 sm:$0xff]  }
 0x2c2   :  { %4497 = vmatmul.mubr.bf16.vlgmr.msra.gmra.mrb[12].mxu0 %v23110_v5  ;;  %4579 = vmatmul.mubr.bf16.vlgmr.msra.gmra.mrb[12].mxu1 %v23110_v5  ;;  %v20253_v5 = vld [vmem:[#allocation8 + $0x180] ss:$48 sps:$4 sm:$0xff]  }
 0x2c3   :  { %7104 = vmatpush1.bf16.msra.mxu0 %v20229_v12  ;;  %7186 = vmatpush1.bf16.msra.mxu1 %v20232_v13  ;;  %v20301_v12 = vld [vmem:[#allocation8 + $0x480] ss:$48 sps:$4 sm:$0xff]   ;;  %v20304_v13 = vld [vmem:[#allocation8 + $0x488] ss:$48 sps:$4 sm:$0xff]  }
 0x2c4   :  { %7105 = vmatprep.subr.bf16.mxu0 %v20237_v59  ;;  %7187 = vmatprep.subr.bf16.mxu1 %v20240_v60  ;;  %v20309_v59 = vld [vmem:[#allocation8 + $0x4e4] ss:$48 sps:$4 sm:$0xff]   ;;  %v20312_v60 = vld [vmem:[#allocation8 + $0x4ec] ss:$48 sps:$4 sm:$0xff]  }
 0x2c7   :  { %7106 = vmatpush1.bf16.msra.mxu0 %v20235_v61  ;;  %7188 = vmatpush1.bf16.msra.mxu1 %v20238_v62  ;;  %v20307_v61 = vld [vmem:[#allocation8 + $0x4e0] ss:$48 sps:$4 sm:$0xff]   ;;  %v20310_v62 = vld [vmem:[#allocation8 + $0x4e8] ss:$48 sps:$4 sm:$0xff]  }
 0x2c8   :  { %7107 = vmatprep.subr.bf16.mxu0 %v20243_v63  ;;  %7189 = vmatprep.subr.bf16.mxu1 %v20246_v18  ;;  %v20315_v63 = vld [vmem:[#allocation8 + $0x544] ss:$48 sps:$4 sm:$0xff]   ;;  %v20318_v18 = vld [vmem:[#allocation8 + $0x54c] ss:$48 sps:$4 sm:$0xff]  }
 0x2cb   :  { %7108 = vmatpush1.bf16.msra.mxu0 %v20241_v0  ;;  %7190 = vmatpush1.bf16.msra.mxu1 %v20244_v1  ;;  %v20313_v0 = vld [vmem:[#allocation8 + $0x540] ss:$48 sps:$4 sm:$0xff]   ;;  %v20316_v1 = vld [vmem:[#allocation8 + $0x548] ss:$48 sps:$4 sm:$0xff]  }
 0x2cc   :  { %7109 = vmatprep.subr.bf16.mxu0 %v20249_v2  ;;  %7191 = vmatprep.subr.bf16.mxu1 %v20252_v6  ;;  %v20321_v2 = vld [vmem:[#allocation8 + $0x5a4] ss:$48 sps:$4 sm:$0xff]   ;;  %v20324_v6 = vld [vmem:[#allocation8 + $0x5ac] ss:$48 sps:$4 sm:$0xff]  }
 0x2cf   :  { %7110 = vmatpush1.bf16.msra.mxu0 %v20247_v7  ;;  %7192 = vmatpush1.bf16.msra.mxu1 %v20250_v10  ;;  %v20319_v7 = vld [vmem:[#allocation8 + $0x5a0] ss:$48 sps:$4 sm:$0xff]   ;;  %v20322_v10 = vld [vmem:[#allocation8 + $0x5a8] ss:$48 sps:$4 sm:$0xff]  }
 0x2d0   :  { %7111 = vmatprep.subr.bf16.mxu0 %v20255_v11  ;;  %7193 = vmatprep.subr.bf16.mxu1 %v20258_v14  ;;  %v20327_v11 = vld [vmem:[#allocation8 + $0x604] ss:$48 sps:$4 sm:$0xff]   ;;  %v20330_v14 = vld [vmem:[#allocation8 + $0x60c] ss:$48 sps:$4 sm:$0xff]  }
 0x2d3   :  { %7112 = vmatpush1.bf16.msra.mxu0 %v20253_v5  ;;  %7194 = vmatpush1.bf16.msra.mxu1 %v20256_v15  ;;  %v358_v5 = vlaneseq }
 0x2d4   :  { %7113 = vmatprep.subr.bf16.mxu0 %v20261_v16  ;;  %7195 = vmatprep.subr.bf16.mxu1 %v20264_v17  ;;  %v348_v17 = vld [vmem:[#allocation11] sm:$0xff] }
 0x2d5   :  { %v359_v15 = vshrl.u32 %v358_v5, 7 }
 0x2d7   :  { %7114 = vmatpush1.bf16.msra.mxu0 %v20259_v19  ;;  %7196 = vmatpush1.bf16.msra.mxu1 %v20262_v20  ;;  %v23154_v16 = vsub.s32 1, %v359_v15  ;;  %v23156_v19 = vsub.s32 5, %v359_v15  ;;  %v23158_v20 = vsub.s32 0, %v359_v15 }
 0x2d8   :  { %7115 = vmatprep.subr.bf16.mxu0 %v20267_v21  ;;  %7197 = vmatprep.subr.bf16.mxu1 %v20270_v22  ;;  %v23160_v21 = vsub.s32 3, %v359_v15  ;;  %v23162_v22 = vsub.s32 4, %v359_v15 }
 0x2db   :  { %7116 = vmatpush1.bf16.msra.mxu0 %v20265_v23  ;;  %7198 = vmatpush1.bf16.msra.mxu1 %v20268_v48  ;;  %v23164_v23 = vsub.s32 7, %v359_v15  ;;  %v23166_v48 = vsub.s32 2, %v359_v15 }
 0x2dc   :  { %7117 = vmatprep.subr.bf16.mxu0 %v20273_v24  ;;  %7199 = vmatprep.subr.bf16.mxu1 %v20276_v25  ;;  %v361_v24 = vrot.slane %v348_v17, %v23158_v20  ;;  %v2070_v25 = vrot.slane %v348_v17, %v23154_v16 }
 0x2df   :  { %7118 = vmatpush1.bf16.msra.mxu0 %v20271_v26  ;;  %7200 = vmatpush1.bf16.msra.mxu1 %v20274_v27  ;;  %v23170_v26 = vsub.s32 6, %v359_v15  ;;  %v369_v27 = vrot.slane %v348_v17, %v23162_v22 }
 0x2e0   :  { %7119 = vmatprep.subr.bf16.mxu0 %v20279_v28  ;;  %7201 = vmatprep.subr.bf16.mxu1 %v20282_v29  ;;  %v2078_v28 = vrot.slane %v348_v17, %v23156_v19  ;;  %v365_v29 = vrot.slane %v348_v17, %v23166_v48 }
 0x2e3   :  { %7120 = vmatpush1.bf16.msra.mxu0 %v20277_v30  ;;  %7202 = vmatpush1.bf16.msra.mxu1 %v20280_v31  ;;  %v2074_v30 = vrot.slane %v348_v17, %v23160_v21  ;;  %v373_v31 = vrot.slane %v348_v17, %v23170_v26 }
 0x2e4   :  { %7121 = vmatprep.subr.bf16.mxu0 %v20285_v32  ;;  %7203 = vmatprep.subr.bf16.mxu1 %v20288_v33  ;;  %v2082_v32 = vrot.slane %v348_v17, %v23164_v23  ;;  %v421_v33 = vrot.slane %v361_v24, %v23158_v20 }
 0x2e7   :  { %7122 = vmatpush1.bf16.msra.mxu0 %v20283_v34  ;;  %7204 = vmatpush1.bf16.msra.mxu1 %v20286_v35  ;;  %v2130_v34 = vrot.slane %v2070_v25, %v23154_v16  ;;  %v429_v35 = vrot.slane %v369_v27, %v23158_v20 }
 0x2e8   :  { %7123 = vmatprep.subr.bf16.mxu0 %v20291_v40  ;;  %7205 = vmatprep.subr.bf16.mxu1 %v20294_v41  ;;  %v2138_v40 = vrot.slane %v2078_v28, %v23154_v16  ;;  %v425_v41 = vrot.slane %v365_v29, %v23158_v20 }
 0x2eb   :  { %7124 = vmatpush1.bf16.msra.mxu0 %v20289_v44  ;;  %7206 = vmatpush1.bf16.msra.mxu1 %v20292_v45  ;;  %v2142_v44 = vrot.slane %v2082_v32, %v23154_v16  ;;  %v19134_v45 = vadd.f32 %v2130_v34, %v421_v33 }
 0x2ec   :  { %7125 = vmatprep.subr.bf16.mxu0 %v20297_v53  ;;  %7207 = vmatprep.subr.bf16.mxu1 %v20300_v54 }
 0x2ef   :  { %7126 = vmatpush1.bf16.msra.mxu0 %v20295_v55  ;;  %7208 = vmatpush1.bf16.msra.mxu1 %v20298_v56  ;;  %v19135_v55 = vadd.f32 %v19134_v45, %v23136_v3 }
 0x2f0   :  { %7127 = vmatprep.subr.bf16.mxu0 %v20303_v57  ;;  %7209 = vmatprep.subr.bf16.mxu1 %v20306_v58 }
 0x2f3   :  { %7128 = vmatpush1.bf16.msra.mxu0 %v20301_v12  ;;  %7210 = vmatpush1.bf16.msra.mxu1 %v20304_v13 }
 0x2f4   :  { %7129 = vmatprep.subr.bf16.mxu0 %v20309_v59  ;;  %7211 = vmatprep.subr.bf16.mxu1 %v20312_v60 }
 0x2f7   :  { %7130 = vmatpush1.bf16.msra.mxu0 %v20307_v61  ;;  %7212 = vmatpush1.bf16.msra.mxu1 %v20310_v62 }
 0x2f8   :  { %7131 = vmatprep.subr.bf16.mxu0 %v20315_v63  ;;  %7213 = vmatprep.subr.bf16.mxu1 %v20318_v18  ;;  %v17497_v63 = vmul.f32 -1.442695, %v19135_v55 }
 0x2fa   :  { %22565 = vpow2.f32 %v17497_v63 }
 0x2fb   :  { %7132 = vmatpush1.bf16.msra.mxu0 %v20313_v0  ;;  %7214 = vmatpush1.bf16.msra.mxu1 %v20316_v1 }
 0x2fc   :  { %7133 = vmatprep.subr.bf16.mxu0 %v20321_v2  ;;  %7215 = vmatprep.subr.bf16.mxu1 %v20324_v6 }
 0x2ff   :  { %7134 = vmatpush1.bf16.msra.mxu0 %v20319_v7  ;;  %7216 = vmatpush1.bf16.msra.mxu1 %v20322_v10 }
 0x300   :  { %7144 = vmatprep.subr.bf16.mxu0 %v20327_v11  ;;  %7226 = vmatprep.subr.bf16.mxu1 %v20330_v14 }
 0x315   :  { %v23146_v36 = vpop.f32.mrb[4].mxu0  ;;  %v23148_v37 = vpop.f32.mrb[4].mxu1 }
 0x316   :  { %v23150_v38 = vpop.f32.mrb[5].mxu0  ;;  %v23152_v39 = vpop.f32.mrb[5].mxu1 }
 0x317   :  { %v4338_v42 = vpop.f32.mrb[6].mxu0  ;;  %v4420_v43 = vpop.f32.mrb[6].mxu1 }
 0x318   :  { %v4339_v50 = vpop.f32.mrb[7].mxu0  ;;  %v4421_v51 = vpop.f32.mrb[7].mxu1  ;;  %v2134_v42 = vrot.slane %v2074_v30, %v23154_v16  ;;  %v433_v43 = vrot.slane %v373_v31, %v23158_v20 }
 0x319   :  { %v19138_v50 = vadd.f32 %v2138_v40, %v429_v35  ;;  %v349_v51 = vld [vmem:[#allocation11 + $0x8] sm:$0xff]  ;;  %v22566_v31 = vpop.eup %22565 }
 0x31a   :  { %v19136_v53 = vadd.f32 %v2134_v42, %v425_v41  ;;  %v19140_v54 = vadd.f32 %v2142_v44, %v433_v43  ;;  %v377_v57 = vrot.slane %v349_v51, %v23158_v20  ;;  %v2086_v58 = vrot.slane %v349_v51, %v23154_v16 }
 0x31b   :  { %v19139_v56 = vadd.f32 %v19138_v50, %v23138_v4  ;;  %v385_v13 = vrot.slane %v349_v51, %v23162_v22  ;;  %v2094_v59 = vrot.slane %v349_v51, %v23156_v19  ;;  %v381_v61 = vrot.slane %v349_v51, %v23166_v48 }
 0x31c   :  { %v19137_v12 = vadd.f32 %v19136_v53, %v23140_v8  ;;  %v19141_v60 = vadd.f32 %v19140_v54, %v23142_v9  ;;  %v2090_v62 = vrot.slane %v349_v51, %v23160_v21  ;;  %v389_v3 = vrot.slane %v349_v51, %v23170_v26 }
 0x31d   :  { %v2098_v4 = vrot.slane %v349_v51, %v23164_v23  ;;  %v17499_v18 = vmul.f32 -1.442695, %v19139_v56  ;;  %v437_v0 = vrot.slane %v377_v57, %v23158_v20  ;;  %v2146_v8 = vrot.slane %v2086_v58, %v23154_v16 }
 0x31e   :  { %v17498_v1 = vmul.f32 -1.442695, %v19137_v12  ;;  %v445_v2 = vrot.slane %v385_v13, %v23158_v20  ;;  %v2154_v6 = vrot.slane %v2094_v59, %v23154_v16  ;;  %v17500_v9 = vmul.f32 -1.442695, %v19141_v60 }
 0x31f   :  { %v441_v7 = vrot.slane %v381_v61, %v23158_v20  ;;  %v2150_v10 = vrot.slane %v2090_v62, %v23154_v16  ;;  %v449_v11 = vrot.slane %v389_v3, %v23158_v20  ;;  %v2158_v14 = vrot.slane %v2098_v4, %v23154_v16 }
 0x320   :  { %22567 = vpow2.f32 %v17499_v18  ;;  %v19142_v5 = vadd.f32 %v2146_v8, %v437_v0  ;;  %v19146_v15 = vadd.f32 %v2154_v6, %v445_v2  ;;  %v4603_v42 = vadd.f32 1.0, %v22566_v31 }
 0x321   :  { %22569 = vpow2.f32 %v17498_v1  ;;  %v19144_v17 = vadd.f32 %v2150_v10, %v441_v7  ;;  %v19148_v24 = vadd.f32 %v2158_v14, %v449_v11 }
 0x322   :  { %22571 = vpow2.f32 %v17500_v9  ;;  %v19143_v25 = vadd.f32 %v19142_v5, %v23146_v36  ;;  %v19147_v27 = vadd.f32 %v19146_v15, %v23148_v37  ;;  %v350_v37 = vld [vmem:[#allocation11 + $0x10] sm:$0xff] }
 0x323   :  { %v19145_v28 = vadd.f32 %v19144_v17, %v23150_v38  ;;  %v19149_v29 = vadd.f32 %v19148_v24, %v23152_v39  ;;  %v393_v38 = vrot.slane %v350_v37, %v23158_v20  ;;  %v2102_v39 = vrot.slane %v350_v37, %v23154_v16 }
 0x324   :  { %v17501_v30 = vmul.f32 -1.442695, %v19143_v25  ;;  %v17503_v32 = vmul.f32 -1.442695, %v19147_v27  ;;  %v2110_v45 = vrot.slane %v350_v37, %v23156_v19  ;;  %v401_v50 = vrot.slane %v350_v37, %v23162_v22 }
 0x325   :  { %v17502_v34 = vmul.f32 -1.442695, %v19145_v28  ;;  %v17504_v40 = vmul.f32 -1.442695, %v19149_v29  ;;  %v2106_v51 = vrot.slane %v350_v37, %v23160_v21  ;;  %v2114_v53 = vrot.slane %v350_v37, %v23164_v23 }
 0x326   :  { %22573 = vpow2.f32 %v17501_v30  ;;  %v397_v54 = vrot.slane %v350_v37, %v23166_v48  ;;  %v405_v56 = vrot.slane %v350_v37, %v23170_v26  ;;  %v453_v58 = vrot.slane %v393_v38, %v23158_v20 }
 0x327   :  { %22575 = vpow2.f32 %v17503_v32  ;;  %v2162_v12 = vrot.slane %v2102_v39, %v23154_v16  ;;  %v2170_v13 = vrot.slane %v2110_v45, %v23154_v16  ;;  %v461_v60 = vrot.slane %v401_v50, %v23158_v20 }
 0x328   :  { %22577 = vpow2.f32 %v17502_v34  ;;  %v2166_v61 = vrot.slane %v2106_v51, %v23154_v16  ;;  %v2174_v62 = vrot.slane %v2114_v53, %v23154_v16  ;;  %v457_v3 = vrot.slane %v397_v54, %v23158_v20  ;;  %v22685_v51 = vld [vmem:[#allocation3] sm:$0xff] }
 0x329   :  { %22579 = vpow2.f32 %v17504_v40  ;;  %v465_v0 = vrot.slane %v405_v56, %v23158_v20  ;;  %v1632_v9 = vadd.f32 %v23120_v46, %v453_v58  ;;  %v1673_v17 = vadd.f32 %v23122_v47, %v461_v60  ;;  %v22687_v60 = vld [vmem:[#allocation3 + $0x8] sm:$0xff] }
 0x32a   :  { %v22568_v33 = vpop.eup %22567  ;;  %22581 = vrcp.f32 %v4603_v42  ;;  %v1634_v31 = vadd.f32 %v23124_v49, %v457_v3  ;;  %v22688_v3 = vld [vmem:[#allocation3 + $0x18] sm:$0xff] }
 0x32b   :  { %v22570_v35 = vpop.eup %22569  ;;  %v4605_v43 = vadd.f32 1.0, %v22568_v33 }
 0x32c   :  { %v22572_v41 = vpop.eup %22571  ;;  %v4604_v44 = vadd.f32 1.0, %v22570_v35  ;;  %v1675_v35 = vadd.f32 %v23126_v52, %v465_v0 }
 0x32d   :  { %v4606_v36 = vadd.f32 1.0, %v22572_v41  ;;  %22583 = vrcp.f32 %v4605_v43 }
 0x32e   :  { %22585 = vrcp.f32 %v4604_v44 }
 0x32f   :  { %22587 = vrcp.f32 %v4606_v36 }
 0x330   :  { %v22574_v55 = vpop.eup %22573 }
 0x331   :  { %v22576_v57 = vpop.eup %22575  ;;  %v4631_v4 = vadd.f32 1.0, %v22574_v55 }
 0x332   :  { %v22578_v59 = vpop.eup %22577  ;;  %v4633_v8 = vadd.f32 1.0, %v22576_v57  ;;  %v22686_v57 = vld [vmem:[#allocation3 + $0x10] sm:$0xff] }
 0x333   :  { %v22580_v63 = vpop.eup %22579  ;;  %v4632_v7 = vadd.f32 1.0, %v22578_v59  ;;  %22589 = vrcp.f32 %v4631_v4 }
 0x334   :  { %v22582_v18 = vpop.eup %22581  ;;  %v4634_v24 = vadd.f32 1.0, %v22580_v63  ;;  %22591 = vrcp.f32 %v4633_v8 }
 0x335   :  { %22593 = vrcp.f32 %v4632_v7  ;;  %v20333_v7 = vld [vmem:[#allocation8 + $0x664] ss:$48 sps:$4 sm:$0xff]  }
 0x336   :  { %22595 = vrcp.f32 %v4634_v24  ;;  %v20342_v24 = vld [vmem:[#allocation8 + $0x6cc] ss:$48 sps:$4 sm:$0xff]  }
 0x337   :  { %v22584_v6 = vpop.eup %22583 }
 0x338   :  { %v22586_v15 = vpop.eup %22585 }
 0x339   :  { %v22588_v30 = vpop.eup %22587 }
 0x33d   :  { %v22590_v49 = vpop.eup %22589 }
 0x33e   :  { %v22592_v36 = vpop.eup %22591  ;;  %v4655_v39 = vsub.f32 1.0, %v22590_v49  ;;  %v4663_v53 = vmul.f32 %v22685_v51, %v22590_v49  ;;  %v20364_v49 = vld [vmem:[#allocation8 + $0x848] ss:$48 sps:$4 sm:$0xff]  }
 0x33f   :  { %v22594_v37 = vpop.eup %22593  ;;  %v4657_v52 = vsub.f32 1.0, %v22592_v36  ;;  %v4665_v58 = vmul.f32 %v22686_v57, %v22592_v36  ;;  %v20369_v36 = vld [vmem:[#allocation8 + $0x8a4] ss:$48 sps:$4 sm:$0xff]   ;;  %v20376_v51 = vld [vmem:[#allocation8 + $0x908] ss:$48 sps:$4 sm:$0xff]  }
 0x340   :  { %v22596_v38 = vpop.eup %22595  ;;  %v4656_v54 = vsub.f32 1.0, %v22594_v37  ;;  %v20387_v57 = vld [vmem:[#allocation8 + $0x9c4] ss:$48 sps:$4 sm:$0xff]  }
 0x341   :  { %v4666_v4 = vmul.f32 %v22688_v3, %v22596_v38  ;;  %v20402_v3 = vld [vmem:[#allocation8 + $0xa8c] ss:$48 sps:$4 sm:$0xff]  }
 0x395   :  { %v4498_v1 = vpop.f32.mrb[12].mxu0  ;;  %v4580_v2 = vpop.f32.mrb[12].mxu1 }
 0x396   :  { %v19150_v10 = vadd.f32 %v4498_v1, %v2162_v12  ;;  %v19152_v11 = vadd.f32 %v4580_v2, %v2170_v13  ;;  %v4500_v14 = vpop.f32.mrb[13].mxu0  ;;  %v4582_v5 = vpop.f32.mrb[13].mxu1  ;;  %v4658_v12 = vsub.f32 1.0, %v22596_v38  ;;  %v20325_v1 = vld [vmem:[#allocation8 + $0x600] ss:$48 sps:$4 sm:$0xff]  }
 0x397   :  { %v19151_v25 = vadd.f32 %v4500_v14, %v2166_v61  ;;  %v19153_v27 = vadd.f32 %v4582_v5, %v2174_v62  ;;  %v4502_v28 = vpop.f32.mrb[14].mxu0  ;;  %v4584_v29 = vpop.f32.mrb[14].mxu1  ;;  %v4664_v61 = vmul.f32 %v22687_v60, %v22594_v37  ;;  %v20328_v2 = vld [vmem:[#allocation8 + $0x608] ss:$48 sps:$4 sm:$0xff]   ;;  %v20336_v5 = vld [vmem:[#allocation8 + $0x66c] ss:$48 sps:$4 sm:$0xff]  }
 0x398   :  { %v4643_v32 = vmul.f32 %v22582_v18, %v19150_v10  ;;  %v4645_v33 = vmul.f32 %v22584_v6, %v19152_v11  ;;  %v4503_v46 = vpop.f32.mrb[15].mxu0  ;;  %v4585_v34 = vpop.f32.mrb[15].mxu1  ;;  %v20331_v11 = vld [vmem:[#allocation8 + $0x660] ss:$48 sps:$4 sm:$0xff]   ;;  %v20334_v14 = vld [vmem:[#allocation8 + $0x668] ss:$48 sps:$4 sm:$0xff]  }
 0x399   :  { %v4644_v40 = vmul.f32 %v22586_v15, %v19151_v25  ;;  %v4646_v41 = vmul.f32 %v22588_v30, %v19153_v27  ;;  %v20337_v25 = vld [vmem:[#allocation8 + $0x6c0] ss:$48 sps:$4 sm:$0xff]   ;;  %v20340_v27 = vld [vmem:[#allocation8 + $0x6c8] ss:$48 sps:$4 sm:$0xff]   ;;  %v20345_v28 = vld [vmem:[#allocation8 + $0x724] ss:$48 sps:$4 sm:$0xff]  }
 0x39a   :  { %v4647_v47 = vadd.f32 %v4643_v32, %v1632_v9  ;;  %v4649_v42 = vadd.f32 %v4645_v33, %v1673_v17  ;;  %v20339_v17 = vld [vmem:[#allocation8 + $0x6c4] ss:$48 sps:$4 sm:$0xff]   ;;  %v20348_v29 = vld [vmem:[#allocation8 + $0x72c] ss:$48 sps:$4 sm:$0xff]   ;;  %v20343_v30 = vld [vmem:[#allocation8 + $0x720] ss:$48 sps:$4 sm:$0xff]  }
 0x39b   :  { %v4648_v43 = vadd.f32 %v4644_v40, %v1634_v31  ;;  %v4650_v44 = vadd.f32 %v4646_v41, %v1675_v35  ;;  %v20346_v31 = vld [vmem:[#allocation8 + $0x728] ss:$48 sps:$4 sm:$0xff]   ;;  %v20351_v32 = vld [vmem:[#allocation8 + $0x784] ss:$48 sps:$4 sm:$0xff]   ;;  %v20354_v33 = vld [vmem:[#allocation8 + $0x78c] ss:$48 sps:$4 sm:$0xff]  }
 0x39c   :  { %22597 = vtanh.f32 %v4647_v47  ;;  %v20349_v46 = vld [vmem:[#allocation8 + $0x780] ss:$48 sps:$4 sm:$0xff]   ;;  %v20352_v34 = vld [vmem:[#allocation8 + $0x788] ss:$48 sps:$4 sm:$0xff]   ;;  %v20357_v35 = vld [vmem:[#allocation8 + $0x7e4] ss:$48 sps:$4 sm:$0xff]  }
 0x39d   :  { %22599 = vtanh.f32 %v4649_v42  ;;  %v20360_v40 = vld [vmem:[#allocation8 + $0x7ec] ss:$48 sps:$4 sm:$0xff]   ;;  %v20355_v41 = vld [vmem:[#allocation8 + $0x7e0] ss:$48 sps:$4 sm:$0xff]   ;;  %v20358_v47 = vld [vmem:[#allocation8 + $0x7e8] ss:$48 sps:$4 sm:$0xff]  }
 0x39e   :  { %22601 = vtanh.f32 %v4648_v43  ;;  %v20363_v42 = vld [vmem:[#allocation8 + $0x844] ss:$48 sps:$4 sm:$0xff]   ;;  %v20366_v43 = vld [vmem:[#allocation8 + $0x84c] ss:$48 sps:$4 sm:$0xff]   ;;  %v20367_v38 = vld [vmem:[#allocation8 + $0x8a0] ss:$48 sps:$4 sm:$0xff]  }
 0x39f   :  { %22603 = vtanh.f32 %v4650_v44  ;;  %v20361_v44 = vld [vmem:[#allocation8 + $0x840] ss:$48 sps:$4 sm:$0xff]   ;;  %v20372_v37 = vld [vmem:[#allocation8 + $0x8ac] ss:$48 sps:$4 sm:$0xff]  }
 0x3a0   :  { %v20396_v60 = vld [vmem:[#allocation8 + $0xa2c] ss:$48 sps:$4 sm:$0xff]  }
 0x3a6   :  { %v22598_v45 = vpop.eup %22597 }
 0x3a7   :  { %v22600_v50 = vpop.eup %22599  ;;  %v4659_v55 = vmul.f32 %v22598_v45, %v4655_v39  ;;  %v20370_v39 = vld [vmem:[#allocation8 + $0x8a8] ss:$48 sps:$4 sm:$0xff]   ;;  %v20375_v45 = vld [vmem:[#allocation8 + $0x904] ss:$48 sps:$4 sm:$0xff]  }
 0x3a8   :  { %v22602_v56 = vpop.eup %22601  ;;  %v4661_v13 = vmul.f32 %v22600_v50, %v4657_v52  ;;  %v20378_v52 = vld [vmem:[#allocation8 + $0x90c] ss:$48 sps:$4 sm:$0xff]   ;;  %v20373_v50 = vld [vmem:[#allocation8 + $0x900] ss:$48 sps:$4 sm:$0xff]  }
 0x3a9   :  { %v22604_v59 = vpop.eup %22603  ;;  %v4667_v62 = vadd.f32 %v4663_v53, %v4659_v55  ;;  %v4660_v63 = vmul.f32 %v22602_v56, %v4656_v54  ;;  %v20381_v53 = vld [vmem:[#allocation8 + $0x964] ss:$48 sps:$4 sm:$0xff]   ;;  %v20384_v54 = vld [vmem:[#allocation8 + $0x96c] ss:$48 sps:$4 sm:$0xff]   ;;  %v20379_v55 = vld [vmem:[#allocation8 + $0x960] ss:$48 sps:$4 sm:$0xff]  }
 0x3aa   :  { %v23230_v18 = vadd.f32 %v4665_v58, %v4661_v13  ;;  %v4662_v0 = vmul.f32 %v22604_v59, %v4658_v12  ;;  %v20382_v56 = vld [vmem:[#allocation8 + $0x968] ss:$48 sps:$4 sm:$0xff]   ;;  %v20390_v58 = vld [vmem:[#allocation8 + $0x9cc] ss:$48 sps:$4 sm:$0xff]   ;;  %v20385_v12 = vld [vmem:[#allocation8 + $0x9c0] ss:$48 sps:$4 sm:$0xff]  }
 0x3ab   :  { %16873 = vst [vmem:[#allocation16] sm:$0xff] %v4667_v62  ;;  %v4668_v8 = vadd.f32 %v4664_v61, %v4660_v63  ;;  %v23235_v10 = vpack.c.bf16 %v4667_v62, %v4667_v62  ;;  %v20388_v13 = vld [vmem:[#allocation8 + $0x9c8] ss:$48 sps:$4 sm:$0xff]   ;;  %v20393_v59 = vld [vmem:[#allocation8 + $0xa24] ss:$48 sps:$4 sm:$0xff]  }
 0x3ac   :  { %16875 = vst [vmem:[#allocation16 + $0x10] sm:$0xff] %v23230_v18  ;;  %v4670_v6 = vadd.f32 %v4666_v4, %v4662_v0  ;;  %v20391_v61 = vld [vmem:[#allocation8 + $0xa20] ss:$48 sps:$4 sm:$0xff]   ;;  %v20394_v62 = vld [vmem:[#allocation8 + $0xa28] ss:$48 sps:$4 sm:$0xff]  }
 0x3ad   :  { %16874 = vst [vmem:[#allocation16 + $0x8] sm:$0xff] %v4668_v8  ;;  %v23233_v9 = vpack.c.bf16 %v4668_v8, %v4668_v8  ;;  %v20399_v63 = vld [vmem:[#allocation8 + $0xa84] ss:$48 sps:$4 sm:$0xff]   ;;  %v20397_v4 = vld [vmem:[#allocation8 + $0xa80] ss:$48 sps:$4 sm:$0xff]  }
 0x3ae   :  { %16876 = vst [vmem:[#allocation16 + $0x18] sm:$0xff] %v4670_v6  ;;  %v23241_v15 = vpack.c.bf16 %v4670_v6, %v4670_v6  ;;  %v20400_v0 = vld [vmem:[#allocation8 + $0xa88] ss:$48 sps:$4 sm:$0xff]   ;;  %v20405_v8 = vld [vmem:[#allocation8 + $0xae4] ss:$48 sps:$4 sm:$0xff]  }
 0x3af   :  { %7135 = vmatprep.mubr.bf16.mxu0 %v23233_v9  ;;  %7217 = vmatprep.mubr.bf16.mxu1 %v23233_v9  ;;  %v20406_v6 = vld [vmem:[#allocation8 + $0xae8] ss:$48 sps:$4 sm:$0xff]  }
 0x3b0   :  { %7136 = vmatmul.mubr.bf16.vlgmr.msra.gmra.mrb[16].mxu0 %v23235_v10  ;;  %7218 = vmatmul.mubr.bf16.vlgmr.msra.gmra.mrb[16].mxu1 %v23235_v10 }
 0x3b1   :  { %7145 = vmatpush1.bf16.msra.mxu0 %v20325_v1  ;;  %7227 = vmatpush1.bf16.msra.mxu1 %v20328_v2  ;;  %v20408_v1 = vld [vmem:[#allocation8 + $0xaec] ss:$48 sps:$4 sm:$0xff]   ;;  %v20403_v2 = vld [vmem:[#allocation8 + $0xae0] ss:$48 sps:$4 sm:$0xff]  }
 0x3b2   :  { %7176 = vmatprep.mubr.bf16.mxu0 %v23241_v15  ;;  %7258 = vmatprep.mubr.bf16.mxu1 %v23241_v15 }
 0x3b3   :  { %7146 = vmatprep.subr.bf16.mxu0 %v20333_v7  ;;  %7228 = vmatprep.subr.bf16.mxu1 %v20336_v5  ;;  %v20411_v7 = vld [vmem:[#allocation8 + $0xb44] ss:$48 sps:$4 sm:$0xff]   ;;  %v20412_v5 = vld [vmem:[#allocation8 + $0xb48] ss:$48 sps:$4 sm:$0xff]  }
 0x3b5   :  { %7147 = vmatpush1.bf16.msra.mxu0 %v20331_v11  ;;  %7229 = vmatpush1.bf16.msra.mxu1 %v20334_v14  ;;  %v20414_v11 = vld [vmem:[#allocation8 + $0xb4c] ss:$48 sps:$4 sm:$0xff]   ;;  %v20409_v14 = vld [vmem:[#allocation8 + $0xb40] ss:$48 sps:$4 sm:$0xff]  }
 0x3b6   :  { %7148 = vmatprep.subr.bf16.mxu0 %v20339_v17  ;;  %7230 = vmatprep.subr.bf16.mxu1 %v20342_v24  ;;  %v20417_v17 = vld [vmem:[#allocation8 + $0xba4] ss:$48 sps:$4 sm:$0xff]   ;;  %v20420_v24 = vld [vmem:[#allocation8 + $0xbac] ss:$48 sps:$4 sm:$0xff]  }
 0x3b9   :  { %7149 = vmatpush1.bf16.msra.mxu0 %v20337_v25  ;;  %7231 = vmatpush1.bf16.msra.mxu1 %v20340_v27  ;;  %v20415_v25 = vld [vmem:[#allocation8 + $0xba0] ss:$48 sps:$4 sm:$0xff]   ;;  %v20418_v27 = vld [vmem:[#allocation8 + $0xba8] ss:$48 sps:$4 sm:$0xff]  }
 0x3ba   :  { %7150 = vmatprep.subr.bf16.mxu0 %v20345_v28  ;;  %7232 = vmatprep.subr.bf16.mxu1 %v20348_v29  ;;  %v20423_v28 = vld [vmem:[#allocation8 + $0x14] ss:$48 sps:$4 sm:$0xff]   ;;  %v20426_v29 = vld [vmem:[#allocation8 + $0x1c] ss:$48 sps:$4 sm:$0xff]  }
 0x3bd   :  { %7151 = vmatpush1.bf16.msra.mxu0 %v20343_v30  ;;  %7233 = vmatpush1.bf16.msra.mxu1 %v20346_v31  ;;  %v20421_v30 = vld [vmem:[#allocation8 + $0x10] ss:$48 sps:$4 sm:$0xff]   ;;  %v20424_v31 = vld [vmem:[#allocation8 + $0x18] ss:$48 sps:$4 sm:$0xff]  }
 0x3be   :  { %7152 = vmatprep.subr.bf16.mxu0 %v20351_v32  ;;  %7234 = vmatprep.subr.bf16.mxu1 %v20354_v33  ;;  %v20429_v32 = vld [vmem:[#allocation8 + $0x74] ss:$48 sps:$4 sm:$0xff]   ;;  %v20432_v33 = vld [vmem:[#allocation8 + $0x7c] ss:$48 sps:$4 sm:$0xff]  }
 0x3c1   :  { %7153 = vmatpush1.bf16.msra.mxu0 %v20349_v46  ;;  %7235 = vmatpush1.bf16.msra.mxu1 %v20352_v34  ;;  %v23247_v46 = vpack.c.bf16 %v23230_v18, %v23230_v18  ;;  %v20427_v34 = vld [vmem:[#allocation8 + $0x70] ss:$48 sps:$4 sm:$0xff]  }
 0x3c2   :  { %7154 = vmatprep.subr.bf16.mxu0 %v20357_v35  ;;  %7236 = vmatprep.subr.bf16.mxu1 %v20360_v40  ;;  %v20430_v35 = vld [vmem:[#allocation8 + $0x78] ss:$48 sps:$4 sm:$0xff]   ;;  %v20435_v40 = vld [vmem:[#allocation8 + $0xd4] ss:$48 sps:$4 sm:$0xff]   ;;  %v20433_v18 = vld [vmem:[#allocation8 + $0xd0] ss:$48 sps:$4 sm:$0xff]  }
 0x3c5   :  { %7155 = vmatpush1.bf16.msra.mxu0 %v20355_v41  ;;  %7237 = vmatpush1.bf16.msra.mxu1 %v20358_v47  ;;  %v20438_v41 = vld [vmem:[#allocation8 + $0xdc] ss:$48 sps:$4 sm:$0xff]   ;;  %v20436_v47 = vld [vmem:[#allocation8 + $0xd8] ss:$48 sps:$4 sm:$0xff]  }
 0x3c6   :  { %7156 = vmatprep.subr.bf16.mxu0 %v20363_v42  ;;  %7238 = vmatprep.subr.bf16.mxu1 %v20366_v43  ;;  %v20441_v42 = vld [vmem:[#allocation8 + $0x134] ss:$48 sps:$4 sm:$0xff]   ;;  %v20439_v43 = vld [vmem:[#allocation8 + $0x130] ss:$48 sps:$4 sm:$0xff]  }
 0x3c9   :  { %7157 = vmatpush1.bf16.msra.mxu0 %v20361_v44  ;;  %7239 = vmatpush1.bf16.msra.mxu1 %v20364_v49  ;;  %v20444_v44 = vld [vmem:[#allocation8 + $0x13c] ss:$48 sps:$4 sm:$0xff]   ;;  %v20442_v49 = vld [vmem:[#allocation8 + $0x138] ss:$48 sps:$4 sm:$0xff]  }
 0x3ca   :  { %7158 = vmatprep.subr.bf16.mxu0 %v20369_v36  ;;  %7240 = vmatprep.subr.bf16.mxu1 %v20372_v37  ;;  %v20447_v36 = vld [vmem:[#allocation8 + $0x194] ss:$48 sps:$4 sm:$0xff]   ;;  %v20445_v37 = vld [vmem:[#allocation8 + $0x190] ss:$48 sps:$4 sm:$0xff]  }
 0x3cd   :  { %7159 = vmatpush1.bf16.msra.mxu0 %v20367_v38  ;;  %7241 = vmatpush1.bf16.msra.mxu1 %v20370_v39  ;;  %v20450_v38 = vld [vmem:[#allocation8 + $0x19c] ss:$48 sps:$4 sm:$0xff]   ;;  %v20448_v39 = vld [vmem:[#allocation8 + $0x198] ss:$48 sps:$4 sm:$0xff]  }
 0x3ce   :  { %7160 = vmatprep.subr.bf16.mxu0 %v20375_v45  ;;  %7242 = vmatprep.subr.bf16.mxu1 %v20378_v52  ;;  %v20453_v45 = vld [vmem:[#allocation8 + $0x1f4] ss:$48 sps:$4 sm:$0xff]   ;;  %v20451_v52 = vld [vmem:[#allocation8 + $0x1f0] ss:$48 sps:$4 sm:$0xff]  }
 0x3d1   :  { %7161 = vmatpush1.bf16.msra.mxu0 %v20373_v50  ;;  %7243 = vmatpush1.bf16.msra.mxu1 %v20376_v51  ;;  %v20456_v50 = vld [vmem:[#allocation8 + $0x1fc] ss:$48 sps:$4 sm:$0xff]   ;;  %v20454_v51 = vld [vmem:[#allocation8 + $0x1f8] ss:$48 sps:$4 sm:$0xff]  }
 0x3d2   :  { %7162 = vmatprep.subr.bf16.mxu0 %v20381_v53  ;;  %7244 = vmatprep.subr.bf16.mxu1 %v20384_v54  ;;  %v20459_v53 = vld [vmem:[#allocation8 + $0x254] ss:$48 sps:$4 sm:$0xff]   ;;  %v20457_v54 = vld [vmem:[#allocation8 + $0x250] ss:$48 sps:$4 sm:$0xff]  }
 0x3d5   :  { %7163 = vmatpush1.bf16.msra.mxu0 %v20379_v55  ;;  %7245 = vmatpush1.bf16.msra.mxu1 %v20382_v56  ;;  %v20462_v55 = vld [vmem:[#allocation8 + $0x25c] ss:$48 sps:$4 sm:$0xff]   ;;  %v20460_v56 = vld [vmem:[#allocation8 + $0x258] ss:$48 sps:$4 sm:$0xff]  }
 0x3d6   :  { %7164 = vmatprep.subr.bf16.mxu0 %v20387_v57  ;;  %7246 = vmatprep.subr.bf16.mxu1 %v20390_v58  ;;  %v20465_v57 = vld [vmem:[#allocation8 + $0x2b4] ss:$48 sps:$4 sm:$0xff]   ;;  %v20463_v58 = vld [vmem:[#allocation8 + $0x2b0] ss:$48 sps:$4 sm:$0xff]  }
 0x3d9   :  { %7165 = vmatpush1.bf16.msra.mxu0 %v20385_v12  ;;  %7247 = vmatpush1.bf16.msra.mxu1 %v20388_v13  ;;  %v20468_v12 = vld [vmem:[#allocation8 + $0x2bc] ss:$48 sps:$4 sm:$0xff]   ;;  %v20466_v13 = vld [vmem:[#allocation8 + $0x2b8] ss:$48 sps:$4 sm:$0xff]  }
 0x3da   :  { %7166 = vmatprep.subr.bf16.mxu0 %v20393_v59  ;;  %7248 = vmatprep.subr.bf16.mxu1 %v20396_v60  ;;  %v20471_v59 = vld [vmem:[#allocation8 + $0x314] ss:$48 sps:$4 sm:$0xff]   ;;  %v20469_v60 = vld [vmem:[#allocation8 + $0x310] ss:$48 sps:$4 sm:$0xff]  }
 0x3dd   :  { %7167 = vmatpush1.bf16.msra.mxu0 %v20391_v61  ;;  %7249 = vmatpush1.bf16.msra.mxu1 %v20394_v62  ;;  %v20474_v61 = vld [vmem:[#allocation8 + $0x31c] ss:$48 sps:$4 sm:$0xff]   ;;  %v20472_v62 = vld [vmem:[#allocation8 + $0x318] ss:$48 sps:$4 sm:$0xff]  }
 0x3de   :  { %7168 = vmatprep.subr.bf16.mxu0 %v20399_v63  ;;  %7250 = vmatprep.subr.bf16.mxu1 %v20402_v3  ;;  %v20477_v63 = vld [vmem:[#allocation8 + $0x374] ss:$48 sps:$4 sm:$0xff]   ;;  %v20475_v3 = vld [vmem:[#allocation8 + $0x370] ss:$48 sps:$4 sm:$0xff]  }
 0x3e1   :  { %7169 = vmatpush1.bf16.msra.mxu0 %v20397_v4  ;;  %7251 = vmatpush1.bf16.msra.mxu1 %v20400_v0  ;;  %v20480_v4 = vld [vmem:[#allocation8 + $0x37c] ss:$48 sps:$4 sm:$0xff]   ;;  %v20478_v0 = vld [vmem:[#allocation8 + $0x378] ss:$48 sps:$4 sm:$0xff]  }
 0x3e2   :  { %7170 = vmatprep.subr.bf16.mxu0 %v20405_v8  ;;  %7252 = vmatprep.subr.bf16.mxu1 %v20408_v1  ;;  %v20483_v8 = vld [vmem:[#allocation8 + $0x3d4] ss:$48 sps:$4 sm:$0xff]   ;;  %v20481_v1 = vld [vmem:[#allocation8 + $0x3d0] ss:$48 sps:$4 sm:$0xff]  }
 0x3e5   :  { %7171 = vmatpush1.bf16.msra.mxu0 %v20403_v2  ;;  %7253 = vmatpush1.bf16.msra.mxu1 %v20406_v6  ;;  %v20486_v2 = vld [vmem:[#allocation8 + $0x3dc] ss:$48 sps:$4 sm:$0xff]   ;;  %v20484_v6 = vld [vmem:[#allocation8 + $0x3d8] ss:$48 sps:$4 sm:$0xff]  }
 0x3e6   :  { %7172 = vmatprep.subr.bf16.mxu0 %v20411_v7  ;;  %7254 = vmatprep.subr.bf16.mxu1 %v20414_v11  ;;  %v20489_v7 = vld [vmem:[#allocation8 + $0x434] ss:$48 sps:$4 sm:$0xff]   ;;  %v20487_v11 = vld [vmem:[#allocation8 + $0x430] ss:$48 sps:$4 sm:$0xff]  }
 0x3e9   :  { %7173 = vmatpush1.bf16.msra.mxu0 %v20409_v14  ;;  %7255 = vmatpush1.bf16.msra.mxu1 %v20412_v5  ;;  %v20492_v14 = vld [vmem:[#allocation8 + $0x43c] ss:$48 sps:$4 sm:$0xff]   ;;  %v20490_v5 = vld [vmem:[#allocation8 + $0x438] ss:$48 sps:$4 sm:$0xff]  }
 0x3ea   :  { %7174 = vmatprep.subr.bf16.mxu0 %v20417_v17  ;;  %7256 = vmatprep.subr.bf16.mxu1 %v20420_v24  ;;  %v20495_v17 = vld [vmem:[#allocation8 + $0x494] ss:$48 sps:$4 sm:$0xff]   ;;  %v20493_v24 = vld [vmem:[#allocation8 + $0x490] ss:$48 sps:$4 sm:$0xff]  }
 0x3ed   :  { %7175 = vmatpush1.bf16.msra.mxu0 %v20415_v25  ;;  %7257 = vmatpush1.bf16.msra.mxu1 %v20418_v27  ;;  %v20498_v25 = vld [vmem:[#allocation8 + $0x49c] ss:$48 sps:$4 sm:$0xff]   ;;  %v20496_v27 = vld [vmem:[#allocation8 + $0x498] ss:$48 sps:$4 sm:$0xff]  }
 0x3ee   :  { %7267 = vmatprep.subr.bf16.mxu0 %v20423_v28  ;;  %7349 = vmatprep.subr.bf16.mxu1 %v20426_v29  ;;  %v20501_v28 = vld [vmem:[#allocation8 + $0x4f4] ss:$48 sps:$4 sm:$0xff]   ;;  %v20499_v29 = vld [vmem:[#allocation8 + $0x4f0] ss:$48 sps:$4 sm:$0xff]  }
 0x3f0   :  { %7177 = vmatmul.mubr.bf16.vlgmr.msra.gmra.mrb[16].mxu0 %v23247_v46  ;;  %7259 = vmatmul.mubr.bf16.vlgmr.msra.gmra.mrb[16].mxu1 %v23247_v46 }
 0x3f1   :  { %7268 = vmatpush1.bf16.msra.mxu0 %v20421_v30  ;;  %7299 = vmatprep.mubr.bf16.mxu0 %v23233_v9  ;;  %v20504_v30 = vld [vmem:[#allocation8 + $0x4fc] ss:$48 sps:$4 sm:$0xff]  }
 0x3f2   :  { %7350 = vmatpush1.bf16.msra.mxu1 %v20424_v31  ;;  %7381 = vmatprep.mubr.bf16.mxu1 %v23233_v9  ;;  %v20502_v31 = vld [vmem:[#allocation8 + $0x4f8] ss:$48 sps:$4 sm:$0xff]  }
 0x3f3   :  { %7269 = vmatprep.subr.bf16.mxu0 %v20429_v32  ;;  %7351 = vmatprep.subr.bf16.mxu1 %v20432_v33  ;;  %v20507_v32 = vld [vmem:[#allocation8 + $0x554] ss:$48 sps:$4 sm:$0xff]   ;;  %v20505_v33 = vld [vmem:[#allocation8 + $0x550] ss:$48 sps:$4 sm:$0xff]  }
 0x3f5   :  { %7270 = vmatpush1.bf16.msra.mxu0 %v20427_v34  ;;  %v20510_v34 = vld [vmem:[#allocation8 + $0x55c] ss:$48 sps:$4 sm:$0xff]  }
 0x3f6   :  { %7352 = vmatpush1.bf16.msra.mxu1 %v20430_v35  ;;  %7271 = vmatprep.subr.bf16.mxu0 %v20435_v40  ;;  %v20508_v35 = vld [vmem:[#allocation8 + $0x558] ss:$48 sps:$4 sm:$0xff]   ;;  %v20513_v40 = vld [vmem:[#allocation8 + $0x5b4] ss:$48 sps:$4 sm:$0xff]  }
 0x3f7   :  { %7353 = vmatprep.subr.bf16.mxu1 %v20438_v41  ;;  %v20511_v41 = vld [vmem:[#allocation8 + $0x5b0] ss:$48 sps:$4 sm:$0xff]  }
 0x3f9   :  { %7272 = vmatpush1.bf16.msra.mxu0 %v20433_v18  ;;  %v20516_v18 = vld [vmem:[#allocation8 + $0x5bc] ss:$48 sps:$4 sm:$0xff]  }
 0x3fa   :  { %7354 = vmatpush1.bf16.msra.mxu1 %v20436_v47  ;;  %7273 = vmatprep.subr.bf16.mxu0 %v20441_v42  ;;  %v20514_v47 = vld [vmem:[#allocation8 + $0x5b8] ss:$48 sps:$4 sm:$0xff]   ;;  %v20519_v42 = vld [vmem:[#allocation8 + $0x614] ss:$48 sps:$4 sm:$0xff]  }
 0x3fb   :  { %7355 = vmatprep.subr.bf16.mxu1 %v20444_v44  ;;  %v20517_v44 = vld [vmem:[#allocation8 + $0x610] ss:$48 sps:$4 sm:$0xff]  }
 0x3fd   :  { %7274 = vmatpush1.bf16.msra.mxu0 %v20439_v43  ;;  %v20522_v43 = vld [vmem:[#allocation8 + $0x61c] ss:$48 sps:$4 sm:$0xff]  }
 0x3fe   :  { %7356 = vmatpush1.bf16.msra.mxu1 %v20442_v49  ;;  %7275 = vmatprep.subr.bf16.mxu0 %v20447_v36  ;;  %v20520_v49 = vld [vmem:[#allocation8 + $0x618] ss:$48 sps:$4 sm:$0xff]   ;;  %v20525_v36 = vld [vmem:[#allocation8 + $0x674] ss:$48 sps:$4 sm:$0xff]  }
 0x3ff   :  { %7357 = vmatprep.subr.bf16.mxu1 %v20450_v38  ;;  %v20528_v38 = vld [vmem:[#allocation8 + $0x67c] ss:$48 sps:$4 sm:$0xff]  }
 0x401   :  { %7276 = vmatpush1.bf16.msra.mxu0 %v20445_v37  ;;  %v20523_v37 = vld [vmem:[#allocation8 + $0x670] ss:$48 sps:$4 sm:$0xff]  }
 0x402   :  { %7358 = vmatpush1.bf16.msra.mxu1 %v20448_v39  ;;  %7277 = vmatprep.subr.bf16.mxu0 %v20453_v45  ;;  %v20526_v39 = vld [vmem:[#allocation8 + $0x678] ss:$48 sps:$4 sm:$0xff]   ;;  %v20531_v45 = vld [vmem:[#allocation8 + $0x6d4] ss:$48 sps:$4 sm:$0xff]  }
 0x403   :  { %7359 = vmatprep.subr.bf16.mxu1 %v20456_v50  ;;  %v20529_v50 = vld [vmem:[#allocation8 + $0x6d0] ss:$48 sps:$4 sm:$0xff]  }
 0x405   :  { %7278 = vmatpush1.bf16.msra.mxu0 %v20451_v52  ;;  %v20534_v52 = vld [vmem:[#allocation8 + $0x6dc] ss:$48 sps:$4 sm:$0xff]  }
 0x406   :  { %7360 = vmatpush1.bf16.msra.mxu1 %v20454_v51  ;;  %7279 = vmatprep.subr.bf16.mxu0 %v20459_v53  ;;  %v20532_v51 = vld [vmem:[#allocation8 + $0x6d8] ss:$48 sps:$4 sm:$0xff]   ;;  %v20537_v53 = vld [vmem:[#allocation8 + $0x734] ss:$48 sps:$4 sm:$0xff]  }
 0x407   :  { %7361 = vmatprep.subr.bf16.mxu1 %v20462_v55  ;;  %v20540_v55 = vld [vmem:[#allocation8 + $0x73c] ss:$48 sps:$4 sm:$0xff]  }
 0x409   :  { %7280 = vmatpush1.bf16.msra.mxu0 %v20457_v54  ;;  %v20535_v54 = vld [vmem:[#allocation8 + $0x730] ss:$48 sps:$4 sm:$0xff]  }
 0x40a   :  { %7362 = vmatpush1.bf16.msra.mxu1 %v20460_v56  ;;  %7281 = vmatprep.subr.bf16.mxu0 %v20465_v57  ;;  %v20538_v56 = vld [vmem:[#allocation8 + $0x738] ss:$48 sps:$4 sm:$0xff]   ;;  %v20543_v57 = vld [vmem:[#allocation8 + $0x794] ss:$48 sps:$4 sm:$0xff]  }
 0x40b   :  { %7363 = vmatprep.subr.bf16.mxu1 %v20468_v12  ;;  %v20546_v12 = vld [vmem:[#allocation8 + $0x79c] ss:$48 sps:$4 sm:$0xff]  }
 0x40d   :  { %7282 = vmatpush1.bf16.msra.mxu0 %v20463_v58  ;;  %v20541_v58 = vld [vmem:[#allocation8 + $0x790] ss:$48 sps:$4 sm:$0xff]  }
 0x40e   :  { %7364 = vmatpush1.bf16.msra.mxu1 %v20466_v13  ;;  %7283 = vmatprep.subr.bf16.mxu0 %v20471_v59  ;;  %v20544_v13 = vld [vmem:[#allocation8 + $0x798] ss:$48 sps:$4 sm:$0xff]   ;;  %v20549_v59 = vld [vmem:[#allocation8 + $0x7f4] ss:$48 sps:$4 sm:$0xff]  }
 0x40f   :  { %7365 = vmatprep.subr.bf16.mxu1 %v20474_v61  ;;  %v20552_v61 = vld [vmem:[#allocation8 + $0x7fc] ss:$48 sps:$4 sm:$0xff]  }
 0x411   :  { %7284 = vmatpush1.bf16.msra.mxu0 %v20469_v60  ;;  %v20547_v60 = vld [vmem:[#allocation8 + $0x7f0] ss:$48 sps:$4 sm:$0xff]  }
 0x412   :  { %7366 = vmatpush1.bf16.msra.mxu1 %v20472_v62  ;;  %7285 = vmatprep.subr.bf16.mxu0 %v20477_v63  ;;  %v20550_v62 = vld [vmem:[#allocation8 + $0x7f8] ss:$48 sps:$4 sm:$0xff]   ;;  %v20555_v63 = vld [vmem:[#allocation8 + $0x854] ss:$48 sps:$4 sm:$0xff]  }
 0x413   :  { %7367 = vmatprep.subr.bf16.mxu1 %v20480_v4  ;;  %v20558_v4 = vld [vmem:[#allocation8 + $0x85c] ss:$48 sps:$4 sm:$0xff]  }
 0x415   :  { %7286 = vmatpush1.bf16.msra.mxu0 %v20475_v3  ;;  %v20553_v3 = vld [vmem:[#allocation8 + $0x850] ss:$48 sps:$4 sm:$0xff]  }
 0x416   :  { %7368 = vmatpush1.bf16.msra.mxu1 %v20478_v0  ;;  %7287 = vmatprep.subr.bf16.mxu0 %v20483_v8  ;;  %v20556_v0 = vld [vmem:[#allocation8 + $0x858] ss:$48 sps:$4 sm:$0xff]   ;;  %v20561_v8 = vld [vmem:[#allocation8 + $0x8b4] ss:$48 sps:$4 sm:$0xff]  }
 0x417   :  { %7369 = vmatprep.subr.bf16.mxu1 %v20486_v2  ;;  %v20564_v2 = vld [vmem:[#allocation8 + $0x8bc] ss:$48 sps:$4 sm:$0xff]  }
 0x419   :  { %7288 = vmatpush1.bf16.msra.mxu0 %v20481_v1  ;;  %v20559_v1 = vld [vmem:[#allocation8 + $0x8b0] ss:$48 sps:$4 sm:$0xff]  }
 0x41a   :  { %7370 = vmatpush1.bf16.msra.mxu1 %v20484_v6  ;;  %7289 = vmatprep.subr.bf16.mxu0 %v20489_v7  ;;  %v20562_v6 = vld [vmem:[#allocation8 + $0x8b8] ss:$48 sps:$4 sm:$0xff]   ;;  %v20567_v7 = vld [vmem:[#allocation8 + $0x914] ss:$48 sps:$4 sm:$0xff]  }
 0x41b   :  { %7371 = vmatprep.subr.bf16.mxu1 %v20492_v14  ;;  %v20570_v14 = vld [vmem:[#allocation8 + $0x91c] ss:$48 sps:$4 sm:$0xff]  }
 0x41d   :  { %7290 = vmatpush1.bf16.msra.mxu0 %v20487_v11  ;;  %v20565_v11 = vld [vmem:[#allocation8 + $0x910] ss:$48 sps:$4 sm:$0xff]  }
 0x41e   :  { %7372 = vmatpush1.bf16.msra.mxu1 %v20490_v5  ;;  %7291 = vmatprep.subr.bf16.mxu0 %v20495_v17  ;;  %v20568_v5 = vld [vmem:[#allocation8 + $0x918] ss:$48 sps:$4 sm:$0xff]   ;;  %v20573_v17 = vld [vmem:[#allocation8 + $0x974] ss:$48 sps:$4 sm:$0xff]  }
 0x41f   :  { %7373 = vmatprep.subr.bf16.mxu1 %v20498_v25  ;;  %v20576_v25 = vld [vmem:[#allocation8 + $0x97c] ss:$48 sps:$4 sm:$0xff]  }
 0x421   :  { %7292 = vmatpush1.bf16.msra.mxu0 %v20493_v24  ;;  %v20571_v24 = vld [vmem:[#allocation8 + $0x970] ss:$48 sps:$4 sm:$0xff]  }
 0x422   :  { %7374 = vmatpush1.bf16.msra.mxu1 %v20496_v27  ;;  %7293 = vmatprep.subr.bf16.mxu0 %v20501_v28  ;;  %v20574_v27 = vld [vmem:[#allocation8 + $0x978] ss:$48 sps:$4 sm:$0xff]   ;;  %v20579_v28 = vld [vmem:[#allocation8 + $0x9d4] ss:$48 sps:$4 sm:$0xff]  }
 0x423   :  { %7375 = vmatprep.subr.bf16.mxu1 %v20504_v30  ;;  %v20582_v30 = vld [vmem:[#allocation8 + $0x9dc] ss:$48 sps:$4 sm:$0xff]  }
 0x425   :  { %7294 = vmatpush1.bf16.msra.mxu0 %v20499_v29  ;;  %v20577_v29 = vld [vmem:[#allocation8 + $0x9d0] ss:$48 sps:$4 sm:$0xff]  }
 0x426   :  { %7376 = vmatpush1.bf16.msra.mxu1 %v20502_v31  ;;  %7295 = vmatprep.subr.bf16.mxu0 %v20507_v32  ;;  %v20580_v31 = vld [vmem:[#allocation8 + $0x9d8] ss:$48 sps:$4 sm:$0xff]   ;;  %v20585_v32 = vld [vmem:[#allocation8 + $0xa34] ss:$48 sps:$4 sm:$0xff]  }
 0x427   :  { %7377 = vmatprep.subr.bf16.mxu1 %v20510_v34  ;;  %v20588_v34 = vld [vmem:[#allocation8 + $0xa3c] ss:$48 sps:$4 sm:$0xff]  }
 0x429   :  { %7296 = vmatpush1.bf16.msra.mxu0 %v20505_v33  ;;  %v20583_v33 = vld [vmem:[#allocation8 + $0xa30] ss:$48 sps:$4 sm:$0xff]  }
 0x42a   :  { %7378 = vmatpush1.bf16.msra.mxu1 %v20508_v35  ;;  %7297 = vmatprep.subr.bf16.mxu0 %v20513_v40  ;;  %v20586_v35 = vld [vmem:[#allocation8 + $0xa38] ss:$48 sps:$4 sm:$0xff]   ;;  %v20591_v40 = vld [vmem:[#allocation8 + $0xa94] ss:$48 sps:$4 sm:$0xff]  }
 0x42b   :  { %7379 = vmatprep.subr.bf16.mxu1 %v20516_v18  ;;  %v20594_v18 = vld [vmem:[#allocation8 + $0xa9c] ss:$48 sps:$4 sm:$0xff]  }
 0x42d   :  { %7298 = vmatpush1.bf16.msra.mxu0 %v20511_v41  ;;  %v20589_v41 = vld [vmem:[#allocation8 + $0xa90] ss:$48 sps:$4 sm:$0xff]  }
 0x42e   :  { %7380 = vmatpush1.bf16.msra.mxu1 %v20514_v47  ;;  %7308 = vmatprep.subr.bf16.mxu0 %v20519_v42  ;;  %v20592_v47 = vld [vmem:[#allocation8 + $0xa98] ss:$48 sps:$4 sm:$0xff]   ;;  %v20597_v42 = vld [vmem:[#allocation8 + $0xaf4] ss:$48 sps:$4 sm:$0xff]  }
 0x42f   :  { %7390 = vmatprep.subr.bf16.mxu1 %v20522_v43  ;;  %v20595_v43 = vld [vmem:[#allocation8 + $0xaf0] ss:$48 sps:$4 sm:$0xff]  }
 0x430   :  { %7300 = vmatmul.mubr.bf16.vlgmr.msra.gmra.mrb[20].mxu0 %v23235_v10 }
 0x431   :  { %7382 = vmatmul.mubr.bf16.vlgmr.msra.gmra.mrb[20].mxu1 %v23235_v10  ;;  %7309 = vmatpush1.bf16.msra.mxu0 %v20517_v44  ;;  %v20600_v44 = vld [vmem:[#allocation8 + $0xafc] ss:$48 sps:$4 sm:$0xff]  }
 0x432   :  { %7340 = vmatprep.mubr.bf16.mxu0 %v23241_v15  ;;  %7391 = vmatpush1.bf16.msra.mxu1 %v20520_v49  ;;  %v20598_v49 = vld [vmem:[#allocation8 + $0xaf8] ss:$48 sps:$4 sm:$0xff]  }
 0x433   :  { %7422 = vmatprep.mubr.bf16.mxu1 %v23241_v15  ;;  %7310 = vmatprep.subr.bf16.mxu0 %v20525_v36  ;;  %v20603_v36 = vld [vmem:[#allocation8 + $0xb54] ss:$48 sps:$4 sm:$0xff]  }
 0x434   :  { %7392 = vmatprep.subr.bf16.mxu1 %v20528_v38  ;;  %v20606_v38 = vld [vmem:[#allocation8 + $0xb5c] ss:$48 sps:$4 sm:$0xff]  }
 0x435   :  { %7311 = vmatpush1.bf16.msra.mxu0 %v20523_v37  ;;  %v20601_v37 = vld [vmem:[#allocation8 + $0xb50] ss:$48 sps:$4 sm:$0xff]  }
 0x436   :  { %7393 = vmatpush1.bf16.msra.mxu1 %v20526_v39  ;;  %7312 = vmatprep.subr.bf16.mxu0 %v20531_v45  ;;  %v20604_v39 = vld [vmem:[#allocation8 + $0xb58] ss:$48 sps:$4 sm:$0xff]   ;;  %v20609_v45 = vld [vmem:[#allocation8 + $0xbb4] ss:$48 sps:$4 sm:$0xff]  }
 0x437   :  { %7394 = vmatprep.subr.bf16.mxu1 %v20534_v52  ;;  %v20607_v52 = vld [vmem:[#allocation8 + $0xbb0] ss:$48 sps:$4 sm:$0xff]  }
 0x439   :  { %7313 = vmatpush1.bf16.msra.mxu0 %v20529_v50  ;;  %v20612_v50 = vld [vmem:[#allocation8 + $0xbbc] ss:$48 sps:$4 sm:$0xff]  }
 0x43a   :  { %7395 = vmatpush1.bf16.msra.mxu1 %v20532_v51  ;;  %7314 = vmatprep.subr.bf16.mxu0 %v20537_v53  ;;  %v20610_v51 = vld [vmem:[#allocation8 + $0xbb8] ss:$48 sps:$4 sm:$0xff]   ;;  %v20615_v53 = vld [vmem:[#allocation8 + $0x24] ss:$48 sps:$4 sm:$0xff]  }
 0x43b   :  { %7396 = vmatprep.subr.bf16.mxu1 %v20540_v55  ;;  %v20613_v55 = vld [vmem:[#allocation8 + $0x20] ss:$48 sps:$4 sm:$0xff]  }
 0x43d   :  { %7315 = vmatpush1.bf16.msra.mxu0 %v20535_v54  ;;  %v20618_v54 = vld [vmem:[#allocation8 + $0x624] ss:$48 sps:$4 sm:$0xff]  }
 0x43e   :  { %7397 = vmatpush1.bf16.msra.mxu1 %v20538_v56  ;;  %7316 = vmatprep.subr.bf16.mxu0 %v20543_v57  ;;  %v20616_v56 = vld [vmem:[#allocation8 + $0x620] ss:$48 sps:$4 sm:$0xff]   ;;  %v20621_v57 = vld [vmem:[#allocation8 + $0x84] ss:$48 sps:$4 sm:$0xff]  }
 0x43f   :  { %7398 = vmatprep.subr.bf16.mxu1 %v20546_v12  ;;  %v20619_v12 = vld [vmem:[#allocation8 + $0x80] ss:$48 sps:$4 sm:$0xff]  }
 0x441   :  { %7317 = vmatpush1.bf16.msra.mxu0 %v20541_v58  ;;  %v20624_v58 = vld [vmem:[#allocation8 + $0x684] ss:$48 sps:$4 sm:$0xff]  }
 0x442   :  { %7399 = vmatpush1.bf16.msra.mxu1 %v20544_v13  ;;  %7318 = vmatprep.subr.bf16.mxu0 %v20549_v59  ;;  %v20622_v13 = vld [vmem:[#allocation8 + $0x680] ss:$48 sps:$4 sm:$0xff]   ;;  %v20627_v59 = vld [vmem:[#allocation8 + $0xe4] ss:$48 sps:$4 sm:$0xff]  }
 0x443   :  { %7400 = vmatprep.subr.bf16.mxu1 %v20552_v61  ;;  %v20630_v61 = vld [vmem:[#allocation8 + $0x6e4] ss:$48 sps:$4 sm:$0xff]  }
 0x445   :  { %7319 = vmatpush1.bf16.msra.mxu0 %v20547_v60  ;;  %v20625_v60 = vld [vmem:[#allocation8 + $0xe0] ss:$48 sps:$4 sm:$0xff]  }
 0x446   :  { %7401 = vmatpush1.bf16.msra.mxu1 %v20550_v62  ;;  %7320 = vmatprep.subr.bf16.mxu0 %v20555_v63  ;;  %v20628_v62 = vld [vmem:[#allocation8 + $0x6e0] ss:$48 sps:$4 sm:$0xff]   ;;  %v20633_v63 = vld [vmem:[#allocation8 + $0x144] ss:$48 sps:$4 sm:$0xff]  }
 0x447   :  { %7402 = vmatprep.subr.bf16.mxu1 %v20558_v4  ;;  %v20636_v4 = vld [vmem:[#allocation8 + $0x744] ss:$48 sps:$4 sm:$0xff]  }
 0x449   :  { %7321 = vmatpush1.bf16.msra.mxu0 %v20553_v3  ;;  %v20631_v3 = vld [vmem:[#allocation8 + $0x140] ss:$48 sps:$4 sm:$0xff]  }
 0x44a   :  { %7403 = vmatpush1.bf16.msra.mxu1 %v20556_v0  ;;  %7322 = vmatprep.subr.bf16.mxu0 %v20561_v8  ;;  %v20634_v0 = vld [vmem:[#allocation8 + $0x740] ss:$48 sps:$4 sm:$0xff]   ;;  %v20639_v8 = vld [vmem:[#allocation8 + $0x1a4] ss:$48 sps:$4 sm:$0xff]  }
 0x44b   :  { %7404 = vmatprep.subr.bf16.mxu1 %v20564_v2  ;;  %v20642_v2 = vld [vmem:[#allocation8 + $0x7a4] ss:$48 sps:$4 sm:$0xff]  }
 0x44d   :  { %7323 = vmatpush1.bf16.msra.mxu0 %v20559_v1  ;;  %v20637_v1 = vld [vmem:[#allocation8 + $0x1a0] ss:$48 sps:$4 sm:$0xff]  }
 0x44e   :  { %7405 = vmatpush1.bf16.msra.mxu1 %v20562_v6  ;;  %7324 = vmatprep.subr.bf16.mxu0 %v20567_v7  ;;  %v20640_v6 = vld [vmem:[#allocation8 + $0x7a0] ss:$48 sps:$4 sm:$0xff]   ;;  %v20645_v7 = vld [vmem:[#allocation8 + $0x204] ss:$48 sps:$4 sm:$0xff]  }
 0x44f   :  { %7406 = vmatprep.subr.bf16.mxu1 %v20570_v14  ;;  %v20648_v14 = vld [vmem:[#allocation8 + $0x804] ss:$48 sps:$4 sm:$0xff]  }
 0x451   :  { %7325 = vmatpush1.bf16.msra.mxu0 %v20565_v11  ;;  %v20643_v11 = vld [vmem:[#allocation8 + $0x200] ss:$48 sps:$4 sm:$0xff]  }
 0x452   :  { %7407 = vmatpush1.bf16.msra.mxu1 %v20568_v5  ;;  %7326 = vmatprep.subr.bf16.mxu0 %v20573_v17  ;;  %v20646_v5 = vld [vmem:[#allocation8 + $0x800] ss:$48 sps:$4 sm:$0xff]   ;;  %v20651_v17 = vld [vmem:[#allocation8 + $0x264] ss:$48 sps:$4 sm:$0xff]  }
 0x453   :  { %7408 = vmatprep.subr.bf16.mxu1 %v20576_v25  ;;  %v20654_v25 = vld [vmem:[#allocation8 + $0x864] ss:$48 sps:$4 sm:$0xff]  }
 0x455   :  { %7327 = vmatpush1.bf16.msra.mxu0 %v20571_v24  ;;  %v20649_v24 = vld [vmem:[#allocation8 + $0x260] ss:$48 sps:$4 sm:$0xff]  }
 0x456   :  { %7409 = vmatpush1.bf16.msra.mxu1 %v20574_v27  ;;  %7328 = vmatprep.subr.bf16.mxu0 %v20579_v28  ;;  %v20652_v27 = vld [vmem:[#allocation8 + $0x860] ss:$48 sps:$4 sm:$0xff]   ;;  %v20657_v28 = vld [vmem:[#allocation8 + $0x2c4] ss:$48 sps:$4 sm:$0xff]  }
 0x457   :  { %7410 = vmatprep.subr.bf16.mxu1 %v20582_v30  ;;  %v20660_v30 = vld [vmem:[#allocation8 + $0x8c4] ss:$48 sps:$4 sm:$0xff]  }
 0x459   :  { %7329 = vmatpush1.bf16.msra.mxu0 %v20577_v29  ;;  %v20655_v29 = vld [vmem:[#allocation8 + $0x2c0] ss:$48 sps:$4 sm:$0xff]  }
 0x45a   :  { %7411 = vmatpush1.bf16.msra.mxu1 %v20580_v31  ;;  %7330 = vmatprep.subr.bf16.mxu0 %v20585_v32  ;;  %v20658_v31 = vld [vmem:[#allocation8 + $0x8c0] ss:$48 sps:$4 sm:$0xff]   ;;  %v20663_v32 = vld [vmem:[#allocation8 + $0x324] ss:$48 sps:$4 sm:$0xff]  }
 0x45b   :  { %7412 = vmatprep.subr.bf16.mxu1 %v20588_v34  ;;  %v20666_v34 = vld [vmem:[#allocation8 + $0x924] ss:$48 sps:$4 sm:$0xff]  }
 0x45d   :  { %7331 = vmatpush1.bf16.msra.mxu0 %v20583_v33  ;;  %v20661_v33 = vld [vmem:[#allocation8 + $0x320] ss:$48 sps:$4 sm:$0xff]  }
 0x45e   :  { %7413 = vmatpush1.bf16.msra.mxu1 %v20586_v35  ;;  %7332 = vmatprep.subr.bf16.mxu0 %v20591_v40  ;;  %v20664_v35 = vld [vmem:[#allocation8 + $0x920] ss:$48 sps:$4 sm:$0xff]   ;;  %v20669_v40 = vld [vmem:[#allocation8 + $0x384] ss:$48 sps:$4 sm:$0xff]  }
 0x45f   :  { %7414 = vmatprep.subr.bf16.mxu1 %v20594_v18  ;;  %v20672_v18 = vld [vmem:[#allocation8 + $0x984] ss:$48 sps:$4 sm:$0xff]  }
 0x461   :  { %7333 = vmatpush1.bf16.msra.mxu0 %v20589_v41  ;;  %v20667_v41 = vld [vmem:[#allocation8 + $0x380] ss:$48 sps:$4 sm:$0xff]  }
 0x462   :  { %7415 = vmatpush1.bf16.msra.mxu1 %v20592_v47  ;;  %7334 = vmatprep.subr.bf16.mxu0 %v20597_v42  ;;  %v20670_v47 = vld [vmem:[#allocation8 + $0x980] ss:$48 sps:$4 sm:$0xff]   ;;  %v20675_v42 = vld [vmem:[#allocation8 + $0x3e4] ss:$48 sps:$4 sm:$0xff]  }
 0x463   :  { %7416 = vmatprep.subr.bf16.mxu1 %v20600_v44  ;;  %v20678_v44 = vld [vmem:[#allocation8 + $0x9e4] ss:$48 sps:$4 sm:$0xff]  }
 0x465   :  { %7335 = vmatpush1.bf16.msra.mxu0 %v20595_v43  ;;  %v20673_v43 = vld [vmem:[#allocation8 + $0x3e0] ss:$48 sps:$4 sm:$0xff]  }
 0x466   :  { %7417 = vmatpush1.bf16.msra.mxu1 %v20598_v49  ;;  %7336 = vmatprep.subr.bf16.mxu0 %v20603_v36  ;;  %v20676_v49 = vld [vmem:[#allocation8 + $0x9e0] ss:$48 sps:$4 sm:$0xff]   ;;  %v20681_v36 = vld [vmem:[#allocation8 + $0x444] ss:$48 sps:$4 sm:$0xff]  }
 0x467   :  { %7418 = vmatprep.subr.bf16.mxu1 %v20606_v38  ;;  %v20684_v38 = vld [vmem:[#allocation8 + $0xa44] ss:$48 sps:$4 sm:$0xff]  }
 0x469   :  { %7337 = vmatpush1.bf16.msra.mxu0 %v20601_v37  ;;  %v20679_v37 = vld [vmem:[#allocation8 + $0x440] ss:$48 sps:$4 sm:$0xff]  }
 0x46a   :  { %7419 = vmatpush1.bf16.msra.mxu1 %v20604_v39  ;;  %7338 = vmatprep.subr.bf16.mxu0 %v20609_v45  ;;  %v20682_v39 = vld [vmem:[#allocation8 + $0xa40] ss:$48 sps:$4 sm:$0xff]   ;;  %v20687_v45 = vld [vmem:[#allocation8 + $0x4a4] ss:$48 sps:$4 sm:$0xff]  }
 0x46b   :  { %7420 = vmatprep.subr.bf16.mxu1 %v20612_v50  ;;  %v20690_v50 = vld [vmem:[#allocation8 + $0xaa4] ss:$48 sps:$4 sm:$0xff]  }
 0x46d   :  { %7339 = vmatpush1.bf16.msra.mxu0 %v20607_v52  ;;  %v20685_v52 = vld [vmem:[#allocation8 + $0x4a0] ss:$48 sps:$4 sm:$0xff]  }
 0x46e   :  { %7421 = vmatpush1.bf16.msra.mxu1 %v20610_v51  ;;  %7431 = vmatprep.subr.bf16.mxu0 %v20615_v53  ;;  %v20688_v51 = vld [vmem:[#allocation8 + $0xaa0] ss:$48 sps:$4 sm:$0xff]   ;;  %v20693_v53 = vld [vmem:[#allocation8 + $0x504] ss:$48 sps:$4 sm:$0xff]  }
 0x46f   :  { %7472 = vmatprep.subr.bf16.mxu1 %v20618_v54  ;;  %v20691_v54 = vld [vmem:[#allocation8 + $0x500] ss:$48 sps:$4 sm:$0xff]  }
 0x470   :  { %7341 = vmatmul.mubr.bf16.vlgmr.msra.gmra.mrb[20].mxu0 %v23247_v46 }
 0x471   :  { %7423 = vmatmul.mubr.bf16.vlgmr.msra.gmra.mrb[20].mxu1 %v23247_v46  ;;  %7432 = vmatpush1.bf16.msra.mxu0 %v20613_v55  ;;  %v20696_v55 = vld [vmem:[#allocation8 + $0xb04] ss:$48 sps:$4 sm:$0xff]  }
 0x472   :  { %7463 = vmatprep.mubr.bf16.mxu0 %v23233_v9  ;;  %7473 = vmatpush1.bf16.msra.mxu1 %v20616_v56  ;;  %v20694_v56 = vld [vmem:[#allocation8 + $0xb00] ss:$48 sps:$4 sm:$0xff]  }
 0x473   :  { %7504 = vmatprep.mubr.bf16.mxu1 %v23241_v15  ;;  %7433 = vmatprep.subr.bf16.mxu0 %v20621_v57  ;;  %v20699_v57 = vld [vmem:[#allocation8 + $0x564] ss:$48 sps:$4 sm:$0xff]  }
 0x474   :  { %7474 = vmatprep.subr.bf16.mxu1 %v20624_v58  ;;  %v20697_v58 = vld [vmem:[#allocation8 + $0x560] ss:$48 sps:$4 sm:$0xff]  }
 0x475   :  { %7434 = vmatpush1.bf16.msra.mxu0 %v20619_v12  ;;  %v20702_v12 = vld [vmem:[#allocation8 + $0xb64] ss:$48 sps:$4 sm:$0xff]  }
 0x476   :  { %7475 = vmatpush1.bf16.msra.mxu1 %v20622_v13  ;;  %7435 = vmatprep.subr.bf16.mxu0 %v20627_v59  ;;  %v20700_v13 = vld [vmem:[#allocation8 + $0xb60] ss:$48 sps:$4 sm:$0xff]   ;;  %v20705_v59 = vld [vmem:[#allocation8 + $0x5c4] ss:$48 sps:$4 sm:$0xff]  }
 0x477   :  { %7476 = vmatprep.subr.bf16.mxu1 %v20630_v61  ;;  %v20708_v61 = vld [vmem:[#allocation8 + $0xbc4] ss:$48 sps:$4 sm:$0xff]  }
 0x479   :  { %7436 = vmatpush1.bf16.msra.mxu0 %v20625_v60  ;;  %v20703_v60 = vld [vmem:[#allocation8 + $0x5c0] ss:$48 sps:$4 sm:$0xff]  }
 0x47a   :  { %7477 = vmatpush1.bf16.msra.mxu1 %v20628_v62  ;;  %7437 = vmatprep.subr.bf16.mxu0 %v20633_v63  ;;  %v20706_v62 = vld [vmem:[#allocation8 + $0xbc0] ss:$48 sps:$4 sm:$0xff]   ;;  %v20711_v63 = vld [vmem:[#allocation8 + $0x2c] ss:$48 sps:$4 sm:$0xff]  }
 0x47b   :  { %7478 = vmatprep.subr.bf16.mxu1 %v20636_v4  ;;  %v20709_v4 = vld [vmem:[#allocation8 + $0x28] ss:$48 sps:$4 sm:$0xff]  }
 0x47d   :  { %7438 = vmatpush1.bf16.msra.mxu0 %v20631_v3  ;;  %v20714_v3 = vld [vmem:[#allocation8 + $0x62c] ss:$48 sps:$4 sm:$0xff]  }
 0x47e   :  { %7479 = vmatpush1.bf16.msra.mxu1 %v20634_v0  ;;  %7439 = vmatprep.subr.bf16.mxu0 %v20639_v8  ;;  %v20712_v0 = vld [vmem:[#allocation8 + $0x628] ss:$48 sps:$4 sm:$0xff]  }
 0x47f   :  { %7480 = vmatprep.subr.bf16.mxu1 %v20642_v2  ;;  %v20715_v8 = vld [vmem:[#allocation8 + $0x88] ss:$48 sps:$4 sm:$0xff]   ;;  %v20720_v2 = vld [vmem:[#allocation8 + $0x68c] ss:$48 sps:$4 sm:$0xff]  }
 0x481   :  { %7440 = vmatpush1.bf16.msra.mxu0 %v20637_v1  ;;  %v20717_v1 = vld [vmem:[#allocation8 + $0x8c] ss:$48 sps:$4 sm:$0xff]  }
 0x482   :  { %7481 = vmatpush1.bf16.msra.mxu1 %v20640_v6  ;;  %7441 = vmatprep.subr.bf16.mxu0 %v20645_v7  ;;  %v20718_v6 = vld [vmem:[#allocation8 + $0x688] ss:$48 sps:$4 sm:$0xff]   ;;  %v20723_v7 = vld [vmem:[#allocation8 + $0xec] ss:$48 sps:$4 sm:$0xff]  }
 0x483   :  { %7482 = vmatprep.subr.bf16.mxu1 %v20648_v14  ;;  %v20721_v14 = vld [vmem:[#allocation8 + $0xe8] ss:$48 sps:$4 sm:$0xff]  }
 0x485   :  { %7442 = vmatpush1.bf16.msra.mxu0 %v20643_v11  ;;  %v20726_v11 = vld [vmem:[#allocation8 + $0x6ec] ss:$48 sps:$4 sm:$0xff]  }
 0x486   :  { %7483 = vmatpush1.bf16.msra.mxu1 %v20646_v5  ;;  %7443 = vmatprep.subr.bf16.mxu0 %v20651_v17  ;;  %v20724_v5 = vld [vmem:[#allocation8 + $0x6e8] ss:$48 sps:$4 sm:$0xff]   ;;  %v20729_v17 = vld [vmem:[#allocation8 + $0x14c] ss:$48 sps:$4 sm:$0xff]  }
 0x487   :  { %7484 = vmatprep.subr.bf16.mxu1 %v20654_v25  ;;  %v20727_v25 = vld [vmem:[#allocation8 + $0x148] ss:$48 sps:$4 sm:$0xff]  }
 0x489   :  { %7444 = vmatpush1.bf16.msra.mxu0 %v20649_v24  ;;  %v20732_v24 = vld [vmem:[#allocation8 + $0x74c] ss:$48 sps:$4 sm:$0xff]  }
 0x48a   :  { %7485 = vmatpush1.bf16.msra.mxu1 %v20652_v27  ;;  %7445 = vmatprep.subr.bf16.mxu0 %v20657_v28  ;;  %v20735_v27 = vld [vmem:[#allocation8 + $0x1ac] ss:$48 sps:$4 sm:$0xff]  }
 0x48b   :  { %7486 = vmatprep.subr.bf16.mxu1 %v20660_v30  ;;  %v20738_v28 = vld [vmem:[#allocation8 + $0x7ac] ss:$48 sps:$4 sm:$0xff]  }
 0x48c   :  { %v20741_v30 = vld [vmem:[#allocation8 + $0x20c] ss:$48 sps:$4 sm:$0xff]  }
 0x48d   :  { %7446 = vmatpush1.bf16.msra.mxu0 %v20655_v29  ;;  %v20736_v29 = vld [vmem:[#allocation8 + $0x7a8] ss:$48 sps:$4 sm:$0xff]  }
 0x48e   :  { %7487 = vmatpush1.bf16.msra.mxu1 %v20658_v31  ;;  %7447 = vmatprep.subr.bf16.mxu0 %v20663_v32  ;;  %v20744_v31 = vld [vmem:[#allocation8 + $0x80c] ss:$48 sps:$4 sm:$0xff]   ;;  %v20739_v32 = vld [vmem:[#allocation8 + $0x208] ss:$48 sps:$4 sm:$0xff]  }
 0x48f   :  { %7488 = vmatprep.subr.bf16.mxu1 %v20666_v34  ;;  %v20747_v34 = vld [vmem:[#allocation8 + $0x26c] ss:$48 sps:$4 sm:$0xff]  }
 0x491   :  { %7448 = vmatpush1.bf16.msra.mxu0 %v20661_v33  ;;  %v20742_v33 = vld [vmem:[#allocation8 + $0x808] ss:$48 sps:$4 sm:$0xff]  }
 0x492   :  { %7489 = vmatpush1.bf16.msra.mxu1 %v20664_v35  ;;  %7449 = vmatprep.subr.bf16.mxu0 %v20669_v40  ;;  %v20750_v35 = vld [vmem:[#allocation8 + $0x86c] ss:$48 sps:$4 sm:$0xff]   ;;  %v20745_v40 = vld [vmem:[#allocation8 + $0x268] ss:$48 sps:$4 sm:$0xff]  }
 0x493   :  { %7490 = vmatprep.subr.bf16.mxu1 %v20672_v18  ;;  %v20753_v18 = vld [vmem:[#allocation8 + $0x2cc] ss:$48 sps:$4 sm:$0xff]  }
 0x495   :  { %7450 = vmatpush1.bf16.msra.mxu0 %v20667_v41  ;;  %v20748_v41 = vld [vmem:[#allocation8 + $0x868] ss:$48 sps:$4 sm:$0xff]  }
 0x496   :  { %7491 = vmatpush1.bf16.msra.mxu1 %v20670_v47  ;;  %7451 = vmatprep.subr.bf16.mxu0 %v20675_v42  ;;  %v20756_v47 = vld [vmem:[#allocation8 + $0x8cc] ss:$48 sps:$4 sm:$0xff]   ;;  %v20751_v42 = vld [vmem:[#allocation8 + $0x2c8] ss:$48 sps:$4 sm:$0xff]  }
 0x497   :  { %7492 = vmatprep.subr.bf16.mxu1 %v20678_v44  ;;  %v20759_v44 = vld [vmem:[#allocation8 + $0x32c] ss:$48 sps:$4 sm:$0xff]  }
 0x499   :  { %7452 = vmatpush1.bf16.msra.mxu0 %v20673_v43  ;;  %v20754_v43 = vld [vmem:[#allocation8 + $0x8c8] ss:$48 sps:$4 sm:$0xff]  }
 0x49a   :  { %7493 = vmatpush1.bf16.msra.mxu1 %v20676_v49  ;;  %7453 = vmatprep.subr.bf16.mxu0 %v20681_v36  ;;  %v20762_v49 = vld [vmem:[#allocation8 + $0x92c] ss:$48 sps:$4 sm:$0xff]   ;;  %v20757_v36 = vld [vmem:[#allocation8 + $0x328] ss:$48 sps:$4 sm:$0xff]  }
 0x49b   :  { %7494 = vmatprep.subr.bf16.mxu1 %v20684_v38  ;;  %v20765_v38 = vld [vmem:[#allocation8 + $0x38c] ss:$48 sps:$4 sm:$0xff]  }
 0x49d   :  { %7454 = vmatpush1.bf16.msra.mxu0 %v20679_v37  ;;  %v20760_v37 = vld [vmem:[#allocation8 + $0x928] ss:$48 sps:$4 sm:$0xff]  }
 0x49e   :  { %7495 = vmatpush1.bf16.msra.mxu1 %v20682_v39  ;;  %7455 = vmatprep.subr.bf16.mxu0 %v20687_v45  ;;  %v20768_v39 = vld [vmem:[#allocation8 + $0x98c] ss:$48 sps:$4 sm:$0xff]   ;;  %v20763_v45 = vld [vmem:[#allocation8 + $0x388] ss:$48 sps:$4 sm:$0xff]  }
 0x49f   :  { %7496 = vmatprep.subr.bf16.mxu1 %v20690_v50  ;;  %v20771_v50 = vld [vmem:[#allocation8 + $0x3ec] ss:$48 sps:$4 sm:$0xff]  }
 0x4a1   :  { %7456 = vmatpush1.bf16.msra.mxu0 %v20685_v52  ;;  %v20766_v52 = vld [vmem:[#allocation8 + $0x988] ss:$48 sps:$4 sm:$0xff]  }
 0x4a2   :  { %7497 = vmatpush1.bf16.msra.mxu1 %v20688_v51  ;;  %7457 = vmatprep.subr.bf16.mxu0 %v20693_v53  ;;  %v20774_v51 = vld [vmem:[#allocation8 + $0x9ec] ss:$48 sps:$4 sm:$0xff]   ;;  %v20769_v53 = vld [vmem:[#allocation8 + $0x3e8] ss:$48 sps:$4 sm:$0xff]  }
 0x4a3   :  { %7498 = vmatprep.subr.bf16.mxu1 %v20696_v55  ;;  %v20777_v55 = vld [vmem:[#allocation8 + $0x44c] ss:$48 sps:$4 sm:$0xff]  }
 0x4a5   :  { %7458 = vmatpush1.bf16.msra.mxu0 %v20691_v54  ;;  %v20772_v54 = vld [vmem:[#allocation8 + $0x9e8] ss:$48 sps:$4 sm:$0xff]  }
 0x4a6   :  { %7499 = vmatpush1.bf16.msra.mxu1 %v20694_v56  ;;  %7459 = vmatprep.subr.bf16.mxu0 %v20699_v57  ;;  %v20780_v56 = vld [vmem:[#allocation8 + $0xa4c] ss:$48 sps:$4 sm:$0xff]   ;;  %v20775_v57 = vld [vmem:[#allocation8 + $0x448] ss:$48 sps:$4 sm:$0xff]  }
 0x4a7   :  { %7500 = vmatprep.subr.bf16.mxu1 %v20702_v12  ;;  %v20783_v12 = vld [vmem:[#allocation8 + $0x4ac] ss:$48 sps:$4 sm:$0xff]  }
 0x4a9   :  { %7460 = vmatpush1.bf16.msra.mxu0 %v20697_v58  ;;  %v20778_v58 = vld [vmem:[#allocation8 + $0xa48] ss:$48 sps:$4 sm:$0xff]  }
 0x4aa   :  { %7501 = vmatpush1.bf16.msra.mxu1 %v20700_v13  ;;  %7461 = vmatprep.subr.bf16.mxu0 %v20705_v59  ;;  %v20786_v13 = vld [vmem:[#allocation8 + $0xaac] ss:$48 sps:$4 sm:$0xff]   ;;  %v20781_v59 = vld [vmem:[#allocation8 + $0x4a8] ss:$48 sps:$4 sm:$0xff]  }
 0x4ab   :  { %7502 = vmatprep.subr.bf16.mxu1 %v20708_v61  ;;  %v20789_v61 = vld [vmem:[#allocation8 + $0x50c] ss:$48 sps:$4 sm:$0xff]  }
 0x4ad   :  { %7462 = vmatpush1.bf16.msra.mxu0 %v20703_v60  ;;  %v20784_v60 = vld [vmem:[#allocation8 + $0xaa8] ss:$48 sps:$4 sm:$0xff]  }
 0x4ae   :  { %7503 = vmatpush1.bf16.msra.mxu1 %v20706_v62  ;;  %7513 = vmatprep.subr.bf16.mxu0 %v20711_v63  ;;  %v20792_v62 = vld [vmem:[#allocation8 + $0xb0c] ss:$48 sps:$4 sm:$0xff]   ;;  %v20787_v63 = vld [vmem:[#allocation8 + $0x508] ss:$48 sps:$4 sm:$0xff]  }
 0x4af   :  { %7554 = vmatprep.subr.bf16.mxu1 %v20714_v3  ;;  %v20790_v3 = vld [vmem:[#allocation8 + $0xb08] ss:$48 sps:$4 sm:$0xff]  }
 0x4b0   :  { %7464 = vmatmul.mubr.bf16.vlgmr.msra.gmra.mrb[24].mxu0 %v23235_v10 }
 0x4b1   :  { %7505 = vmatmul.mubr.bf16.vlgmr.msra.gmra.mrb[24].mxu1 %v23247_v46  ;;  %7514 = vmatpush1.bf16.msra.mxu0 %v20709_v4  ;;  %v20795_v4 = vld [vmem:[#allocation8 + $0x56c] ss:$48 sps:$4 sm:$0xff]  }
 0x4b2   :  { %7545 = vmatprep.mubr.bf16.mxu0 %v23233_v9  ;;  %7555 = vmatpush1.bf16.msra.mxu1 %v20712_v0  ;;  %v20730_v9 = vld [vmem:[#allocation8 + $0x748] ss:$48 sps:$4 sm:$0xff]   ;;  %v20798_v0 = vld [vmem:[#allocation8 + $0xb6c] ss:$48 sps:$4 sm:$0xff]  }
 0x4b3   :  { %7586 = vmatprep.mubr.bf16.mxu1 %v23241_v15  ;;  %7515 = vmatprep.subr.bf16.mxu0 %v20717_v1  ;;  %v20733_v15 = vld [vmem:[#allocation8 + $0x1a8] ss:$48 sps:$4 sm:$0xff]  }
 0x4b4   :  { %7556 = vmatprep.subr.bf16.mxu1 %v20720_v2  ;;  %v20796_v1 = vld [vmem:[#allocation8 + $0xb68] ss:$48 sps:$4 sm:$0xff]   ;;  %v20801_v2 = vld [vmem:[#allocation8 + $0x5cc] ss:$48 sps:$4 sm:$0xff]  }
 0x4b5   :  { %7516 = vmatpush1.bf16.msra.mxu0 %v20715_v8  ;;  %v20793_v8 = vld [vmem:[#allocation8 + $0x568] ss:$48 sps:$4 sm:$0xff]  }
 0x4b6   :  { %7557 = vmatpush1.bf16.msra.mxu1 %v20718_v6  ;;  %7517 = vmatprep.subr.bf16.mxu0 %v20723_v7  ;;  %v20804_v6 = vld [vmem:[#allocation8 + $0xbcc] ss:$48 sps:$4 sm:$0xff]   ;;  %v20799_v7 = vld [vmem:[#allocation8 + $0x5c8] ss:$48 sps:$4 sm:$0xff]  }
 0x4b7   :  { %7558 = vmatprep.subr.bf16.mxu1 %v20726_v11  ;;  %v20802_v11 = vld [vmem:[#allocation8 + $0xbc8] ss:$48 sps:$4 sm:$0xff]  }
 0x4b9   :  { %7518 = vmatpush1.bf16.msra.mxu0 %v20721_v14  ;;  %v20807_v14 = vld [vmem:[#allocation9 + $0xc04] ss:$48 sps:$4 sm:$0xff]  }
 0x4ba   :  { %7559 = vmatpush1.bf16.msra.mxu1 %v20724_v5  ;;  %7519 = vmatprep.subr.bf16.mxu0 %v20729_v17  ;;  %v20810_v5 = vld [vmem:[#allocation9 + $0xc0c] ss:$48 sps:$4 sm:$0xff]  }
 0x4bb   :  { %7560 = vmatprep.subr.bf16.mxu1 %v20732_v24  ;;  %v136_v17 = vld [vmem:[#allocation3 + $0x28] sm:$0xff]  ;;  %v20805_v24 = vld [vmem:[#allocation9 + $0xc00] ss:$48 sps:$4 sm:$0xff]  }
 0x4bd   :  { %7520 = vmatpush1.bf16.msra.mxu0 %v20727_v25  ;;  %v20808_v25 = vld [vmem:[#allocation9 + $0xc08] ss:$48 sps:$4 sm:$0xff]  }
 0x4be   :  { %7561 = vmatpush1.bf16.msra.mxu1 %v20730_v9  ;;  %7521 = vmatprep.subr.bf16.mxu0 %v20735_v27  ;;  %v20813_v9 = vld [vmem:[#allocation9 + $0xc64] ss:$48 sps:$4 sm:$0xff]   ;;  %v20816_v27 = vld [vmem:[#allocation9 + $0xc6c] ss:$48 sps:$4 sm:$0xff]  }
 0x4bf   :  { %7562 = vmatprep.subr.bf16.mxu1 %v20738_v28  ;;  %v23265_v28 = vpack.c.bf16 %v136_v17, %v136_v17  ;;  %v20891_v17 = vld [vmem:[#allocation9 + $0x1144] ss:$48 sps:$4 sm:$0xff]  }
 0x4c1   :  { %7522 = vmatpush1.bf16.msra.mxu0 %v20733_v15  ;;  %v20811_v15 = vld [vmem:[#allocation9 + $0xc60] ss:$48 sps:$4 sm:$0xff]  }
 0x4c2   :  { %7563 = vmatpush1.bf16.msra.mxu1 %v20736_v29  ;;  %7523 = vmatprep.subr.bf16.mxu0 %v20741_v30  ;;  %v20814_v29 = vld [vmem:[#allocation9 + $0xc68] ss:$48 sps:$4 sm:$0xff]   ;;  %v20819_v30 = vld [vmem:[#allocation9 + $0xcc4] ss:$48 sps:$4 sm:$0xff]  }
 0x4c3   :  { %7564 = vmatprep.subr.bf16.mxu1 %v20744_v31  ;;  %v20822_v31 = vld [vmem:[#allocation9 + $0xccc] ss:$48 sps:$4 sm:$0xff]  }
 0x4c5   :  { %7524 = vmatpush1.bf16.msra.mxu0 %v20739_v32  ;;  %v20817_v32 = vld [vmem:[#allocation9 + $0xcc0] ss:$48 sps:$4 sm:$0xff]  }
 0x4c6   :  { %7565 = vmatpush1.bf16.msra.mxu1 %v20742_v33  ;;  %7525 = vmatprep.subr.bf16.mxu0 %v20747_v34  ;;  %v20820_v33 = vld [vmem:[#allocation9 + $0xcc8] ss:$48 sps:$4 sm:$0xff]   ;;  %v20823_v34 = vld [vmem:[#allocation9 + $0xd20] ss:$48 sps:$4 sm:$0xff]  }
 0x4c7   :  { %7566 = vmatprep.subr.bf16.mxu1 %v20750_v35  ;;  %v20826_v35 = vld [vmem:[#allocation9 + $0xd28] ss:$48 sps:$4 sm:$0xff]  }
 0x4c9   :  { %7526 = vmatpush1.bf16.msra.mxu0 %v20745_v40  ;;  %v20831_v40 = vld [vmem:[#allocation9 + $0xd84] ss:$48 sps:$4 sm:$0xff]  }
 0x4ca   :  { %7567 = vmatpush1.bf16.msra.mxu1 %v20748_v41  ;;  %7527 = vmatprep.subr.bf16.mxu0 %v20753_v18  ;;  %v20834_v41 = vld [vmem:[#allocation9 + $0xd8c] ss:$48 sps:$4 sm:$0xff]   ;;  %v20829_v18 = vld [vmem:[#allocation9 + $0xd80] ss:$48 sps:$4 sm:$0xff]  }
 0x4cb   :  { %7568 = vmatprep.subr.bf16.mxu1 %v20756_v47  ;;  %v20832_v47 = vld [vmem:[#allocation9 + $0xd88] ss:$48 sps:$4 sm:$0xff]  }
 0x4cd   :  { %7528 = vmatpush1.bf16.msra.mxu0 %v20751_v42  ;;  %v20837_v42 = vld [vmem:[#allocation9 + $0xde4] ss:$48 sps:$4 sm:$0xff]  }
 0x4ce   :  { %7569 = vmatpush1.bf16.msra.mxu1 %v20754_v43  ;;  %7529 = vmatprep.subr.bf16.mxu0 %v20759_v44  ;;  %v20840_v43 = vld [vmem:[#allocation9 + $0xdec] ss:$48 sps:$4 sm:$0xff]   ;;  %v20835_v44 = vld [vmem:[#allocation9 + $0xde0] ss:$48 sps:$4 sm:$0xff]  }
 0x4cf   :  { %7570 = vmatprep.subr.bf16.mxu1 %v20762_v49  ;;  %v20838_v49 = vld [vmem:[#allocation9 + $0xde8] ss:$48 sps:$4 sm:$0xff]  }
 0x4d1   :  { %7530 = vmatpush1.bf16.msra.mxu0 %v20757_v36  ;;  %v20843_v36 = vld [vmem:[#allocation9 + $0xe44] ss:$48 sps:$4 sm:$0xff]  }
 0x4d2   :  { %7571 = vmatpush1.bf16.msra.mxu1 %v20760_v37  ;;  %7531 = vmatprep.subr.bf16.mxu0 %v20765_v38  ;;  %v20846_v37 = vld [vmem:[#allocation9 + $0xe4c] ss:$48 sps:$4 sm:$0xff]   ;;  %v20841_v38 = vld [vmem:[#allocation9 + $0xe40] ss:$48 sps:$4 sm:$0xff]  }
 0x4d3   :  { %7572 = vmatprep.subr.bf16.mxu1 %v20768_v39  ;;  %v20844_v39 = vld [vmem:[#allocation9 + $0xe48] ss:$48 sps:$4 sm:$0xff]  }
 0x4d5   :  { %7532 = vmatpush1.bf16.msra.mxu0 %v20763_v45  ;;  %v20849_v45 = vld [vmem:[#allocation9 + $0xea4] ss:$48 sps:$4 sm:$0xff]  }
 0x4d6   :  { %7573 = vmatpush1.bf16.msra.mxu1 %v20766_v52  ;;  %7533 = vmatprep.subr.bf16.mxu0 %v20771_v50  ;;  %v20852_v52 = vld [vmem:[#allocation9 + $0xeac] ss:$48 sps:$4 sm:$0xff]   ;;  %v20847_v50 = vld [vmem:[#allocation9 + $0xea0] ss:$48 sps:$4 sm:$0xff]  }
 0x4d7   :  { %7574 = vmatprep.subr.bf16.mxu1 %v20774_v51  ;;  %v20850_v51 = vld [vmem:[#allocation9 + $0xea8] ss:$48 sps:$4 sm:$0xff]  }
 0x4d9   :  { %7534 = vmatpush1.bf16.msra.mxu0 %v20769_v53  ;;  %v20855_v53 = vld [vmem:[#allocation9 + $0xf04] ss:$48 sps:$4 sm:$0xff]  }
 0x4da   :  { %7575 = vmatpush1.bf16.msra.mxu1 %v20772_v54  ;;  %7535 = vmatprep.subr.bf16.mxu0 %v20777_v55  ;;  %v20858_v54 = vld [vmem:[#allocation9 + $0xf0c] ss:$48 sps:$4 sm:$0xff]   ;;  %v20853_v55 = vld [vmem:[#allocation9 + $0xf00] ss:$48 sps:$4 sm:$0xff]  }
 0x4db   :  { %7576 = vmatprep.subr.bf16.mxu1 %v20780_v56  ;;  %v20856_v56 = vld [vmem:[#allocation9 + $0xf08] ss:$48 sps:$4 sm:$0xff]  }
 0x4dd   :  { %7536 = vmatpush1.bf16.msra.mxu0 %v20775_v57  ;;  %v20861_v57 = vld [vmem:[#allocation9 + $0xf64] ss:$48 sps:$4 sm:$0xff]  }
 0x4de   :  { %7577 = vmatpush1.bf16.msra.mxu1 %v20778_v58  ;;  %7537 = vmatprep.subr.bf16.mxu0 %v20783_v12  ;;  %v20864_v58 = vld [vmem:[#allocation9 + $0xf6c] ss:$48 sps:$4 sm:$0xff]   ;;  %v20859_v12 = vld [vmem:[#allocation9 + $0xf60] ss:$48 sps:$4 sm:$0xff]  }
 0x4df   :  { %7578 = vmatprep.subr.bf16.mxu1 %v20786_v13  ;;  %v20862_v13 = vld [vmem:[#allocation9 + $0xf68] ss:$48 sps:$4 sm:$0xff]  }
 0x4e1   :  { %7538 = vmatpush1.bf16.msra.mxu0 %v20781_v59  ;;  %v20867_v59 = vld [vmem:[#allocation9 + $0xfc4] ss:$48 sps:$4 sm:$0xff]  }
 0x4e2   :  { %7579 = vmatpush1.bf16.msra.mxu1 %v20784_v60  ;;  %7539 = vmatprep.subr.bf16.mxu0 %v20789_v61  ;;  %v20870_v60 = vld [vmem:[#allocation9 + $0xfcc] ss:$48 sps:$4 sm:$0xff]   ;;  %v20865_v61 = vld [vmem:[#allocation9 + $0xfc0] ss:$48 sps:$4 sm:$0xff]  }
 0x4e3   :  { %7580 = vmatprep.subr.bf16.mxu1 %v20792_v62  ;;  %v20868_v62 = vld [vmem:[#allocation9 + $0xfc8] ss:$48 sps:$4 sm:$0xff]  }
 0x4e5   :  { %7540 = vmatpush1.bf16.msra.mxu0 %v20787_v63  ;;  %v20873_v63 = vld [vmem:[#allocation9 + $0x1024] ss:$48 sps:$4 sm:$0xff]  }
 0x4e6   :  { %7581 = vmatpush1.bf16.msra.mxu1 %v20790_v3  ;;  %7541 = vmatprep.subr.bf16.mxu0 %v20795_v4  ;;  %v20876_v3 = vld [vmem:[#allocation9 + $0x102c] ss:$48 sps:$4 sm:$0xff]   ;;  %v20871_v4 = vld [vmem:[#allocation9 + $0x1020] ss:$48 sps:$4 sm:$0xff]  }
 0x4e7   :  { %7582 = vmatprep.subr.bf16.mxu1 %v20798_v0  ;;  %v20874_v0 = vld [vmem:[#allocation9 + $0x1028] ss:$48 sps:$4 sm:$0xff]  }
 0x4e9   :  { %7542 = vmatpush1.bf16.msra.mxu0 %v20793_v8  ;;  %v20879_v8 = vld [vmem:[#allocation9 + $0x1084] ss:$48 sps:$4 sm:$0xff]  }
 0x4ea   :  { %7583 = vmatpush1.bf16.msra.mxu1 %v20796_v1  ;;  %7543 = vmatprep.subr.bf16.mxu0 %v20801_v2  ;;  %v20882_v1 = vld [vmem:[#allocation9 + $0x108c] ss:$48 sps:$4 sm:$0xff]   ;;  %v20877_v2 = vld [vmem:[#allocation9 + $0x1080] ss:$48 sps:$4 sm:$0xff]  }
 0x4eb   :  { %7584 = vmatprep.subr.bf16.mxu1 %v20804_v6  ;;  %v20880_v6 = vld [vmem:[#allocation9 + $0x1088] ss:$48 sps:$4 sm:$0xff]  }
 0x4ed   :  { %7544 = vmatpush1.bf16.msra.mxu0 %v20799_v7  ;;  %v20885_v7 = vld [vmem:[#allocation9 + $0x10e4] ss:$48 sps:$4 sm:$0xff]  }
 0x4ee   :  { %7585 = vmatpush1.bf16.msra.mxu1 %v20802_v11  ;;  %10012 = vmatprep.subr.bf16.mxu0 %v20807_v14  ;;  %v20888_v11 = vld [vmem:[#allocation9 + $0x10ec] ss:$48 sps:$4 sm:$0xff]   ;;  %v20883_v14 = vld [vmem:[#allocation9 + $0x10e0] ss:$48 sps:$4 sm:$0xff]  }
 0x4ef   :  { %10094 = vmatprep.subr.bf16.mxu1 %v20810_v5  ;;  %v20886_v5 = vld [vmem:[#allocation9 + $0x10e8] ss:$48 sps:$4 sm:$0xff]  }
 0x4f0   :  { %7546 = vmatmul.mubr.bf16.vlgmr.msra.gmra.mrb[28].mxu0 %v23235_v10  ;;  %v20825_v10 = vld [vmem:[#allocation9 + $0xd24] ss:$48 sps:$4 sm:$0xff]  }
 0x4f1   :  { %7587 = vmatmul.mubr.bf16.vlgmr.msra.gmra.mrb[28].mxu1 %v23247_v46  ;;  %10013 = vmatpush1.bf16.msra.mxu0 %v20805_v24  ;;  %v20828_v46 = vld [vmem:[#allocation9 + $0xd2c] ss:$48 sps:$4 sm:$0xff]  }
 0x4f2   :  { %10095 = vmatpush1.bf16.msra.mxu1 %v20808_v25  ;;  %10014 = vmatprep.subr.bf16.mxu0 %v20813_v9  ;;  %v20894_v24 = vld [vmem:[#allocation9 + $0x114c] ss:$48 sps:$4 sm:$0xff]   ;;  %v20889_v25 = vld [vmem:[#allocation9 + $0x1140] ss:$48 sps:$4 sm:$0xff]   ;;  %v20892_v9 = vld [vmem:[#allocation9 + $0x1148] ss:$48 sps:$4 sm:$0xff]  }
 0x4f3   :  { %10096 = vmatprep.subr.bf16.mxu1 %v20816_v27  ;;  %10044 = vmatprep.mubr.bf16.mxu0 %v23265_v28  ;;  %v20897_v27 = vld [vmem:[#allocation9 + $0x11a4] ss:$48 sps:$4 sm:$0xff]  }
 0x4f4   :  { %10126 = vmatprep.mubr.bf16.mxu1 %v23265_v28 }
 0x4f5   :  { %10015 = vmatpush1.bf16.msra.mxu0 %v20811_v15  ;;  %v20900_v15 = vld [vmem:[#allocation9 + $0x11ac] ss:$48 sps:$4 sm:$0xff]  }
 0x4f6   :  { %10097 = vmatpush1.bf16.msra.mxu1 %v20814_v29  ;;  %10016 = vmatprep.subr.bf16.mxu0 %v20819_v30  ;;  %v20895_v29 = vld [vmem:[#allocation9 + $0x11a0] ss:$48 sps:$4 sm:$0xff]  }
 0x4f7   :  { %10098 = vmatprep.subr.bf16.mxu1 %v20822_v31  ;;  %v135_v30 = vld [vmem:[#allocation3 + $0x20] sm:$0xff]  ;;  %v20898_v31 = vld [vmem:[#allocation9 + $0x11a8] ss:$48 sps:$4 sm:$0xff]  }
 0x4f9   :  { %10017 = vmatpush1.bf16.msra.mxu0 %v20817_v32  ;;  %v20903_v32 = vld [vmem:[#allocation9 + $0x1204] ss:$48 sps:$4 sm:$0xff]  }
 0x4fa   :  { %10099 = vmatpush1.bf16.msra.mxu1 %v20820_v33  ;;  %10018 = vmatprep.subr.bf16.mxu0 %v20825_v10  ;;  %v20906_v33 = vld [vmem:[#allocation9 + $0x120c] ss:$48 sps:$4 sm:$0xff]   ;;  %v23271_v10 = vpack.c.bf16 %v135_v30, %v135_v30  ;;  %v20973_v30 = vld [vmem:[#allocation9 + $0x1680] ss:$48 sps:$4 sm:$0xff]  }
 0x4fb   :  { %10100 = vmatprep.subr.bf16.mxu1 %v20828_v46  ;;  %v138_v46 = vld [vmem:[#allocation3 + $0x38] sm:$0xff] }
 0x4fd   :  { %10019 = vmatpush1.bf16.msra.mxu0 %v20823_v34  ;;  %v20901_v34 = vld [vmem:[#allocation9 + $0x1200] ss:$48 sps:$4 sm:$0xff]  }
 0x4fe   :  { %10101 = vmatpush1.bf16.msra.mxu1 %v20826_v35  ;;  %10020 = vmatprep.subr.bf16.mxu0 %v20831_v40  ;;  %v20904_v35 = vld [vmem:[#allocation9 + $0x1208] ss:$48 sps:$4 sm:$0xff]   ;;  %v20909_v40 = vld [vmem:[#allocation9 + $0x1264] ss:$48 sps:$4 sm:$0xff]  }
 0x4ff   :  { %10102 = vmatprep.subr.bf16.mxu1 %v20834_v41  ;;  %v20912_v41 = vld [vmem:[#allocation9 + $0x126c] ss:$48 sps:$4 sm:$0xff]  }
 0x501   :  { %10021 = vmatpush1.bf16.msra.mxu0 %v20829_v18  ;;  %v23273_v18 = vpack.c.bf16 %v138_v46, %v138_v46  ;;  %v20979_v46 = vld [vmem:[#allocation9 + $0x16e0] ss:$48 sps:$4 sm:$0xff]  }
 0x502   :  { %10103 = vmatpush1.bf16.msra.mxu1 %v20832_v47  ;;  %10022 = vmatprep.subr.bf16.mxu0 %v20837_v42  ;;  %v20907_v47 = vld [vmem:[#allocation9 + $0x1260] ss:$48 sps:$4 sm:$0xff]   ;;  %v20910_v42 = vld [vmem:[#allocation9 + $0x1268] ss:$48 sps:$4 sm:$0xff]  }
 0x503   :  { %10104 = vmatprep.subr.bf16.mxu1 %v20840_v43  ;;  %v20915_v43 = vld [vmem:[#allocation9 + $0x12c4] ss:$48 sps:$4 sm:$0xff]  }
 0x505   :  { %10023 = vmatpush1.bf16.msra.mxu0 %v20835_v44  ;;  %v20918_v44 = vld [vmem:[#allocation9 + $0x12cc] ss:$48 sps:$4 sm:$0xff]  }
 0x506   :  { %10105 = vmatpush1.bf16.msra.mxu1 %v20838_v49  ;;  %10024 = vmatprep.subr.bf16.mxu0 %v20843_v36  ;;  %v20913_v49 = vld [vmem:[#allocation9 + $0x12c0] ss:$48 sps:$4 sm:$0xff]   ;;  %v20916_v36 = vld [vmem:[#allocation9 + $0x12c8] ss:$48 sps:$4 sm:$0xff]  }
 0x507   :  { %10106 = vmatprep.subr.bf16.mxu1 %v20846_v37  ;;  %v20921_v37 = vld [vmem:[#allocation9 + $0x1324] ss:$48 sps:$4 sm:$0xff]  }
 0x509   :  { %10025 = vmatpush1.bf16.msra.mxu0 %v20841_v38  ;;  %v20924_v38 = vld [vmem:[#allocation9 + $0x132c] ss:$48 sps:$4 sm:$0xff]  }
 0x50a   :  { %10107 = vmatpush1.bf16.msra.mxu1 %v20844_v39  ;;  %10026 = vmatprep.subr.bf16.mxu0 %v20849_v45  ;;  %v20919_v39 = vld [vmem:[#allocation9 + $0x1320] ss:$48 sps:$4 sm:$0xff]   ;;  %v20922_v45 = vld [vmem:[#allocation9 + $0x1328] ss:$48 sps:$4 sm:$0xff]  }
 0x50b   :  { %10108 = vmatprep.subr.bf16.mxu1 %v20852_v52  ;;  %v20927_v52 = vld [vmem:[#allocation9 + $0x1384] ss:$48 sps:$4 sm:$0xff]  }
 0x50d   :  { %10027 = vmatpush1.bf16.msra.mxu0 %v20847_v50  ;;  %v20930_v50 = vld [vmem:[#allocation9 + $0x138c] ss:$48 sps:$4 sm:$0xff]  }
 0x50e   :  { %10109 = vmatpush1.bf16.msra.mxu1 %v20850_v51  ;;  %10028 = vmatprep.subr.bf16.mxu0 %v20855_v53  ;;  %v20925_v51 = vld [vmem:[#allocation9 + $0x1380] ss:$48 sps:$4 sm:$0xff]   ;;  %v20928_v53 = vld [vmem:[#allocation9 + $0x1388] ss:$48 sps:$4 sm:$0xff]  }
 0x50f   :  { %10110 = vmatprep.subr.bf16.mxu1 %v20858_v54  ;;  %v20933_v54 = vld [vmem:[#allocation9 + $0x13e4] ss:$48 sps:$4 sm:$0xff]  }
 0x511   :  { %10029 = vmatpush1.bf16.msra.mxu0 %v20853_v55  ;;  %v20936_v55 = vld [vmem:[#allocation9 + $0x13ec] ss:$48 sps:$4 sm:$0xff]  }
 0x512   :  { %10111 = vmatpush1.bf16.msra.mxu1 %v20856_v56  ;;  %10030 = vmatprep.subr.bf16.mxu0 %v20861_v57  ;;  %v20931_v56 = vld [vmem:[#allocation9 + $0x13e0] ss:$48 sps:$4 sm:$0xff]   ;;  %v20934_v57 = vld [vmem:[#allocation9 + $0x13e8] ss:$48 sps:$4 sm:$0xff]  }
 0x513   :  { %10112 = vmatprep.subr.bf16.mxu1 %v20864_v58  ;;  %v20939_v58 = vld [vmem:[#allocation9 + $0x1444] ss:$48 sps:$4 sm:$0xff]  }
 0x515   :  { %10031 = vmatpush1.bf16.msra.mxu0 %v20859_v12  ;;  %v20942_v12 = vld [vmem:[#allocation9 + $0x144c] ss:$48 sps:$4 sm:$0xff]  }
 0x516   :  { %10113 = vmatpush1.bf16.msra.mxu1 %v20862_v13  ;;  %10032 = vmatprep.subr.bf16.mxu0 %v20867_v59  ;;  %v20937_v13 = vld [vmem:[#allocation9 + $0x1440] ss:$48 sps:$4 sm:$0xff]   ;;  %v20940_v59 = vld [vmem:[#allocation9 + $0x1448] ss:$48 sps:$4 sm:$0xff]  }
 0x517   :  { %10114 = vmatprep.subr.bf16.mxu1 %v20870_v60  ;;  %v20945_v60 = vld [vmem:[#allocation9 + $0x14a4] ss:$48 sps:$4 sm:$0xff]  }
 0x519   :  { %10033 = vmatpush1.bf16.msra.mxu0 %v20865_v61  ;;  %v20948_v61 = vld [vmem:[#allocation9 + $0x14ac] ss:$48 sps:$4 sm:$0xff]  }
 0x51a   :  { %10115 = vmatpush1.bf16.msra.mxu1 %v20868_v62  ;;  %10034 = vmatprep.subr.bf16.mxu0 %v20873_v63  ;;  %v20943_v62 = vld [vmem:[#allocation9 + $0x14a0] ss:$48 sps:$4 sm:$0xff]   ;;  %v20946_v63 = vld [vmem:[#allocation9 + $0x14a8] ss:$48 sps:$4 sm:$0xff]  }
 0x51b   :  { %10116 = vmatprep.subr.bf16.mxu1 %v20876_v3  ;;  %v20951_v3 = vld [vmem:[#allocation9 + $0x1504] ss:$48 sps:$4 sm:$0xff]  }
 0x51d   :  { %10035 = vmatpush1.bf16.msra.mxu0 %v20871_v4  ;;  %v20954_v4 = vld [vmem:[#allocation9 + $0x150c] ss:$48 sps:$4 sm:$0xff]  }
 0x51e   :  { %10117 = vmatpush1.bf16.msra.mxu1 %v20874_v0  ;;  %10036 = vmatprep.subr.bf16.mxu0 %v20879_v8  ;;  %v20949_v0 = vld [vmem:[#allocation9 + $0x1500] ss:$48 sps:$4 sm:$0xff]   ;;  %v20952_v8 = vld [vmem:[#allocation9 + $0x1508] ss:$48 sps:$4 sm:$0xff]  }
 0x51f   :  { %10118 = vmatprep.subr.bf16.mxu1 %v20882_v1  ;;  %v20957_v1 = vld [vmem:[#allocation9 + $0x1564] ss:$48 sps:$4 sm:$0xff]  }
 0x521   :  { %10037 = vmatpush1.bf16.msra.mxu0 %v20877_v2  ;;  %v20960_v2 = vld [vmem:[#allocation9 + $0x156c] ss:$48 sps:$4 sm:$0xff]  }
 0x522   :  { %10119 = vmatpush1.bf16.msra.mxu1 %v20880_v6  ;;  %10038 = vmatprep.subr.bf16.mxu0 %v20885_v7  ;;  %v20955_v6 = vld [vmem:[#allocation9 + $0x1560] ss:$48 sps:$4 sm:$0xff]   ;;  %v20958_v7 = vld [vmem:[#allocation9 + $0x1568] ss:$48 sps:$4 sm:$0xff]  }
 0x523   :  { %10120 = vmatprep.subr.bf16.mxu1 %v20888_v11  ;;  %v20963_v11 = vld [vmem:[#allocation9 + $0x15c4] ss:$48 sps:$4 sm:$0xff]  }
 0x525   :  { %10039 = vmatpush1.bf16.msra.mxu0 %v20883_v14  ;;  %v20966_v14 = vld [vmem:[#allocation9 + $0x15cc] ss:$48 sps:$4 sm:$0xff]  }
 0x526   :  { %10121 = vmatpush1.bf16.msra.mxu1 %v20886_v5  ;;  %10040 = vmatprep.subr.bf16.mxu0 %v20891_v17  ;;  %v20961_v5 = vld [vmem:[#allocation9 + $0x15c0] ss:$48 sps:$4 sm:$0xff]   ;;  %v20964_v17 = vld [vmem:[#allocation9 + $0x15c8] ss:$48 sps:$4 sm:$0xff]  }
 0x527   :  { %10122 = vmatprep.subr.bf16.mxu1 %v20894_v24  ;;  %v20969_v24 = vld [vmem:[#allocation9 + $0x1624] ss:$48 sps:$4 sm:$0xff]  }
 0x529   :  { %10041 = vmatpush1.bf16.msra.mxu0 %v20889_v25  ;;  %v20972_v25 = vld [vmem:[#allocation9 + $0x162c] ss:$48 sps:$4 sm:$0xff]  }
 0x52a   :  { %10123 = vmatpush1.bf16.msra.mxu1 %v20892_v9  ;;  %10042 = vmatprep.subr.bf16.mxu0 %v20897_v27  ;;  %v20967_v9 = vld [vmem:[#allocation9 + $0x1620] ss:$48 sps:$4 sm:$0xff]   ;;  %v20970_v27 = vld [vmem:[#allocation9 + $0x1628] ss:$48 sps:$4 sm:$0xff]  }
 0x52b   :  { %10124 = vmatprep.subr.bf16.mxu1 %v20900_v15  ;;  %v20975_v15 = vld [vmem:[#allocation9 + $0x1684] ss:$48 sps:$4 sm:$0xff]  }
 0x52d   :  { %10043 = vmatpush1.bf16.msra.mxu0 %v20895_v29  ;;  %v20978_v29 = vld [vmem:[#allocation9 + $0x168c] ss:$48 sps:$4 sm:$0xff]  }
 0x52e   :  { %10125 = vmatpush1.bf16.msra.mxu1 %v20898_v31  ;;  %10053 = vmatprep.subr.bf16.mxu0 %v20903_v32  ;;  %v20976_v31 = vld [vmem:[#allocation9 + $0x1688] ss:$48 sps:$4 sm:$0xff]   ;;  %v20981_v32 = vld [vmem:[#allocation9 + $0x16e4] ss:$48 sps:$4 sm:$0xff]  }
 0x52f   :  { %10135 = vmatprep.subr.bf16.mxu1 %v20906_v33  ;;  %v20984_v33 = vld [vmem:[#allocation9 + $0x16ec] ss:$48 sps:$4 sm:$0xff]  }
 0x530   :  { %10045 = vmatmul.mubr.bf16.vlgmr.msra.gmra.mrb[16].mxu0 %v23271_v10 }
 0x531   :  { %10054 = vmatpush1.bf16.msra.mxu0 %v20901_v34  ;;  %10127 = vmatmul.mubr.bf16.vlgmr.msra.gmra.mrb[16].mxu1 %v23271_v10  ;;  %v20982_v34 = vld [vmem:[#allocation9 + $0x16e8] ss:$48 sps:$4 sm:$0xff]  }
 0x532   :  { %10136 = vmatpush1.bf16.msra.mxu1 %v20904_v35  ;;  %10055 = vmatprep.subr.bf16.mxu0 %v20909_v40  ;;  %v20987_v35 = vld [vmem:[#allocation9 + $0x1744] ss:$48 sps:$4 sm:$0xff]   ;;  %v20990_v40 = vld [vmem:[#allocation9 + $0x174c] ss:$48 sps:$4 sm:$0xff]  }
 0x533   :  { %10137 = vmatprep.subr.bf16.mxu1 %v20912_v41  ;;  %10085 = vmatprep.mubr.bf16.mxu0 %v23273_v18  ;;  %v20985_v41 = vld [vmem:[#allocation9 + $0x1740] ss:$48 sps:$4 sm:$0xff]  }
 0x534   :  { %10167 = vmatprep.mubr.bf16.mxu1 %v23273_v18 }
 0x535   :  { %10056 = vmatpush1.bf16.msra.mxu0 %v20907_v47  ;;  %v20988_v47 = vld [vmem:[#allocation9 + $0x1748] ss:$48 sps:$4 sm:$0xff]  }
 0x536   :  { %10138 = vmatpush1.bf16.msra.mxu1 %v20910_v42  ;;  %10057 = vmatprep.subr.bf16.mxu0 %v20915_v43  ;;  %v20993_v42 = vld [vmem:[#allocation9 + $0x17a4] ss:$48 sps:$4 sm:$0xff]   ;;  %v20996_v43 = vld [vmem:[#allocation9 + $0x17ac] ss:$48 sps:$4 sm:$0xff]  }
 0x537   :  { %10139 = vmatprep.subr.bf16.mxu1 %v20918_v44  ;;  %v20991_v44 = vld [vmem:[#allocation9 + $0x17a0] ss:$48 sps:$4 sm:$0xff]  }
 0x539   :  { %10058 = vmatpush1.bf16.msra.mxu0 %v20913_v49  ;;  %v137_v49 = vld [vmem:[#allocation3 + $0x30] sm:$0xff] }
 0x53a   :  { %10140 = vmatpush1.bf16.msra.mxu1 %v20916_v36  ;;  %10059 = vmatprep.subr.bf16.mxu0 %v20921_v37  ;;  %v20994_v36 = vld [vmem:[#allocation9 + $0x17a8] ss:$48 sps:$4 sm:$0xff]   ;;  %v20999_v37 = vld [vmem:[#allocation9 + $0xc14] ss:$48 sps:$4 sm:$0xff]  }
 0x53b   :  { %10141 = vmatprep.subr.bf16.mxu1 %v20924_v38  ;;  %v21002_v38 = vld [vmem:[#allocation9 + $0xc1c] ss:$48 sps:$4 sm:$0xff]  }
 0x53d   :  { %10060 = vmatpush1.bf16.msra.mxu0 %v20919_v39  ;;  %v23279_v39 = vpack.c.bf16 %v137_v49, %v137_v49  ;;  %v21050_v49 = vld [vmem:[#allocation9 + $0xf1c] ss:$48 sps:$4 sm:$0xff]  }
 0x53e   :  { %10142 = vmatpush1.bf16.msra.mxu1 %v20922_v45  ;;  %10061 = vmatprep.subr.bf16.mxu0 %v20927_v52  ;;  %v20997_v45 = vld [vmem:[#allocation9 + $0xc10] ss:$48 sps:$4 sm:$0xff]   ;;  %v21000_v52 = vld [vmem:[#allocation9 + $0xc18] ss:$48 sps:$4 sm:$0xff]  }
 0x53f   :  { %10143 = vmatprep.subr.bf16.mxu1 %v20930_v50  ;;  %v21005_v50 = vld [vmem:[#allocation9 + $0xc74] ss:$48 sps:$4 sm:$0xff]  }
 0x541   :  { %10062 = vmatpush1.bf16.msra.mxu0 %v20925_v51  ;;  %v21008_v51 = vld [vmem:[#allocation9 + $0xc7c] ss:$48 sps:$4 sm:$0xff]  }
 0x542   :  { %10144 = vmatpush1.bf16.msra.mxu1 %v20928_v53  ;;  %10063 = vmatprep.subr.bf16.mxu0 %v20933_v54  ;;  %v21003_v53 = vld [vmem:[#allocation9 + $0xc70] ss:$48 sps:$4 sm:$0xff]   ;;  %v21006_v54 = vld [vmem:[#allocation9 + $0xc78] ss:$48 sps:$4 sm:$0xff]  }
 0x543   :  { %10145 = vmatprep.subr.bf16.mxu1 %v20936_v55  ;;  %v21011_v55 = vld [vmem:[#allocation9 + $0xcd4] ss:$48 sps:$4 sm:$0xff]  }
 0x545   :  { %10064 = vmatpush1.bf16.msra.mxu0 %v20931_v56  ;;  %v21014_v56 = vld [vmem:[#allocation9 + $0xcdc] ss:$48 sps:$4 sm:$0xff]  }
 0x546   :  { %10146 = vmatpush1.bf16.msra.mxu1 %v20934_v57  ;;  %10065 = vmatprep.subr.bf16.mxu0 %v20939_v58  ;;  %v21009_v57 = vld [vmem:[#allocation9 + $0xcd0] ss:$48 sps:$4 sm:$0xff]   ;;  %v21012_v58 = vld [vmem:[#allocation9 + $0xcd8] ss:$48 sps:$4 sm:$0xff]  }
 0x547   :  { %10147 = vmatprep.subr.bf16.mxu1 %v20942_v12  ;;  %v21017_v12 = vld [vmem:[#allocation9 + $0xd34] ss:$48 sps:$4 sm:$0xff]  }
 0x549   :  { %10066 = vmatpush1.bf16.msra.mxu0 %v20937_v13  ;;  %v21020_v13 = vld [vmem:[#allocation9 + $0xd3c] ss:$48 sps:$4 sm:$0xff]  }
 0x54a   :  { %10148 = vmatpush1.bf16.msra.mxu1 %v20940_v59  ;;  %10067 = vmatprep.subr.bf16.mxu0 %v20945_v60  ;;  %v21015_v59 = vld [vmem:[#allocation9 + $0xd30] ss:$48 sps:$4 sm:$0xff]   ;;  %v23285_v60 = vld [vmem:[#allocation11 + $0x28] sm:$0xff] }
 0x54b   :  { %10149 = vmatprep.subr.bf16.mxu1 %v20948_v61  ;;  %v21018_v61 = vld [vmem:[#allocation9 + $0xd38] ss:$48 sps:$4 sm:$0xff]  }
 0x54d   :  { %10068 = vmatpush1.bf16.msra.mxu0 %v20943_v62  ;;  %v21023_v62 = vld [vmem:[#allocation9 + $0xd94] ss:$48 sps:$4 sm:$0xff]  }
 0x54e   :  { %10150 = vmatpush1.bf16.msra.mxu1 %v20946_v63  ;;  %10069 = vmatprep.subr.bf16.mxu0 %v20951_v3  ;;  %v21026_v63 = vld [vmem:[#allocation9 + $0xd9c] ss:$48 sps:$4 sm:$0xff]   ;;  %v5110_v3 = vrot.slane %v23285_v60, %v23158_v20 }
 0x54f   :  { %10151 = vmatprep.subr.bf16.mxu1 %v20954_v4  ;;  %v21021_v4 = vld [vmem:[#allocation9 + $0xd90] ss:$48 sps:$4 sm:$0xff]  }
 0x551   :  { %10070 = vmatpush1.bf16.msra.mxu0 %v20949_v0  ;;  %v5114_v0 = vrot.slane %v23285_v60, %v23166_v48 }
 0x552   :  { %10152 = vmatpush1.bf16.msra.mxu1 %v20952_v8  ;;  %10071 = vmatprep.subr.bf16.mxu0 %v20957_v1  ;;  %v21024_v8 = vld [vmem:[#allocation9 + $0xd98] ss:$48 sps:$4 sm:$0xff]   ;;  %v21029_v1 = vld [vmem:[#allocation9 + $0xdf4] ss:$48 sps:$4 sm:$0xff]  }
 0x553   :  { %10153 = vmatprep.subr.bf16.mxu1 %v20960_v2  ;;  %v21032_v2 = vld [vmem:[#allocation9 + $0xdfc] ss:$48 sps:$4 sm:$0xff]  }
 0x555   :  { %10072 = vmatpush1.bf16.msra.mxu0 %v20955_v6  ;;  %v5170_v6 = vrot.slane %v5110_v3, %v23158_v20  ;;  %v21080_v3 = vld [vmem:[#allocation9 + $0x10fc] ss:$48 sps:$4 sm:$0xff]  }
 0x556   :  { %10154 = vmatpush1.bf16.msra.mxu1 %v20958_v7  ;;  %10073 = vmatprep.subr.bf16.mxu0 %v20963_v11  ;;  %v5174_v7 = vrot.slane %v5114_v0, %v23158_v20  ;;  %v21027_v11 = vld [vmem:[#allocation9 + $0xdf0] ss:$48 sps:$4 sm:$0xff]   ;;  %v21078_v0 = vld [vmem:[#allocation9 + $0x10f8] ss:$48 sps:$4 sm:$0xff]  }
 0x557   :  { %10155 = vmatprep.subr.bf16.mxu1 %v20966_v14  ;;  %v21030_v14 = vld [vmem:[#allocation9 + $0xdf8] ss:$48 sps:$4 sm:$0xff]  }
 0x559   :  { %10074 = vmatpush1.bf16.msra.mxu0 %v20961_v5  ;;  %v21035_v5 = vld [vmem:[#allocation9 + $0xe54] ss:$48 sps:$4 sm:$0xff]  }
 0x55a   :  { %10156 = vmatpush1.bf16.msra.mxu1 %v20964_v17  ;;  %10075 = vmatprep.subr.bf16.mxu0 %v20969_v24  ;;  %v21038_v24 = vld [vmem:[#allocation9 + $0xe5c] ss:$48 sps:$4 sm:$0xff]  }
 0x55b   :  { %10157 = vmatprep.subr.bf16.mxu1 %v20972_v25 }
 0x55d   :  { %10076 = vmatpush1.bf16.msra.mxu0 %v20967_v9 }
 0x55e   :  { %10158 = vmatpush1.bf16.msra.mxu1 %v20970_v27  ;;  %10077 = vmatprep.subr.bf16.mxu0 %v20975_v15 }
 0x55f   :  { %10159 = vmatprep.subr.bf16.mxu1 %v20978_v29 }
 0x561   :  { %10078 = vmatpush1.bf16.msra.mxu0 %v20973_v30 }
 0x562   :  { %10160 = vmatpush1.bf16.msra.mxu1 %v20976_v31  ;;  %10079 = vmatprep.subr.bf16.mxu0 %v20981_v32  ;;  %v21033_v31 = vld [vmem:[#allocation9 + $0xe50] ss:$48 sps:$4 sm:$0xff]  }
 0x563   :  { %10161 = vmatprep.subr.bf16.mxu1 %v20984_v33 }
 0x565   :  { %10080 = vmatpush1.bf16.msra.mxu0 %v20979_v46 }
 0x566   :  { %10162 = vmatpush1.bf16.msra.mxu1 %v20982_v34  ;;  %10081 = vmatprep.subr.bf16.mxu0 %v20987_v35  ;;  %v21036_v34 = vld [vmem:[#allocation9 + $0xe58] ss:$48 sps:$4 sm:$0xff]   ;;  %v21041_v35 = vld [vmem:[#allocation9 + $0xeb4] ss:$48 sps:$4 sm:$0xff]  }
 0x567   :  { %10163 = vmatprep.subr.bf16.mxu1 %v20990_v40 }
 0x569   :  { %10082 = vmatpush1.bf16.msra.mxu0 %v20985_v41 }
 0x56a   :  { %10164 = vmatpush1.bf16.msra.mxu1 %v20988_v47  ;;  %10083 = vmatprep.subr.bf16.mxu0 %v20993_v42  ;;  %v21044_v47 = vld [vmem:[#allocation9 + $0xebc] ss:$48 sps:$4 sm:$0xff]   ;;  %v21039_v42 = vld [vmem:[#allocation9 + $0xeb0] ss:$48 sps:$4 sm:$0xff]  }
 0x56b   :  { %10165 = vmatprep.subr.bf16.mxu1 %v20996_v43  ;;  %v21042_v43 = vld [vmem:[#allocation9 + $0xeb8] ss:$48 sps:$4 sm:$0xff]  }
 0x56d   :  { %10084 = vmatpush1.bf16.msra.mxu0 %v20991_v44  ;;  %v21047_v44 = vld [vmem:[#allocation9 + $0xf14] ss:$48 sps:$4 sm:$0xff]  }
 0x56e   :  { %10166 = vmatpush1.bf16.msra.mxu1 %v20994_v36  ;;  %10176 = vmatprep.subr.bf16.mxu0 %v20999_v37  ;;  %v21045_v36 = vld [vmem:[#allocation9 + $0xf10] ss:$48 sps:$4 sm:$0xff]   ;;  %v21048_v37 = vld [vmem:[#allocation9 + $0xf18] ss:$48 sps:$4 sm:$0xff]  }
 0x56f   :  { %10258 = vmatprep.subr.bf16.mxu1 %v21002_v38  ;;  %v21053_v38 = vld [vmem:[#allocation9 + $0xf74] ss:$48 sps:$4 sm:$0xff]  }
 0x570   :  { %10086 = vmatmul.mubr.bf16.vlgmr.msra.gmra.mrb[16].mxu0 %v23279_v39 }
 0x571   :  { %10168 = vmatmul.mubr.bf16.vlgmr.msra.gmra.mrb[16].mxu1 %v23279_v39  ;;  %10177 = vmatpush1.bf16.msra.mxu0 %v20997_v45  ;;  %v21056_v45 = vld [vmem:[#allocation9 + $0xf7c] ss:$48 sps:$4 sm:$0xff]  }
 0x572   :  { %10259 = vmatpush1.bf16.msra.mxu1 %v21000_v52  ;;  %10178 = vmatprep.subr.bf16.mxu0 %v21005_v50  ;;  %v21051_v52 = vld [vmem:[#allocation9 + $0xf70] ss:$48 sps:$4 sm:$0xff]   ;;  %v21054_v50 = vld [vmem:[#allocation9 + $0xf78] ss:$48 sps:$4 sm:$0xff]  }
 0x573   :  { %10260 = vmatprep.subr.bf16.mxu1 %v21008_v51  ;;  %10208 = vmatprep.mubr.bf16.mxu0 %v23265_v28  ;;  %v21059_v51 = vld [vmem:[#allocation9 + $0xfd4] ss:$48 sps:$4 sm:$0xff]  }
 0x574   :  { %10290 = vmatprep.mubr.bf16.mxu1 %v23265_v28 }
 0x575   :  { %10179 = vmatpush1.bf16.msra.mxu0 %v21003_v53  ;;  %v21062_v53 = vld [vmem:[#allocation9 + $0xfdc] ss:$48 sps:$4 sm:$0xff]  }
 0x576   :  { %10261 = vmatpush1.bf16.msra.mxu1 %v21006_v54  ;;  %10180 = vmatprep.subr.bf16.mxu0 %v21011_v55  ;;  %v21057_v54 = vld [vmem:[#allocation9 + $0xfd0] ss:$48 sps:$4 sm:$0xff]   ;;  %v21060_v55 = vld [vmem:[#allocation9 + $0xfd8] ss:$48 sps:$4 sm:$0xff]  }
 0x577   :  { %10262 = vmatprep.subr.bf16.mxu1 %v21014_v56  ;;  %v21065_v56 = vld [vmem:[#allocation9 + $0x1034] ss:$48 sps:$4 sm:$0xff]  }
 0x579   :  { %10181 = vmatpush1.bf16.msra.mxu0 %v21009_v57  ;;  %v21068_v57 = vld [vmem:[#allocation9 + $0x103c] ss:$48 sps:$4 sm:$0xff]  }
 0x57a   :  { %10263 = vmatpush1.bf16.msra.mxu1 %v21012_v58  ;;  %10182 = vmatprep.subr.bf16.mxu0 %v21017_v12  ;;  %v21063_v58 = vld [vmem:[#allocation9 + $0x1030] ss:$48 sps:$4 sm:$0xff]   ;;  %v21066_v12 = vld [vmem:[#allocation9 + $0x1038] ss:$48 sps:$4 sm:$0xff]  }
 0x57b   :  { %10264 = vmatprep.subr.bf16.mxu1 %v21020_v13  ;;  %v21071_v13 = vld [vmem:[#allocation9 + $0x1094] ss:$48 sps:$4 sm:$0xff]  }
 0x57d   :  { %10183 = vmatpush1.bf16.msra.mxu0 %v21015_v59  ;;  %v21074_v59 = vld [vmem:[#allocation9 + $0x109c] ss:$48 sps:$4 sm:$0xff]  }
 0x57e   :  { %10265 = vmatpush1.bf16.msra.mxu1 %v21018_v61  ;;  %10184 = vmatprep.subr.bf16.mxu0 %v21023_v62  ;;  %v21069_v61 = vld [vmem:[#allocation9 + $0x1090] ss:$48 sps:$4 sm:$0xff]   ;;  %v21072_v62 = vld [vmem:[#allocation9 + $0x1098] ss:$48 sps:$4 sm:$0xff]  }
 0x57f   :  { %10266 = vmatprep.subr.bf16.mxu1 %v21026_v63  ;;  %v21077_v63 = vld [vmem:[#allocation9 + $0x10f4] ss:$48 sps:$4 sm:$0xff]  }
 0x581   :  { %10185 = vmatpush1.bf16.msra.mxu0 %v21021_v4  ;;  %v21075_v4 = vld [vmem:[#allocation9 + $0x10f0] ss:$48 sps:$4 sm:$0xff]  }
 0x582   :  { %10267 = vmatpush1.bf16.msra.mxu1 %v21024_v8  ;;  %10186 = vmatprep.subr.bf16.mxu0 %v21029_v1  ;;  %v21083_v8 = vld [vmem:[#allocation9 + $0x1154] ss:$48 sps:$4 sm:$0xff]   ;;  %v21086_v1 = vld [vmem:[#allocation9 + $0x115c] ss:$48 sps:$4 sm:$0xff]  }
 0x583   :  { %v7465_v17 = vpop.f32.mrb[24].mxu0  ;;  %10268 = vmatprep.subr.bf16.mxu1 %v21032_v2  ;;  %v21081_v2 = vld [vmem:[#allocation9 + $0x1150] ss:$48 sps:$4 sm:$0xff]  }
 0x584   :  { %v7466_v25 = vadd.f32 %v7465_v17, %v5170_v6  ;;  %v7506_v9 = vpop.f32.mrb[24].mxu1  ;;  %v7467_v27 = vpop.f32.mrb[25].mxu0  ;;  %v21084_v6 = vld [vmem:[#allocation9 + $0x1158] ss:$48 sps:$4 sm:$0xff]   ;;  %v21095_v17 = vld [vmem:[#allocation9 + $0x1214] ss:$48 sps:$4 sm:$0xff]  }
 0x585   :  { %v7468_v15 = vadd.f32 %v7467_v27, %v5174_v7  ;;  %v7508_v29 = vpop.f32.mrb[25].mxu1  ;;  %v7469_v30 = vpop.f32.mrb[26].mxu0  ;;  %10187 = vmatpush1.bf16.msra.mxu0 %v21027_v11  ;;  %v21089_v7 = vld [vmem:[#allocation9 + $0x11b4] ss:$48 sps:$4 sm:$0xff]   ;;  %v21092_v11 = vld [vmem:[#allocation9 + $0x11bc] ss:$48 sps:$4 sm:$0xff]  }
 0x586   :  { %v23293_v32 = vadd.f32 %v7506_v9, %v7466_v25  ;;  %v7510_v33 = vpop.f32.mrb[26].mxu1  ;;  %10269 = vmatpush1.bf16.msra.mxu1 %v21030_v14  ;;  %v7470_v46 = vpop.f32.mrb[27].mxu0  ;;  %10188 = vmatprep.subr.bf16.mxu0 %v21035_v5  ;;  %v21087_v14 = vld [vmem:[#allocation9 + $0x11b0] ss:$48 sps:$4 sm:$0xff]   ;;  %v21090_v5 = vld [vmem:[#allocation9 + $0x11b8] ss:$48 sps:$4 sm:$0xff]  }
 0x587   :  { %v23295_v40 = vadd.f32 %v7508_v29, %v7468_v15  ;;  %v7511_v41 = vpop.f32.mrb[27].mxu1  ;;  %10270 = vmatprep.subr.bf16.mxu1 %v21038_v24  ;;  %v21098_v24 = vld [vmem:[#allocation9 + $0x121c] ss:$48 sps:$4 sm:$0xff]   ;;  %v21093_v25 = vld [vmem:[#allocation9 + $0x1210] ss:$48 sps:$4 sm:$0xff]  }
 0x588   :  { %v21096_v9 = vld [vmem:[#allocation9 + $0x1218] ss:$48 sps:$4 sm:$0xff]   ;;  %v21101_v27 = vld [vmem:[#allocation9 + $0x1274] ss:$48 sps:$4 sm:$0xff]   ;;  %v21104_v15 = vld [vmem:[#allocation9 + $0x127c] ss:$48 sps:$4 sm:$0xff]  }
 0x589   :  { %10189 = vmatpush1.bf16.msra.mxu0 %v21033_v31  ;;  %v21099_v29 = vld [vmem:[#allocation9 + $0x1270] ss:$48 sps:$4 sm:$0xff]   ;;  %v21102_v30 = vld [vmem:[#allocation9 + $0x1278] ss:$48 sps:$4 sm:$0xff]   ;;  %v21107_v31 = vld [vmem:[#allocation9 + $0x12d4] ss:$48 sps:$4 sm:$0xff]  }
 0x58a   :  { %10271 = vmatpush1.bf16.msra.mxu1 %v21036_v34  ;;  %10190 = vmatprep.subr.bf16.mxu0 %v21041_v35  ;;  %v21110_v33 = vld [vmem:[#allocation9 + $0x12dc] ss:$48 sps:$4 sm:$0xff]   ;;  %v21105_v46 = vld [vmem:[#allocation9 + $0x12d0] ss:$48 sps:$4 sm:$0xff]   ;;  %v21108_v34 = vld [vmem:[#allocation9 + $0x12d8] ss:$48 sps:$4 sm:$0xff]  }
 0x58b   :  { %10272 = vmatprep.subr.bf16.mxu1 %v21044_v47  ;;  %v21113_v35 = vld [vmem:[#allocation9 + $0x1334] ss:$48 sps:$4 sm:$0xff]   ;;  %v21116_v41 = vld [vmem:[#allocation9 + $0x133c] ss:$48 sps:$4 sm:$0xff]   ;;  %v21111_v47 = vld [vmem:[#allocation9 + $0x1330] ss:$48 sps:$4 sm:$0xff]  }
 0x58d   :  { %10191 = vmatpush1.bf16.msra.mxu0 %v21039_v42  ;;  %v21114_v42 = vld [vmem:[#allocation9 + $0x1338] ss:$48 sps:$4 sm:$0xff]  }
 0x58e   :  { %10273 = vmatpush1.bf16.msra.mxu1 %v21042_v43  ;;  %10192 = vmatprep.subr.bf16.mxu0 %v21047_v44  ;;  %v21119_v43 = vld [vmem:[#allocation9 + $0x1394] ss:$48 sps:$4 sm:$0xff]   ;;  %v21122_v44 = vld [vmem:[#allocation9 + $0x139c] ss:$48 sps:$4 sm:$0xff]  }
 0x58f   :  { %10274 = vmatprep.subr.bf16.mxu1 %v21050_v49  ;;  %v5118_v49 = vrot.slane %v23285_v60, %v23162_v22 }
 0x591   :  { %10193 = vmatpush1.bf16.msra.mxu0 %v21045_v36  ;;  %v21117_v36 = vld [vmem:[#allocation9 + $0x1390] ss:$48 sps:$4 sm:$0xff]  }
 0x592   :  { %10275 = vmatpush1.bf16.msra.mxu1 %v21048_v37  ;;  %10194 = vmatprep.subr.bf16.mxu0 %v21053_v38  ;;  %v5122_v37 = vrot.slane %v23285_v60, %v23170_v26  ;;  %v21120_v38 = vld [vmem:[#allocation9 + $0x1398] ss:$48 sps:$4 sm:$0xff]  }
 0x593   :  { %10276 = vmatprep.subr.bf16.mxu1 %v21056_v45  ;;  %v21125_v45 = vld [vmem:[#allocation9 + $0x13f4] ss:$48 sps:$4 sm:$0xff]  }
 0x595   :  { %10195 = vmatpush1.bf16.msra.mxu0 %v21051_v52  ;;  %v21128_v52 = vld [vmem:[#allocation9 + $0x13fc] ss:$48 sps:$4 sm:$0xff]  }
 0x596   :  { %10277 = vmatpush1.bf16.msra.mxu1 %v21054_v50  ;;  %10196 = vmatprep.subr.bf16.mxu0 %v21059_v51  ;;  %v5178_v50 = vrot.slane %v5118_v49, %v23158_v20  ;;  %v5182_v51 = vrot.slane %v5122_v37, %v23158_v20  ;;  %v21173_v49 = vld [vmem:[#allocation9 + $0x16f4] ss:$48 sps:$4 sm:$0xff]   ;;  %v21171_v37 = vld [vmem:[#allocation9 + $0x16f0] ss:$48 sps:$4 sm:$0xff]  }
 0x597   :  { %10278 = vmatprep.subr.bf16.mxu1 %v21062_v53  ;;  %v21123_v53 = vld [vmem:[#allocation9 + $0x13f0] ss:$48 sps:$4 sm:$0xff]  }
 0x599   :  { %10197 = vmatpush1.bf16.msra.mxu0 %v21057_v54  ;;  %v21126_v54 = vld [vmem:[#allocation9 + $0x13f8] ss:$48 sps:$4 sm:$0xff]  }
 0x59a   :  { %10279 = vmatpush1.bf16.msra.mxu1 %v21060_v55  ;;  %10198 = vmatprep.subr.bf16.mxu0 %v21065_v56  ;;  %v21131_v55 = vld [vmem:[#allocation9 + $0x1454] ss:$48 sps:$4 sm:$0xff]  }
 0x59b   :  { %10280 = vmatprep.subr.bf16.mxu1 %v21068_v57  ;;  %v21134_v57 = vld [vmem:[#allocation9 + $0x145c] ss:$48 sps:$4 sm:$0xff]  }
 0x59d   :  { %10199 = vmatpush1.bf16.msra.mxu0 %v21063_v58 }
 0x59e   :  { %10281 = vmatpush1.bf16.msra.mxu1 %v21066_v12  ;;  %10200 = vmatprep.subr.bf16.mxu0 %v21071_v13 }
 0x59f   :  { %10282 = vmatprep.subr.bf16.mxu1 %v21074_v59 }
 0x5a1   :  { %10201 = vmatpush1.bf16.msra.mxu0 %v21069_v61 }
 0x5a2   :  { %10283 = vmatpush1.bf16.msra.mxu1 %v21072_v62  ;;  %10202 = vmatprep.subr.bf16.mxu0 %v21077_v63  ;;  %v21129_v62 = vld [vmem:[#allocation9 + $0x1450] ss:$48 sps:$4 sm:$0xff]  }
 0x5a3   :  { %10284 = vmatprep.subr.bf16.mxu1 %v21080_v3 }
 0x5a5   :  { %10203 = vmatpush1.bf16.msra.mxu0 %v21075_v4 }
 0x5a6   :  { %10285 = vmatpush1.bf16.msra.mxu1 %v21078_v0  ;;  %10204 = vmatprep.subr.bf16.mxu0 %v21083_v8  ;;  %v21132_v0 = vld [vmem:[#allocation9 + $0x1458] ss:$48 sps:$4 sm:$0xff]   ;;  %v21137_v8 = vld [vmem:[#allocation9 + $0x14b4] ss:$48 sps:$4 sm:$0xff]  }
 0x5a7   :  { %10286 = vmatprep.subr.bf16.mxu1 %v21086_v1 }
 0x5a9   :  { %10205 = vmatpush1.bf16.msra.mxu0 %v21081_v2 }
 0x5aa   :  { %10287 = vmatpush1.bf16.msra.mxu1 %v21084_v6  ;;  %10206 = vmatprep.subr.bf16.mxu0 %v21089_v7  ;;  %v21140_v6 = vld [vmem:[#allocation9 + $0x14bc] ss:$48 sps:$4 sm:$0xff]   ;;  %v21135_v7 = vld [vmem:[#allocation9 + $0x14b0] ss:$48 sps:$4 sm:$0xff]  }
 0x5ab   :  { %10288 = vmatprep.subr.bf16.mxu1 %v21092_v11  ;;  %v21138_v11 = vld [vmem:[#allocation9 + $0x14b8] ss:$48 sps:$4 sm:$0xff]  }
 0x5ad   :  { %10207 = vmatpush1.bf16.msra.mxu0 %v21087_v14  ;;  %v21143_v14 = vld [vmem:[#allocation9 + $0x1514] ss:$48 sps:$4 sm:$0xff]  }
 0x5ae   :  { %10289 = vmatpush1.bf16.msra.mxu1 %v21090_v5  ;;  %10217 = vmatprep.subr.bf16.mxu0 %v21095_v17  ;;  %v21146_v5 = vld [vmem:[#allocation9 + $0x151c] ss:$48 sps:$4 sm:$0xff]   ;;  %v21141_v17 = vld [vmem:[#allocation9 + $0x1510] ss:$48 sps:$4 sm:$0xff]  }
 0x5af   :  { %10299 = vmatprep.subr.bf16.mxu1 %v21098_v24  ;;  %v21144_v24 = vld [vmem:[#allocation9 + $0x1518] ss:$48 sps:$4 sm:$0xff]  }
 0x5b0   :  { %10209 = vmatmul.mubr.bf16.vlgmr.msra.gmra.mrb[20].mxu0 %v23271_v10 }
 0x5b1   :  { %10218 = vmatpush1.bf16.msra.mxu0 %v21093_v25  ;;  %10291 = vmatmul.mubr.bf16.vlgmr.msra.gmra.mrb[20].mxu1 %v23271_v10  ;;  %v21149_v25 = vld [vmem:[#allocation9 + $0x1574] ss:$48 sps:$4 sm:$0xff]  }
 0x5b2   :  { %10300 = vmatpush1.bf16.msra.mxu1 %v21096_v9  ;;  %10219 = vmatprep.subr.bf16.mxu0 %v21101_v27  ;;  %v21152_v9 = vld [vmem:[#allocation9 + $0x157c] ss:$48 sps:$4 sm:$0xff]   ;;  %v21147_v27 = vld [vmem:[#allocation9 + $0x1570] ss:$48 sps:$4 sm:$0xff]  }
 0x5b3   :  { %10301 = vmatprep.subr.bf16.mxu1 %v21104_v15  ;;  %10249 = vmatprep.mubr.bf16.mxu0 %v23273_v18  ;;  %v21150_v15 = vld [vmem:[#allocation9 + $0x1578] ss:$48 sps:$4 sm:$0xff]  }
 0x5b4   :  { %10331 = vmatprep.mubr.bf16.mxu1 %v23273_v18 }
 0x5b5   :  { %10220 = vmatpush1.bf16.msra.mxu0 %v21099_v29  ;;  %v21155_v29 = vld [vmem:[#allocation9 + $0x15d4] ss:$48 sps:$4 sm:$0xff]  }
 0x5b6   :  { %10302 = vmatpush1.bf16.msra.mxu1 %v21102_v30  ;;  %10221 = vmatprep.subr.bf16.mxu0 %v21107_v31  ;;  %v21158_v30 = vld [vmem:[#allocation9 + $0x15dc] ss:$48 sps:$4 sm:$0xff]   ;;  %v21153_v31 = vld [vmem:[#allocation9 + $0x15d0] ss:$48 sps:$4 sm:$0xff]  }
 0x5b7   :  { %10303 = vmatprep.subr.bf16.mxu1 %v21110_v33  ;;  %v21156_v33 = vld [vmem:[#allocation9 + $0x15d8] ss:$48 sps:$4 sm:$0xff]  }
 0x5b9   :  { %10222 = vmatpush1.bf16.msra.mxu0 %v21105_v46  ;;  %v21161_v46 = vld [vmem:[#allocation9 + $0x1634] ss:$48 sps:$4 sm:$0xff]  }
 0x5ba   :  { %10304 = vmatpush1.bf16.msra.mxu1 %v21108_v34  ;;  %10223 = vmatprep.subr.bf16.mxu0 %v21113_v35  ;;  %v21164_v34 = vld [vmem:[#allocation9 + $0x163c] ss:$48 sps:$4 sm:$0xff]   ;;  %v21159_v35 = vld [vmem:[#allocation9 + $0x1630] ss:$48 sps:$4 sm:$0xff]  }
 0x5bb   :  { %10305 = vmatprep.subr.bf16.mxu1 %v21116_v41  ;;  %v21162_v41 = vld [vmem:[#allocation9 + $0x1638] ss:$48 sps:$4 sm:$0xff]  }
 0x5bd   :  { %10224 = vmatpush1.bf16.msra.mxu0 %v21111_v47  ;;  %v21167_v47 = vld [vmem:[#allocation9 + $0x1694] ss:$48 sps:$4 sm:$0xff]  }
 0x5be   :  { %10306 = vmatpush1.bf16.msra.mxu1 %v21114_v42  ;;  %10225 = vmatprep.subr.bf16.mxu0 %v21119_v43  ;;  %v21170_v42 = vld [vmem:[#allocation9 + $0x169c] ss:$48 sps:$4 sm:$0xff]   ;;  %v21165_v43 = vld [vmem:[#allocation9 + $0x1690] ss:$48 sps:$4 sm:$0xff]  }
 0x5bf   :  { %10307 = vmatprep.subr.bf16.mxu1 %v21122_v44  ;;  %v21168_v44 = vld [vmem:[#allocation9 + $0x1698] ss:$48 sps:$4 sm:$0xff]  }
 0x5c1   :  { %10226 = vmatpush1.bf16.msra.mxu0 %v21117_v36  ;;  %v21176_v36 = vld [vmem:[#allocation9 + $0x16fc] ss:$48 sps:$4 sm:$0xff]  }
 0x5c2   :  { %10308 = vmatpush1.bf16.msra.mxu1 %v21120_v38  ;;  %10227 = vmatprep.subr.bf16.mxu0 %v21125_v45  ;;  %v21174_v38 = vld [vmem:[#allocation9 + $0x16f8] ss:$48 sps:$4 sm:$0xff]   ;;  %v21179_v45 = vld [vmem:[#allocation9 + $0x1754] ss:$48 sps:$4 sm:$0xff]  }
 0x5c3   :  { %v7547_v56 = vpop.f32.mrb[28].mxu0  ;;  %10309 = vmatprep.subr.bf16.mxu1 %v21128_v52  ;;  %v21182_v52 = vld [vmem:[#allocation9 + $0x175c] ss:$48 sps:$4 sm:$0xff]  }
 0x5c4   :  { %v7548_v60 = vadd.f32 %v7547_v56, %v5178_v50  ;;  %v7588_v58 = vpop.f32.mrb[28].mxu1  ;;  %v7549_v12 = vpop.f32.mrb[29].mxu0  ;;  %v21177_v50 = vld [vmem:[#allocation9 + $0x1750] ss:$48 sps:$4 sm:$0xff]   ;;  %v21186_v56 = vld [vmem:[#allocation9 + $0x17b8] ss:$48 sps:$4 sm:$0xff]  }
 0x5c5   :  { %v7550_v13 = vadd.f32 %v7549_v12, %v5182_v51  ;;  %v7590_v59 = vpop.f32.mrb[29].mxu1  ;;  %v7551_v61 = vpop.f32.mrb[30].mxu0  ;;  %10228 = vmatpush1.bf16.msra.mxu0 %v21123_v53  ;;  %v21180_v51 = vld [vmem:[#allocation9 + $0x1758] ss:$48 sps:$4 sm:$0xff]   ;;  %v21185_v53 = vld [vmem:[#allocation9 + $0x17b4] ss:$48 sps:$4 sm:$0xff]  }
 0x5c6   :  { %v23307_v63 = vadd.f32 %v7588_v58, %v7548_v60  ;;  %v7592_v3 = vpop.f32.mrb[30].mxu1  ;;  %10310 = vmatpush1.bf16.msra.mxu1 %v21126_v54  ;;  %v7552_v4 = vpop.f32.mrb[31].mxu0  ;;  %10229 = vmatprep.subr.bf16.mxu0 %v21131_v55  ;;  %v21188_v54 = vld [vmem:[#allocation9 + $0x17bc] ss:$48 sps:$4 sm:$0xff]   ;;  %v21183_v55 = vld [vmem:[#allocation9 + $0x17b0] ss:$48 sps:$4 sm:$0xff]  }
 0x5c7   :  { %v23309_v1 = vadd.f32 %v7590_v59, %v7550_v13  ;;  %v7593_v2 = vpop.f32.mrb[31].mxu1  ;;  %10311 = vmatprep.subr.bf16.mxu1 %v21134_v57  ;;  %v21191_v57 = vld [vmem:[#allocation9 + $0xc24] ss:$48 sps:$4 sm:$0xff]   ;;  %v21194_v60 = vld [vmem:[#allocation9 + $0xc2c] ss:$48 sps:$4 sm:$0xff]  }
 0x5c8   :  { %v21189_v58 = vld [vmem:[#allocation9 + $0xc20] ss:$48 sps:$4 sm:$0xff]   ;;  %v21192_v12 = vld [vmem:[#allocation9 + $0xc28] ss:$48 sps:$4 sm:$0xff]   ;;  %v21197_v13 = vld [vmem:[#allocation9 + $0xc84] ss:$48 sps:$4 sm:$0xff]  }
 0x5c9   :  { %10230 = vmatpush1.bf16.msra.mxu0 %v21129_v62  ;;  %v21200_v59 = vld [vmem:[#allocation9 + $0xc8c] ss:$48 sps:$4 sm:$0xff]   ;;  %v21195_v61 = vld [vmem:[#allocation9 + $0xc80] ss:$48 sps:$4 sm:$0xff]   ;;  %v21198_v62 = vld [vmem:[#allocation9 + $0xc88] ss:$48 sps:$4 sm:$0xff]  }
 0x5ca   :  { %10312 = vmatpush1.bf16.msra.mxu1 %v21132_v0  ;;  %10231 = vmatprep.subr.bf16.mxu0 %v21137_v8  ;;  %v21203_v3 = vld [vmem:[#allocation9 + $0xce4] ss:$48 sps:$4 sm:$0xff]   ;;  %v21206_v4 = vld [vmem:[#allocation9 + $0xcec] ss:$48 sps:$4 sm:$0xff]   ;;  %v21201_v0 = vld [vmem:[#allocation9 + $0xce0] ss:$48 sps:$4 sm:$0xff]  }
 0x5cb   :  { %10313 = vmatprep.subr.bf16.mxu1 %v21140_v6  ;;  %v21204_v8 = vld [vmem:[#allocation9 + $0xce8] ss:$48 sps:$4 sm:$0xff]   ;;  %v21209_v2 = vld [vmem:[#allocation9 + $0xd44] ss:$48 sps:$4 sm:$0xff]   ;;  %v21212_v6 = vld [vmem:[#allocation9 + $0xd4c] ss:$48 sps:$4 sm:$0xff]  }
 0x5cd   :  { %10232 = vmatpush1.bf16.msra.mxu0 %v21135_v7  ;;  %v21207_v7 = vld [vmem:[#allocation9 + $0xd40] ss:$48 sps:$4 sm:$0xff]  }
 0x5ce   :  { %10314 = vmatpush1.bf16.msra.mxu1 %v21138_v11  ;;  %10233 = vmatprep.subr.bf16.mxu0 %v21143_v14  ;;  %v21210_v11 = vld [vmem:[#allocation9 + $0xd48] ss:$48 sps:$4 sm:$0xff]   ;;  %v21215_v14 = vld [vmem:[#allocation9 + $0xda4] ss:$48 sps:$4 sm:$0xff]  }
 0x5cf   :  { %10315 = vmatprep.subr.bf16.mxu1 %v21146_v5  ;;  %v21218_v5 = vld [vmem:[#allocation9 + $0xdac] ss:$48 sps:$4 sm:$0xff]  }
 0x5d1   :  { %10234 = vmatpush1.bf16.msra.mxu0 %v21141_v17  ;;  %v21213_v17 = vld [vmem:[#allocation9 + $0xda0] ss:$48 sps:$4 sm:$0xff]  }
 0x5d2   :  { %10316 = vmatpush1.bf16.msra.mxu1 %v21144_v24  ;;  %10235 = vmatprep.subr.bf16.mxu0 %v21149_v25  ;;  %v21221_v24 = vld [vmem:[#allocation9 + $0xe04] ss:$48 sps:$4 sm:$0xff]   ;;  %v21224_v25 = vld [vmem:[#allocation9 + $0xe0c] ss:$48 sps:$4 sm:$0xff]  }
 0x5d3   :  { %10317 = vmatprep.subr.bf16.mxu1 %v21152_v9  ;;  %v21219_v9 = vld [vmem:[#allocation9 + $0xe00] ss:$48 sps:$4 sm:$0xff]  }
 0x5d5   :  { %10236 = vmatpush1.bf16.msra.mxu0 %v21147_v27  ;;  %v21222_v27 = vld [vmem:[#allocation9 + $0xe08] ss:$48 sps:$4 sm:$0xff]  }
 0x5d6   :  { %10318 = vmatpush1.bf16.msra.mxu1 %v21150_v15  ;;  %10237 = vmatprep.subr.bf16.mxu0 %v21155_v29  ;;  %v21227_v15 = vld [vmem:[#allocation9 + $0xe64] ss:$48 sps:$4 sm:$0xff]   ;;  %v21230_v29 = vld [vmem:[#allocation9 + $0xe6c] ss:$48 sps:$4 sm:$0xff]  }
 0x5d7   :  { %10319 = vmatprep.subr.bf16.mxu1 %v21158_v30  ;;  %v21225_v30 = vld [vmem:[#allocation9 + $0xe60] ss:$48 sps:$4 sm:$0xff]  }
 0x5d9   :  { %10238 = vmatpush1.bf16.msra.mxu0 %v21153_v31  ;;  %v21228_v31 = vld [vmem:[#allocation9 + $0xe68] ss:$48 sps:$4 sm:$0xff]  }
 0x5da   :  { %10320 = vmatpush1.bf16.msra.mxu1 %v21156_v33  ;;  %10239 = vmatprep.subr.bf16.mxu0 %v21161_v46  ;;  %v21233_v33 = vld [vmem:[#allocation9 + $0xec4] ss:$48 sps:$4 sm:$0xff]   ;;  %v21236_v46 = vld [vmem:[#allocation9 + $0xecc] ss:$48 sps:$4 sm:$0xff]  }
 0x5db   :  { %10321 = vmatprep.subr.bf16.mxu1 %v21164_v34  ;;  %v21231_v34 = vld [vmem:[#allocation9 + $0xec0] ss:$48 sps:$4 sm:$0xff]  }
 0x5dd   :  { %10240 = vmatpush1.bf16.msra.mxu0 %v21159_v35  ;;  %v21234_v35 = vld [vmem:[#allocation9 + $0xec8] ss:$48 sps:$4 sm:$0xff]  }
 0x5de   :  { %10322 = vmatpush1.bf16.msra.mxu1 %v21162_v41  ;;  %10241 = vmatprep.subr.bf16.mxu0 %v21167_v47  ;;  %v21239_v41 = vld [vmem:[#allocation9 + $0xf24] ss:$48 sps:$4 sm:$0xff]   ;;  %v21242_v47 = vld [vmem:[#allocation9 + $0xf2c] ss:$48 sps:$4 sm:$0xff]  }
 0x5df   :  { %10323 = vmatprep.subr.bf16.mxu1 %v21170_v42  ;;  %v21237_v42 = vld [vmem:[#allocation9 + $0xf20] ss:$48 sps:$4 sm:$0xff]  }
 0x5e1   :  { %10242 = vmatpush1.bf16.msra.mxu0 %v21165_v43  ;;  %v21240_v43 = vld [vmem:[#allocation9 + $0xf28] ss:$48 sps:$4 sm:$0xff]  }
 0x5e2   :  { %10324 = vmatpush1.bf16.msra.mxu1 %v21168_v44  ;;  %10243 = vmatprep.subr.bf16.mxu0 %v21173_v49  ;;  %v21245_v44 = vld [vmem:[#allocation9 + $0xf84] ss:$48 sps:$4 sm:$0xff]   ;;  %v21248_v49 = vld [vmem:[#allocation9 + $0xf8c] ss:$48 sps:$4 sm:$0xff]  }
 0x5e3   :  { %10325 = vmatprep.subr.bf16.mxu1 %v21176_v36  ;;  %v21243_v36 = vld [vmem:[#allocation9 + $0xf80] ss:$48 sps:$4 sm:$0xff]  }
 0x5e5   :  { %10244 = vmatpush1.bf16.msra.mxu0 %v21171_v37  ;;  %v21246_v37 = vld [vmem:[#allocation9 + $0xf88] ss:$48 sps:$4 sm:$0xff]  }
 0x5e6   :  { %10326 = vmatpush1.bf16.msra.mxu1 %v21174_v38  ;;  %10245 = vmatprep.subr.bf16.mxu0 %v21179_v45  ;;  %v21251_v38 = vld [vmem:[#allocation9 + $0xfe4] ss:$48 sps:$4 sm:$0xff]   ;;  %v21254_v45 = vld [vmem:[#allocation9 + $0xfec] ss:$48 sps:$4 sm:$0xff]  }
 0x5e7   :  { %10327 = vmatprep.subr.bf16.mxu1 %v21182_v52  ;;  %v21249_v52 = vld [vmem:[#allocation9 + $0xfe0] ss:$48 sps:$4 sm:$0xff]  }
 0x5e9   :  { %10246 = vmatpush1.bf16.msra.mxu0 %v21177_v50  ;;  %v21252_v50 = vld [vmem:[#allocation9 + $0xfe8] ss:$48 sps:$4 sm:$0xff]  }
 0x5ea   :  { %10328 = vmatpush1.bf16.msra.mxu1 %v21180_v51  ;;  %10247 = vmatprep.subr.bf16.mxu0 %v21185_v53  ;;  %v21257_v51 = vld [vmem:[#allocation9 + $0x1044] ss:$48 sps:$4 sm:$0xff]   ;;  %v21260_v53 = vld [vmem:[#allocation9 + $0x104c] ss:$48 sps:$4 sm:$0xff]  }
 0x5eb   :  { %10329 = vmatprep.subr.bf16.mxu1 %v21188_v54  ;;  %v21255_v54 = vld [vmem:[#allocation9 + $0x1040] ss:$48 sps:$4 sm:$0xff]  }
 0x5ed   :  { %10248 = vmatpush1.bf16.msra.mxu0 %v21183_v55  ;;  %v21258_v55 = vld [vmem:[#allocation9 + $0x1048] ss:$48 sps:$4 sm:$0xff]  }
 0x5ee   :  { %10330 = vmatpush1.bf16.msra.mxu1 %v21186_v56  ;;  %10340 = vmatprep.subr.bf16.mxu0 %v21191_v57  ;;  %v21263_v56 = vld [vmem:[#allocation9 + $0x10a4] ss:$48 sps:$4 sm:$0xff]   ;;  %v21266_v57 = vld [vmem:[#allocation9 + $0x10ac] ss:$48 sps:$4 sm:$0xff]  }
 0x5ef   :  { %10422 = vmatprep.subr.bf16.mxu1 %v21194_v60  ;;  %v21261_v60 = vld [vmem:[#allocation9 + $0x10a0] ss:$48 sps:$4 sm:$0xff]  }
 0x5f0   :  { %10250 = vmatmul.mubr.bf16.vlgmr.msra.gmra.mrb[20].mxu0 %v23279_v39 }
 0x5f1   :  { %10332 = vmatmul.mubr.bf16.vlgmr.msra.gmra.mrb[20].mxu1 %v23279_v39  ;;  %10341 = vmatpush1.bf16.msra.mxu0 %v21189_v58  ;;  %v21264_v58 = vld [vmem:[#allocation9 + $0x10a8] ss:$48 sps:$4 sm:$0xff]  }
 0x5f2   :  { %10423 = vmatpush1.bf16.msra.mxu1 %v21192_v12  ;;  %10342 = vmatprep.subr.bf16.mxu0 %v21197_v13  ;;  %v21269_v12 = vld [vmem:[#allocation9 + $0x1104] ss:$48 sps:$4 sm:$0xff]   ;;  %v21272_v13 = vld [vmem:[#allocation9 + $0x110c] ss:$48 sps:$4 sm:$0xff]  }
 0x5f3   :  { %10424 = vmatprep.subr.bf16.mxu1 %v21200_v59  ;;  %10372 = vmatprep.mubr.bf16.mxu0 %v23265_v28  ;;  %v21267_v59 = vld [vmem:[#allocation9 + $0x1100] ss:$48 sps:$4 sm:$0xff]  }
 0x5f4   :  { %10454 = vmatprep.mubr.bf16.mxu1 %v23265_v28  ;;  %v21216_v28 = vld [vmem:[#allocation9 + $0xda8] ss:$48 sps:$4 sm:$0xff]  }
 0x5f5   :  { %10343 = vmatpush1.bf16.msra.mxu0 %v21195_v61  ;;  %v21270_v61 = vld [vmem:[#allocation9 + $0x1108] ss:$48 sps:$4 sm:$0xff]  }
 0x5f6   :  { %10425 = vmatpush1.bf16.msra.mxu1 %v21198_v62  ;;  %10344 = vmatprep.subr.bf16.mxu0 %v21203_v3  ;;  %v21275_v62 = vld [vmem:[#allocation9 + $0x1164] ss:$48 sps:$4 sm:$0xff]   ;;  %v21278_v3 = vld [vmem:[#allocation9 + $0x116c] ss:$48 sps:$4 sm:$0xff]  }
 0x5f7   :  { %10426 = vmatprep.subr.bf16.mxu1 %v21206_v4  ;;  %v21273_v4 = vld [vmem:[#allocation9 + $0x1160] ss:$48 sps:$4 sm:$0xff]  }
 0x5f9   :  { %10345 = vmatpush1.bf16.msra.mxu0 %v21201_v0  ;;  %v21276_v0 = vld [vmem:[#allocation9 + $0x1168] ss:$48 sps:$4 sm:$0xff]  }
 0x5fa   :  { %10427 = vmatpush1.bf16.msra.mxu1 %v21204_v8  ;;  %10346 = vmatprep.subr.bf16.mxu0 %v21209_v2  ;;  %v21281_v8 = vld [vmem:[#allocation9 + $0x11c4] ss:$48 sps:$4 sm:$0xff]   ;;  %v21284_v2 = vld [vmem:[#allocation9 + $0x11cc] ss:$48 sps:$4 sm:$0xff]  }
 0x5fb   :  { %10428 = vmatprep.subr.bf16.mxu1 %v21212_v6  ;;  %v21279_v6 = vld [vmem:[#allocation9 + $0x11c0] ss:$48 sps:$4 sm:$0xff]  }
 0x5fd   :  { %10347 = vmatpush1.bf16.msra.mxu0 %v21207_v7  ;;  %v21282_v7 = vld [vmem:[#allocation9 + $0x11c8] ss:$48 sps:$4 sm:$0xff]  }
 0x5fe   :  { %10429 = vmatpush1.bf16.msra.mxu1 %v21210_v11  ;;  %10348 = vmatprep.subr.bf16.mxu0 %v21215_v14  ;;  %v21287_v11 = vld [vmem:[#allocation9 + $0x1224] ss:$48 sps:$4 sm:$0xff]   ;;  %v21290_v14 = vld [vmem:[#allocation9 + $0x122c] ss:$48 sps:$4 sm:$0xff]  }
 0x5ff   :  { %10430 = vmatprep.subr.bf16.mxu1 %v21218_v5  ;;  %v21285_v5 = vld [vmem:[#allocation9 + $0x1220] ss:$48 sps:$4 sm:$0xff]  }
 0x601   :  { %10349 = vmatpush1.bf16.msra.mxu0 %v21213_v17  ;;  %v21288_v17 = vld [vmem:[#allocation9 + $0x1228] ss:$48 sps:$4 sm:$0xff]  }
 0x602   :  { %10431 = vmatpush1.bf16.msra.mxu1 %v21216_v28  ;;  %10350 = vmatprep.subr.bf16.mxu0 %v21221_v24  ;;  %v21293_v28 = vld [vmem:[#allocation9 + $0x1284] ss:$48 sps:$4 sm:$0xff]   ;;  %v21296_v24 = vld [vmem:[#allocation9 + $0x128c] ss:$48 sps:$4 sm:$0xff]  }
 0x603   :  { %10432 = vmatprep.subr.bf16.mxu1 %v21224_v25  ;;  %v21291_v25 = vld [vmem:[#allocation9 + $0x1280] ss:$48 sps:$4 sm:$0xff]  }
 0x605   :  { %10351 = vmatpush1.bf16.msra.mxu0 %v21219_v9  ;;  %v21294_v9 = vld [vmem:[#allocation9 + $0x1288] ss:$48 sps:$4 sm:$0xff]  }
 0x606   :  { %10433 = vmatpush1.bf16.msra.mxu1 %v21222_v27  ;;  %10352 = vmatprep.subr.bf16.mxu0 %v21227_v15  ;;  %v21299_v27 = vld [vmem:[#allocation9 + $0x12e4] ss:$48 sps:$4 sm:$0xff]   ;;  %v21302_v15 = vld [vmem:[#allocation9 + $0x12ec] ss:$48 sps:$4 sm:$0xff]  }
 0x607   :  { %10434 = vmatprep.subr.bf16.mxu1 %v21230_v29  ;;  %v21297_v29 = vld [vmem:[#allocation9 + $0x12e0] ss:$48 sps:$4 sm:$0xff]  }
 0x609   :  { %10353 = vmatpush1.bf16.msra.mxu0 %v21225_v30  ;;  %v21300_v30 = vld [vmem:[#allocation9 + $0x12e8] ss:$48 sps:$4 sm:$0xff]  }
 0x60a   :  { %10435 = vmatpush1.bf16.msra.mxu1 %v21228_v31  ;;  %10354 = vmatprep.subr.bf16.mxu0 %v21233_v33  ;;  %v21305_v31 = vld [vmem:[#allocation9 + $0x1344] ss:$48 sps:$4 sm:$0xff]   ;;  %v21308_v33 = vld [vmem:[#allocation9 + $0x134c] ss:$48 sps:$4 sm:$0xff]  }
 0x60b   :  { %10436 = vmatprep.subr.bf16.mxu1 %v21236_v46  ;;  %v21306_v46 = vld [vmem:[#allocation9 + $0x1348] ss:$48 sps:$4 sm:$0xff]  }
 0x60d   :  { %10355 = vmatpush1.bf16.msra.mxu0 %v21231_v34  ;;  %v21311_v34 = vld [vmem:[#allocation9 + $0x13a4] ss:$48 sps:$4 sm:$0xff]  }
 0x60e   :  { %10437 = vmatpush1.bf16.msra.mxu1 %v21234_v35  ;;  %10356 = vmatprep.subr.bf16.mxu0 %v21239_v41  ;;  %v21314_v35 = vld [vmem:[#allocation9 + $0x13ac] ss:$48 sps:$4 sm:$0xff]   ;;  %v21309_v41 = vld [vmem:[#allocation9 + $0x13a0] ss:$48 sps:$4 sm:$0xff]  }
 0x60f   :  { %10438 = vmatprep.subr.bf16.mxu1 %v21242_v47  ;;  %v21317_v47 = vld [vmem:[#allocation9 + $0x1404] ss:$48 sps:$4 sm:$0xff]  }
 0x611   :  { %10357 = vmatpush1.bf16.msra.mxu0 %v21237_v42  ;;  %v21320_v42 = vld [vmem:[#allocation9 + $0x140c] ss:$48 sps:$4 sm:$0xff]  }
 0x612   :  { %10439 = vmatpush1.bf16.msra.mxu1 %v21240_v43  ;;  %10358 = vmatprep.subr.bf16.mxu0 %v21245_v44  ;;  %v21315_v43 = vld [vmem:[#allocation9 + $0x1400] ss:$48 sps:$4 sm:$0xff]   ;;  %v21318_v44 = vld [vmem:[#allocation9 + $0x1408] ss:$48 sps:$4 sm:$0xff]  }
 0x613   :  { %10440 = vmatprep.subr.bf16.mxu1 %v21248_v49  ;;  %v21323_v49 = vld [vmem:[#allocation9 + $0x1464] ss:$48 sps:$4 sm:$0xff]  }
 0x615   :  { %10359 = vmatpush1.bf16.msra.mxu0 %v21243_v36 }
 0x616   :  { %10441 = vmatpush1.bf16.msra.mxu1 %v21246_v37  ;;  %10360 = vmatprep.subr.bf16.mxu0 %v21251_v38  ;;  %v21326_v37 = vld [vmem:[#allocation9 + $0x146c] ss:$48 sps:$4 sm:$0xff]  }
 0x617   :  { %10442 = vmatprep.subr.bf16.mxu1 %v21254_v45 }
 0x619   :  { %10361 = vmatpush1.bf16.msra.mxu0 %v21249_v52 }
 0x61a   :  { %10443 = vmatpush1.bf16.msra.mxu1 %v21252_v50  ;;  %10362 = vmatprep.subr.bf16.mxu0 %v21257_v51  ;;  %v21321_v51 = vld [vmem:[#allocation9 + $0x1460] ss:$48 sps:$4 sm:$0xff]  }
 0x61b   :  { %10444 = vmatprep.subr.bf16.mxu1 %v21260_v53 }
 0x61d   :  { %10363 = vmatpush1.bf16.msra.mxu0 %v21255_v54 }
 0x61e   :  { %10445 = vmatpush1.bf16.msra.mxu1 %v21258_v55  ;;  %10364 = vmatprep.subr.bf16.mxu0 %v21263_v56  ;;  %v21324_v55 = vld [vmem:[#allocation9 + $0x1468] ss:$48 sps:$4 sm:$0xff]   ;;  %v21329_v56 = vld [vmem:[#allocation9 + $0x14c4] ss:$48 sps:$4 sm:$0xff]  }
 0x61f   :  { %10446 = vmatprep.subr.bf16.mxu1 %v21266_v57 }
 0x621   :  { %10365 = vmatpush1.bf16.msra.mxu0 %v21261_v60  ;;  %v21332_v60 = vld [vmem:[#allocation9 + $0x14cc] ss:$48 sps:$4 sm:$0xff]  }
 0x622   :  { %10447 = vmatpush1.bf16.msra.mxu1 %v21264_v58  ;;  %10366 = vmatprep.subr.bf16.mxu0 %v21269_v12  ;;  %v21327_v58 = vld [vmem:[#allocation9 + $0x14c0] ss:$48 sps:$4 sm:$0xff]   ;;  %v21330_v12 = vld [vmem:[#allocation9 + $0x14c8] ss:$48 sps:$4 sm:$0xff]  }
 0x623   :  { %10448 = vmatprep.subr.bf16.mxu1 %v21272_v13  ;;  %v21335_v13 = vld [vmem:[#allocation9 + $0x1524] ss:$48 sps:$4 sm:$0xff]  }
 0x625   :  { %10367 = vmatpush1.bf16.msra.mxu0 %v21267_v59  ;;  %v21338_v59 = vld [vmem:[#allocation9 + $0x152c] ss:$48 sps:$4 sm:$0xff]  }
 0x626   :  { %10449 = vmatpush1.bf16.msra.mxu1 %v21270_v61  ;;  %10368 = vmatprep.subr.bf16.mxu0 %v21275_v62  ;;  %v21333_v61 = vld [vmem:[#allocation9 + $0x1520] ss:$48 sps:$4 sm:$0xff]   ;;  %v21336_v62 = vld [vmem:[#allocation9 + $0x1528] ss:$48 sps:$4 sm:$0xff]  }
 0x627   :  { %10450 = vmatprep.subr.bf16.mxu1 %v21278_v3  ;;  %v21341_v3 = vld [vmem:[#allocation9 + $0x1584] ss:$48 sps:$4 sm:$0xff]  }
 0x629   :  { %10369 = vmatpush1.bf16.msra.mxu0 %v21273_v4  ;;  %v21344_v4 = vld [vmem:[#allocation9 + $0x158c] ss:$48 sps:$4 sm:$0xff]  }
 0x62a   :  { %10451 = vmatpush1.bf16.msra.mxu1 %v21276_v0  ;;  %10370 = vmatprep.subr.bf16.mxu0 %v21281_v8  ;;  %v21339_v0 = vld [vmem:[#allocation9 + $0x1580] ss:$48 sps:$4 sm:$0xff]   ;;  %v21342_v8 = vld [vmem:[#allocation9 + $0x1588] ss:$48 sps:$4 sm:$0xff]  }
 0x62b   :  { %10452 = vmatprep.subr.bf16.mxu1 %v21284_v2  ;;  %v21347_v2 = vld [vmem:[#allocation9 + $0x15e4] ss:$48 sps:$4 sm:$0xff]  }
 0x62d   :  { %10371 = vmatpush1.bf16.msra.mxu0 %v21279_v6  ;;  %v21350_v6 = vld [vmem:[#allocation9 + $0x15ec] ss:$48 sps:$4 sm:$0xff]  }
 0x62e   :  { %10453 = vmatpush1.bf16.msra.mxu1 %v21282_v7  ;;  %10381 = vmatprep.subr.bf16.mxu0 %v21287_v11  ;;  %v21345_v7 = vld [vmem:[#allocation9 + $0x15e0] ss:$48 sps:$4 sm:$0xff]   ;;  %v21348_v11 = vld [vmem:[#allocation9 + $0x15e8] ss:$48 sps:$4 sm:$0xff]  }
 0x62f   :  { %10463 = vmatprep.subr.bf16.mxu1 %v21290_v14  ;;  %v21353_v14 = vld [vmem:[#allocation9 + $0x1644] ss:$48 sps:$4 sm:$0xff]  }
 0x630   :  { %10373 = vmatmul.mubr.bf16.vlgmr.msra.gmra.mrb[32].mxu0 %v23271_v10 }
 0x631   :  { %10382 = vmatpush1.bf16.msra.mxu0 %v21285_v5  ;;  %10455 = vmatmul.mubr.bf16.vlgmr.msra.gmra.mrb[32].mxu1 %v23271_v10  ;;  %v21303_v10 = vld [vmem:[#allocation9 + $0x1340] ss:$48 sps:$4 sm:$0xff]   ;;  %v21356_v5 = vld [vmem:[#allocation9 + $0x164c] ss:$48 sps:$4 sm:$0xff]  }
 0x632   :  { %10464 = vmatpush1.bf16.msra.mxu1 %v21288_v17  ;;  %10383 = vmatprep.subr.bf16.mxu0 %v21293_v28  ;;  %v21351_v17 = vld [vmem:[#allocation9 + $0x1640] ss:$48 sps:$4 sm:$0xff]   ;;  %v21354_v28 = vld [vmem:[#allocation9 + $0x1648] ss:$48 sps:$4 sm:$0xff]  }
 0x633   :  { %10465 = vmatprep.subr.bf16.mxu1 %v21296_v24  ;;  %10413 = vmatprep.mubr.bf16.mxu0 %v23273_v18  ;;  %v21359_v24 = vld [vmem:[#allocation9 + $0x16a4] ss:$48 sps:$4 sm:$0xff]  }
 0x634   :  { %10495 = vmatprep.mubr.bf16.mxu1 %v23273_v18  ;;  %v21312_v18 = vld [vmem:[#allocation9 + $0x13a8] ss:$48 sps:$4 sm:$0xff]  }
 0x635   :  { %10384 = vmatpush1.bf16.msra.mxu0 %v21291_v25  ;;  %v21362_v25 = vld [vmem:[#allocation9 + $0x16ac] ss:$48 sps:$4 sm:$0xff]  }
 0x636   :  { %10466 = vmatpush1.bf16.msra.mxu1 %v21294_v9  ;;  %10385 = vmatprep.subr.bf16.mxu0 %v21299_v27  ;;  %v21357_v9 = vld [vmem:[#allocation9 + $0x16a0] ss:$48 sps:$4 sm:$0xff]   ;;  %v21360_v27 = vld [vmem:[#allocation9 + $0x16a8] ss:$48 sps:$4 sm:$0xff]  }
 0x637   :  { %10467 = vmatprep.subr.bf16.mxu1 %v21302_v15  ;;  %v21365_v15 = vld [vmem:[#allocation9 + $0x1704] ss:$48 sps:$4 sm:$0xff]  }
 0x639   :  { %10386 = vmatpush1.bf16.msra.mxu0 %v21297_v29  ;;  %v21368_v29 = vld [vmem:[#allocation9 + $0x170c] ss:$48 sps:$4 sm:$0xff]  }
 0x63a   :  { %10468 = vmatpush1.bf16.msra.mxu1 %v21300_v30  ;;  %10387 = vmatprep.subr.bf16.mxu0 %v21305_v31  ;;  %v21363_v30 = vld [vmem:[#allocation9 + $0x1700] ss:$48 sps:$4 sm:$0xff]   ;;  %v21366_v31 = vld [vmem:[#allocation9 + $0x1708] ss:$48 sps:$4 sm:$0xff]  }
 0x63b   :  { %10469 = vmatprep.subr.bf16.mxu1 %v21308_v33  ;;  %v21371_v33 = vld [vmem:[#allocation9 + $0x1764] ss:$48 sps:$4 sm:$0xff]  }
 0x63d   :  { %10388 = vmatpush1.bf16.msra.mxu0 %v21303_v10  ;;  %v21374_v10 = vld [vmem:[#allocation9 + $0x176c] ss:$48 sps:$4 sm:$0xff]  }
 0x63e   :  { %10470 = vmatpush1.bf16.msra.mxu1 %v21306_v46  ;;  %10389 = vmatprep.subr.bf16.mxu0 %v21311_v34  ;;  %v21369_v46 = vld [vmem:[#allocation9 + $0x1760] ss:$48 sps:$4 sm:$0xff]   ;;  %v21372_v34 = vld [vmem:[#allocation9 + $0x1768] ss:$48 sps:$4 sm:$0xff]  }
 0x63f   :  { %10471 = vmatprep.subr.bf16.mxu1 %v21314_v35  ;;  %v21377_v35 = vld [vmem:[#allocation9 + $0x17c4] ss:$48 sps:$4 sm:$0xff]  }
 0x641   :  { %10390 = vmatpush1.bf16.msra.mxu0 %v21309_v41  ;;  %v21380_v41 = vld [vmem:[#allocation9 + $0x17cc] ss:$48 sps:$4 sm:$0xff]  }
 0x642   :  { %10472 = vmatpush1.bf16.msra.mxu1 %v21312_v18  ;;  %10391 = vmatprep.subr.bf16.mxu0 %v21317_v47  ;;  %v21375_v18 = vld [vmem:[#allocation9 + $0x17c0] ss:$48 sps:$4 sm:$0xff]   ;;  %v21378_v47 = vld [vmem:[#allocation9 + $0x17c8] ss:$48 sps:$4 sm:$0xff]  }
 0x643   :  { %v23319_v36 = vpop.f32.mrb[16].mxu0  ;;  %10473 = vmatprep.subr.bf16.mxu1 %v21320_v42  ;;  %v21383_v42 = vld [vmem:[#allocation8 + $0xc04] ss:$48 sps:$4 sm:$0xff]  }
 0x644   :  { %v23321_v38 = vpop.f32.mrb[16].mxu1  ;;  %v23323_v45 = vpop.f32.mrb[17].mxu0 }
 0x645   :  { %v23325_v52 = vpop.f32.mrb[17].mxu1  ;;  %v10091_v50 = vpop.f32.mrb[18].mxu0  ;;  %10392 = vmatpush1.bf16.msra.mxu0 %v21315_v43  ;;  %v21386_v43 = vld [vmem:[#allocation8 + $0xc0c] ss:$48 sps:$4 sm:$0xff]  }
 0x646   :  { %v10173_v53 = vpop.f32.mrb[18].mxu1  ;;  %10474 = vmatpush1.bf16.msra.mxu1 %v21318_v44  ;;  %v10092_v54 = vpop.f32.mrb[19].mxu0  ;;  %10393 = vmatprep.subr.bf16.mxu0 %v21323_v49  ;;  %v21381_v44 = vld [vmem:[#allocation8 + $0xc00] ss:$48 sps:$4 sm:$0xff]   ;;  %v21384_v49 = vld [vmem:[#allocation8 + $0xc08] ss:$48 sps:$4 sm:$0xff]  }
 0x647   :  { %v10174_v57 = vpop.f32.mrb[19].mxu1  ;;  %10475 = vmatprep.subr.bf16.mxu1 %v21326_v37  ;;  %v21389_v37 = vld [vmem:[#allocation8 + $0xc64] ss:$48 sps:$4 sm:$0xff]   ;;  %v21392_v50 = vld [vmem:[#allocation8 + $0xc6c] ss:$48 sps:$4 sm:$0xff]  }
 0x648   :  { %v21390_v53 = vld [vmem:[#allocation8 + $0xc68] ss:$48 sps:$4 sm:$0xff]   ;;  %v21395_v54 = vld [vmem:[#allocation8 + $0xcc4] ss:$48 sps:$4 sm:$0xff]  }
 0x649   :  { %10394 = vmatpush1.bf16.msra.mxu0 %v21321_v51  ;;  %v21387_v51 = vld [vmem:[#allocation8 + $0xc60] ss:$48 sps:$4 sm:$0xff]   ;;  %v21396_v57 = vld [vmem:[#allocation8 + $0xcc8] ss:$48 sps:$4 sm:$0xff]  }
 0x64a   :  { %10476 = vmatpush1.bf16.msra.mxu1 %v21324_v55  ;;  %10395 = vmatprep.subr.bf16.mxu0 %v21329_v56  ;;  %v21398_v55 = vld [vmem:[#allocation8 + $0xccc] ss:$48 sps:$4 sm:$0xff]   ;;  %v21393_v56 = vld [vmem:[#allocation8 + $0xcc0] ss:$48 sps:$4 sm:$0xff]  }
 0x64b   :  { %10477 = vmatprep.subr.bf16.mxu1 %v21332_v60  ;;  %v21401_v60 = vld [vmem:[#allocation8 + $0xd24] ss:$48 sps:$4 sm:$0xff]  }
 0x64d   :  { %10396 = vmatpush1.bf16.msra.mxu0 %v21327_v58  ;;  %v21404_v58 = vld [vmem:[#allocation8 + $0xd2c] ss:$48 sps:$4 sm:$0xff]  }
 0x64e   :  { %10478 = vmatpush1.bf16.msra.mxu1 %v21330_v12  ;;  %10397 = vmatprep.subr.bf16.mxu0 %v21335_v13  ;;  %v21399_v12 = vld [vmem:[#allocation8 + $0xd20] ss:$48 sps:$4 sm:$0xff]   ;;  %v21407_v13 = vld [vmem:[#allocation8 + $0xd84] ss:$48 sps:$4 sm:$0xff]  }
 0x64f   :  { %10479 = vmatprep.subr.bf16.mxu1 %v21338_v59  ;;  %v21410_v59 = vld [vmem:[#allocation8 + $0xd8c] ss:$48 sps:$4 sm:$0xff]  }
 0x651   :  { %10398 = vmatpush1.bf16.msra.mxu0 %v21333_v61  ;;  %v21405_v61 = vld [vmem:[#allocation8 + $0xd80] ss:$48 sps:$4 sm:$0xff]  }
 0x652   :  { %10480 = vmatpush1.bf16.msra.mxu1 %v21336_v62  ;;  %10399 = vmatprep.subr.bf16.mxu0 %v21341_v3  ;;  %v21408_v62 = vld [vmem:[#allocation8 + $0xd88] ss:$48 sps:$4 sm:$0xff]   ;;  %v21413_v3 = vld [vmem:[#allocation8 + $0xde4] ss:$48 sps:$4 sm:$0xff]  }
 0x653   :  { %10481 = vmatprep.subr.bf16.mxu1 %v21344_v4  ;;  %v21416_v4 = vld [vmem:[#allocation8 + $0xdec] ss:$48 sps:$4 sm:$0xff]  }
 0x655   :  { %10400 = vmatpush1.bf16.msra.mxu0 %v21339_v0  ;;  %v21411_v0 = vld [vmem:[#allocation8 + $0xde0] ss:$48 sps:$4 sm:$0xff]  }
 0x656   :  { %10482 = vmatpush1.bf16.msra.mxu1 %v21342_v8  ;;  %10401 = vmatprep.subr.bf16.mxu0 %v21347_v2  ;;  %v21414_v8 = vld [vmem:[#allocation8 + $0xde8] ss:$48 sps:$4 sm:$0xff]   ;;  %v21419_v2 = vld [vmem:[#allocation8 + $0xe44] ss:$48 sps:$4 sm:$0xff]  }
 0x657   :  { %10483 = vmatprep.subr.bf16.mxu1 %v21350_v6  ;;  %v21422_v6 = vld [vmem:[#allocation8 + $0xe4c] ss:$48 sps:$4 sm:$0xff]  }
 0x659   :  { %10402 = vmatpush1.bf16.msra.mxu0 %v21345_v7  ;;  %v21417_v7 = vld [vmem:[#allocation8 + $0xe40] ss:$48 sps:$4 sm:$0xff]  }
 0x65a   :  { %10484 = vmatpush1.bf16.msra.mxu1 %v21348_v11  ;;  %10403 = vmatprep.subr.bf16.mxu0 %v21353_v14  ;;  %v21420_v11 = vld [vmem:[#allocation8 + $0xe48] ss:$48 sps:$4 sm:$0xff]   ;;  %v21425_v14 = vld [vmem:[#allocation8 + $0xea4] ss:$48 sps:$4 sm:$0xff]  }
 0x65b   :  { %10485 = vmatprep.subr.bf16.mxu1 %v21356_v5  ;;  %v21428_v5 = vld [vmem:[#allocation8 + $0xeac] ss:$48 sps:$4 sm:$0xff]  }
 0x65d   :  { %10404 = vmatpush1.bf16.msra.mxu0 %v21351_v17  ;;  %v21423_v17 = vld [vmem:[#allocation8 + $0xea0] ss:$48 sps:$4 sm:$0xff]  }
 0x65e   :  { %10486 = vmatpush1.bf16.msra.mxu1 %v21354_v28  ;;  %10405 = vmatprep.subr.bf16.mxu0 %v21359_v24  ;;  %v21426_v28 = vld [vmem:[#allocation8 + $0xea8] ss:$48 sps:$4 sm:$0xff]   ;;  %v21431_v24 = vld [vmem:[#allocation8 + $0xf04] ss:$48 sps:$4 sm:$0xff]  }
 0x65f   :  { %10487 = vmatprep.subr.bf16.mxu1 %v21362_v25  ;;  %v21434_v25 = vld [vmem:[#allocation8 + $0xf0c] ss:$48 sps:$4 sm:$0xff]  }
 0x661   :  { %10406 = vmatpush1.bf16.msra.mxu0 %v21357_v9  ;;  %v21429_v9 = vld [vmem:[#allocation8 + $0xf00] ss:$48 sps:$4 sm:$0xff]  }
 0x662   :  { %10488 = vmatpush1.bf16.msra.mxu1 %v21360_v27  ;;  %10407 = vmatprep.subr.bf16.mxu0 %v21365_v15  ;;  %v21432_v27 = vld [vmem:[#allocation8 + $0xf08] ss:$48 sps:$4 sm:$0xff]   ;;  %v21437_v15 = vld [vmem:[#allocation8 + $0xf64] ss:$48 sps:$4 sm:$0xff]  }
 0x663   :  { %10489 = vmatprep.subr.bf16.mxu1 %v21368_v29  ;;  %v21440_v29 = vld [vmem:[#allocation8 + $0xf6c] ss:$48 sps:$4 sm:$0xff]  }
 0x665   :  { %10408 = vmatpush1.bf16.msra.mxu0 %v21363_v30  ;;  %v21435_v30 = vld [vmem:[#allocation8 + $0xf60] ss:$48 sps:$4 sm:$0xff]  }
 0x666   :  { %10490 = vmatpush1.bf16.msra.mxu1 %v21366_v31  ;;  %10409 = vmatprep.subr.bf16.mxu0 %v21371_v33  ;;  %v21438_v31 = vld [vmem:[#allocation8 + $0xf68] ss:$48 sps:$4 sm:$0xff]  }
 0x667   :  { %10491 = vmatprep.subr.bf16.mxu1 %v21374_v10 }
 0x669   :  { %10410 = vmatpush1.bf16.msra.mxu0 %v21369_v46 }
 0x66a   :  { %10492 = vmatpush1.bf16.msra.mxu1 %v21372_v34  ;;  %10411 = vmatprep.subr.bf16.mxu0 %v21377_v35  ;;  %v21443_v34 = vld [vmem:[#allocation8 + $0xfc4] ss:$48 sps:$4 sm:$0xff]   ;;  %v21446_v35 = vld [vmem:[#allocation8 + $0xfcc] ss:$48 sps:$4 sm:$0xff]  }
 0x66b   :  { %10493 = vmatprep.subr.bf16.mxu1 %v21380_v41 }
 0x66d   :  { %10412 = vmatpush1.bf16.msra.mxu0 %v21375_v18 }
 0x66e   :  { %10494 = vmatpush1.bf16.msra.mxu1 %v21378_v47  ;;  %13021 = vmatprep.subr.bf16.mxu0 %v21383_v42  ;;  %v21441_v47 = vld [vmem:[#allocation8 + $0xfc0] ss:$48 sps:$4 sm:$0xff]   ;;  %v21444_v42 = vld [vmem:[#allocation8 + $0xfc8] ss:$48 sps:$4 sm:$0xff]  }
 0x66f   :  { %13103 = vmatprep.subr.bf16.mxu1 %v21386_v43 }
 0x670   :  { %10414 = vmatmul.mubr.bf16.vlgmr.msra.gmra.mrb[32].mxu0 %v23279_v39 }
 0x671   :  { %10496 = vmatmul.mubr.bf16.vlgmr.msra.gmra.mrb[32].mxu1 %v23279_v39  ;;  %13022 = vmatpush1.bf16.msra.mxu0 %v21381_v44  ;;  %v21402_v39 = vld [vmem:[#allocation8 + $0xd28] ss:$48 sps:$4 sm:$0xff]  }
 0x672   :  { %13104 = vmatpush1.bf16.msra.mxu1 %v21384_v49  ;;  %13023 = vmatprep.subr.bf16.mxu0 %v21389_v37  ;;  %v21449_v37 = vld [vmem:[#allocation8 + $0x1024] ss:$48 sps:$4 sm:$0xff]  }
 0x673   :  { %13105 = vmatprep.subr.bf16.mxu1 %v21392_v50  ;;  %v21452_v50 = vld [vmem:[#allocation8 + $0x102c] ss:$48 sps:$4 sm:$0xff]  }
 0x675   :  { %13024 = vmatpush1.bf16.msra.mxu0 %v21387_v51  ;;  %v21447_v51 = vld [vmem:[#allocation8 + $0x1020] ss:$48 sps:$4 sm:$0xff]  }
 0x676   :  { %13106 = vmatpush1.bf16.msra.mxu1 %v21390_v53  ;;  %13025 = vmatprep.subr.bf16.mxu0 %v21395_v54  ;;  %v21450_v53 = vld [vmem:[#allocation8 + $0x1028] ss:$48 sps:$4 sm:$0xff]   ;;  %v21455_v54 = vld [vmem:[#allocation8 + $0x1084] ss:$48 sps:$4 sm:$0xff]  }
 0x677   :  { %13107 = vmatprep.subr.bf16.mxu1 %v21398_v55  ;;  %v21458_v55 = vld [vmem:[#allocation8 + $0x108c] ss:$48 sps:$4 sm:$0xff]  }
 0x679   :  { %13026 = vmatpush1.bf16.msra.mxu0 %v21393_v56  ;;  %v21453_v56 = vld [vmem:[#allocation8 + $0x1080] ss:$48 sps:$4 sm:$0xff]  }
 0x67a   :  { %13108 = vmatpush1.bf16.msra.mxu1 %v21396_v57  ;;  %13027 = vmatprep.subr.bf16.mxu0 %v21401_v60  ;;  %v21456_v57 = vld [vmem:[#allocation8 + $0x1088] ss:$48 sps:$4 sm:$0xff]   ;;  %v21461_v60 = vld [vmem:[#allocation8 + $0x10e4] ss:$48 sps:$4 sm:$0xff]  }
 0x67b   :  { %13109 = vmatprep.subr.bf16.mxu1 %v21404_v58  ;;  %v21464_v58 = vld [vmem:[#allocation8 + $0x10ec] ss:$48 sps:$4 sm:$0xff]  }
 0x67d   :  { %13028 = vmatpush1.bf16.msra.mxu0 %v21399_v12  ;;  %v21459_v12 = vld [vmem:[#allocation8 + $0x10e0] ss:$48 sps:$4 sm:$0xff]  }
 0x67e   :  { %13110 = vmatpush1.bf16.msra.mxu1 %v21402_v39  ;;  %13029 = vmatprep.subr.bf16.mxu0 %v21407_v13  ;;  %v21462_v39 = vld [vmem:[#allocation8 + $0x10e8] ss:$48 sps:$4 sm:$0xff]   ;;  %v21467_v13 = vld [vmem:[#allocation8 + $0x1144] ss:$48 sps:$4 sm:$0xff]  }
 0x67f   :  { %13111 = vmatprep.subr.bf16.mxu1 %v21410_v59  ;;  %v21470_v59 = vld [vmem:[#allocation8 + $0x114c] ss:$48 sps:$4 sm:$0xff]  }
 0x681   :  { %13030 = vmatpush1.bf16.msra.mxu0 %v21405_v61  ;;  %v21465_v61 = vld [vmem:[#allocation8 + $0x1140] ss:$48 sps:$4 sm:$0xff]  }
 0x682   :  { %13112 = vmatpush1.bf16.msra.mxu1 %v21408_v62  ;;  %13031 = vmatprep.subr.bf16.mxu0 %v21413_v3  ;;  %v21468_v62 = vld [vmem:[#allocation8 + $0x1148] ss:$48 sps:$4 sm:$0xff]   ;;  %v21473_v3 = vld [vmem:[#allocation8 + $0x11a4] ss:$48 sps:$4 sm:$0xff]  }
 0x683   :  { %13113 = vmatprep.subr.bf16.mxu1 %v21416_v4  ;;  %v21476_v4 = vld [vmem:[#allocation8 + $0x11ac] ss:$48 sps:$4 sm:$0xff]  }
 0x685   :  { %13032 = vmatpush1.bf16.msra.mxu0 %v21411_v0  ;;  %v21471_v0 = vld [vmem:[#allocation8 + $0x11a0] ss:$48 sps:$4 sm:$0xff]  }
 0x686   :  { %13114 = vmatpush1.bf16.msra.mxu1 %v21414_v8  ;;  %13033 = vmatprep.subr.bf16.mxu0 %v21419_v2  ;;  %v21474_v8 = vld [vmem:[#allocation8 + $0x11a8] ss:$48 sps:$4 sm:$0xff]   ;;  %v21479_v2 = vld [vmem:[#allocation8 + $0x1204] ss:$48 sps:$4 sm:$0xff]  }
 0x687   :  { %13115 = vmatprep.subr.bf16.mxu1 %v21422_v6  ;;  %v21482_v6 = vld [vmem:[#allocation8 + $0x120c] ss:$48 sps:$4 sm:$0xff]  }
 0x689   :  { %13034 = vmatpush1.bf16.msra.mxu0 %v21417_v7  ;;  %v5064_v7 = vld [vmem:[#allocation11 + $0x18] sm:$0xff] }
 0x68a   :  { %13116 = vmatpush1.bf16.msra.mxu1 %v21420_v11  ;;  %13035 = vmatprep.subr.bf16.mxu0 %v21425_v14  ;;  %v5078_v11 = vrot.slane %v5064_v7, %v23158_v20  ;;  %v7987_v14 = vrot.slane %v5064_v7, %v23154_v16 }
 0x68b   :  { %13117 = vmatprep.subr.bf16.mxu1 %v21428_v5  ;;  %v5086_v5 = vrot.slane %v5064_v7, %v23162_v22 }
 0x68d   :  { %13036 = vmatpush1.bf16.msra.mxu0 %v21423_v17  ;;  %v7995_v17 = vrot.slane %v5064_v7, %v23156_v19 }
 0x68e   :  { %13118 = vmatpush1.bf16.msra.mxu1 %v21426_v28  ;;  %13037 = vmatprep.subr.bf16.mxu0 %v21431_v24  ;;  %v5082_v28 = vrot.slane %v5064_v7, %v23166_v48  ;;  %v7991_v24 = vrot.slane %v5064_v7, %v23160_v21 }
 0x68f   :  { %13119 = vmatprep.subr.bf16.mxu1 %v21434_v25  ;;  %v5090_v25 = vrot.slane %v5064_v7, %v23170_v26 }
 0x691   :  { %13038 = vmatpush1.bf16.msra.mxu0 %v21429_v9  ;;  %v7999_v9 = vrot.slane %v5064_v7, %v23164_v23 }
 0x692   :  { %13120 = vmatpush1.bf16.msra.mxu1 %v21432_v27  ;;  %13039 = vmatprep.subr.bf16.mxu0 %v21437_v15  ;;  %v5138_v27 = vrot.slane %v5078_v11, %v23158_v20  ;;  %v8047_v15 = vrot.slane %v7987_v14, %v23154_v16 }
 0x693   :  { %13121 = vmatprep.subr.bf16.mxu1 %v21440_v29  ;;  %v5146_v29 = vrot.slane %v5086_v5, %v23158_v20 }
 0x695   :  { %13040 = vmatpush1.bf16.msra.mxu0 %v21435_v30  ;;  %v8055_v30 = vrot.slane %v7995_v17, %v23154_v16 }
 0x696   :  { %13122 = vmatpush1.bf16.msra.mxu1 %v21438_v31  ;;  %13041 = vmatprep.subr.bf16.mxu0 %v21443_v34  ;;  %v5142_v31 = vrot.slane %v5082_v28, %v23158_v20  ;;  %v8051_v34 = vrot.slane %v7991_v24, %v23154_v16 }
 0x697   :  { %13123 = vmatprep.subr.bf16.mxu1 %v21446_v35  ;;  %v5150_v35 = vrot.slane %v5090_v25, %v23158_v20 }
 0x699   :  { %13042 = vmatpush1.bf16.msra.mxu0 %v21441_v47  ;;  %v19154_v47 = vadd.f32 %v8047_v15, %v5138_v27 }
 0x69a   :  { %13124 = vmatpush1.bf16.msra.mxu1 %v21444_v42  ;;  %13043 = vmatprep.subr.bf16.mxu0 %v21449_v37  ;;  %v19158_v42 = vadd.f32 %v8055_v30, %v5146_v29 }
 0x69b   :  { %13125 = vmatprep.subr.bf16.mxu1 %v21452_v50  ;;  %v19155_v37 = vadd.f32 %v19154_v47, %v23319_v36 }
 0x69d   :  { %13044 = vmatpush1.bf16.msra.mxu0 %v21447_v51 }
 0x69e   :  { %13126 = vmatpush1.bf16.msra.mxu1 %v21450_v53  ;;  %13045 = vmatprep.subr.bf16.mxu0 %v21455_v54  ;;  %v19159_v53 = vadd.f32 %v19158_v42, %v23321_v38 }
 0x69f   :  { %13127 = vmatprep.subr.bf16.mxu1 %v21458_v55 }
 0x6a1   :  { %13046 = vmatpush1.bf16.msra.mxu0 %v21453_v56 }
 0x6a2   :  { %13128 = vmatpush1.bf16.msra.mxu1 %v21456_v57  ;;  %13047 = vmatprep.subr.bf16.mxu0 %v21461_v60 }
 0x6a3   :  { %13129 = vmatprep.subr.bf16.mxu1 %v21464_v58 }
 0x6a5   :  { %13048 = vmatpush1.bf16.msra.mxu0 %v21459_v12 }
 0x6a6   :  { %13130 = vmatpush1.bf16.msra.mxu1 %v21462_v39  ;;  %13049 = vmatprep.subr.bf16.mxu0 %v21467_v13  ;;  %v18273_v39 = vmul.f32 -1.442695, %v19155_v37 }
 0x6a7   :  { %13131 = vmatprep.subr.bf16.mxu1 %v21470_v59  ;;  %v18275_v59 = vmul.f32 -1.442695, %v19159_v53 }
 0x6a8   :  { %22605 = vpow2.f32 %v18273_v39 }
 0x6a9   :  { %13050 = vmatpush1.bf16.msra.mxu0 %v21465_v61  ;;  %22607 = vpow2.f32 %v18275_v59 }
 0x6aa   :  { %13132 = vmatpush1.bf16.msra.mxu1 %v21468_v62  ;;  %13051 = vmatprep.subr.bf16.mxu0 %v21473_v3 }
 0x6ab   :  { %13133 = vmatprep.subr.bf16.mxu1 %v21476_v4 }
 0x6ad   :  { %13052 = vmatpush1.bf16.msra.mxu0 %v21471_v0 }
 0x6ae   :  { %13134 = vmatpush1.bf16.msra.mxu1 %v21474_v8  ;;  %13062 = vmatprep.subr.bf16.mxu0 %v21479_v2 }
 0x6af   :  { %13144 = vmatprep.subr.bf16.mxu1 %v21482_v6 }
 0x6c3   :  { %v23329_v33 = vpop.f32.mrb[20].mxu0 }
 0x6c4   :  { %v23331_v10 = vpop.f32.mrb[20].mxu1  ;;  %v23333_v46 = vpop.f32.mrb[21].mxu0 }
 0x6c5   :  { %v23335_v41 = vpop.f32.mrb[21].mxu1  ;;  %v10255_v18 = vpop.f32.mrb[22].mxu0 }
 0x6c6   :  { %v10337_v43 = vpop.f32.mrb[22].mxu1  ;;  %v10256_v44 = vpop.f32.mrb[23].mxu0  ;;  %v8059_v18 = vrot.slane %v7999_v9, %v23154_v16 }
 0x6c7   :  { %v10338_v49 = vpop.f32.mrb[23].mxu1  ;;  %v5065_v43 = vld [vmem:[#allocation11 + $0x20] sm:$0xff]  ;;  %v19156_v44 = vadd.f32 %v8051_v34, %v5142_v31  ;;  %v22606_v9 = vpop.eup %22605 }
 0x6c8   :  { %v19160_v49 = vadd.f32 %v8059_v18, %v5150_v35  ;;  %v5094_v50 = vrot.slane %v5065_v43, %v23158_v20  ;;  %v8003_v51 = vrot.slane %v5065_v43, %v23154_v16  ;;  %v5102_v54 = vrot.slane %v5065_v43, %v23162_v22  ;;  %v22608_v15 = vpop.eup %22607 }
 0x6c9   :  { %v8011_v55 = vrot.slane %v5065_v43, %v23156_v19  ;;  %v19157_v56 = vadd.f32 %v19156_v44, %v23323_v45  ;;  %v5098_v57 = vrot.slane %v5065_v43, %v23166_v48  ;;  %v8007_v60 = vrot.slane %v5065_v43, %v23160_v21 }
 0x6ca   :  { %v19161_v58 = vadd.f32 %v19160_v49, %v23325_v52  ;;  %v5106_v36 = vrot.slane %v5065_v43, %v23170_v26  ;;  %v8015_v12 = vrot.slane %v5065_v43, %v23164_v23  ;;  %v5154_v13 = vrot.slane %v5094_v50, %v23158_v20 }
 0x6cb   :  { %v8063_v38 = vrot.slane %v8003_v51, %v23154_v16  ;;  %v5162_v61 = vrot.slane %v5102_v54, %v23158_v20  ;;  %v8071_v45 = vrot.slane %v8011_v55, %v23154_v16  ;;  %v18274_v62 = vmul.f32 -1.442695, %v19157_v56 }
 0x6cc   :  { %v5158_v3 = vrot.slane %v5098_v57, %v23158_v20  ;;  %v8067_v4 = vrot.slane %v8007_v60, %v23154_v16  ;;  %v18276_v52 = vmul.f32 -1.442695, %v19161_v58  ;;  %v5166_v0 = vrot.slane %v5106_v36, %v23158_v20 }
 0x6cd   :  { %v8075_v8 = vrot.slane %v8015_v12, %v23154_v16  ;;  %v19162_v2 = vadd.f32 %v8063_v38, %v5154_v13  ;;  %v19166_v6 = vadd.f32 %v8071_v45, %v5162_v61  ;;  %22609 = vpow2.f32 %v18274_v62 }
 0x6ce   :  { %v19164_v7 = vadd.f32 %v8067_v4, %v5158_v3  ;;  %22611 = vpow2.f32 %v18276_v52  ;;  %v10520_v34 = vadd.f32 1.0, %v22606_v9  ;;  %v10522_v35 = vadd.f32 1.0, %v22608_v15 }
 0x6cf   :  { %v19168_v11 = vadd.f32 %v8075_v8, %v5166_v0  ;;  %v19163_v14 = vadd.f32 %v19162_v2, %v23329_v33  ;;  %v19167_v5 = vadd.f32 %v19166_v6, %v23331_v10 }
 0x6d0   :  { %v19165_v17 = vadd.f32 %v19164_v7, %v23333_v46  ;;  %v22689_v46 = vld [vmem:[#allocation11 + $0x28] sm:$0xff] }
 0x6d1   :  { %v19169_v28 = vadd.f32 %v19168_v11, %v23335_v41  ;;  %v18277_v24 = vmul.f32 -1.442695, %v19163_v14  ;;  %v18279_v25 = vmul.f32 -1.442695, %v19167_v5  ;;  %v8019_v41 = vrot.slane %v22689_v46, %v23154_v16 }
 0x6d2   :  { %v18278_v27 = vmul.f32 -1.442695, %v19165_v17  ;;  %v8027_v18 = vrot.slane %v22689_v46, %v23156_v19  ;;  %v8023_v47 = vrot.slane %v22689_v46, %v23160_v21  ;;  %v8031_v42 = vrot.slane %v22689_v46, %v23164_v23 }
 0x6d3   :  { %v18280_v29 = vmul.f32 -1.442695, %v19169_v28  ;;  %22613 = vpow2.f32 %v18277_v24  ;;  %v8079_v49 = vrot.slane %v8019_v41, %v23154_v16 }
 0x6d4   :  { %22615 = vpow2.f32 %v18279_v25  ;;  %v8087_v50 = vrot.slane %v8027_v18, %v23154_v16  ;;  %v8083_v51 = vrot.slane %v8023_v47, %v23154_v16  ;;  %v8091_v55 = vrot.slane %v8031_v42, %v23154_v16  ;;  %v22692_v47 = vld [vmem:[#allocation3 + $0x28] sm:$0xff] }
 0x6d5   :  { %22617 = vpow2.f32 %v18278_v27 }
 0x6d6   :  { %22619 = vpow2.f32 %v18280_v29 }
 0x6d7   :  { %v22610_v30 = vpop.eup %22609  ;;  %22621 = vrcp.f32 %v10520_v34  ;;  %v22690_v34 = vld [vmem:[#allocation3 + $0x20] sm:$0xff] }
 0x6d8   :  { %v22612_v31 = vpop.eup %22611  ;;  %v10521_v33 = vadd.f32 1.0, %v22610_v30  ;;  %22623 = vrcp.f32 %v10522_v35 }
 0x6d9   :  { %v10523_v10 = vadd.f32 1.0, %v22612_v31 }
 0x6da   :  { %22625 = vrcp.f32 %v10521_v33 }
 0x6db   :  { %22627 = vrcp.f32 %v10523_v10 }
 0x6dd   :  { %v22614_v43 = vpop.eup %22613 }
 0x6de   :  { %v22616_v44 = vpop.eup %22615  ;;  %v10548_v54 = vadd.f32 1.0, %v22614_v43 }
 0x6df   :  { %v22618_v37 = vpop.eup %22617  ;;  %v10550_v56 = vadd.f32 1.0, %v22616_v44 }
 0x6e0   :  { %v22620_v53 = vpop.eup %22619  ;;  %v10549_v58 = vadd.f32 1.0, %v22618_v37  ;;  %22629 = vrcp.f32 %v10548_v54 }
 0x6e1   :  { %v22622_v60 = vpop.eup %22621  ;;  %v10551_v38 = vadd.f32 1.0, %v22620_v53  ;;  %22631 = vrcp.f32 %v10550_v56  ;;  %v21477_v56 = vld [vmem:[#allocation8 + $0x1200] ss:$48 sps:$4 sm:$0xff]  }
 0x6e2   :  { %v22624_v13 = vpop.eup %22623  ;;  %22633 = vrcp.f32 %v10549_v58  ;;  %v21485_v58 = vld [vmem:[#allocation8 + $0x1264] ss:$48 sps:$4 sm:$0xff]  }
 0x6e3   :  { %22635 = vrcp.f32 %v10551_v38  ;;  %v21491_v38 = vld [vmem:[#allocation8 + $0x12c4] ss:$48 sps:$4 sm:$0xff]  }
 0x6e4   :  { %v22626_v3 = vpop.eup %22625 }
 0x6e5   :  { %v22628_v2 = vpop.eup %22627 }
 0x6ea   :  { %v22630_v25 = vpop.eup %22629 }
 0x6eb   :  { %v22632_v9 = vpop.eup %22631  ;;  %v10572_v29 = vsub.f32 1.0, %v22630_v25  ;;  %v10580_v35 = vmul.f32 %v22690_v34, %v22630_v25  ;;  %v21516_v25 = vld [vmem:[#allocation8 + $0x1448] ss:$48 sps:$4 sm:$0xff]  }
 0x6ec   :  { %v22634_v27 = vpop.eup %22633  ;;  %v10574_v31 = vsub.f32 1.0, %v22632_v9  ;;  %v21528_v34 = vld [vmem:[#allocation8 + $0x1508] ss:$48 sps:$4 sm:$0xff]  }
 0x6ed   :  { %v22636_v15 = vpop.eup %22635  ;;  %v10573_v33 = vsub.f32 1.0, %v22634_v27  ;;  %v10581_v42 = vmul.f32 %v22692_v47, %v22634_v27  ;;  %v21524_v27 = vld [vmem:[#allocation8 + $0x14ac] ss:$48 sps:$4 sm:$0xff]  }
 0x6ee   :  { %v10575_v41 = vsub.f32 1.0, %v22636_v15  ;;  %v21548_v47 = vld [vmem:[#allocation8 + $0x162c] ss:$48 sps:$4 sm:$0xff]  }
 0x743   :  { %v10415_v57 = vpop.f32.mrb[32].mxu0 }
 0x744   :  { %v19170_v36 = vadd.f32 %v10415_v57, %v8079_v49  ;;  %v10497_v12 = vpop.f32.mrb[32].mxu1  ;;  %v10417_v39 = vpop.f32.mrb[33].mxu0  ;;  %v22693_v49 = vld [vmem:[#allocation3 + $0x38] sm:$0xff] }
 0x745   :  { %v19172_v59 = vadd.f32 %v10497_v12, %v8087_v50  ;;  %v19171_v61 = vadd.f32 %v10417_v39, %v8083_v51  ;;  %v10499_v45 = vpop.f32.mrb[33].mxu1  ;;  %v10419_v62 = vpop.f32.mrb[34].mxu0  ;;  %v10583_v37 = vmul.f32 %v22693_v49, %v22636_v15  ;;  %v21480_v57 = vld [vmem:[#allocation8 + $0x1208] ss:$48 sps:$4 sm:$0xff]   ;;  %v21483_v39 = vld [vmem:[#allocation8 + $0x1260] ss:$48 sps:$4 sm:$0xff]  }
 0x746   :  { %v10560_v4 = vmul.f32 %v22622_v60, %v19170_v36  ;;  %v19173_v52 = vadd.f32 %v10499_v45, %v8091_v55  ;;  %v10501_v0 = vpop.f32.mrb[34].mxu1  ;;  %v10420_v8 = vpop.f32.mrb[35].mxu0  ;;  %v21488_v36 = vld [vmem:[#allocation8 + $0x126c] ss:$48 sps:$4 sm:$0xff]   ;;  %v21492_v45 = vld [vmem:[#allocation8 + $0x12c8] ss:$48 sps:$4 sm:$0xff]  }
 0x747   :  { %v10562_v6 = vmul.f32 %v22624_v13, %v19172_v59  ;;  %v10561_v7 = vmul.f32 %v22626_v3, %v19171_v61  ;;  %v10502_v11 = vpop.f32.mrb[35].mxu1  ;;  %v21486_v13 = vld [vmem:[#allocation8 + $0x1268] ss:$48 sps:$4 sm:$0xff]   ;;  %v21494_v59 = vld [vmem:[#allocation8 + $0x12cc] ss:$48 sps:$4 sm:$0xff]  }
 0x748   :  { %v10564_v14 = vadd.f32 %v10560_v4, %v23293_v32  ;;  %v10563_v5 = vmul.f32 %v22628_v2, %v19173_v52  ;;  %v21489_v61 = vld [vmem:[#allocation8 + $0x12c0] ss:$48 sps:$4 sm:$0xff]   ;;  %v21497_v62 = vld [vmem:[#allocation8 + $0x1324] ss:$48 sps:$4 sm:$0xff]   ;;  %v21500_v3 = vld [vmem:[#allocation8 + $0x132c] ss:$48 sps:$4 sm:$0xff]  }
 0x749   :  { %v10566_v17 = vadd.f32 %v10562_v6, %v23307_v63  ;;  %v10565_v28 = vadd.f32 %v10561_v7, %v23295_v40  ;;  %v22691_v40 = vld [vmem:[#allocation3 + $0x30] sm:$0xff]  ;;  %v21498_v52 = vld [vmem:[#allocation8 + $0x1328] ss:$48 sps:$4 sm:$0xff]   ;;  %v21506_v8 = vld [vmem:[#allocation8 + $0x138c] ss:$48 sps:$4 sm:$0xff]  }
 0x74a   :  { %22637 = vtanh.f32 %v10564_v14  ;;  %v10567_v24 = vadd.f32 %v10563_v5, %v23309_v1  ;;  %v10582_v46 = vmul.f32 %v22691_v40, %v22632_v9  ;;  %v21495_v4 = vld [vmem:[#allocation8 + $0x1320] ss:$48 sps:$4 sm:$0xff]   ;;  %v21503_v0 = vld [vmem:[#allocation8 + $0x1384] ss:$48 sps:$4 sm:$0xff]   ;;  %v21504_v6 = vld [vmem:[#allocation8 + $0x1388] ss:$48 sps:$4 sm:$0xff]  }
 0x74b   :  { %22639 = vtanh.f32 %v10566_v17  ;;  %v21501_v2 = vld [vmem:[#allocation8 + $0x1380] ss:$48 sps:$4 sm:$0xff]   ;;  %v21509_v7 = vld [vmem:[#allocation8 + $0x13e4] ss:$48 sps:$4 sm:$0xff]   ;;  %v21512_v11 = vld [vmem:[#allocation8 + $0x13ec] ss:$48 sps:$4 sm:$0xff]  }
 0x74c   :  { %22641 = vtanh.f32 %v10565_v28  ;;  %v21507_v14 = vld [vmem:[#allocation8 + $0x13e0] ss:$48 sps:$4 sm:$0xff]   ;;  %v21510_v5 = vld [vmem:[#allocation8 + $0x13e8] ss:$48 sps:$4 sm:$0xff]   ;;  %v21515_v17 = vld [vmem:[#allocation8 + $0x1444] ss:$48 sps:$4 sm:$0xff]  }
 0x74d   :  { %22643 = vtanh.f32 %v10567_v24  ;;  %v21518_v28 = vld [vmem:[#allocation8 + $0x144c] ss:$48 sps:$4 sm:$0xff]   ;;  %v21513_v24 = vld [vmem:[#allocation8 + $0x1440] ss:$48 sps:$4 sm:$0xff]   ;;  %v21521_v9 = vld [vmem:[#allocation8 + $0x14a4] ss:$48 sps:$4 sm:$0xff]  }
 0x74e   :  { %v21519_v15 = vld [vmem:[#allocation8 + $0x14a0] ss:$48 sps:$4 sm:$0xff]   ;;  %v21539_v40 = vld [vmem:[#allocation8 + $0x15c4] ss:$48 sps:$4 sm:$0xff]   ;;  %v21554_v49 = vld [vmem:[#allocation8 + $0x168c] ss:$48 sps:$4 sm:$0xff]  }
 0x754   :  { %v22638_v30 = vpop.eup %22637 }
 0x755   :  { %v22640_v32 = vpop.eup %22639  ;;  %v10576_v63 = vmul.f32 %v22638_v30, %v10572_v29  ;;  %v21522_v29 = vld [vmem:[#allocation8 + $0x14a8] ss:$48 sps:$4 sm:$0xff]   ;;  %v21527_v30 = vld [vmem:[#allocation8 + $0x1504] ss:$48 sps:$4 sm:$0xff]  }
 0x756   :  { %v22642_v10 = vpop.eup %22641  ;;  %v10578_v1 = vmul.f32 %v22640_v32, %v10574_v31  ;;  %v21530_v31 = vld [vmem:[#allocation8 + $0x150c] ss:$48 sps:$4 sm:$0xff]   ;;  %v21525_v32 = vld [vmem:[#allocation8 + $0x1500] ss:$48 sps:$4 sm:$0xff]  }
 0x757   :  { %v22644_v18 = vpop.eup %22643  ;;  %v10584_v43 = vadd.f32 %v10580_v35, %v10576_v63  ;;  %v10577_v44 = vmul.f32 %v22642_v10, %v10573_v33  ;;  %v21533_v35 = vld [vmem:[#allocation8 + $0x1564] ss:$48 sps:$4 sm:$0xff]   ;;  %v21536_v33 = vld [vmem:[#allocation8 + $0x156c] ss:$48 sps:$4 sm:$0xff]   ;;  %v21531_v63 = vld [vmem:[#allocation8 + $0x1560] ss:$48 sps:$4 sm:$0xff]  }
 0x758   :  { %v23389_v50 = vadd.f32 %v10582_v46, %v10578_v1  ;;  %v10579_v51 = vmul.f32 %v22644_v18, %v10575_v41  ;;  %v21534_v10 = vld [vmem:[#allocation8 + $0x1568] ss:$48 sps:$4 sm:$0xff]   ;;  %v21542_v46 = vld [vmem:[#allocation8 + $0x15cc] ss:$48 sps:$4 sm:$0xff]   ;;  %v21537_v41 = vld [vmem:[#allocation8 + $0x15c0] ss:$48 sps:$4 sm:$0xff]  }
 0x759   :  { %16877 = vst [vmem:[#allocation16 + $0x20] sm:$0xff] %v10584_v43  ;;  %v10585_v53 = vadd.f32 %v10581_v42, %v10577_v44  ;;  %v23394_v60 = vpack.c.bf16 %v10584_v43, %v10584_v43  ;;  %v21540_v1 = vld [vmem:[#allocation8 + $0x15c8] ss:$48 sps:$4 sm:$0xff]   ;;  %v21545_v18 = vld [vmem:[#allocation8 + $0x1624] ss:$48 sps:$4 sm:$0xff]  }
 0x75a   :  { %16879 = vst [vmem:[#allocation16 + $0x30] sm:$0xff] %v23389_v50  ;;  %v10587_v54 = vadd.f32 %v10583_v37, %v10579_v51  ;;  %v21543_v42 = vld [vmem:[#allocation8 + $0x1620] ss:$48 sps:$4 sm:$0xff]   ;;  %v21546_v43 = vld [vmem:[#allocation8 + $0x1628] ss:$48 sps:$4 sm:$0xff]  }
 0x75b   :  { %16878 = vst [vmem:[#allocation16 + $0x28] sm:$0xff] %v10585_v53  ;;  %v23392_v55 = vpack.c.bf16 %v10585_v53, %v10585_v53  ;;  %v21551_v44 = vld [vmem:[#allocation8 + $0x1684] ss:$48 sps:$4 sm:$0xff]   ;;  %v21549_v37 = vld [vmem:[#allocation8 + $0x1680] ss:$48 sps:$4 sm:$0xff]  }
 0x75c   :  { %16880 = vst [vmem:[#allocation16 + $0x38] sm:$0xff] %v10587_v54  ;;  %v23400_v12 = vpack.c.bf16 %v10587_v54, %v10587_v54  ;;  %v21552_v51 = vld [vmem:[#allocation8 + $0x1688] ss:$48 sps:$4 sm:$0xff]   ;;  %v21557_v53 = vld [vmem:[#allocation8 + $0x16e4] ss:$48 sps:$4 sm:$0xff]  }
 0x75d   :  { %13053 = vmatprep.mubr.bf16.mxu0 %v23392_v55  ;;  %13135 = vmatprep.mubr.bf16.mxu1 %v23392_v55  ;;  %v21560_v54 = vld [vmem:[#allocation8 + $0x16ec] ss:$48 sps:$4 sm:$0xff]  }
 0x75e   :  { %13054 = vmatmul.mubr.bf16.vlgmr.msra.gmra.mrb[36].mxu0 %v23394_v60  ;;  %13136 = vmatmul.mubr.bf16.vlgmr.msra.gmra.mrb[36].mxu1 %v23394_v60 }
 0x75f   :  { %13063 = vmatpush1.bf16.msra.mxu0 %v21477_v56  ;;  %13145 = vmatpush1.bf16.msra.mxu1 %v21480_v57  ;;  %v21555_v56 = vld [vmem:[#allocation8 + $0x16e0] ss:$48 sps:$4 sm:$0xff]   ;;  %v21558_v57 = vld [vmem:[#allocation8 + $0x16e8] ss:$48 sps:$4 sm:$0xff]  }
 0x760   :  { %13094 = vmatprep.mubr.bf16.mxu0 %v23400_v12  ;;  %13176 = vmatprep.mubr.bf16.mxu1 %v23400_v12 }
 0x761   :  { %13064 = vmatprep.subr.bf16.mxu0 %v21485_v58  ;;  %13146 = vmatprep.subr.bf16.mxu1 %v21488_v36  ;;  %v21563_v58 = vld [vmem:[#allocation8 + $0x1744] ss:$48 sps:$4 sm:$0xff]   ;;  %v21566_v36 = vld [vmem:[#allocation8 + $0x174c] ss:$48 sps:$4 sm:$0xff]  }
 0x763   :  { %13065 = vmatpush1.bf16.msra.mxu0 %v21483_v39  ;;  %13147 = vmatpush1.bf16.msra.mxu1 %v21486_v13  ;;  %v21561_v39 = vld [vmem:[#allocation8 + $0x1740] ss:$48 sps:$4 sm:$0xff]   ;;  %v21564_v13 = vld [vmem:[#allocation8 + $0x1748] ss:$48 sps:$4 sm:$0xff]  }
 0x764   :  { %13066 = vmatprep.subr.bf16.mxu0 %v21491_v38  ;;  %13148 = vmatprep.subr.bf16.mxu1 %v21494_v59  ;;  %v21569_v38 = vld [vmem:[#allocation8 + $0x17a4] ss:$48 sps:$4 sm:$0xff]   ;;  %v21572_v59 = vld [vmem:[#allocation8 + $0x17ac] ss:$48 sps:$4 sm:$0xff]  }
 0x767   :  { %13067 = vmatpush1.bf16.msra.mxu0 %v21489_v61  ;;  %13149 = vmatpush1.bf16.msra.mxu1 %v21492_v45  ;;  %v21567_v61 = vld [vmem:[#allocation8 + $0x17a0] ss:$48 sps:$4 sm:$0xff]   ;;  %v21570_v45 = vld [vmem:[#allocation8 + $0x17a8] ss:$48 sps:$4 sm:$0xff]  }
 0x768   :  { %13068 = vmatprep.subr.bf16.mxu0 %v21497_v62  ;;  %13150 = vmatprep.subr.bf16.mxu1 %v21500_v3  ;;  %v21575_v62 = vld [vmem:[#allocation8 + $0xc14] ss:$48 sps:$4 sm:$0xff]   ;;  %v21578_v3 = vld [vmem:[#allocation8 + $0xc1c] ss:$48 sps:$4 sm:$0xff]  }
 0x76b   :  { %13069 = vmatpush1.bf16.msra.mxu0 %v21495_v4  ;;  %13151 = vmatpush1.bf16.msra.mxu1 %v21498_v52  ;;  %v21573_v4 = vld [vmem:[#allocation8 + $0xc10] ss:$48 sps:$4 sm:$0xff]   ;;  %v23406_v52 = vpack.c.bf16 %v23389_v50, %v23389_v50  ;;  %v21590_v50 = vld [vmem:[#allocation8 + $0xcdc] ss:$48 sps:$4 sm:$0xff]  }
 0x76c   :  { %13070 = vmatprep.subr.bf16.mxu0 %v21503_v0  ;;  %13152 = vmatprep.subr.bf16.mxu1 %v21506_v8  ;;  %v21576_v0 = vld [vmem:[#allocation8 + $0xc18] ss:$48 sps:$4 sm:$0xff]   ;;  %v21581_v8 = vld [vmem:[#allocation8 + $0xc74] ss:$48 sps:$4 sm:$0xff]  }
 0x76f   :  { %13071 = vmatpush1.bf16.msra.mxu0 %v21501_v2  ;;  %13153 = vmatpush1.bf16.msra.mxu1 %v21504_v6  ;;  %v21584_v2 = vld [vmem:[#allocation8 + $0xc7c] ss:$48 sps:$4 sm:$0xff]   ;;  %v21579_v6 = vld [vmem:[#allocation8 + $0xc70] ss:$48 sps:$4 sm:$0xff]  }
 0x770   :  { %13072 = vmatprep.subr.bf16.mxu0 %v21509_v7  ;;  %13154 = vmatprep.subr.bf16.mxu1 %v21512_v11  ;;  %v21582_v7 = vld [vmem:[#allocation8 + $0xc78] ss:$48 sps:$4 sm:$0xff]   ;;  %v21587_v11 = vld [vmem:[#allocation8 + $0xcd4] ss:$48 sps:$4 sm:$0xff]  }
 0x773   :  { %13073 = vmatpush1.bf16.msra.mxu0 %v21507_v14  ;;  %13155 = vmatpush1.bf16.msra.mxu1 %v21510_v5  ;;  %v21585_v14 = vld [vmem:[#allocation8 + $0xcd0] ss:$48 sps:$4 sm:$0xff]   ;;  %v21588_v5 = vld [vmem:[#allocation8 + $0xcd8] ss:$48 sps:$4 sm:$0xff]  }
 0x774   :  { %13074 = vmatprep.subr.bf16.mxu0 %v21515_v17  ;;  %13156 = vmatprep.subr.bf16.mxu1 %v21518_v28  ;;  %v21593_v17 = vld [vmem:[#allocation8 + $0xd34] ss:$48 sps:$4 sm:$0xff]   ;;  %v21596_v28 = vld [vmem:[#allocation8 + $0xd3c] ss:$48 sps:$4 sm:$0xff]  }
 0x777   :  { %13075 = vmatpush1.bf16.msra.mxu0 %v21513_v24  ;;  %13157 = vmatpush1.bf16.msra.mxu1 %v21516_v25  ;;  %v21591_v24 = vld [vmem:[#allocation8 + $0xd30] ss:$48 sps:$4 sm:$0xff]   ;;  %v21594_v25 = vld [vmem:[#allocation8 + $0xd38] ss:$48 sps:$4 sm:$0xff]  }
 0x778   :  { %13076 = vmatprep.subr.bf16.mxu0 %v21521_v9  ;;  %13158 = vmatprep.subr.bf16.mxu1 %v21524_v27  ;;  %v21599_v9 = vld [vmem:[#allocation8 + $0xd94] ss:$48 sps:$4 sm:$0xff]   ;;  %v21602_v27 = vld [vmem:[#allocation8 + $0xd9c] ss:$48 sps:$4 sm:$0xff]  }
 0x77b   :  { %13077 = vmatpush1.bf16.msra.mxu0 %v21519_v15  ;;  %13159 = vmatpush1.bf16.msra.mxu1 %v21522_v29  ;;  %v21597_v15 = vld [vmem:[#allocation8 + $0xd90] ss:$48 sps:$4 sm:$0xff]   ;;  %v21600_v29 = vld [vmem:[#allocation8 + $0xd98] ss:$48 sps:$4 sm:$0xff]  }
 0x77c   :  { %13078 = vmatprep.subr.bf16.mxu0 %v21527_v30  ;;  %13160 = vmatprep.subr.bf16.mxu1 %v21530_v31  ;;  %v21605_v30 = vld [vmem:[#allocation8 + $0xdf4] ss:$48 sps:$4 sm:$0xff]   ;;  %v21608_v31 = vld [vmem:[#allocation8 + $0xdfc] ss:$48 sps:$4 sm:$0xff]  }
 0x77f   :  { %13079 = vmatpush1.bf16.msra.mxu0 %v21525_v32  ;;  %13161 = vmatpush1.bf16.msra.mxu1 %v21528_v34  ;;  %v21603_v32 = vld [vmem:[#allocation8 + $0xdf0] ss:$48 sps:$4 sm:$0xff]   ;;  %v21606_v34 = vld [vmem:[#allocation8 + $0xdf8] ss:$48 sps:$4 sm:$0xff]  }
 0x780   :  { %13080 = vmatprep.subr.bf16.mxu0 %v21533_v35  ;;  %13162 = vmatprep.subr.bf16.mxu1 %v21536_v33  ;;  %v21611_v35 = vld [vmem:[#allocation8 + $0xe54] ss:$48 sps:$4 sm:$0xff]   ;;  %v21614_v33 = vld [vmem:[#allocation8 + $0xe5c] ss:$48 sps:$4 sm:$0xff]  }
 0x783   :  { %13081 = vmatpush1.bf16.msra.mxu0 %v21531_v63  ;;  %13163 = vmatpush1.bf16.msra.mxu1 %v21534_v10  ;;  %v21609_v63 = vld [vmem:[#allocation8 + $0xe50] ss:$48 sps:$4 sm:$0xff]   ;;  %v21612_v10 = vld [vmem:[#allocation8 + $0xe58] ss:$48 sps:$4 sm:$0xff]  }
 0x784   :  { %13082 = vmatprep.subr.bf16.mxu0 %v21539_v40  ;;  %13164 = vmatprep.subr.bf16.mxu1 %v21542_v46  ;;  %v21617_v40 = vld [vmem:[#allocation8 + $0xeb4] ss:$48 sps:$4 sm:$0xff]   ;;  %v21620_v46 = vld [vmem:[#allocation8 + $0xebc] ss:$48 sps:$4 sm:$0xff]  }
 0x787   :  { %13083 = vmatpush1.bf16.msra.mxu0 %v21537_v41  ;;  %13165 = vmatpush1.bf16.msra.mxu1 %v21540_v1  ;;  %v21615_v41 = vld [vmem:[#allocation8 + $0xeb0] ss:$48 sps:$4 sm:$0xff]   ;;  %v21618_v1 = vld [vmem:[#allocation8 + $0xeb8] ss:$48 sps:$4 sm:$0xff]  }
 0x788   :  { %13084 = vmatprep.subr.bf16.mxu0 %v21545_v18  ;;  %13166 = vmatprep.subr.bf16.mxu1 %v21548_v47  ;;  %v21623_v18 = vld [vmem:[#allocation8 + $0xf14] ss:$48 sps:$4 sm:$0xff]   ;;  %v21626_v47 = vld [vmem:[#allocation8 + $0xf1c] ss:$48 sps:$4 sm:$0xff]  }
 0x78b   :  { %13085 = vmatpush1.bf16.msra.mxu0 %v21543_v42  ;;  %13167 = vmatpush1.bf16.msra.mxu1 %v21546_v43  ;;  %v21621_v42 = vld [vmem:[#allocation8 + $0xf10] ss:$48 sps:$4 sm:$0xff]   ;;  %v21624_v43 = vld [vmem:[#allocation8 + $0xf18] ss:$48 sps:$4 sm:$0xff]  }
 0x78c   :  { %13086 = vmatprep.subr.bf16.mxu0 %v21551_v44  ;;  %13168 = vmatprep.subr.bf16.mxu1 %v21554_v49  ;;  %v21629_v44 = vld [vmem:[#allocation8 + $0xf74] ss:$48 sps:$4 sm:$0xff]   ;;  %v21632_v49 = vld [vmem:[#allocation8 + $0xf7c] ss:$48 sps:$4 sm:$0xff]  }
 0x78f   :  { %13087 = vmatpush1.bf16.msra.mxu0 %v21549_v37  ;;  %13169 = vmatpush1.bf16.msra.mxu1 %v21552_v51  ;;  %v21627_v37 = vld [vmem:[#allocation8 + $0xf70] ss:$48 sps:$4 sm:$0xff]   ;;  %v21630_v51 = vld [vmem:[#allocation8 + $0xf78] ss:$48 sps:$4 sm:$0xff]  }
 0x790   :  { %13088 = vmatprep.subr.bf16.mxu0 %v21557_v53  ;;  %13170 = vmatprep.subr.bf16.mxu1 %v21560_v54  ;;  %v21635_v53 = vld [vmem:[#allocation8 + $0xfd4] ss:$48 sps:$4 sm:$0xff]   ;;  %v21638_v54 = vld [vmem:[#allocation8 + $0xfdc] ss:$48 sps:$4 sm:$0xff]  }
 0x793   :  { %13089 = vmatpush1.bf16.msra.mxu0 %v21555_v56  ;;  %13171 = vmatpush1.bf16.msra.mxu1 %v21558_v57  ;;  %v21633_v56 = vld [vmem:[#allocation8 + $0xfd0] ss:$48 sps:$4 sm:$0xff]   ;;  %v21636_v57 = vld [vmem:[#allocation8 + $0xfd8] ss:$48 sps:$4 sm:$0xff]  }
 0x794   :  { %13090 = vmatprep.subr.bf16.mxu0 %v21563_v58  ;;  %13172 = vmatprep.subr.bf16.mxu1 %v21566_v36  ;;  %v21641_v58 = vld [vmem:[#allocation8 + $0x1034] ss:$48 sps:$4 sm:$0xff]   ;;  %v21644_v36 = vld [vmem:[#allocation8 + $0x103c] ss:$48 sps:$4 sm:$0xff]  }
 0x797   :  { %13091 = vmatpush1.bf16.msra.mxu0 %v21561_v39  ;;  %13173 = vmatpush1.bf16.msra.mxu1 %v21564_v13  ;;  %v21639_v39 = vld [vmem:[#allocation8 + $0x1030] ss:$48 sps:$4 sm:$0xff]   ;;  %v21642_v13 = vld [vmem:[#allocation8 + $0x1038] ss:$48 sps:$4 sm:$0xff]  }
 0x798   :  { %13092 = vmatprep.subr.bf16.mxu0 %v21569_v38  ;;  %13174 = vmatprep.subr.bf16.mxu1 %v21572_v59  ;;  %v21647_v38 = vld [vmem:[#allocation8 + $0x1094] ss:$48 sps:$4 sm:$0xff]   ;;  %v21650_v59 = vld [vmem:[#allocation8 + $0x109c] ss:$48 sps:$4 sm:$0xff]  }
 0x79b   :  { %13093 = vmatpush1.bf16.msra.mxu0 %v21567_v61  ;;  %13175 = vmatpush1.bf16.msra.mxu1 %v21570_v45  ;;  %v21645_v61 = vld [vmem:[#allocation8 + $0x1090] ss:$48 sps:$4 sm:$0xff]   ;;  %v21648_v45 = vld [vmem:[#allocation8 + $0x1098] ss:$48 sps:$4 sm:$0xff]  }
 0x79c   :  { %13185 = vmatprep.subr.bf16.mxu0 %v21575_v62  ;;  %13267 = vmatprep.subr.bf16.mxu1 %v21578_v3  ;;  %v21653_v62 = vld [vmem:[#allocation8 + $0x10f4] ss:$48 sps:$4 sm:$0xff]   ;;  %v21656_v3 = vld [vmem:[#allocation8 + $0x10fc] ss:$48 sps:$4 sm:$0xff]  }
 0x79e   :  { %13095 = vmatmul.mubr.bf16.vlgmr.msra.gmra.mrb[36].mxu0 %v23406_v52  ;;  %13177 = vmatmul.mubr.bf16.vlgmr.msra.gmra.mrb[36].mxu1 %v23406_v52 }
 0x79f   :  { %13186 = vmatpush1.bf16.msra.mxu0 %v21573_v4  ;;  %13217 = vmatprep.mubr.bf16.mxu0 %v23392_v55  ;;  %v21651_v4 = vld [vmem:[#allocation8 + $0x10f0] ss:$48 sps:$4 sm:$0xff]  }
 0x7a0   :  { %13268 = vmatpush1.bf16.msra.mxu1 %v21576_v0  ;;  %13299 = vmatprep.mubr.bf16.mxu1 %v23392_v55  ;;  %v21654_v0 = vld [vmem:[#allocation8 + $0x10f8] ss:$48 sps:$4 sm:$0xff]  }
 0x7a1   :  { %13187 = vmatprep.subr.bf16.mxu0 %v21581_v8  ;;  %13269 = vmatprep.subr.bf16.mxu1 %v21584_v2  ;;  %v21659_v8 = vld [vmem:[#allocation8 + $0x1154] ss:$48 sps:$4 sm:$0xff]   ;;  %v21662_v2 = vld [vmem:[#allocation8 + $0x115c] ss:$48 sps:$4 sm:$0xff]  }
 0x7a3   :  { %13188 = vmatpush1.bf16.msra.mxu0 %v21579_v6  ;;  %v21657_v6 = vld [vmem:[#allocation8 + $0x1150] ss:$48 sps:$4 sm:$0xff]  }
 0x7a4   :  { %13270 = vmatpush1.bf16.msra.mxu1 %v21582_v7  ;;  %13189 = vmatprep.subr.bf16.mxu0 %v21587_v11  ;;  %v21660_v7 = vld [vmem:[#allocation8 + $0x1158] ss:$48 sps:$4 sm:$0xff]   ;;  %v21665_v11 = vld [vmem:[#allocation8 + $0x11b4] ss:$48 sps:$4 sm:$0xff]  }
 0x7a5   :  { %13271 = vmatprep.subr.bf16.mxu1 %v21590_v50  ;;  %v21668_v50 = vld [vmem:[#allocation8 + $0x11bc] ss:$48 sps:$4 sm:$0xff]  }
 0x7a7   :  { %13190 = vmatpush1.bf16.msra.mxu0 %v21585_v14  ;;  %v21663_v14 = vld [vmem:[#allocation8 + $0x11b0] ss:$48 sps:$4 sm:$0xff]  }
 0x7a8   :  { %13272 = vmatpush1.bf16.msra.mxu1 %v21588_v5  ;;  %13191 = vmatprep.subr.bf16.mxu0 %v21593_v17  ;;  %v21666_v5 = vld [vmem:[#allocation8 + $0x11b8] ss:$48 sps:$4 sm:$0xff]   ;;  %v21671_v17 = vld [vmem:[#allocation8 + $0x1214] ss:$48 sps:$4 sm:$0xff]  }
 0x7a9   :  { %13273 = vmatprep.subr.bf16.mxu1 %v21596_v28  ;;  %v21674_v28 = vld [vmem:[#allocation8 + $0x121c] ss:$48 sps:$4 sm:$0xff]  }
 0x7ab   :  { %13192 = vmatpush1.bf16.msra.mxu0 %v21591_v24  ;;  %v21669_v24 = vld [vmem:[#allocation8 + $0x1210] ss:$48 sps:$4 sm:$0xff]  }
 0x7ac   :  { %13274 = vmatpush1.bf16.msra.mxu1 %v21594_v25  ;;  %13193 = vmatprep.subr.bf16.mxu0 %v21599_v9  ;;  %v21672_v25 = vld [vmem:[#allocation8 + $0x1218] ss:$48 sps:$4 sm:$0xff]   ;;  %v21677_v9 = vld [vmem:[#allocation8 + $0x1274] ss:$48 sps:$4 sm:$0xff]  }
 0x7ad   :  { %13275 = vmatprep.subr.bf16.mxu1 %v21602_v27  ;;  %v21680_v27 = vld [vmem:[#allocation8 + $0x127c] ss:$48 sps:$4 sm:$0xff]  }
 0x7af   :  { %13194 = vmatpush1.bf16.msra.mxu0 %v21597_v15  ;;  %v21675_v15 = vld [vmem:[#allocation8 + $0x1270] ss:$48 sps:$4 sm:$0xff]  }
 0x7b0   :  { %13276 = vmatpush1.bf16.msra.mxu1 %v21600_v29  ;;  %13195 = vmatprep.subr.bf16.mxu0 %v21605_v30  ;;  %v21678_v29 = vld [vmem:[#allocation8 + $0x1278] ss:$48 sps:$4 sm:$0xff]   ;;  %v21683_v30 = vld [vmem:[#allocation8 + $0x12d4] ss:$48 sps:$4 sm:$0xff]  }
 0x7b1   :  { %13277 = vmatprep.subr.bf16.mxu1 %v21608_v31  ;;  %v21686_v31 = vld [vmem:[#allocation8 + $0x12dc] ss:$48 sps:$4 sm:$0xff]  }
 0x7b3   :  { %13196 = vmatpush1.bf16.msra.mxu0 %v21603_v32  ;;  %v21681_v32 = vld [vmem:[#allocation8 + $0x12d0] ss:$48 sps:$4 sm:$0xff]  }
 0x7b4   :  { %13278 = vmatpush1.bf16.msra.mxu1 %v21606_v34  ;;  %13197 = vmatprep.subr.bf16.mxu0 %v21611_v35  ;;  %v21684_v34 = vld [vmem:[#allocation8 + $0x12d8] ss:$48 sps:$4 sm:$0xff]   ;;  %v21689_v35 = vld [vmem:[#allocation8 + $0x1334] ss:$48 sps:$4 sm:$0xff]  }
 0x7b5   :  { %13279 = vmatprep.subr.bf16.mxu1 %v21614_v33  ;;  %v21692_v33 = vld [vmem:[#allocation8 + $0x133c] ss:$48 sps:$4 sm:$0xff]  }
 0x7b7   :  { %13198 = vmatpush1.bf16.msra.mxu0 %v21609_v63  ;;  %v21687_v63 = vld [vmem:[#allocation8 + $0x1330] ss:$48 sps:$4 sm:$0xff]  }
 0x7b8   :  { %13280 = vmatpush1.bf16.msra.mxu1 %v21612_v10  ;;  %13199 = vmatprep.subr.bf16.mxu0 %v21617_v40  ;;  %v21690_v10 = vld [vmem:[#allocation8 + $0x1338] ss:$48 sps:$4 sm:$0xff]   ;;  %v21695_v40 = vld [vmem:[#allocation8 + $0x1394] ss:$48 sps:$4 sm:$0xff]  }
 0x7b9   :  { %13281 = vmatprep.subr.bf16.mxu1 %v21620_v46  ;;  %v21698_v46 = vld [vmem:[#allocation8 + $0x139c] ss:$48 sps:$4 sm:$0xff]  }
 0x7bb   :  { %13200 = vmatpush1.bf16.msra.mxu0 %v21615_v41  ;;  %v21693_v41 = vld [vmem:[#allocation8 + $0x1390] ss:$48 sps:$4 sm:$0xff]  }
 0x7bc   :  { %13282 = vmatpush1.bf16.msra.mxu1 %v21618_v1  ;;  %13201 = vmatprep.subr.bf16.mxu0 %v21623_v18  ;;  %v21696_v1 = vld [vmem:[#allocation8 + $0x1398] ss:$48 sps:$4 sm:$0xff]   ;;  %v21701_v18 = vld [vmem:[#allocation8 + $0x13f4] ss:$48 sps:$4 sm:$0xff]  }
 0x7bd   :  { %13283 = vmatprep.subr.bf16.mxu1 %v21626_v47  ;;  %v21704_v47 = vld [vmem:[#allocation8 + $0x13fc] ss:$48 sps:$4 sm:$0xff]  }
 0x7bf   :  { %13202 = vmatpush1.bf16.msra.mxu0 %v21621_v42  ;;  %v21699_v42 = vld [vmem:[#allocation8 + $0x13f0] ss:$48 sps:$4 sm:$0xff]  }
 0x7c0   :  { %13284 = vmatpush1.bf16.msra.mxu1 %v21624_v43  ;;  %13203 = vmatprep.subr.bf16.mxu0 %v21629_v44  ;;  %v21702_v43 = vld [vmem:[#allocation8 + $0x13f8] ss:$48 sps:$4 sm:$0xff]   ;;  %v21707_v44 = vld [vmem:[#allocation8 + $0x1454] ss:$48 sps:$4 sm:$0xff]  }
 0x7c1   :  { %13285 = vmatprep.subr.bf16.mxu1 %v21632_v49  ;;  %v21710_v49 = vld [vmem:[#allocation8 + $0x145c] ss:$48 sps:$4 sm:$0xff]  }
 0x7c3   :  { %13204 = vmatpush1.bf16.msra.mxu0 %v21627_v37  ;;  %v21705_v37 = vld [vmem:[#allocation8 + $0x1450] ss:$48 sps:$4 sm:$0xff]  }
 0x7c4   :  { %13286 = vmatpush1.bf16.msra.mxu1 %v21630_v51  ;;  %13205 = vmatprep.subr.bf16.mxu0 %v21635_v53  ;;  %v21708_v51 = vld [vmem:[#allocation8 + $0x1458] ss:$48 sps:$4 sm:$0xff]   ;;  %v21713_v53 = vld [vmem:[#allocation8 + $0x14b4] ss:$48 sps:$4 sm:$0xff]  }
 0x7c5   :  { %13287 = vmatprep.subr.bf16.mxu1 %v21638_v54  ;;  %v21716_v54 = vld [vmem:[#allocation8 + $0x14bc] ss:$48 sps:$4 sm:$0xff]  }
 0x7c7   :  { %13206 = vmatpush1.bf16.msra.mxu0 %v21633_v56  ;;  %v21711_v56 = vld [vmem:[#allocation8 + $0x14b0] ss:$48 sps:$4 sm:$0xff]  }
 0x7c8   :  { %13288 = vmatpush1.bf16.msra.mxu1 %v21636_v57  ;;  %13207 = vmatprep.subr.bf16.mxu0 %v21641_v58  ;;  %v21714_v57 = vld [vmem:[#allocation8 + $0x14b8] ss:$48 sps:$4 sm:$0xff]   ;;  %v21719_v58 = vld [vmem:[#allocation8 + $0x1514] ss:$48 sps:$4 sm:$0xff]  }
 0x7c9   :  { %13289 = vmatprep.subr.bf16.mxu1 %v21644_v36  ;;  %v21722_v36 = vld [vmem:[#allocation8 + $0x151c] ss:$48 sps:$4 sm:$0xff]  }
 0x7cb   :  { %13208 = vmatpush1.bf16.msra.mxu0 %v21639_v39  ;;  %v21717_v39 = vld [vmem:[#allocation8 + $0x1510] ss:$48 sps:$4 sm:$0xff]  }
 0x7cc   :  { %13290 = vmatpush1.bf16.msra.mxu1 %v21642_v13  ;;  %13209 = vmatprep.subr.bf16.mxu0 %v21647_v38  ;;  %v21720_v13 = vld [vmem:[#allocation8 + $0x1518] ss:$48 sps:$4 sm:$0xff]   ;;  %v21725_v38 = vld [vmem:[#allocation8 + $0x1574] ss:$48 sps:$4 sm:$0xff]  }
 0x7cd   :  { %13291 = vmatprep.subr.bf16.mxu1 %v21650_v59  ;;  %v21728_v59 = vld [vmem:[#allocation8 + $0x157c] ss:$48 sps:$4 sm:$0xff]  }
 0x7cf   :  { %13210 = vmatpush1.bf16.msra.mxu0 %v21645_v61  ;;  %v21723_v61 = vld [vmem:[#allocation8 + $0x1570] ss:$48 sps:$4 sm:$0xff]  }
 0x7d0   :  { %13292 = vmatpush1.bf16.msra.mxu1 %v21648_v45  ;;  %13211 = vmatprep.subr.bf16.mxu0 %v21653_v62  ;;  %v21726_v45 = vld [vmem:[#allocation8 + $0x1578] ss:$48 sps:$4 sm:$0xff]   ;;  %v21731_v62 = vld [vmem:[#allocation8 + $0x15d4] ss:$48 sps:$4 sm:$0xff]  }
 0x7d1   :  { %13293 = vmatprep.subr.bf16.mxu1 %v21656_v3  ;;  %v21734_v3 = vld [vmem:[#allocation8 + $0x15dc] ss:$48 sps:$4 sm:$0xff]  }
 0x7d3   :  { %13212 = vmatpush1.bf16.msra.mxu0 %v21651_v4  ;;  %v21729_v4 = vld [vmem:[#allocation8 + $0x15d0] ss:$48 sps:$4 sm:$0xff]  }
 0x7d4   :  { %13294 = vmatpush1.bf16.msra.mxu1 %v21654_v0  ;;  %13213 = vmatprep.subr.bf16.mxu0 %v21659_v8  ;;  %v21732_v0 = vld [vmem:[#allocation8 + $0x15d8] ss:$48 sps:$4 sm:$0xff]   ;;  %v21737_v8 = vld [vmem:[#allocation8 + $0x1634] ss:$48 sps:$4 sm:$0xff]  }
 0x7d5   :  { %13295 = vmatprep.subr.bf16.mxu1 %v21662_v2  ;;  %v21740_v2 = vld [vmem:[#allocation8 + $0x163c] ss:$48 sps:$4 sm:$0xff]  }
 0x7d7   :  { %13214 = vmatpush1.bf16.msra.mxu0 %v21657_v6  ;;  %v21735_v6 = vld [vmem:[#allocation8 + $0x1630] ss:$48 sps:$4 sm:$0xff]  }
 0x7d8   :  { %13296 = vmatpush1.bf16.msra.mxu1 %v21660_v7  ;;  %13215 = vmatprep.subr.bf16.mxu0 %v21665_v11  ;;  %v21738_v7 = vld [vmem:[#allocation8 + $0x1638] ss:$48 sps:$4 sm:$0xff]   ;;  %v21743_v11 = vld [vmem:[#allocation8 + $0x1694] ss:$48 sps:$4 sm:$0xff]  }
 0x7d9   :  { %13297 = vmatprep.subr.bf16.mxu1 %v21668_v50  ;;  %v21746_v50 = vld [vmem:[#allocation8 + $0x169c] ss:$48 sps:$4 sm:$0xff]  }
 0x7db   :  { %13216 = vmatpush1.bf16.msra.mxu0 %v21663_v14  ;;  %v21741_v14 = vld [vmem:[#allocation8 + $0x1690] ss:$48 sps:$4 sm:$0xff]  }
 0x7dc   :  { %13298 = vmatpush1.bf16.msra.mxu1 %v21666_v5  ;;  %13226 = vmatprep.subr.bf16.mxu0 %v21671_v17  ;;  %v21744_v5 = vld [vmem:[#allocation8 + $0x1698] ss:$48 sps:$4 sm:$0xff]   ;;  %v21749_v17 = vld [vmem:[#allocation8 + $0x16f4] ss:$48 sps:$4 sm:$0xff]  }
 0x7dd   :  { %13308 = vmatprep.subr.bf16.mxu1 %v21674_v28  ;;  %v21752_v28 = vld [vmem:[#allocation8 + $0x16fc] ss:$48 sps:$4 sm:$0xff]  }
 0x7de   :  { %13218 = vmatmul.mubr.bf16.vlgmr.msra.gmra.mrb[40].mxu0 %v23394_v60 }
 0x7df   :  { %13300 = vmatmul.mubr.bf16.vlgmr.msra.gmra.mrb[40].mxu1 %v23394_v60  ;;  %13227 = vmatpush1.bf16.msra.mxu0 %v21669_v24  ;;  %v21747_v24 = vld [vmem:[#allocation8 + $0x16f0] ss:$48 sps:$4 sm:$0xff]  }
 0x7e0   :  { %13258 = vmatprep.mubr.bf16.mxu0 %v23400_v12  ;;  %13309 = vmatpush1.bf16.msra.mxu1 %v21672_v25  ;;  %v21750_v25 = vld [vmem:[#allocation8 + $0x16f8] ss:$48 sps:$4 sm:$0xff]  }
 0x7e1   :  { %13340 = vmatprep.mubr.bf16.mxu1 %v23400_v12  ;;  %13228 = vmatprep.subr.bf16.mxu0 %v21677_v9  ;;  %v21755_v9 = vld [vmem:[#allocation8 + $0x1754] ss:$48 sps:$4 sm:$0xff]  }
 0x7e2   :  { %13310 = vmatprep.subr.bf16.mxu1 %v21680_v27  ;;  %v21758_v27 = vld [vmem:[#allocation8 + $0x175c] ss:$48 sps:$4 sm:$0xff]  }
 0x7e3   :  { %13229 = vmatpush1.bf16.msra.mxu0 %v21675_v15  ;;  %v21753_v15 = vld [vmem:[#allocation8 + $0x1750] ss:$48 sps:$4 sm:$0xff]  }
 0x7e4   :  { %13311 = vmatpush1.bf16.msra.mxu1 %v21678_v29  ;;  %13230 = vmatprep.subr.bf16.mxu0 %v21683_v30  ;;  %v21756_v29 = vld [vmem:[#allocation8 + $0x1758] ss:$48 sps:$4 sm:$0xff]   ;;  %v21761_v30 = vld [vmem:[#allocation8 + $0x17b4] ss:$48 sps:$4 sm:$0xff]  }
 0x7e5   :  { %13312 = vmatprep.subr.bf16.mxu1 %v21686_v31  ;;  %v21764_v31 = vld [vmem:[#allocation8 + $0x17bc] ss:$48 sps:$4 sm:$0xff]  }
 0x7e7   :  { %13231 = vmatpush1.bf16.msra.mxu0 %v21681_v32  ;;  %v21759_v32 = vld [vmem:[#allocation8 + $0x17b0] ss:$48 sps:$4 sm:$0xff]  }
 0x7e8   :  { %13313 = vmatpush1.bf16.msra.mxu1 %v21684_v34  ;;  %13232 = vmatprep.subr.bf16.mxu0 %v21689_v35  ;;  %v21762_v34 = vld [vmem:[#allocation8 + $0x17b8] ss:$48 sps:$4 sm:$0xff]   ;;  %v21767_v35 = vld [vmem:[#allocation8 + $0xc24] ss:$48 sps:$4 sm:$0xff]  }
 0x7e9   :  { %13314 = vmatprep.subr.bf16.mxu1 %v21692_v33  ;;  %v21770_v33 = vld [vmem:[#allocation8 + $0x1224] ss:$48 sps:$4 sm:$0xff]  }
 0x7eb   :  { %13233 = vmatpush1.bf16.msra.mxu0 %v21687_v63  ;;  %v21765_v63 = vld [vmem:[#allocation8 + $0xc20] ss:$48 sps:$4 sm:$0xff]  }
 0x7ec   :  { %13315 = vmatpush1.bf16.msra.mxu1 %v21690_v10  ;;  %13234 = vmatprep.subr.bf16.mxu0 %v21695_v40  ;;  %v21768_v10 = vld [vmem:[#allocation8 + $0x1220] ss:$48 sps:$4 sm:$0xff]   ;;  %v21773_v40 = vld [vmem:[#allocation8 + $0xc84] ss:$48 sps:$4 sm:$0xff]  }
 0x7ed   :  { %13316 = vmatprep.subr.bf16.mxu1 %v21698_v46  ;;  %v21776_v46 = vld [vmem:[#allocation8 + $0x1284] ss:$48 sps:$4 sm:$0xff]  }
 0x7ef   :  { %13235 = vmatpush1.bf16.msra.mxu0 %v21693_v41  ;;  %v21771_v41 = vld [vmem:[#allocation8 + $0xc80] ss:$48 sps:$4 sm:$0xff]  }
 0x7f0   :  { %13317 = vmatpush1.bf16.msra.mxu1 %v21696_v1  ;;  %13236 = vmatprep.subr.bf16.mxu0 %v21701_v18  ;;  %v21774_v1 = vld [vmem:[#allocation8 + $0x1280] ss:$48 sps:$4 sm:$0xff]   ;;  %v21779_v18 = vld [vmem:[#allocation8 + $0xce4] ss:$48 sps:$4 sm:$0xff]  }
 0x7f1   :  { %13318 = vmatprep.subr.bf16.mxu1 %v21704_v47  ;;  %v21782_v47 = vld [vmem:[#allocation8 + $0x12e4] ss:$48 sps:$4 sm:$0xff]  }
 0x7f3   :  { %13237 = vmatpush1.bf16.msra.mxu0 %v21699_v42  ;;  %v21777_v42 = vld [vmem:[#allocation8 + $0xce0] ss:$48 sps:$4 sm:$0xff]  }
 0x7f4   :  { %13319 = vmatpush1.bf16.msra.mxu1 %v21702_v43  ;;  %13238 = vmatprep.subr.bf16.mxu0 %v21707_v44  ;;  %v21780_v43 = vld [vmem:[#allocation8 + $0x12e0] ss:$48 sps:$4 sm:$0xff]   ;;  %v21785_v44 = vld [vmem:[#allocation8 + $0xd44] ss:$48 sps:$4 sm:$0xff]  }
 0x7f5   :  { %13320 = vmatprep.subr.bf16.mxu1 %v21710_v49  ;;  %v21788_v49 = vld [vmem:[#allocation8 + $0x1344] ss:$48 sps:$4 sm:$0xff]  }
 0x7f7   :  { %13239 = vmatpush1.bf16.msra.mxu0 %v21705_v37  ;;  %v21783_v37 = vld [vmem:[#allocation8 + $0xd40] ss:$48 sps:$4 sm:$0xff]  }
 0x7f8   :  { %13321 = vmatpush1.bf16.msra.mxu1 %v21708_v51  ;;  %13240 = vmatprep.subr.bf16.mxu0 %v21713_v53  ;;  %v21786_v51 = vld [vmem:[#allocation8 + $0x1340] ss:$48 sps:$4 sm:$0xff]   ;;  %v21791_v53 = vld [vmem:[#allocation8 + $0xda4] ss:$48 sps:$4 sm:$0xff]  }
 0x7f9   :  { %13322 = vmatprep.subr.bf16.mxu1 %v21716_v54  ;;  %v21794_v54 = vld [vmem:[#allocation8 + $0x13a4] ss:$48 sps:$4 sm:$0xff]  }
 0x7fb   :  { %13241 = vmatpush1.bf16.msra.mxu0 %v21711_v56  ;;  %v21789_v56 = vld [vmem:[#allocation8 + $0xda0] ss:$48 sps:$4 sm:$0xff]  }
 0x7fc   :  { %13323 = vmatpush1.bf16.msra.mxu1 %v21714_v57  ;;  %13242 = vmatprep.subr.bf16.mxu0 %v21719_v58  ;;  %v21792_v57 = vld [vmem:[#allocation8 + $0x13a0] ss:$48 sps:$4 sm:$0xff]   ;;  %v21797_v58 = vld [vmem:[#allocation8 + $0xe04] ss:$48 sps:$4 sm:$0xff]  }
 0x7fd   :  { %13324 = vmatprep.subr.bf16.mxu1 %v21722_v36  ;;  %v21800_v36 = vld [vmem:[#allocation8 + $0x1404] ss:$48 sps:$4 sm:$0xff]  }
 0x7ff   :  { %13243 = vmatpush1.bf16.msra.mxu0 %v21717_v39  ;;  %v21795_v39 = vld [vmem:[#allocation8 + $0xe00] ss:$48 sps:$4 sm:$0xff]  }
 0x800   :  { %13325 = vmatpush1.bf16.msra.mxu1 %v21720_v13  ;;  %13244 = vmatprep.subr.bf16.mxu0 %v21725_v38  ;;  %v21798_v13 = vld [vmem:[#allocation8 + $0x1400] ss:$48 sps:$4 sm:$0xff]   ;;  %v21803_v38 = vld [vmem:[#allocation8 + $0xe64] ss:$48 sps:$4 sm:$0xff]  }
 0x801   :  { %13326 = vmatprep.subr.bf16.mxu1 %v21728_v59  ;;  %v21806_v59 = vld [vmem:[#allocation8 + $0x1464] ss:$48 sps:$4 sm:$0xff]  }
 0x803   :  { %13245 = vmatpush1.bf16.msra.mxu0 %v21723_v61  ;;  %v21801_v61 = vld [vmem:[#allocation8 + $0xe60] ss:$48 sps:$4 sm:$0xff]  }
 0x804   :  { %13327 = vmatpush1.bf16.msra.mxu1 %v21726_v45  ;;  %13246 = vmatprep.subr.bf16.mxu0 %v21731_v62  ;;  %v21804_v45 = vld [vmem:[#allocation8 + $0x1460] ss:$48 sps:$4 sm:$0xff]   ;;  %v21809_v62 = vld [vmem:[#allocation8 + $0xec4] ss:$48 sps:$4 sm:$0xff]  }
 0x805   :  { %13328 = vmatprep.subr.bf16.mxu1 %v21734_v3  ;;  %v21812_v3 = vld [vmem:[#allocation8 + $0x14c4] ss:$48 sps:$4 sm:$0xff]  }
 0x807   :  { %13247 = vmatpush1.bf16.msra.mxu0 %v21729_v4  ;;  %v21807_v4 = vld [vmem:[#allocation8 + $0xec0] ss:$48 sps:$4 sm:$0xff]  }
 0x808   :  { %13329 = vmatpush1.bf16.msra.mxu1 %v21732_v0  ;;  %13248 = vmatprep.subr.bf16.mxu0 %v21737_v8  ;;  %v21810_v0 = vld [vmem:[#allocation8 + $0x14c0] ss:$48 sps:$4 sm:$0xff]   ;;  %v21815_v8 = vld [vmem:[#allocation8 + $0xf24] ss:$48 sps:$4 sm:$0xff]  }
 0x809   :  { %13330 = vmatprep.subr.bf16.mxu1 %v21740_v2  ;;  %v21818_v2 = vld [vmem:[#allocation8 + $0x1524] ss:$48 sps:$4 sm:$0xff]  }
 0x80b   :  { %13249 = vmatpush1.bf16.msra.mxu0 %v21735_v6  ;;  %v21813_v6 = vld [vmem:[#allocation8 + $0xf20] ss:$48 sps:$4 sm:$0xff]  }
 0x80c   :  { %13331 = vmatpush1.bf16.msra.mxu1 %v21738_v7  ;;  %13250 = vmatprep.subr.bf16.mxu0 %v21743_v11  ;;  %v21816_v7 = vld [vmem:[#allocation8 + $0x1520] ss:$48 sps:$4 sm:$0xff]   ;;  %v21821_v11 = vld [vmem:[#allocation8 + $0xf84] ss:$48 sps:$4 sm:$0xff]  }
 0x80d   :  { %13332 = vmatprep.subr.bf16.mxu1 %v21746_v50  ;;  %v21824_v50 = vld [vmem:[#allocation8 + $0x1584] ss:$48 sps:$4 sm:$0xff]  }
 0x80f   :  { %13251 = vmatpush1.bf16.msra.mxu0 %v21741_v14  ;;  %v21819_v14 = vld [vmem:[#allocation8 + $0xf80] ss:$48 sps:$4 sm:$0xff]  }
 0x810   :  { %13333 = vmatpush1.bf16.msra.mxu1 %v21744_v5  ;;  %13252 = vmatprep.subr.bf16.mxu0 %v21749_v17  ;;  %v21822_v5 = vld [vmem:[#allocation8 + $0x1580] ss:$48 sps:$4 sm:$0xff]   ;;  %v21827_v17 = vld [vmem:[#allocation8 + $0xfe4] ss:$48 sps:$4 sm:$0xff]  }
 0x811   :  { %13334 = vmatprep.subr.bf16.mxu1 %v21752_v28  ;;  %v21830_v28 = vld [vmem:[#allocation8 + $0x15e4] ss:$48 sps:$4 sm:$0xff]  }
 0x813   :  { %13253 = vmatpush1.bf16.msra.mxu0 %v21747_v24  ;;  %v21825_v24 = vld [vmem:[#allocation8 + $0xfe0] ss:$48 sps:$4 sm:$0xff]  }
 0x814   :  { %13335 = vmatpush1.bf16.msra.mxu1 %v21750_v25  ;;  %13254 = vmatprep.subr.bf16.mxu0 %v21755_v9  ;;  %v21828_v25 = vld [vmem:[#allocation8 + $0x15e0] ss:$48 sps:$4 sm:$0xff]   ;;  %v21833_v9 = vld [vmem:[#allocation8 + $0x1044] ss:$48 sps:$4 sm:$0xff]  }
 0x815   :  { %13336 = vmatprep.subr.bf16.mxu1 %v21758_v27  ;;  %v21836_v27 = vld [vmem:[#allocation8 + $0x1644] ss:$48 sps:$4 sm:$0xff]  }
 0x817   :  { %13255 = vmatpush1.bf16.msra.mxu0 %v21753_v15  ;;  %v21831_v15 = vld [vmem:[#allocation8 + $0x1040] ss:$48 sps:$4 sm:$0xff]  }
 0x818   :  { %13337 = vmatpush1.bf16.msra.mxu1 %v21756_v29  ;;  %13256 = vmatprep.subr.bf16.mxu0 %v21761_v30  ;;  %v21834_v29 = vld [vmem:[#allocation8 + $0x1640] ss:$48 sps:$4 sm:$0xff]   ;;  %v21839_v30 = vld [vmem:[#allocation8 + $0x10a4] ss:$48 sps:$4 sm:$0xff]  }
 0x819   :  { %13338 = vmatprep.subr.bf16.mxu1 %v21764_v31  ;;  %v21842_v31 = vld [vmem:[#allocation8 + $0x16a4] ss:$48 sps:$4 sm:$0xff]  }
 0x81b   :  { %13257 = vmatpush1.bf16.msra.mxu0 %v21759_v32  ;;  %v21837_v32 = vld [vmem:[#allocation8 + $0x10a0] ss:$48 sps:$4 sm:$0xff]  }
 0x81c   :  { %13339 = vmatpush1.bf16.msra.mxu1 %v21762_v34  ;;  %13349 = vmatprep.subr.bf16.mxu0 %v21767_v35  ;;  %v21840_v34 = vld [vmem:[#allocation8 + $0x16a0] ss:$48 sps:$4 sm:$0xff]   ;;  %v21845_v35 = vld [vmem:[#allocation8 + $0x1104] ss:$48 sps:$4 sm:$0xff]  }
 0x81d   :  { %13390 = vmatprep.subr.bf16.mxu1 %v21770_v33  ;;  %v21848_v33 = vld [vmem:[#allocation8 + $0x1704] ss:$48 sps:$4 sm:$0xff]  }
 0x81e   :  { %13259 = vmatmul.mubr.bf16.vlgmr.msra.gmra.mrb[40].mxu0 %v23406_v52 }
 0x81f   :  { %13341 = vmatmul.mubr.bf16.vlgmr.msra.gmra.mrb[40].mxu1 %v23406_v52  ;;  %13350 = vmatpush1.bf16.msra.mxu0 %v21765_v63  ;;  %v21843_v63 = vld [vmem:[#allocation8 + $0x1100] ss:$48 sps:$4 sm:$0xff]  }
 0x820   :  { %13381 = vmatprep.mubr.bf16.mxu0 %v23392_v55  ;;  %13391 = vmatpush1.bf16.msra.mxu1 %v21768_v10  ;;  %v21846_v10 = vld [vmem:[#allocation8 + $0x1700] ss:$48 sps:$4 sm:$0xff]  }
 0x821   :  { %13422 = vmatprep.mubr.bf16.mxu1 %v23400_v12  ;;  %13351 = vmatprep.subr.bf16.mxu0 %v21773_v40  ;;  %v21851_v40 = vld [vmem:[#allocation8 + $0x1164] ss:$48 sps:$4 sm:$0xff]  }
 0x822   :  { %13392 = vmatprep.subr.bf16.mxu1 %v21776_v46  ;;  %v21854_v46 = vld [vmem:[#allocation8 + $0x1764] ss:$48 sps:$4 sm:$0xff]  }
 0x823   :  { %13352 = vmatpush1.bf16.msra.mxu0 %v21771_v41  ;;  %v21849_v41 = vld [vmem:[#allocation8 + $0x1160] ss:$48 sps:$4 sm:$0xff]  }
 0x824   :  { %13393 = vmatpush1.bf16.msra.mxu1 %v21774_v1  ;;  %13353 = vmatprep.subr.bf16.mxu0 %v21779_v18  ;;  %v21852_v1 = vld [vmem:[#allocation8 + $0x1760] ss:$48 sps:$4 sm:$0xff]   ;;  %v21857_v18 = vld [vmem:[#allocation8 + $0x11c4] ss:$48 sps:$4 sm:$0xff]  }
 0x825   :  { %13394 = vmatprep.subr.bf16.mxu1 %v21782_v47  ;;  %v21860_v47 = vld [vmem:[#allocation8 + $0x17c4] ss:$48 sps:$4 sm:$0xff]  }
 0x827   :  { %13354 = vmatpush1.bf16.msra.mxu0 %v21777_v42  ;;  %v21855_v42 = vld [vmem:[#allocation8 + $0x11c0] ss:$48 sps:$4 sm:$0xff]  }
 0x828   :  { %13395 = vmatpush1.bf16.msra.mxu1 %v21780_v43  ;;  %13355 = vmatprep.subr.bf16.mxu0 %v21785_v44  ;;  %v21858_v43 = vld [vmem:[#allocation8 + $0x17c0] ss:$48 sps:$4 sm:$0xff]   ;;  %v21863_v44 = vld [vmem:[#allocation8 + $0xc2c] ss:$48 sps:$4 sm:$0xff]  }
 0x829   :  { %13396 = vmatprep.subr.bf16.mxu1 %v21788_v49  ;;  %v21866_v49 = vld [vmem:[#allocation8 + $0x122c] ss:$48 sps:$4 sm:$0xff]  }
 0x82b   :  { %13356 = vmatpush1.bf16.msra.mxu0 %v21783_v37  ;;  %v21861_v37 = vld [vmem:[#allocation8 + $0xc28] ss:$48 sps:$4 sm:$0xff]  }
 0x82c   :  { %13397 = vmatpush1.bf16.msra.mxu1 %v21786_v51  ;;  %13357 = vmatprep.subr.bf16.mxu0 %v21791_v53  ;;  %v21864_v51 = vld [vmem:[#allocation8 + $0x1228] ss:$48 sps:$4 sm:$0xff]   ;;  %v21869_v53 = vld [vmem:[#allocation8 + $0xc8c] ss:$48 sps:$4 sm:$0xff]  }
 0x82d   :  { %13398 = vmatprep.subr.bf16.mxu1 %v21794_v54  ;;  %v21872_v54 = vld [vmem:[#allocation8 + $0x128c] ss:$48 sps:$4 sm:$0xff]  }
 0x82f   :  { %13358 = vmatpush1.bf16.msra.mxu0 %v21789_v56  ;;  %v21867_v56 = vld [vmem:[#allocation8 + $0xc88] ss:$48 sps:$4 sm:$0xff]  }
 0x830   :  { %13399 = vmatpush1.bf16.msra.mxu1 %v21792_v57  ;;  %13359 = vmatprep.subr.bf16.mxu0 %v21797_v58  ;;  %v21870_v57 = vld [vmem:[#allocation8 + $0x1288] ss:$48 sps:$4 sm:$0xff]   ;;  %v21875_v58 = vld [vmem:[#allocation8 + $0xcec] ss:$48 sps:$4 sm:$0xff]  }
 0x831   :  { %13400 = vmatprep.subr.bf16.mxu1 %v21800_v36  ;;  %v21878_v36 = vld [vmem:[#allocation8 + $0x12ec] ss:$48 sps:$4 sm:$0xff]  }
 0x833   :  { %13360 = vmatpush1.bf16.msra.mxu0 %v21795_v39  ;;  %v21873_v39 = vld [vmem:[#allocation8 + $0xce8] ss:$48 sps:$4 sm:$0xff]  }
 0x834   :  { %13401 = vmatpush1.bf16.msra.mxu1 %v21798_v13  ;;  %13361 = vmatprep.subr.bf16.mxu0 %v21803_v38  ;;  %v21876_v13 = vld [vmem:[#allocation8 + $0x12e8] ss:$48 sps:$4 sm:$0xff]   ;;  %v21881_v38 = vld [vmem:[#allocation8 + $0xd4c] ss:$48 sps:$4 sm:$0xff]  }
 0x835   :  { %13402 = vmatprep.subr.bf16.mxu1 %v21806_v59  ;;  %v21884_v59 = vld [vmem:[#allocation8 + $0x134c] ss:$48 sps:$4 sm:$0xff]  }
 0x837   :  { %13362 = vmatpush1.bf16.msra.mxu0 %v21801_v61  ;;  %v21879_v61 = vld [vmem:[#allocation8 + $0xd48] ss:$48 sps:$4 sm:$0xff]  }
 0x838   :  { %13403 = vmatpush1.bf16.msra.mxu1 %v21804_v45  ;;  %13363 = vmatprep.subr.bf16.mxu0 %v21809_v62  ;;  %v21887_v45 = vld [vmem:[#allocation8 + $0xdac] ss:$48 sps:$4 sm:$0xff]  }
 0x839   :  { %13404 = vmatprep.subr.bf16.mxu1 %v21812_v3  ;;  %v21890_v62 = vld [vmem:[#allocation8 + $0x13ac] ss:$48 sps:$4 sm:$0xff]   ;;  %v21888_v3 = vld [vmem:[#allocation8 + $0x13a8] ss:$48 sps:$4 sm:$0xff]  }
 0x83b   :  { %13364 = vmatpush1.bf16.msra.mxu0 %v21807_v4  ;;  %v21893_v4 = vld [vmem:[#allocation8 + $0xe0c] ss:$48 sps:$4 sm:$0xff]  }
 0x83c   :  { %13405 = vmatpush1.bf16.msra.mxu1 %v21810_v0  ;;  %13365 = vmatprep.subr.bf16.mxu0 %v21815_v8  ;;  %v21896_v0 = vld [vmem:[#allocation8 + $0x140c] ss:$48 sps:$4 sm:$0xff]   ;;  %v21891_v8 = vld [vmem:[#allocation8 + $0xe08] ss:$48 sps:$4 sm:$0xff]  }
 0x83d   :  { %13406 = vmatprep.subr.bf16.mxu1 %v21818_v2  ;;  %v21894_v2 = vld [vmem:[#allocation8 + $0x1408] ss:$48 sps:$4 sm:$0xff]  }
 0x83f   :  { %13366 = vmatpush1.bf16.msra.mxu0 %v21813_v6  ;;  %v21899_v6 = vld [vmem:[#allocation8 + $0xe6c] ss:$48 sps:$4 sm:$0xff]  }
 0x840   :  { %13407 = vmatpush1.bf16.msra.mxu1 %v21816_v7  ;;  %13367 = vmatprep.subr.bf16.mxu0 %v21821_v11  ;;  %v21902_v7 = vld [vmem:[#allocation8 + $0x146c] ss:$48 sps:$4 sm:$0xff]   ;;  %v21897_v11 = vld [vmem:[#allocation8 + $0xe68] ss:$48 sps:$4 sm:$0xff]  }
 0x841   :  { %13408 = vmatprep.subr.bf16.mxu1 %v21824_v50  ;;  %v21900_v50 = vld [vmem:[#allocation8 + $0x1468] ss:$48 sps:$4 sm:$0xff]  }
 0x843   :  { %13368 = vmatpush1.bf16.msra.mxu0 %v21819_v14  ;;  %v21905_v14 = vld [vmem:[#allocation8 + $0xecc] ss:$48 sps:$4 sm:$0xff]  }
 0x844   :  { %13409 = vmatpush1.bf16.msra.mxu1 %v21822_v5  ;;  %13369 = vmatprep.subr.bf16.mxu0 %v21827_v17  ;;  %v21908_v5 = vld [vmem:[#allocation8 + $0x14cc] ss:$48 sps:$4 sm:$0xff]   ;;  %v21903_v17 = vld [vmem:[#allocation8 + $0xec8] ss:$48 sps:$4 sm:$0xff]  }
 0x845   :  { %13410 = vmatprep.subr.bf16.mxu1 %v21830_v28  ;;  %v21906_v28 = vld [vmem:[#allocation8 + $0x14c8] ss:$48 sps:$4 sm:$0xff]  }
 0x847   :  { %13370 = vmatpush1.bf16.msra.mxu0 %v21825_v24  ;;  %v21911_v24 = vld [vmem:[#allocation8 + $0xf2c] ss:$48 sps:$4 sm:$0xff]  }
 0x848   :  { %13411 = vmatpush1.bf16.msra.mxu1 %v21828_v25  ;;  %13371 = vmatprep.subr.bf16.mxu0 %v21833_v9  ;;  %v21914_v25 = vld [vmem:[#allocation8 + $0x152c] ss:$48 sps:$4 sm:$0xff]   ;;  %v21909_v9 = vld [vmem:[#allocation8 + $0xf28] ss:$48 sps:$4 sm:$0xff]  }
 0x849   :  { %13412 = vmatprep.subr.bf16.mxu1 %v21836_v27  ;;  %v21912_v27 = vld [vmem:[#allocation8 + $0x1528] ss:$48 sps:$4 sm:$0xff]  }
 0x84b   :  { %13372 = vmatpush1.bf16.msra.mxu0 %v21831_v15  ;;  %v21917_v15 = vld [vmem:[#allocation8 + $0xf8c] ss:$48 sps:$4 sm:$0xff]  }
 0x84c   :  { %13413 = vmatpush1.bf16.msra.mxu1 %v21834_v29  ;;  %13373 = vmatprep.subr.bf16.mxu0 %v21839_v30  ;;  %v21920_v29 = vld [vmem:[#allocation8 + $0x158c] ss:$48 sps:$4 sm:$0xff]   ;;  %v21915_v30 = vld [vmem:[#allocation8 + $0xf88] ss:$48 sps:$4 sm:$0xff]  }
 0x84d   :  { %13414 = vmatprep.subr.bf16.mxu1 %v21842_v31  ;;  %v21918_v31 = vld [vmem:[#allocation8 + $0x1588] ss:$48 sps:$4 sm:$0xff]  }
 0x84f   :  { %13374 = vmatpush1.bf16.msra.mxu0 %v21837_v32  ;;  %v21923_v32 = vld [vmem:[#allocation8 + $0xfec] ss:$48 sps:$4 sm:$0xff]  }
 0x850   :  { %13415 = vmatpush1.bf16.msra.mxu1 %v21840_v34  ;;  %13375 = vmatprep.subr.bf16.mxu0 %v21845_v35  ;;  %v21926_v34 = vld [vmem:[#allocation8 + $0x15ec] ss:$48 sps:$4 sm:$0xff]   ;;  %v21921_v35 = vld [vmem:[#allocation8 + $0xfe8] ss:$48 sps:$4 sm:$0xff]  }
 0x851   :  { %13416 = vmatprep.subr.bf16.mxu1 %v21848_v33  ;;  %v21924_v33 = vld [vmem:[#allocation8 + $0x15e8] ss:$48 sps:$4 sm:$0xff]  }
 0x853   :  { %13376 = vmatpush1.bf16.msra.mxu0 %v21843_v63  ;;  %v21929_v63 = vld [vmem:[#allocation8 + $0x104c] ss:$48 sps:$4 sm:$0xff]  }
 0x854   :  { %13417 = vmatpush1.bf16.msra.mxu1 %v21846_v10  ;;  %13377 = vmatprep.subr.bf16.mxu0 %v21851_v40  ;;  %v21932_v10 = vld [vmem:[#allocation8 + $0x164c] ss:$48 sps:$4 sm:$0xff]   ;;  %v21927_v40 = vld [vmem:[#allocation8 + $0x1048] ss:$48 sps:$4 sm:$0xff]  }
 0x855   :  { %13418 = vmatprep.subr.bf16.mxu1 %v21854_v46  ;;  %v21930_v46 = vld [vmem:[#allocation8 + $0x1648] ss:$48 sps:$4 sm:$0xff]  }
 0x857   :  { %13378 = vmatpush1.bf16.msra.mxu0 %v21849_v41  ;;  %v21935_v41 = vld [vmem:[#allocation8 + $0x10ac] ss:$48 sps:$4 sm:$0xff]  }
 0x858   :  { %13419 = vmatpush1.bf16.msra.mxu1 %v21852_v1  ;;  %13379 = vmatprep.subr.bf16.mxu0 %v21857_v18  ;;  %v21938_v1 = vld [vmem:[#allocation8 + $0x16ac] ss:$48 sps:$4 sm:$0xff]   ;;  %v21933_v18 = vld [vmem:[#allocation8 + $0x10a8] ss:$48 sps:$4 sm:$0xff]  }
 0x859   :  { %13420 = vmatprep.subr.bf16.mxu1 %v21860_v47  ;;  %v21936_v47 = vld [vmem:[#allocation8 + $0x16a8] ss:$48 sps:$4 sm:$0xff]  }
 0x85b   :  { %13380 = vmatpush1.bf16.msra.mxu0 %v21855_v42  ;;  %v21941_v42 = vld [vmem:[#allocation8 + $0x110c] ss:$48 sps:$4 sm:$0xff]  }
 0x85c   :  { %13421 = vmatpush1.bf16.msra.mxu1 %v21858_v43  ;;  %13431 = vmatprep.subr.bf16.mxu0 %v21863_v44  ;;  %v21944_v43 = vld [vmem:[#allocation8 + $0x170c] ss:$48 sps:$4 sm:$0xff]   ;;  %v21939_v44 = vld [vmem:[#allocation8 + $0x1108] ss:$48 sps:$4 sm:$0xff]  }
 0x85d   :  { %13472 = vmatprep.subr.bf16.mxu1 %v21866_v49  ;;  %v21942_v49 = vld [vmem:[#allocation8 + $0x1708] ss:$48 sps:$4 sm:$0xff]  }
 0x85e   :  { %13382 = vmatmul.mubr.bf16.vlgmr.msra.gmra.mrb[44].mxu0 %v23394_v60 }
 0x85f   :  { %13423 = vmatmul.mubr.bf16.vlgmr.msra.gmra.mrb[44].mxu1 %v23406_v52  ;;  %13432 = vmatpush1.bf16.msra.mxu0 %v21861_v37  ;;  %v21947_v37 = vld [vmem:[#allocation8 + $0x116c] ss:$48 sps:$4 sm:$0xff]  }
 0x860   :  { %13463 = vmatprep.mubr.bf16.mxu0 %v23392_v55  ;;  %13473 = vmatpush1.bf16.msra.mxu1 %v21864_v51  ;;  %v21882_v55 = vld [vmem:[#allocation8 + $0x1348] ss:$48 sps:$4 sm:$0xff]   ;;  %v21950_v51 = vld [vmem:[#allocation8 + $0x176c] ss:$48 sps:$4 sm:$0xff]  }
 0x861   :  { %13504 = vmatprep.mubr.bf16.mxu1 %v23400_v12  ;;  %13433 = vmatprep.subr.bf16.mxu0 %v21869_v53  ;;  %v21885_v12 = vld [vmem:[#allocation8 + $0xda8] ss:$48 sps:$4 sm:$0xff]  }
 0x862   :  { %13474 = vmatprep.subr.bf16.mxu1 %v21872_v54  ;;  %v21945_v53 = vld [vmem:[#allocation8 + $0x1168] ss:$48 sps:$4 sm:$0xff]  }
 0x863   :  { %13434 = vmatpush1.bf16.msra.mxu0 %v21867_v56  ;;  %v21948_v54 = vld [vmem:[#allocation8 + $0x1768] ss:$48 sps:$4 sm:$0xff]   ;;  %v21953_v56 = vld [vmem:[#allocation8 + $0x11cc] ss:$48 sps:$4 sm:$0xff]  }
 0x864   :  { %13475 = vmatpush1.bf16.msra.mxu1 %v21870_v57  ;;  %13435 = vmatprep.subr.bf16.mxu0 %v21875_v58  ;;  %v21956_v57 = vld [vmem:[#allocation8 + $0x17cc] ss:$48 sps:$4 sm:$0xff]   ;;  %v21951_v58 = vld [vmem:[#allocation8 + $0x11c8] ss:$48 sps:$4 sm:$0xff]  }
 0x865   :  { %13476 = vmatprep.subr.bf16.mxu1 %v21878_v36  ;;  %v21954_v36 = vld [vmem:[#allocation8 + $0x17c8] ss:$48 sps:$4 sm:$0xff]  }
 0x867   :  { %13436 = vmatpush1.bf16.msra.mxu0 %v21873_v39  ;;  %v21959_v39 = vld [vmem:[#allocation9 + $0x1804] ss:$48 sps:$4 sm:$0xff]  }
 0x868   :  { %13477 = vmatpush1.bf16.msra.mxu1 %v21876_v13  ;;  %13437 = vmatprep.subr.bf16.mxu0 %v21881_v38  ;;  %v21962_v13 = vld [vmem:[#allocation9 + $0x180c] ss:$48 sps:$4 sm:$0xff]  }
 0x869   :  { %13478 = vmatprep.subr.bf16.mxu1 %v21884_v59  ;;  %v140_v38 = vld [vmem:[#allocation3 + $0x48] sm:$0xff]  ;;  %v21957_v59 = vld [vmem:[#allocation9 + $0x1800] ss:$48 sps:$4 sm:$0xff]  }
 0x86b   :  { %13438 = vmatpush1.bf16.msra.mxu0 %v21879_v61  ;;  %v21960_v61 = vld [vmem:[#allocation9 + $0x1808] ss:$48 sps:$4 sm:$0xff]  }
 0x86c   :  { %13479 = vmatpush1.bf16.msra.mxu1 %v21882_v55  ;;  %13439 = vmatprep.subr.bf16.mxu0 %v21887_v45  ;;  %v21965_v55 = vld [vmem:[#allocation9 + $0x1864] ss:$48 sps:$4 sm:$0xff]   ;;  %v21968_v45 = vld [vmem:[#allocation9 + $0x186c] ss:$48 sps:$4 sm:$0xff]  }
 0x86d   :  { %13480 = vmatprep.subr.bf16.mxu1 %v21890_v62  ;;  %v23424_v62 = vpack.c.bf16 %v140_v38, %v140_v38  ;;  %v22043_v38 = vld [vmem:[#allocation9 + $0x1d44] ss:$48 sps:$4 sm:$0xff]  }
 0x86f   :  { %13440 = vmatpush1.bf16.msra.mxu0 %v21885_v12  ;;  %v21963_v12 = vld [vmem:[#allocation9 + $0x1860] ss:$48 sps:$4 sm:$0xff]  }
 0x870   :  { %13481 = vmatpush1.bf16.msra.mxu1 %v21888_v3  ;;  %13441 = vmatprep.subr.bf16.mxu0 %v21893_v4  ;;  %v21966_v3 = vld [vmem:[#allocation9 + $0x1868] ss:$48 sps:$4 sm:$0xff]   ;;  %v21971_v4 = vld [vmem:[#allocation9 + $0x18c4] ss:$48 sps:$4 sm:$0xff]  }
 0x871   :  { %13482 = vmatprep.subr.bf16.mxu1 %v21896_v0  ;;  %v21974_v0 = vld [vmem:[#allocation9 + $0x18cc] ss:$48 sps:$4 sm:$0xff]  }
 0x873   :  { %13442 = vmatpush1.bf16.msra.mxu0 %v21891_v8  ;;  %v21969_v8 = vld [vmem:[#allocation9 + $0x18c0] ss:$48 sps:$4 sm:$0xff]  }
 0x874   :  { %13483 = vmatpush1.bf16.msra.mxu1 %v21894_v2  ;;  %13443 = vmatprep.subr.bf16.mxu0 %v21899_v6  ;;  %v21972_v2 = vld [vmem:[#allocation9 + $0x18c8] ss:$48 sps:$4 sm:$0xff]   ;;  %v21975_v6 = vld [vmem:[#allocation9 + $0x1920] ss:$48 sps:$4 sm:$0xff]  }
 0x875   :  { %13484 = vmatprep.subr.bf16.mxu1 %v21902_v7  ;;  %v21978_v7 = vld [vmem:[#allocation9 + $0x1928] ss:$48 sps:$4 sm:$0xff]  }
 0x877   :  { %13444 = vmatpush1.bf16.msra.mxu0 %v21897_v11  ;;  %v21983_v11 = vld [vmem:[#allocation9 + $0x1984] ss:$48 sps:$4 sm:$0xff]  }
 0x878   :  { %13485 = vmatpush1.bf16.msra.mxu1 %v21900_v50  ;;  %13445 = vmatprep.subr.bf16.mxu0 %v21905_v14  ;;  %v21986_v50 = vld [vmem:[#allocation9 + $0x198c] ss:$48 sps:$4 sm:$0xff]   ;;  %v21981_v14 = vld [vmem:[#allocation9 + $0x1980] ss:$48 sps:$4 sm:$0xff]  }
 0x879   :  { %13486 = vmatprep.subr.bf16.mxu1 %v21908_v5  ;;  %v21984_v5 = vld [vmem:[#allocation9 + $0x1988] ss:$48 sps:$4 sm:$0xff]  }
 0x87b   :  { %13446 = vmatpush1.bf16.msra.mxu0 %v21903_v17  ;;  %v21989_v17 = vld [vmem:[#allocation9 + $0x19e4] ss:$48 sps:$4 sm:$0xff]  }
 0x87c   :  { %13487 = vmatpush1.bf16.msra.mxu1 %v21906_v28  ;;  %13447 = vmatprep.subr.bf16.mxu0 %v21911_v24  ;;  %v21992_v28 = vld [vmem:[#allocation9 + $0x19ec] ss:$48 sps:$4 sm:$0xff]   ;;  %v21987_v24 = vld [vmem:[#allocation9 + $0x19e0] ss:$48 sps:$4 sm:$0xff]  }
 0x87d   :  { %13488 = vmatprep.subr.bf16.mxu1 %v21914_v25  ;;  %v21990_v25 = vld [vmem:[#allocation9 + $0x19e8] ss:$48 sps:$4 sm:$0xff]  }
 0x87f   :  { %13448 = vmatpush1.bf16.msra.mxu0 %v21909_v9  ;;  %v21995_v9 = vld [vmem:[#allocation9 + $0x1a44] ss:$48 sps:$4 sm:$0xff]  }
 0x880   :  { %13489 = vmatpush1.bf16.msra.mxu1 %v21912_v27  ;;  %13449 = vmatprep.subr.bf16.mxu0 %v21917_v15  ;;  %v21998_v27 = vld [vmem:[#allocation9 + $0x1a4c] ss:$48 sps:$4 sm:$0xff]   ;;  %v21993_v15 = vld [vmem:[#allocation9 + $0x1a40] ss:$48 sps:$4 sm:$0xff]  }
 0x881   :  { %13490 = vmatprep.subr.bf16.mxu1 %v21920_v29  ;;  %v21996_v29 = vld [vmem:[#allocation9 + $0x1a48] ss:$48 sps:$4 sm:$0xff]  }
 0x883   :  { %13450 = vmatpush1.bf16.msra.mxu0 %v21915_v30  ;;  %v22001_v30 = vld [vmem:[#allocation9 + $0x1aa4] ss:$48 sps:$4 sm:$0xff]  }
 0x884   :  { %13491 = vmatpush1.bf16.msra.mxu1 %v21918_v31  ;;  %13451 = vmatprep.subr.bf16.mxu0 %v21923_v32  ;;  %v22004_v31 = vld [vmem:[#allocation9 + $0x1aac] ss:$48 sps:$4 sm:$0xff]   ;;  %v21999_v32 = vld [vmem:[#allocation9 + $0x1aa0] ss:$48 sps:$4 sm:$0xff]  }
 0x885   :  { %13492 = vmatprep.subr.bf16.mxu1 %v21926_v34  ;;  %v22002_v34 = vld [vmem:[#allocation9 + $0x1aa8] ss:$48 sps:$4 sm:$0xff]  }
 0x887   :  { %13452 = vmatpush1.bf16.msra.mxu0 %v21921_v35  ;;  %v22007_v35 = vld [vmem:[#allocation9 + $0x1b04] ss:$48 sps:$4 sm:$0xff]  }
 0x888   :  { %13493 = vmatpush1.bf16.msra.mxu1 %v21924_v33  ;;  %13453 = vmatprep.subr.bf16.mxu0 %v21929_v63  ;;  %v22010_v33 = vld [vmem:[#allocation9 + $0x1b0c] ss:$48 sps:$4 sm:$0xff]   ;;  %v22005_v63 = vld [vmem:[#allocation9 + $0x1b00] ss:$48 sps:$4 sm:$0xff]  }
 0x889   :  { %13494 = vmatprep.subr.bf16.mxu1 %v21932_v10  ;;  %v22008_v10 = vld [vmem:[#allocation9 + $0x1b08] ss:$48 sps:$4 sm:$0xff]  }
 0x88b   :  { %13454 = vmatpush1.bf16.msra.mxu0 %v21927_v40  ;;  %v22013_v40 = vld [vmem:[#allocation9 + $0x1b64] ss:$48 sps:$4 sm:$0xff]  }
 0x88c   :  { %13495 = vmatpush1.bf16.msra.mxu1 %v21930_v46  ;;  %13455 = vmatprep.subr.bf16.mxu0 %v21935_v41  ;;  %v22016_v46 = vld [vmem:[#allocation9 + $0x1b6c] ss:$48 sps:$4 sm:$0xff]   ;;  %v22011_v41 = vld [vmem:[#allocation9 + $0x1b60] ss:$48 sps:$4 sm:$0xff]  }
 0x88d   :  { %13496 = vmatprep.subr.bf16.mxu1 %v21938_v1  ;;  %v22014_v1 = vld [vmem:[#allocation9 + $0x1b68] ss:$48 sps:$4 sm:$0xff]  }
 0x88f   :  { %13456 = vmatpush1.bf16.msra.mxu0 %v21933_v18  ;;  %v22019_v18 = vld [vmem:[#allocation9 + $0x1bc4] ss:$48 sps:$4 sm:$0xff]  }
 0x890   :  { %13497 = vmatpush1.bf16.msra.mxu1 %v21936_v47  ;;  %13457 = vmatprep.subr.bf16.mxu0 %v21941_v42  ;;  %v22022_v47 = vld [vmem:[#allocation9 + $0x1bcc] ss:$48 sps:$4 sm:$0xff]   ;;  %v22017_v42 = vld [vmem:[#allocation9 + $0x1bc0] ss:$48 sps:$4 sm:$0xff]  }
 0x891   :  { %13498 = vmatprep.subr.bf16.mxu1 %v21944_v43  ;;  %v22020_v43 = vld [vmem:[#allocation9 + $0x1bc8] ss:$48 sps:$4 sm:$0xff]  }
 0x893   :  { %13458 = vmatpush1.bf16.msra.mxu0 %v21939_v44  ;;  %v22025_v44 = vld [vmem:[#allocation9 + $0x1c24] ss:$48 sps:$4 sm:$0xff]  }
 0x894   :  { %13499 = vmatpush1.bf16.msra.mxu1 %v21942_v49  ;;  %13459 = vmatprep.subr.bf16.mxu0 %v21947_v37  ;;  %v22028_v49 = vld [vmem:[#allocation9 + $0x1c2c] ss:$48 sps:$4 sm:$0xff]   ;;  %v22023_v37 = vld [vmem:[#allocation9 + $0x1c20] ss:$48 sps:$4 sm:$0xff]  }
 0x895   :  { %13500 = vmatprep.subr.bf16.mxu1 %v21950_v51  ;;  %v22026_v51 = vld [vmem:[#allocation9 + $0x1c28] ss:$48 sps:$4 sm:$0xff]  }
 0x897   :  { %13460 = vmatpush1.bf16.msra.mxu0 %v21945_v53  ;;  %v22031_v53 = vld [vmem:[#allocation9 + $0x1c84] ss:$48 sps:$4 sm:$0xff]  }
 0x898   :  { %13501 = vmatpush1.bf16.msra.mxu1 %v21948_v54  ;;  %13461 = vmatprep.subr.bf16.mxu0 %v21953_v56  ;;  %v22034_v54 = vld [vmem:[#allocation9 + $0x1c8c] ss:$48 sps:$4 sm:$0xff]   ;;  %v22029_v56 = vld [vmem:[#allocation9 + $0x1c80] ss:$48 sps:$4 sm:$0xff]  }
 0x899   :  { %13502 = vmatprep.subr.bf16.mxu1 %v21956_v57  ;;  %v22032_v57 = vld [vmem:[#allocation9 + $0x1c88] ss:$48 sps:$4 sm:$0xff]  }
 0x89b   :  { %13462 = vmatpush1.bf16.msra.mxu0 %v21951_v58  ;;  %v22037_v58 = vld [vmem:[#allocation9 + $0x1ce4] ss:$48 sps:$4 sm:$0xff]  }
 0x89c   :  { %13503 = vmatpush1.bf16.msra.mxu1 %v21954_v36  ;;  %15930 = vmatprep.subr.bf16.mxu0 %v21959_v39  ;;  %v22040_v36 = vld [vmem:[#allocation9 + $0x1cec] ss:$48 sps:$4 sm:$0xff]   ;;  %v22035_v39 = vld [vmem:[#allocation9 + $0x1ce0] ss:$48 sps:$4 sm:$0xff]  }
 0x89d   :  { %16012 = vmatprep.subr.bf16.mxu1 %v21962_v13  ;;  %v22038_v13 = vld [vmem:[#allocation9 + $0x1ce8] ss:$48 sps:$4 sm:$0xff]  }
 0x89e   :  { %13464 = vmatmul.mubr.bf16.vlgmr.msra.gmra.mrb[48].mxu0 %v23394_v60  ;;  %v21977_v60 = vld [vmem:[#allocation9 + $0x1924] ss:$48 sps:$4 sm:$0xff]  }
 0x89f   :  { %13505 = vmatmul.mubr.bf16.vlgmr.msra.gmra.mrb[48].mxu1 %v23406_v52  ;;  %15931 = vmatpush1.bf16.msra.mxu0 %v21957_v59  ;;  %v21980_v52 = vld [vmem:[#allocation9 + $0x192c] ss:$48 sps:$4 sm:$0xff]  }
 0x8a0   :  { %16013 = vmatpush1.bf16.msra.mxu1 %v21960_v61  ;;  %15932 = vmatprep.subr.bf16.mxu0 %v21965_v55  ;;  %v22046_v59 = vld [vmem:[#allocation9 + $0x1d4c] ss:$48 sps:$4 sm:$0xff]   ;;  %v22041_v61 = vld [vmem:[#allocation9 + $0x1d40] ss:$48 sps:$4 sm:$0xff]   ;;  %v22044_v55 = vld [vmem:[#allocation9 + $0x1d48] ss:$48 sps:$4 sm:$0xff]  }
 0x8a1   :  { %16014 = vmatprep.subr.bf16.mxu1 %v21968_v45  ;;  %15962 = vmatprep.mubr.bf16.mxu0 %v23424_v62  ;;  %v22049_v45 = vld [vmem:[#allocation9 + $0x1da4] ss:$48 sps:$4 sm:$0xff]  }
 0x8a2   :  { %16044 = vmatprep.mubr.bf16.mxu1 %v23424_v62 }
 0x8a3   :  { %15933 = vmatpush1.bf16.msra.mxu0 %v21963_v12  ;;  %v22052_v12 = vld [vmem:[#allocation9 + $0x1dac] ss:$48 sps:$4 sm:$0xff]  }
 0x8a4   :  { %16015 = vmatpush1.bf16.msra.mxu1 %v21966_v3  ;;  %15934 = vmatprep.subr.bf16.mxu0 %v21971_v4  ;;  %v22047_v3 = vld [vmem:[#allocation9 + $0x1da0] ss:$48 sps:$4 sm:$0xff]  }
 0x8a5   :  { %16016 = vmatprep.subr.bf16.mxu1 %v21974_v0  ;;  %v139_v4 = vld [vmem:[#allocation3 + $0x40] sm:$0xff]  ;;  %v22050_v0 = vld [vmem:[#allocation9 + $0x1da8] ss:$48 sps:$4 sm:$0xff]  }
 0x8a7   :  { %15935 = vmatpush1.bf16.msra.mxu0 %v21969_v8  ;;  %v22055_v8 = vld [vmem:[#allocation9 + $0x1e04] ss:$48 sps:$4 sm:$0xff]  }
 0x8a8   :  { %16017 = vmatpush1.bf16.msra.mxu1 %v21972_v2  ;;  %15936 = vmatprep.subr.bf16.mxu0 %v21977_v60  ;;  %v22058_v2 = vld [vmem:[#allocation9 + $0x1e0c] ss:$48 sps:$4 sm:$0xff]   ;;  %v23430_v60 = vpack.c.bf16 %v139_v4, %v139_v4  ;;  %v22125_v4 = vld [vmem:[#allocation9 + $0x2280] ss:$48 sps:$4 sm:$0xff]  }
 0x8a9   :  { %16018 = vmatprep.subr.bf16.mxu1 %v21980_v52  ;;  %v142_v52 = vld [vmem:[#allocation3 + $0x58] sm:$0xff] }
 0x8ab   :  { %15937 = vmatpush1.bf16.msra.mxu0 %v21975_v6  ;;  %v22053_v6 = vld [vmem:[#allocation9 + $0x1e00] ss:$48 sps:$4 sm:$0xff]  }
 0x8ac   :  { %16019 = vmatpush1.bf16.msra.mxu1 %v21978_v7  ;;  %15938 = vmatprep.subr.bf16.mxu0 %v21983_v11  ;;  %v22056_v7 = vld [vmem:[#allocation9 + $0x1e08] ss:$48 sps:$4 sm:$0xff]   ;;  %v22061_v11 = vld [vmem:[#allocation9 + $0x1e64] ss:$48 sps:$4 sm:$0xff]  }
 0x8ad   :  { %16020 = vmatprep.subr.bf16.mxu1 %v21986_v50  ;;  %v22064_v50 = vld [vmem:[#allocation9 + $0x1e6c] ss:$48 sps:$4 sm:$0xff]  }
 0x8af   :  { %15939 = vmatpush1.bf16.msra.mxu0 %v21981_v14  ;;  %v23432_v14 = vpack.c.bf16 %v142_v52, %v142_v52  ;;  %v22131_v52 = vld [vmem:[#allocation9 + $0x22e0] ss:$48 sps:$4 sm:$0xff]  }
 0x8b0   :  { %16021 = vmatpush1.bf16.msra.mxu1 %v21984_v5  ;;  %15940 = vmatprep.subr.bf16.mxu0 %v21989_v17  ;;  %v22059_v5 = vld [vmem:[#allocation9 + $0x1e60] ss:$48 sps:$4 sm:$0xff]   ;;  %v22062_v17 = vld [vmem:[#allocation9 + $0x1e68] ss:$48 sps:$4 sm:$0xff]  }
 0x8b1   :  { %16022 = vmatprep.subr.bf16.mxu1 %v21992_v28  ;;  %v22067_v28 = vld [vmem:[#allocation9 + $0x1ec4] ss:$48 sps:$4 sm:$0xff]  }
 0x8b3   :  { %15941 = vmatpush1.bf16.msra.mxu0 %v21987_v24  ;;  %v22070_v24 = vld [vmem:[#allocation9 + $0x1ecc] ss:$48 sps:$4 sm:$0xff]  }
 0x8b4   :  { %16023 = vmatpush1.bf16.msra.mxu1 %v21990_v25  ;;  %15942 = vmatprep.subr.bf16.mxu0 %v21995_v9  ;;  %v22065_v25 = vld [vmem:[#allocation9 + $0x1ec0] ss:$48 sps:$4 sm:$0xff]   ;;  %v22068_v9 = vld [vmem:[#allocation9 + $0x1ec8] ss:$48 sps:$4 sm:$0xff]  }
 0x8b5   :  { %16024 = vmatprep.subr.bf16.mxu1 %v21998_v27  ;;  %v22073_v27 = vld [vmem:[#allocation9 + $0x1f24] ss:$48 sps:$4 sm:$0xff]  }
 0x8b7   :  { %15943 = vmatpush1.bf16.msra.mxu0 %v21993_v15  ;;  %v22076_v15 = vld [vmem:[#allocation9 + $0x1f2c] ss:$48 sps:$4 sm:$0xff]  }
 0x8b8   :  { %16025 = vmatpush1.bf16.msra.mxu1 %v21996_v29  ;;  %15944 = vmatprep.subr.bf16.mxu0 %v22001_v30  ;;  %v22071_v29 = vld [vmem:[#allocation9 + $0x1f20] ss:$48 sps:$4 sm:$0xff]   ;;  %v22074_v30 = vld [vmem:[#allocation9 + $0x1f28] ss:$48 sps:$4 sm:$0xff]  }
 0x8b9   :  { %16026 = vmatprep.subr.bf16.mxu1 %v22004_v31  ;;  %v22079_v31 = vld [vmem:[#allocation9 + $0x1f84] ss:$48 sps:$4 sm:$0xff]  }
 0x8bb   :  { %15945 = vmatpush1.bf16.msra.mxu0 %v21999_v32  ;;  %v22082_v32 = vld [vmem:[#allocation9 + $0x1f8c] ss:$48 sps:$4 sm:$0xff]  }
 0x8bc   :  { %16027 = vmatpush1.bf16.msra.mxu1 %v22002_v34  ;;  %15946 = vmatprep.subr.bf16.mxu0 %v22007_v35  ;;  %v22077_v34 = vld [vmem:[#allocation9 + $0x1f80] ss:$48 sps:$4 sm:$0xff]   ;;  %v22080_v35 = vld [vmem:[#allocation9 + $0x1f88] ss:$48 sps:$4 sm:$0xff]  }
 0x8bd   :  { %16028 = vmatprep.subr.bf16.mxu1 %v22010_v33  ;;  %v22085_v33 = vld [vmem:[#allocation9 + $0x1fe4] ss:$48 sps:$4 sm:$0xff]  }
 0x8bf   :  { %15947 = vmatpush1.bf16.msra.mxu0 %v22005_v63  ;;  %v22088_v63 = vld [vmem:[#allocation9 + $0x1fec] ss:$48 sps:$4 sm:$0xff]  }
 0x8c0   :  { %16029 = vmatpush1.bf16.msra.mxu1 %v22008_v10  ;;  %15948 = vmatprep.subr.bf16.mxu0 %v22013_v40  ;;  %v22083_v10 = vld [vmem:[#allocation9 + $0x1fe0] ss:$48 sps:$4 sm:$0xff]   ;;  %v22086_v40 = vld [vmem:[#allocation9 + $0x1fe8] ss:$48 sps:$4 sm:$0xff]  }
 0x8c1   :  { %16030 = vmatprep.subr.bf16.mxu1 %v22016_v46  ;;  %v22091_v46 = vld [vmem:[#allocation9 + $0x2044] ss:$48 sps:$4 sm:$0xff]  }
 0x8c3   :  { %15949 = vmatpush1.bf16.msra.mxu0 %v22011_v41  ;;  %v22094_v41 = vld [vmem:[#allocation9 + $0x204c] ss:$48 sps:$4 sm:$0xff]  }
 0x8c4   :  { %16031 = vmatpush1.bf16.msra.mxu1 %v22014_v1  ;;  %15950 = vmatprep.subr.bf16.mxu0 %v22019_v18  ;;  %v22089_v1 = vld [vmem:[#allocation9 + $0x2040] ss:$48 sps:$4 sm:$0xff]   ;;  %v22092_v18 = vld [vmem:[#allocation9 + $0x2048] ss:$48 sps:$4 sm:$0xff]  }
 0x8c5   :  { %16032 = vmatprep.subr.bf16.mxu1 %v22022_v47  ;;  %v22097_v47 = vld [vmem:[#allocation9 + $0x20a4] ss:$48 sps:$4 sm:$0xff]  }
 0x8c7   :  { %15951 = vmatpush1.bf16.msra.mxu0 %v22017_v42  ;;  %v22100_v42 = vld [vmem:[#allocation9 + $0x20ac] ss:$48 sps:$4 sm:$0xff]  }
 0x8c8   :  { %16033 = vmatpush1.bf16.msra.mxu1 %v22020_v43  ;;  %15952 = vmatprep.subr.bf16.mxu0 %v22025_v44  ;;  %v22095_v43 = vld [vmem:[#allocation9 + $0x20a0] ss:$48 sps:$4 sm:$0xff]   ;;  %v22098_v44 = vld [vmem:[#allocation9 + $0x20a8] ss:$48 sps:$4 sm:$0xff]  }
 0x8c9   :  { %16034 = vmatprep.subr.bf16.mxu1 %v22028_v49  ;;  %v22103_v49 = vld [vmem:[#allocation9 + $0x2104] ss:$48 sps:$4 sm:$0xff]  }
 0x8cb   :  { %15953 = vmatpush1.bf16.msra.mxu0 %v22023_v37  ;;  %v22106_v37 = vld [vmem:[#allocation9 + $0x210c] ss:$48 sps:$4 sm:$0xff]  }
 0x8cc   :  { %16035 = vmatpush1.bf16.msra.mxu1 %v22026_v51  ;;  %15954 = vmatprep.subr.bf16.mxu0 %v22031_v53  ;;  %v22101_v51 = vld [vmem:[#allocation9 + $0x2100] ss:$48 sps:$4 sm:$0xff]   ;;  %v22104_v53 = vld [vmem:[#allocation9 + $0x2108] ss:$48 sps:$4 sm:$0xff]  }
 0x8cd   :  { %16036 = vmatprep.subr.bf16.mxu1 %v22034_v54  ;;  %v22109_v54 = vld [vmem:[#allocation9 + $0x2164] ss:$48 sps:$4 sm:$0xff]  }
 0x8cf   :  { %15955 = vmatpush1.bf16.msra.mxu0 %v22029_v56  ;;  %v22112_v56 = vld [vmem:[#allocation9 + $0x216c] ss:$48 sps:$4 sm:$0xff]  }
 0x8d0   :  { %16037 = vmatpush1.bf16.msra.mxu1 %v22032_v57  ;;  %15956 = vmatprep.subr.bf16.mxu0 %v22037_v58  ;;  %v22107_v57 = vld [vmem:[#allocation9 + $0x2160] ss:$48 sps:$4 sm:$0xff]   ;;  %v22110_v58 = vld [vmem:[#allocation9 + $0x2168] ss:$48 sps:$4 sm:$0xff]  }
 0x8d1   :  { %16038 = vmatprep.subr.bf16.mxu1 %v22040_v36  ;;  %v22115_v36 = vld [vmem:[#allocation9 + $0x21c4] ss:$48 sps:$4 sm:$0xff]  }
 0x8d3   :  { %15957 = vmatpush1.bf16.msra.mxu0 %v22035_v39  ;;  %v22118_v39 = vld [vmem:[#allocation9 + $0x21cc] ss:$48 sps:$4 sm:$0xff]  }
 0x8d4   :  { %16039 = vmatpush1.bf16.msra.mxu1 %v22038_v13  ;;  %15958 = vmatprep.subr.bf16.mxu0 %v22043_v38  ;;  %v22113_v13 = vld [vmem:[#allocation9 + $0x21c0] ss:$48 sps:$4 sm:$0xff]   ;;  %v22116_v38 = vld [vmem:[#allocation9 + $0x21c8] ss:$48 sps:$4 sm:$0xff]  }
 0x8d5   :  { %16040 = vmatprep.subr.bf16.mxu1 %v22046_v59  ;;  %v22121_v59 = vld [vmem:[#allocation9 + $0x2224] ss:$48 sps:$4 sm:$0xff]  }
 0x8d7   :  { %15959 = vmatpush1.bf16.msra.mxu0 %v22041_v61  ;;  %v22124_v61 = vld [vmem:[#allocation9 + $0x222c] ss:$48 sps:$4 sm:$0xff]  }
 0x8d8   :  { %16041 = vmatpush1.bf16.msra.mxu1 %v22044_v55  ;;  %15960 = vmatprep.subr.bf16.mxu0 %v22049_v45  ;;  %v22119_v55 = vld [vmem:[#allocation9 + $0x2220] ss:$48 sps:$4 sm:$0xff]   ;;  %v22122_v45 = vld [vmem:[#allocation9 + $0x2228] ss:$48 sps:$4 sm:$0xff]  }
 0x8d9   :  { %16042 = vmatprep.subr.bf16.mxu1 %v22052_v12  ;;  %v22127_v12 = vld [vmem:[#allocation9 + $0x2284] ss:$48 sps:$4 sm:$0xff]  }
 0x8db   :  { %15961 = vmatpush1.bf16.msra.mxu0 %v22047_v3  ;;  %v22130_v3 = vld [vmem:[#allocation9 + $0x228c] ss:$48 sps:$4 sm:$0xff]  }
 0x8dc   :  { %16043 = vmatpush1.bf16.msra.mxu1 %v22050_v0  ;;  %15971 = vmatprep.subr.bf16.mxu0 %v22055_v8  ;;  %v22128_v0 = vld [vmem:[#allocation9 + $0x2288] ss:$48 sps:$4 sm:$0xff]   ;;  %v22133_v8 = vld [vmem:[#allocation9 + $0x22e4] ss:$48 sps:$4 sm:$0xff]  }
 0x8dd   :  { %16053 = vmatprep.subr.bf16.mxu1 %v22058_v2  ;;  %v22136_v2 = vld [vmem:[#allocation9 + $0x22ec] ss:$48 sps:$4 sm:$0xff]  }
 0x8de   :  { %15963 = vmatmul.mubr.bf16.vlgmr.msra.gmra.mrb[36].mxu0 %v23430_v60 }
 0x8df   :  { %15972 = vmatpush1.bf16.msra.mxu0 %v22053_v6  ;;  %16045 = vmatmul.mubr.bf16.vlgmr.msra.gmra.mrb[36].mxu1 %v23430_v60  ;;  %v22134_v6 = vld [vmem:[#allocation9 + $0x22e8] ss:$48 sps:$4 sm:$0xff]  }
 0x8e0   :  { %16054 = vmatpush1.bf16.msra.mxu1 %v22056_v7  ;;  %15973 = vmatprep.subr.bf16.mxu0 %v22061_v11  ;;  %v22139_v7 = vld [vmem:[#allocation9 + $0x2344] ss:$48 sps:$4 sm:$0xff]   ;;  %v22142_v11 = vld [vmem:[#allocation9 + $0x234c] ss:$48 sps:$4 sm:$0xff]  }
 0x8e1   :  { %16055 = vmatprep.subr.bf16.mxu1 %v22064_v50  ;;  %16003 = vmatprep.mubr.bf16.mxu0 %v23432_v14  ;;  %v22137_v50 = vld [vmem:[#allocation9 + $0x2340] ss:$48 sps:$4 sm:$0xff]  }
 0x8e2   :  { %16085 = vmatprep.mubr.bf16.mxu1 %v23432_v14 }
 0x8e3   :  { %15974 = vmatpush1.bf16.msra.mxu0 %v22059_v5  ;;  %v22140_v5 = vld [vmem:[#allocation9 + $0x2348] ss:$48 sps:$4 sm:$0xff]  }
 0x8e4   :  { %16056 = vmatpush1.bf16.msra.mxu1 %v22062_v17  ;;  %15975 = vmatprep.subr.bf16.mxu0 %v22067_v28  ;;  %v22145_v17 = vld [vmem:[#allocation9 + $0x23a4] ss:$48 sps:$4 sm:$0xff]   ;;  %v22148_v28 = vld [vmem:[#allocation9 + $0x23ac] ss:$48 sps:$4 sm:$0xff]  }
 0x8e5   :  { %16057 = vmatprep.subr.bf16.mxu1 %v22070_v24  ;;  %v22143_v24 = vld [vmem:[#allocation9 + $0x23a0] ss:$48 sps:$4 sm:$0xff]  }
 0x8e7   :  { %15976 = vmatpush1.bf16.msra.mxu0 %v22065_v25  ;;  %v141_v25 = vld [vmem:[#allocation3 + $0x50] sm:$0xff] }
 0x8e8   :  { %16058 = vmatpush1.bf16.msra.mxu1 %v22068_v9  ;;  %15977 = vmatprep.subr.bf16.mxu0 %v22073_v27  ;;  %v22146_v9 = vld [vmem:[#allocation9 + $0x23a8] ss:$48 sps:$4 sm:$0xff]   ;;  %v22151_v27 = vld [vmem:[#allocation9 + $0x1814] ss:$48 sps:$4 sm:$0xff]  }
 0x8e9   :  { %16059 = vmatprep.subr.bf16.mxu1 %v22076_v15  ;;  %v22154_v15 = vld [vmem:[#allocation9 + $0x181c] ss:$48 sps:$4 sm:$0xff]  }
 0x8eb   :  { %15978 = vmatpush1.bf16.msra.mxu0 %v22071_v29  ;;  %v23438_v29 = vpack.c.bf16 %v141_v25, %v141_v25  ;;  %v22202_v25 = vld [vmem:[#allocation9 + $0x1b1c] ss:$48 sps:$4 sm:$0xff]  }
 0x8ec   :  { %16060 = vmatpush1.bf16.msra.mxu1 %v22074_v30  ;;  %15979 = vmatprep.subr.bf16.mxu0 %v22079_v31  ;;  %v22149_v30 = vld [vmem:[#allocation9 + $0x1810] ss:$48 sps:$4 sm:$0xff]   ;;  %v22152_v31 = vld [vmem:[#allocation9 + $0x1818] ss:$48 sps:$4 sm:$0xff]  }
 0x8ed   :  { %16061 = vmatprep.subr.bf16.mxu1 %v22082_v32  ;;  %v22157_v32 = vld [vmem:[#allocation9 + $0x1874] ss:$48 sps:$4 sm:$0xff]  }
 0x8ef   :  { %15980 = vmatpush1.bf16.msra.mxu0 %v22077_v34  ;;  %v22160_v34 = vld [vmem:[#allocation9 + $0x187c] ss:$48 sps:$4 sm:$0xff]  }
 0x8f0   :  { %16062 = vmatpush1.bf16.msra.mxu1 %v22080_v35  ;;  %15981 = vmatprep.subr.bf16.mxu0 %v22085_v33  ;;  %v22155_v35 = vld [vmem:[#allocation9 + $0x1870] ss:$48 sps:$4 sm:$0xff]   ;;  %v22158_v33 = vld [vmem:[#allocation9 + $0x1878] ss:$48 sps:$4 sm:$0xff]  }
 0x8f1   :  { %16063 = vmatprep.subr.bf16.mxu1 %v22088_v63  ;;  %v22163_v63 = vld [vmem:[#allocation9 + $0x18d4] ss:$48 sps:$4 sm:$0xff]  }
 0x8f3   :  { %15982 = vmatpush1.bf16.msra.mxu0 %v22083_v10  ;;  %v22166_v10 = vld [vmem:[#allocation9 + $0x18dc] ss:$48 sps:$4 sm:$0xff]  }
 0x8f4   :  { %16064 = vmatpush1.bf16.msra.mxu1 %v22086_v40  ;;  %15983 = vmatprep.subr.bf16.mxu0 %v22091_v46  ;;  %v22161_v40 = vld [vmem:[#allocation9 + $0x18d0] ss:$48 sps:$4 sm:$0xff]   ;;  %v22164_v46 = vld [vmem:[#allocation9 + $0x18d8] ss:$48 sps:$4 sm:$0xff]  }
 0x8f5   :  { %16065 = vmatprep.subr.bf16.mxu1 %v22094_v41  ;;  %v22169_v41 = vld [vmem:[#allocation9 + $0x1934] ss:$48 sps:$4 sm:$0xff]  }
 0x8f7   :  { %15984 = vmatpush1.bf16.msra.mxu0 %v22089_v1  ;;  %v22172_v1 = vld [vmem:[#allocation9 + $0x193c] ss:$48 sps:$4 sm:$0xff]  }
 0x8f8   :  { %16066 = vmatpush1.bf16.msra.mxu1 %v22092_v18  ;;  %15985 = vmatprep.subr.bf16.mxu0 %v22097_v47  ;;  %v22167_v18 = vld [vmem:[#allocation9 + $0x1930] ss:$48 sps:$4 sm:$0xff]  }
 0x8f9   :  { %16067 = vmatprep.subr.bf16.mxu1 %v22100_v42  ;;  %v23444_v47 = vld [vmem:[#allocation11 + $0x40] sm:$0xff]  ;;  %v22170_v42 = vld [vmem:[#allocation9 + $0x1938] ss:$48 sps:$4 sm:$0xff]  }
 0x8fb   :  { %15986 = vmatpush1.bf16.msra.mxu0 %v22095_v43  ;;  %v22175_v43 = vld [vmem:[#allocation9 + $0x1994] ss:$48 sps:$4 sm:$0xff]  }
 0x8fc   :  { %16068 = vmatpush1.bf16.msra.mxu1 %v22098_v44  ;;  %15987 = vmatprep.subr.bf16.mxu0 %v22103_v49  ;;  %v22178_v44 = vld [vmem:[#allocation9 + $0x199c] ss:$48 sps:$4 sm:$0xff]   ;;  %v11028_v49 = vrot.slane %v23444_v47, %v23158_v20 }
 0x8fd   :  { %16069 = vmatprep.subr.bf16.mxu1 %v22106_v37  ;;  %v22173_v37 = vld [vmem:[#allocation9 + $0x1990] ss:$48 sps:$4 sm:$0xff]  }
 0x8ff   :  { %15988 = vmatpush1.bf16.msra.mxu0 %v22101_v51  ;;  %v11032_v51 = vrot.slane %v23444_v47, %v23166_v48 }
 0x900   :  { %16070 = vmatpush1.bf16.msra.mxu1 %v22104_v53  ;;  %15989 = vmatprep.subr.bf16.mxu0 %v22109_v54  ;;  %v22176_v53 = vld [vmem:[#allocation9 + $0x1998] ss:$48 sps:$4 sm:$0xff]   ;;  %v22181_v54 = vld [vmem:[#allocation9 + $0x19f4] ss:$48 sps:$4 sm:$0xff]  }
 0x901   :  { %16071 = vmatprep.subr.bf16.mxu1 %v22112_v56  ;;  %v22184_v56 = vld [vmem:[#allocation9 + $0x19fc] ss:$48 sps:$4 sm:$0xff]  }
 0x903   :  { %15990 = vmatpush1.bf16.msra.mxu0 %v22107_v57  ;;  %v11088_v57 = vrot.slane %v11028_v49, %v23158_v20  ;;  %v22232_v49 = vld [vmem:[#allocation9 + $0x1cfc] ss:$48 sps:$4 sm:$0xff]  }
 0x904   :  { %16072 = vmatpush1.bf16.msra.mxu1 %v22110_v58  ;;  %15991 = vmatprep.subr.bf16.mxu0 %v22115_v36  ;;  %v11092_v58 = vrot.slane %v11032_v51, %v23158_v20  ;;  %v22179_v36 = vld [vmem:[#allocation9 + $0x19f0] ss:$48 sps:$4 sm:$0xff]   ;;  %v22230_v51 = vld [vmem:[#allocation9 + $0x1cf8] ss:$48 sps:$4 sm:$0xff]  }
 0x905   :  { %16073 = vmatprep.subr.bf16.mxu1 %v22118_v39  ;;  %v22182_v39 = vld [vmem:[#allocation9 + $0x19f8] ss:$48 sps:$4 sm:$0xff]  }
 0x907   :  { %15992 = vmatpush1.bf16.msra.mxu0 %v22113_v13  ;;  %v22187_v13 = vld [vmem:[#allocation9 + $0x1a54] ss:$48 sps:$4 sm:$0xff]  }
 0x908   :  { %16074 = vmatpush1.bf16.msra.mxu1 %v22116_v38  ;;  %15993 = vmatprep.subr.bf16.mxu0 %v22121_v59  ;;  %v22190_v59 = vld [vmem:[#allocation9 + $0x1a5c] ss:$48 sps:$4 sm:$0xff]  }
 0x909   :  { %16075 = vmatprep.subr.bf16.mxu1 %v22124_v61 }
 0x90b   :  { %15994 = vmatpush1.bf16.msra.mxu0 %v22119_v55 }
 0x90c   :  { %16076 = vmatpush1.bf16.msra.mxu1 %v22122_v45  ;;  %15995 = vmatprep.subr.bf16.mxu0 %v22127_v12 }
 0x90d   :  { %16077 = vmatprep.subr.bf16.mxu1 %v22130_v3 }
 0x90f   :  { %15996 = vmatpush1.bf16.msra.mxu0 %v22125_v4 }
 0x910   :  { %16078 = vmatpush1.bf16.msra.mxu1 %v22128_v0  ;;  %15997 = vmatprep.subr.bf16.mxu0 %v22133_v8  ;;  %v22185_v0 = vld [vmem:[#allocation9 + $0x1a50] ss:$48 sps:$4 sm:$0xff]  }
 0x911   :  { %16079 = vmatprep.subr.bf16.mxu1 %v22136_v2 }
 0x913   :  { %15998 = vmatpush1.bf16.msra.mxu0 %v22131_v52 }
 0x914   :  { %16080 = vmatpush1.bf16.msra.mxu1 %v22134_v6  ;;  %15999 = vmatprep.subr.bf16.mxu0 %v22139_v7  ;;  %v22188_v6 = vld [vmem:[#allocation9 + $0x1a58] ss:$48 sps:$4 sm:$0xff]   ;;  %v22193_v7 = vld [vmem:[#allocation9 + $0x1ab4] ss:$48 sps:$4 sm:$0xff]  }
 0x915   :  { %16081 = vmatprep.subr.bf16.mxu1 %v22142_v11 }
 0x917   :  { %16000 = vmatpush1.bf16.msra.mxu0 %v22137_v50 }
 0x918   :  { %16082 = vmatpush1.bf16.msra.mxu1 %v22140_v5  ;;  %16001 = vmatprep.subr.bf16.mxu0 %v22145_v17  ;;  %v22196_v5 = vld [vmem:[#allocation9 + $0x1abc] ss:$48 sps:$4 sm:$0xff]   ;;  %v22191_v17 = vld [vmem:[#allocation9 + $0x1ab0] ss:$48 sps:$4 sm:$0xff]  }
 0x919   :  { %16083 = vmatprep.subr.bf16.mxu1 %v22148_v28  ;;  %v22194_v28 = vld [vmem:[#allocation9 + $0x1ab8] ss:$48 sps:$4 sm:$0xff]  }
 0x91b   :  { %16002 = vmatpush1.bf16.msra.mxu0 %v22143_v24  ;;  %v22199_v24 = vld [vmem:[#allocation9 + $0x1b14] ss:$48 sps:$4 sm:$0xff]  }
 0x91c   :  { %16084 = vmatpush1.bf16.msra.mxu1 %v22146_v9  ;;  %16094 = vmatprep.subr.bf16.mxu0 %v22151_v27  ;;  %v22197_v9 = vld [vmem:[#allocation9 + $0x1b10] ss:$48 sps:$4 sm:$0xff]   ;;  %v22200_v27 = vld [vmem:[#allocation9 + $0x1b18] ss:$48 sps:$4 sm:$0xff]  }
 0x91d   :  { %16176 = vmatprep.subr.bf16.mxu1 %v22154_v15  ;;  %v22205_v15 = vld [vmem:[#allocation9 + $0x1b74] ss:$48 sps:$4 sm:$0xff]  }
 0x91e   :  { %16004 = vmatmul.mubr.bf16.vlgmr.msra.gmra.mrb[36].mxu0 %v23438_v29 }
 0x91f   :  { %16086 = vmatmul.mubr.bf16.vlgmr.msra.gmra.mrb[36].mxu1 %v23438_v29  ;;  %16095 = vmatpush1.bf16.msra.mxu0 %v22149_v30  ;;  %v22208_v30 = vld [vmem:[#allocation9 + $0x1b7c] ss:$48 sps:$4 sm:$0xff]  }
 0x920   :  { %16177 = vmatpush1.bf16.msra.mxu1 %v22152_v31  ;;  %16096 = vmatprep.subr.bf16.mxu0 %v22157_v32  ;;  %v22203_v31 = vld [vmem:[#allocation9 + $0x1b70] ss:$48 sps:$4 sm:$0xff]   ;;  %v22206_v32 = vld [vmem:[#allocation9 + $0x1b78] ss:$48 sps:$4 sm:$0xff]  }
 0x921   :  { %16178 = vmatprep.subr.bf16.mxu1 %v22160_v34  ;;  %16126 = vmatprep.mubr.bf16.mxu0 %v23424_v62  ;;  %v22211_v34 = vld [vmem:[#allocation9 + $0x1bd4] ss:$48 sps:$4 sm:$0xff]  }
 0x922   :  { %16208 = vmatprep.mubr.bf16.mxu1 %v23424_v62 }
 0x923   :  { %16097 = vmatpush1.bf16.msra.mxu0 %v22155_v35  ;;  %v22214_v35 = vld [vmem:[#allocation9 + $0x1bdc] ss:$48 sps:$4 sm:$0xff]  }
 0x924   :  { %16179 = vmatpush1.bf16.msra.mxu1 %v22158_v33  ;;  %16098 = vmatprep.subr.bf16.mxu0 %v22163_v63  ;;  %v22209_v33 = vld [vmem:[#allocation9 + $0x1bd0] ss:$48 sps:$4 sm:$0xff]   ;;  %v22212_v63 = vld [vmem:[#allocation9 + $0x1bd8] ss:$48 sps:$4 sm:$0xff]  }
 0x925   :  { %16180 = vmatprep.subr.bf16.mxu1 %v22166_v10  ;;  %v22217_v10 = vld [vmem:[#allocation9 + $0x1c34] ss:$48 sps:$4 sm:$0xff]  }
 0x927   :  { %16099 = vmatpush1.bf16.msra.mxu0 %v22161_v40  ;;  %v22220_v40 = vld [vmem:[#allocation9 + $0x1c3c] ss:$48 sps:$4 sm:$0xff]  }
 0x928   :  { %16181 = vmatpush1.bf16.msra.mxu1 %v22164_v46  ;;  %16100 = vmatprep.subr.bf16.mxu0 %v22169_v41  ;;  %v22215_v46 = vld [vmem:[#allocation9 + $0x1c30] ss:$48 sps:$4 sm:$0xff]   ;;  %v22218_v41 = vld [vmem:[#allocation9 + $0x1c38] ss:$48 sps:$4 sm:$0xff]  }
 0x929   :  { %16182 = vmatprep.subr.bf16.mxu1 %v22172_v1  ;;  %v22223_v1 = vld [vmem:[#allocation9 + $0x1c94] ss:$48 sps:$4 sm:$0xff]  }
 0x92b   :  { %16101 = vmatpush1.bf16.msra.mxu0 %v22167_v18  ;;  %v22226_v18 = vld [vmem:[#allocation9 + $0x1c9c] ss:$48 sps:$4 sm:$0xff]  }
 0x92c   :  { %16183 = vmatpush1.bf16.msra.mxu1 %v22170_v42  ;;  %16102 = vmatprep.subr.bf16.mxu0 %v22175_v43  ;;  %v22221_v42 = vld [vmem:[#allocation9 + $0x1c90] ss:$48 sps:$4 sm:$0xff]   ;;  %v22224_v43 = vld [vmem:[#allocation9 + $0x1c98] ss:$48 sps:$4 sm:$0xff]  }
 0x92d   :  { %16184 = vmatprep.subr.bf16.mxu1 %v22178_v44  ;;  %v22229_v44 = vld [vmem:[#allocation9 + $0x1cf4] ss:$48 sps:$4 sm:$0xff]  }
 0x92f   :  { %16103 = vmatpush1.bf16.msra.mxu0 %v22173_v37  ;;  %v22227_v37 = vld [vmem:[#allocation9 + $0x1cf0] ss:$48 sps:$4 sm:$0xff]  }
 0x930   :  { %16185 = vmatpush1.bf16.msra.mxu1 %v22176_v53  ;;  %16104 = vmatprep.subr.bf16.mxu0 %v22181_v54  ;;  %v22235_v53 = vld [vmem:[#allocation9 + $0x1d54] ss:$48 sps:$4 sm:$0xff]   ;;  %v22238_v54 = vld [vmem:[#allocation9 + $0x1d5c] ss:$48 sps:$4 sm:$0xff]  }
 0x931   :  { %v13383_v38 = vpop.f32.mrb[44].mxu0  ;;  %16186 = vmatprep.subr.bf16.mxu1 %v22184_v56  ;;  %v22233_v56 = vld [vmem:[#allocation9 + $0x1d50] ss:$48 sps:$4 sm:$0xff]  }
 0x932   :  { %v13384_v61 = vadd.f32 %v13383_v38, %v11088_v57  ;;  %v13424_v55 = vpop.f32.mrb[44].mxu1  ;;  %v13385_v45 = vpop.f32.mrb[45].mxu0  ;;  %v22236_v57 = vld [vmem:[#allocation9 + $0x1d58] ss:$48 sps:$4 sm:$0xff]   ;;  %v22247_v38 = vld [vmem:[#allocation9 + $0x1e14] ss:$48 sps:$4 sm:$0xff]  }
 0x933   :  { %v13386_v12 = vadd.f32 %v13385_v45, %v11092_v58  ;;  %v13426_v3 = vpop.f32.mrb[45].mxu1  ;;  %v13387_v4 = vpop.f32.mrb[46].mxu0  ;;  %16105 = vmatpush1.bf16.msra.mxu0 %v22179_v36  ;;  %v22241_v58 = vld [vmem:[#allocation9 + $0x1db4] ss:$48 sps:$4 sm:$0xff]   ;;  %v22244_v36 = vld [vmem:[#allocation9 + $0x1dbc] ss:$48 sps:$4 sm:$0xff]  }
 0x934   :  { %v23452_v8 = vadd.f32 %v13424_v55, %v13384_v61  ;;  %v13428_v2 = vpop.f32.mrb[46].mxu1  ;;  %16187 = vmatpush1.bf16.msra.mxu1 %v22182_v39  ;;  %v13388_v52 = vpop.f32.mrb[47].mxu0  ;;  %16106 = vmatprep.subr.bf16.mxu0 %v22187_v13  ;;  %v22239_v39 = vld [vmem:[#allocation9 + $0x1db0] ss:$48 sps:$4 sm:$0xff]   ;;  %v22242_v13 = vld [vmem:[#allocation9 + $0x1db8] ss:$48 sps:$4 sm:$0xff]  }
 0x935   :  { %v23454_v11 = vadd.f32 %v13426_v3, %v13386_v12  ;;  %v13429_v50 = vpop.f32.mrb[47].mxu1  ;;  %16188 = vmatprep.subr.bf16.mxu1 %v22190_v59  ;;  %v22250_v59 = vld [vmem:[#allocation9 + $0x1e1c] ss:$48 sps:$4 sm:$0xff]   ;;  %v22245_v61 = vld [vmem:[#allocation9 + $0x1e10] ss:$48 sps:$4 sm:$0xff]  }
 0x936   :  { %v22248_v55 = vld [vmem:[#allocation9 + $0x1e18] ss:$48 sps:$4 sm:$0xff]   ;;  %v22253_v45 = vld [vmem:[#allocation9 + $0x1e74] ss:$48 sps:$4 sm:$0xff]   ;;  %v22256_v12 = vld [vmem:[#allocation9 + $0x1e7c] ss:$48 sps:$4 sm:$0xff]  }
 0x937   :  { %16107 = vmatpush1.bf16.msra.mxu0 %v22185_v0  ;;  %v22251_v3 = vld [vmem:[#allocation9 + $0x1e70] ss:$48 sps:$4 sm:$0xff]   ;;  %v22254_v4 = vld [vmem:[#allocation9 + $0x1e78] ss:$48 sps:$4 sm:$0xff]   ;;  %v22259_v0 = vld [vmem:[#allocation9 + $0x1ed4] ss:$48 sps:$4 sm:$0xff]  }
 0x938   :  { %16189 = vmatpush1.bf16.msra.mxu1 %v22188_v6  ;;  %16108 = vmatprep.subr.bf16.mxu0 %v22193_v7  ;;  %v22262_v2 = vld [vmem:[#allocation9 + $0x1edc] ss:$48 sps:$4 sm:$0xff]   ;;  %v22257_v52 = vld [vmem:[#allocation9 + $0x1ed0] ss:$48 sps:$4 sm:$0xff]   ;;  %v22260_v6 = vld [vmem:[#allocation9 + $0x1ed8] ss:$48 sps:$4 sm:$0xff]  }
 0x939   :  { %16190 = vmatprep.subr.bf16.mxu1 %v22196_v5  ;;  %v22265_v7 = vld [vmem:[#allocation9 + $0x1f34] ss:$48 sps:$4 sm:$0xff]   ;;  %v22268_v50 = vld [vmem:[#allocation9 + $0x1f3c] ss:$48 sps:$4 sm:$0xff]   ;;  %v22263_v5 = vld [vmem:[#allocation9 + $0x1f30] ss:$48 sps:$4 sm:$0xff]  }
 0x93b   :  { %16109 = vmatpush1.bf16.msra.mxu0 %v22191_v17  ;;  %v22266_v17 = vld [vmem:[#allocation9 + $0x1f38] ss:$48 sps:$4 sm:$0xff]  }
 0x93c   :  { %16191 = vmatpush1.bf16.msra.mxu1 %v22194_v28  ;;  %16110 = vmatprep.subr.bf16.mxu0 %v22199_v24  ;;  %v22271_v28 = vld [vmem:[#allocation9 + $0x1f94] ss:$48 sps:$4 sm:$0xff]   ;;  %v22274_v24 = vld [vmem:[#allocation9 + $0x1f9c] ss:$48 sps:$4 sm:$0xff]  }
 0x93d   :  { %16192 = vmatprep.subr.bf16.mxu1 %v22202_v25  ;;  %v11036_v25 = vrot.slane %v23444_v47, %v23162_v22 }
 0x93f   :  { %16111 = vmatpush1.bf16.msra.mxu0 %v22197_v9  ;;  %v22269_v9 = vld [vmem:[#allocation9 + $0x1f90] ss:$48 sps:$4 sm:$0xff]  }
 0x940   :  { %16193 = vmatpush1.bf16.msra.mxu1 %v22200_v27  ;;  %16112 = vmatprep.subr.bf16.mxu0 %v22205_v15  ;;  %v11040_v27 = vrot.slane %v23444_v47, %v23170_v26  ;;  %v22272_v15 = vld [vmem:[#allocation9 + $0x1f98] ss:$48 sps:$4 sm:$0xff]  }
 0x941   :  { %16194 = vmatprep.subr.bf16.mxu1 %v22208_v30  ;;  %v22277_v30 = vld [vmem:[#allocation9 + $0x1ff4] ss:$48 sps:$4 sm:$0xff]  }
 0x943   :  { %16113 = vmatpush1.bf16.msra.mxu0 %v22203_v31  ;;  %v22280_v31 = vld [vmem:[#allocation9 + $0x1ffc] ss:$48 sps:$4 sm:$0xff]  }
 0x944   :  { %16195 = vmatpush1.bf16.msra.mxu1 %v22206_v32  ;;  %16114 = vmatprep.subr.bf16.mxu0 %v22211_v34  ;;  %v11096_v32 = vrot.slane %v11036_v25, %v23158_v20  ;;  %v11100_v34 = vrot.slane %v11040_v27, %v23158_v20  ;;  %v22325_v25 = vld [vmem:[#allocation9 + $0x22f4] ss:$48 sps:$4 sm:$0xff]   ;;  %v22323_v27 = vld [vmem:[#allocation9 + $0x22f0] ss:$48 sps:$4 sm:$0xff]  }
 0x945   :  { %16196 = vmatprep.subr.bf16.mxu1 %v22214_v35  ;;  %v22275_v35 = vld [vmem:[#allocation9 + $0x1ff0] ss:$48 sps:$4 sm:$0xff]  }
 0x947   :  { %16115 = vmatpush1.bf16.msra.mxu0 %v22209_v33  ;;  %v22278_v33 = vld [vmem:[#allocation9 + $0x1ff8] ss:$48 sps:$4 sm:$0xff]  }
 0x948   :  { %16197 = vmatpush1.bf16.msra.mxu1 %v22212_v63  ;;  %16116 = vmatprep.subr.bf16.mxu0 %v22217_v10  ;;  %v22283_v63 = vld [vmem:[#allocation9 + $0x2054] ss:$48 sps:$4 sm:$0xff]  }
 0x949   :  { %16198 = vmatprep.subr.bf16.mxu1 %v22220_v40  ;;  %v22286_v40 = vld [vmem:[#allocation9 + $0x205c] ss:$48 sps:$4 sm:$0xff]  }
 0x94b   :  { %16117 = vmatpush1.bf16.msra.mxu0 %v22215_v46 }
 0x94c   :  { %16199 = vmatpush1.bf16.msra.mxu1 %v22218_v41  ;;  %16118 = vmatprep.subr.bf16.mxu0 %v22223_v1 }
 0x94d   :  { %16200 = vmatprep.subr.bf16.mxu1 %v22226_v18 }
 0x94f   :  { %16119 = vmatpush1.bf16.msra.mxu0 %v22221_v42 }
 0x950   :  { %16201 = vmatpush1.bf16.msra.mxu1 %v22224_v43  ;;  %16120 = vmatprep.subr.bf16.mxu0 %v22229_v44  ;;  %v22281_v43 = vld [vmem:[#allocation9 + $0x2050] ss:$48 sps:$4 sm:$0xff]  }
 0x951   :  { %16202 = vmatprep.subr.bf16.mxu1 %v22232_v49 }
 0x953   :  { %16121 = vmatpush1.bf16.msra.mxu0 %v22227_v37 }
 0x954   :  { %16203 = vmatpush1.bf16.msra.mxu1 %v22230_v51  ;;  %16122 = vmatprep.subr.bf16.mxu0 %v22235_v53  ;;  %v22284_v51 = vld [vmem:[#allocation9 + $0x2058] ss:$48 sps:$4 sm:$0xff]   ;;  %v22289_v53 = vld [vmem:[#allocation9 + $0x20b4] ss:$48 sps:$4 sm:$0xff]  }
 0x955   :  { %16204 = vmatprep.subr.bf16.mxu1 %v22238_v54 }
 0x957   :  { %16123 = vmatpush1.bf16.msra.mxu0 %v22233_v56 }
 0x958   :  { %16205 = vmatpush1.bf16.msra.mxu1 %v22236_v57  ;;  %16124 = vmatprep.subr.bf16.mxu0 %v22241_v58  ;;  %v22292_v57 = vld [vmem:[#allocation9 + $0x20bc] ss:$48 sps:$4 sm:$0xff]   ;;  %v22287_v58 = vld [vmem:[#allocation9 + $0x20b0] ss:$48 sps:$4 sm:$0xff]  }
 0x959   :  { %16206 = vmatprep.subr.bf16.mxu1 %v22244_v36  ;;  %v22290_v36 = vld [vmem:[#allocation9 + $0x20b8] ss:$48 sps:$4 sm:$0xff]  }
 0x95b   :  { %16125 = vmatpush1.bf16.msra.mxu0 %v22239_v39  ;;  %v22295_v39 = vld [vmem:[#allocation9 + $0x2114] ss:$48 sps:$4 sm:$0xff]  }
 0x95c   :  { %16207 = vmatpush1.bf16.msra.mxu1 %v22242_v13  ;;  %16135 = vmatprep.subr.bf16.mxu0 %v22247_v38  ;;  %v22298_v13 = vld [vmem:[#allocation9 + $0x211c] ss:$48 sps:$4 sm:$0xff]   ;;  %v22293_v38 = vld [vmem:[#allocation9 + $0x2110] ss:$48 sps:$4 sm:$0xff]  }
 0x95d   :  { %16217 = vmatprep.subr.bf16.mxu1 %v22250_v59  ;;  %v22296_v59 = vld [vmem:[#allocation9 + $0x2118] ss:$48 sps:$4 sm:$0xff]  }
 0x95e   :  { %16127 = vmatmul.mubr.bf16.vlgmr.msra.gmra.mrb[40].mxu0 %v23430_v60 }
 0x95f   :  { %16136 = vmatpush1.bf16.msra.mxu0 %v22245_v61  ;;  %16209 = vmatmul.mubr.bf16.vlgmr.msra.gmra.mrb[40].mxu1 %v23430_v60  ;;  %v22301_v61 = vld [vmem:[#allocation9 + $0x2174] ss:$48 sps:$4 sm:$0xff]  }
 0x960   :  { %16218 = vmatpush1.bf16.msra.mxu1 %v22248_v55  ;;  %16137 = vmatprep.subr.bf16.mxu0 %v22253_v45  ;;  %v22304_v55 = vld [vmem:[#allocation9 + $0x217c] ss:$48 sps:$4 sm:$0xff]   ;;  %v22299_v45 = vld [vmem:[#allocation9 + $0x2170] ss:$48 sps:$4 sm:$0xff]  }
 0x961   :  { %16219 = vmatprep.subr.bf16.mxu1 %v22256_v12  ;;  %16167 = vmatprep.mubr.bf16.mxu0 %v23432_v14  ;;  %v22302_v12 = vld [vmem:[#allocation9 + $0x2178] ss:$48 sps:$4 sm:$0xff]  }
 0x962   :  { %16249 = vmatprep.mubr.bf16.mxu1 %v23432_v14 }
 0x963   :  { %16138 = vmatpush1.bf16.msra.mxu0 %v22251_v3  ;;  %v22307_v3 = vld [vmem:[#allocation9 + $0x21d4] ss:$48 sps:$4 sm:$0xff]  }
 0x964   :  { %16220 = vmatpush1.bf16.msra.mxu1 %v22254_v4  ;;  %16139 = vmatprep.subr.bf16.mxu0 %v22259_v0  ;;  %v22310_v4 = vld [vmem:[#allocation9 + $0x21dc] ss:$48 sps:$4 sm:$0xff]   ;;  %v22305_v0 = vld [vmem:[#allocation9 + $0x21d0] ss:$48 sps:$4 sm:$0xff]  }
 0x965   :  { %16221 = vmatprep.subr.bf16.mxu1 %v22262_v2  ;;  %v22308_v2 = vld [vmem:[#allocation9 + $0x21d8] ss:$48 sps:$4 sm:$0xff]  }
 0x967   :  { %16140 = vmatpush1.bf16.msra.mxu0 %v22257_v52  ;;  %v22313_v52 = vld [vmem:[#allocation9 + $0x2234] ss:$48 sps:$4 sm:$0xff]  }
 0x968   :  { %16222 = vmatpush1.bf16.msra.mxu1 %v22260_v6  ;;  %16141 = vmatprep.subr.bf16.mxu0 %v22265_v7  ;;  %v22316_v6 = vld [vmem:[#allocation9 + $0x223c] ss:$48 sps:$4 sm:$0xff]   ;;  %v22311_v7 = vld [vmem:[#allocation9 + $0x2230] ss:$48 sps:$4 sm:$0xff]  }
 0x969   :  { %16223 = vmatprep.subr.bf16.mxu1 %v22268_v50  ;;  %v22314_v50 = vld [vmem:[#allocation9 + $0x2238] ss:$48 sps:$4 sm:$0xff]  }
 0x96b   :  { %16142 = vmatpush1.bf16.msra.mxu0 %v22263_v5  ;;  %v22319_v5 = vld [vmem:[#allocation9 + $0x2294] ss:$48 sps:$4 sm:$0xff]  }
 0x96c   :  { %16224 = vmatpush1.bf16.msra.mxu1 %v22266_v17  ;;  %16143 = vmatprep.subr.bf16.mxu0 %v22271_v28  ;;  %v22322_v17 = vld [vmem:[#allocation9 + $0x229c] ss:$48 sps:$4 sm:$0xff]   ;;  %v22317_v28 = vld [vmem:[#allocation9 + $0x2290] ss:$48 sps:$4 sm:$0xff]  }
 0x96d   :  { %16225 = vmatprep.subr.bf16.mxu1 %v22274_v24  ;;  %v22320_v24 = vld [vmem:[#allocation9 + $0x2298] ss:$48 sps:$4 sm:$0xff]  }
 0x96f   :  { %16144 = vmatpush1.bf16.msra.mxu0 %v22269_v9  ;;  %v22328_v9 = vld [vmem:[#allocation9 + $0x22fc] ss:$48 sps:$4 sm:$0xff]  }
 0x970   :  { %16226 = vmatpush1.bf16.msra.mxu1 %v22272_v15  ;;  %16145 = vmatprep.subr.bf16.mxu0 %v22277_v30  ;;  %v22326_v15 = vld [vmem:[#allocation9 + $0x22f8] ss:$48 sps:$4 sm:$0xff]   ;;  %v22331_v30 = vld [vmem:[#allocation9 + $0x2354] ss:$48 sps:$4 sm:$0xff]  }
 0x971   :  { %v13465_v10 = vpop.f32.mrb[48].mxu0  ;;  %16227 = vmatprep.subr.bf16.mxu1 %v22280_v31  ;;  %v22334_v31 = vld [vmem:[#allocation9 + $0x235c] ss:$48 sps:$4 sm:$0xff]  }
 0x972   :  { %v13466_v47 = vadd.f32 %v13465_v10, %v11096_v32  ;;  %v13506_v46 = vpop.f32.mrb[48].mxu1  ;;  %v13467_v41 = vpop.f32.mrb[49].mxu0  ;;  %v22329_v32 = vld [vmem:[#allocation9 + $0x2350] ss:$48 sps:$4 sm:$0xff]   ;;  %v22338_v10 = vld [vmem:[#allocation9 + $0x23b8] ss:$48 sps:$4 sm:$0xff]  }
 0x973   :  { %v13468_v1 = vadd.f32 %v13467_v41, %v11100_v34  ;;  %v13508_v18 = vpop.f32.mrb[49].mxu1  ;;  %v13469_v42 = vpop.f32.mrb[50].mxu0  ;;  %16146 = vmatpush1.bf16.msra.mxu0 %v22275_v35  ;;  %v22332_v34 = vld [vmem:[#allocation9 + $0x2358] ss:$48 sps:$4 sm:$0xff]   ;;  %v22337_v35 = vld [vmem:[#allocation9 + $0x23b4] ss:$48 sps:$4 sm:$0xff]  }
 0x974   :  { %v23466_v44 = vadd.f32 %v13506_v46, %v13466_v47  ;;  %v13510_v49 = vpop.f32.mrb[50].mxu1  ;;  %16228 = vmatpush1.bf16.msra.mxu1 %v22278_v33  ;;  %v13470_v37 = vpop.f32.mrb[51].mxu0  ;;  %16147 = vmatprep.subr.bf16.mxu0 %v22283_v63  ;;  %v22340_v33 = vld [vmem:[#allocation9 + $0x23bc] ss:$48 sps:$4 sm:$0xff]   ;;  %v22335_v63 = vld [vmem:[#allocation9 + $0x23b0] ss:$48 sps:$4 sm:$0xff]  }
 0x975   :  { %v23468_v54 = vadd.f32 %v13508_v18, %v13468_v1  ;;  %v13511_v56 = vpop.f32.mrb[51].mxu1  ;;  %16229 = vmatprep.subr.bf16.mxu1 %v22286_v40  ;;  %v22343_v40 = vld [vmem:[#allocation9 + $0x1824] ss:$48 sps:$4 sm:$0xff]   ;;  %v22346_v47 = vld [vmem:[#allocation9 + $0x182c] ss:$48 sps:$4 sm:$0xff]  }
 0x976   :  { %v22341_v46 = vld [vmem:[#allocation9 + $0x1820] ss:$48 sps:$4 sm:$0xff]   ;;  %v22344_v41 = vld [vmem:[#allocation9 + $0x1828] ss:$48 sps:$4 sm:$0xff]   ;;  %v22349_v1 = vld [vmem:[#allocation9 + $0x1884] ss:$48 sps:$4 sm:$0xff]  }
 0x977   :  { %16148 = vmatpush1.bf16.msra.mxu0 %v22281_v43  ;;  %v22352_v18 = vld [vmem:[#allocation9 + $0x188c] ss:$48 sps:$4 sm:$0xff]   ;;  %v22347_v42 = vld [vmem:[#allocation9 + $0x1880] ss:$48 sps:$4 sm:$0xff]   ;;  %v22350_v43 = vld [vmem:[#allocation9 + $0x1888] ss:$48 sps:$4 sm:$0xff]  }
 0x978   :  { %16230 = vmatpush1.bf16.msra.mxu1 %v22284_v51  ;;  %16149 = vmatprep.subr.bf16.mxu0 %v22289_v53  ;;  %v22355_v49 = vld [vmem:[#allocation9 + $0x18e4] ss:$48 sps:$4 sm:$0xff]   ;;  %v22358_v37 = vld [vmem:[#allocation9 + $0x18ec] ss:$48 sps:$4 sm:$0xff]   ;;  %v22353_v51 = vld [vmem:[#allocation9 + $0x18e0] ss:$48 sps:$4 sm:$0xff]  }
 0x979   :  { %16231 = vmatprep.subr.bf16.mxu1 %v22292_v57  ;;  %v22356_v53 = vld [vmem:[#allocation9 + $0x18e8] ss:$48 sps:$4 sm:$0xff]   ;;  %v22361_v56 = vld [vmem:[#allocation9 + $0x1944] ss:$48 sps:$4 sm:$0xff]   ;;  %v22364_v57 = vld [vmem:[#allocation9 + $0x194c] ss:$48 sps:$4 sm:$0xff]  }
 0x97b   :  { %16150 = vmatpush1.bf16.msra.mxu0 %v22287_v58  ;;  %v22359_v58 = vld [vmem:[#allocation9 + $0x1940] ss:$48 sps:$4 sm:$0xff]  }
 0x97c   :  { %16232 = vmatpush1.bf16.msra.mxu1 %v22290_v36  ;;  %16151 = vmatprep.subr.bf16.mxu0 %v22295_v39  ;;  %v22362_v36 = vld [vmem:[#allocation9 + $0x1948] ss:$48 sps:$4 sm:$0xff]   ;;  %v22367_v39 = vld [vmem:[#allocation9 + $0x19a4] ss:$48 sps:$4 sm:$0xff]  }
 0x97d   :  { %16233 = vmatprep.subr.bf16.mxu1 %v22298_v13  ;;  %v22370_v13 = vld [vmem:[#allocation9 + $0x19ac] ss:$48 sps:$4 sm:$0xff]  }
 0x97f   :  { %16152 = vmatpush1.bf16.msra.mxu0 %v22293_v38  ;;  %v22365_v38 = vld [vmem:[#allocation9 + $0x19a0] ss:$48 sps:$4 sm:$0xff]  }
 0x980   :  { %16234 = vmatpush1.bf16.msra.mxu1 %v22296_v59  ;;  %16153 = vmatprep.subr.bf16.mxu0 %v22301_v61  ;;  %v22373_v59 = vld [vmem:[#allocation9 + $0x1a04] ss:$48 sps:$4 sm:$0xff]   ;;  %v22376_v61 = vld [vmem:[#allocation9 + $0x1a0c] ss:$48 sps:$4 sm:$0xff]  }
 0x981   :  { %16235 = vmatprep.subr.bf16.mxu1 %v22304_v55  ;;  %v22371_v55 = vld [vmem:[#allocation9 + $0x1a00] ss:$48 sps:$4 sm:$0xff]  }
 0x983   :  { %16154 = vmatpush1.bf16.msra.mxu0 %v22299_v45  ;;  %v22374_v45 = vld [vmem:[#allocation9 + $0x1a08] ss:$48 sps:$4 sm:$0xff]  }
 0x984   :  { %16236 = vmatpush1.bf16.msra.mxu1 %v22302_v12  ;;  %16155 = vmatprep.subr.bf16.mxu0 %v22307_v3  ;;  %v22379_v12 = vld [vmem:[#allocation9 + $0x1a64] ss:$48 sps:$4 sm:$0xff]   ;;  %v22382_v3 = vld [vmem:[#allocation9 + $0x1a6c] ss:$48 sps:$4 sm:$0xff]  }
 0x985   :  { %16237 = vmatprep.subr.bf16.mxu1 %v22310_v4  ;;  %v22377_v4 = vld [vmem:[#allocation9 + $0x1a60] ss:$48 sps:$4 sm:$0xff]  }
 0x987   :  { %16156 = vmatpush1.bf16.msra.mxu0 %v22305_v0  ;;  %v22380_v0 = vld [vmem:[#allocation9 + $0x1a68] ss:$48 sps:$4 sm:$0xff]  }
 0x988   :  { %16238 = vmatpush1.bf16.msra.mxu1 %v22308_v2  ;;  %16157 = vmatprep.subr.bf16.mxu0 %v22313_v52  ;;  %v22385_v2 = vld [vmem:[#allocation9 + $0x1ac4] ss:$48 sps:$4 sm:$0xff]   ;;  %v22388_v52 = vld [vmem:[#allocation9 + $0x1acc] ss:$48 sps:$4 sm:$0xff]  }
 0x989   :  { %16239 = vmatprep.subr.bf16.mxu1 %v22316_v6  ;;  %v22383_v6 = vld [vmem:[#allocation9 + $0x1ac0] ss:$48 sps:$4 sm:$0xff]  }
 0x98b   :  { %16158 = vmatpush1.bf16.msra.mxu0 %v22311_v7  ;;  %v22386_v7 = vld [vmem:[#allocation9 + $0x1ac8] ss:$48 sps:$4 sm:$0xff]  }
 0x98c   :  { %16240 = vmatpush1.bf16.msra.mxu1 %v22314_v50  ;;  %16159 = vmatprep.subr.bf16.mxu0 %v22319_v5  ;;  %v22391_v50 = vld [vmem:[#allocation9 + $0x1b24] ss:$48 sps:$4 sm:$0xff]   ;;  %v22394_v5 = vld [vmem:[#allocation9 + $0x1b2c] ss:$48 sps:$4 sm:$0xff]  }
 0x98d   :  { %16241 = vmatprep.subr.bf16.mxu1 %v22322_v17  ;;  %v22389_v17 = vld [vmem:[#allocation9 + $0x1b20] ss:$48 sps:$4 sm:$0xff]  }
 0x98f   :  { %16160 = vmatpush1.bf16.msra.mxu0 %v22317_v28  ;;  %v22392_v28 = vld [vmem:[#allocation9 + $0x1b28] ss:$48 sps:$4 sm:$0xff]  }
 0x990   :  { %16242 = vmatpush1.bf16.msra.mxu1 %v22320_v24  ;;  %16161 = vmatprep.subr.bf16.mxu0 %v22325_v25  ;;  %v22397_v24 = vld [vmem:[#allocation9 + $0x1b84] ss:$48 sps:$4 sm:$0xff]   ;;  %v22400_v25 = vld [vmem:[#allocation9 + $0x1b8c] ss:$48 sps:$4 sm:$0xff]  }
 0x991   :  { %16243 = vmatprep.subr.bf16.mxu1 %v22328_v9  ;;  %v22395_v9 = vld [vmem:[#allocation9 + $0x1b80] ss:$48 sps:$4 sm:$0xff]  }
 0x993   :  { %16162 = vmatpush1.bf16.msra.mxu0 %v22323_v27  ;;  %v22398_v27 = vld [vmem:[#allocation9 + $0x1b88] ss:$48 sps:$4 sm:$0xff]  }
 0x994   :  { %16244 = vmatpush1.bf16.msra.mxu1 %v22326_v15  ;;  %16163 = vmatprep.subr.bf16.mxu0 %v22331_v30  ;;  %v22403_v15 = vld [vmem:[#allocation9 + $0x1be4] ss:$48 sps:$4 sm:$0xff]   ;;  %v22406_v30 = vld [vmem:[#allocation9 + $0x1bec] ss:$48 sps:$4 sm:$0xff]  }
 0x995   :  { %16245 = vmatprep.subr.bf16.mxu1 %v22334_v31  ;;  %v22401_v31 = vld [vmem:[#allocation9 + $0x1be0] ss:$48 sps:$4 sm:$0xff]  }
 0x997   :  { %16164 = vmatpush1.bf16.msra.mxu0 %v22329_v32  ;;  %v22404_v32 = vld [vmem:[#allocation9 + $0x1be8] ss:$48 sps:$4 sm:$0xff]  }
 0x998   :  { %16246 = vmatpush1.bf16.msra.mxu1 %v22332_v34  ;;  %16165 = vmatprep.subr.bf16.mxu0 %v22337_v35  ;;  %v22409_v34 = vld [vmem:[#allocation9 + $0x1c44] ss:$48 sps:$4 sm:$0xff]   ;;  %v22412_v35 = vld [vmem:[#allocation9 + $0x1c4c] ss:$48 sps:$4 sm:$0xff]  }
 0x999   :  { %16247 = vmatprep.subr.bf16.mxu1 %v22340_v33  ;;  %v22407_v33 = vld [vmem:[#allocation9 + $0x1c40] ss:$48 sps:$4 sm:$0xff]  }
 0x99b   :  { %16166 = vmatpush1.bf16.msra.mxu0 %v22335_v63  ;;  %v22410_v63 = vld [vmem:[#allocation9 + $0x1c48] ss:$48 sps:$4 sm:$0xff]  }
 0x99c   :  { %16248 = vmatpush1.bf16.msra.mxu1 %v22338_v10  ;;  %16258 = vmatprep.subr.bf16.mxu0 %v22343_v40  ;;  %v22415_v10 = vld [vmem:[#allocation9 + $0x1ca4] ss:$48 sps:$4 sm:$0xff]   ;;  %v22418_v40 = vld [vmem:[#allocation9 + $0x1cac] ss:$48 sps:$4 sm:$0xff]  }
 0x99d   :  { %16340 = vmatprep.subr.bf16.mxu1 %v22346_v47  ;;  %v22413_v47 = vld [vmem:[#allocation9 + $0x1ca0] ss:$48 sps:$4 sm:$0xff]  }
 0x99e   :  { %16168 = vmatmul.mubr.bf16.vlgmr.msra.gmra.mrb[40].mxu0 %v23438_v29 }
 0x99f   :  { %16250 = vmatmul.mubr.bf16.vlgmr.msra.gmra.mrb[40].mxu1 %v23438_v29  ;;  %16259 = vmatpush1.bf16.msra.mxu0 %v22341_v46  ;;  %v22416_v46 = vld [vmem:[#allocation9 + $0x1ca8] ss:$48 sps:$4 sm:$0xff]  }
 0x9a0   :  { %16341 = vmatpush1.bf16.msra.mxu1 %v22344_v41  ;;  %16260 = vmatprep.subr.bf16.mxu0 %v22349_v1  ;;  %v22421_v41 = vld [vmem:[#allocation9 + $0x1d04] ss:$48 sps:$4 sm:$0xff]   ;;  %v22424_v1 = vld [vmem:[#allocation9 + $0x1d0c] ss:$48 sps:$4 sm:$0xff]  }
 0x9a1   :  { %16342 = vmatprep.subr.bf16.mxu1 %v22352_v18  ;;  %16290 = vmatprep.mubr.bf16.mxu0 %v23424_v62  ;;  %v22419_v18 = vld [vmem:[#allocation9 + $0x1d00] ss:$48 sps:$4 sm:$0xff]  }
 0x9a2   :  { %16372 = vmatprep.mubr.bf16.mxu1 %v23424_v62  ;;  %v22368_v62 = vld [vmem:[#allocation9 + $0x19a8] ss:$48 sps:$4 sm:$0xff]  }
 0x9a3   :  { %16261 = vmatpush1.bf16.msra.mxu0 %v22347_v42  ;;  %v22422_v42 = vld [vmem:[#allocation9 + $0x1d08] ss:$48 sps:$4 sm:$0xff]  }
 0x9a4   :  { %16343 = vmatpush1.bf16.msra.mxu1 %v22350_v43  ;;  %16262 = vmatprep.subr.bf16.mxu0 %v22355_v49  ;;  %v22427_v43 = vld [vmem:[#allocation9 + $0x1d64] ss:$48 sps:$4 sm:$0xff]   ;;  %v22430_v49 = vld [vmem:[#allocation9 + $0x1d6c] ss:$48 sps:$4 sm:$0xff]  }
 0x9a5   :  { %16344 = vmatprep.subr.bf16.mxu1 %v22358_v37  ;;  %v22425_v37 = vld [vmem:[#allocation9 + $0x1d60] ss:$48 sps:$4 sm:$0xff]  }
 0x9a7   :  { %16263 = vmatpush1.bf16.msra.mxu0 %v22353_v51  ;;  %v22428_v51 = vld [vmem:[#allocation9 + $0x1d68] ss:$48 sps:$4 sm:$0xff]  }
 0x9a8   :  { %16345 = vmatpush1.bf16.msra.mxu1 %v22356_v53  ;;  %16264 = vmatprep.subr.bf16.mxu0 %v22361_v56  ;;  %v22433_v53 = vld [vmem:[#allocation9 + $0x1dc4] ss:$48 sps:$4 sm:$0xff]   ;;  %v22436_v56 = vld [vmem:[#allocation9 + $0x1dcc] ss:$48 sps:$4 sm:$0xff]  }
 0x9a9   :  { %16346 = vmatprep.subr.bf16.mxu1 %v22364_v57  ;;  %v22431_v57 = vld [vmem:[#allocation9 + $0x1dc0] ss:$48 sps:$4 sm:$0xff]  }
 0x9ab   :  { %16265 = vmatpush1.bf16.msra.mxu0 %v22359_v58  ;;  %v22434_v58 = vld [vmem:[#allocation9 + $0x1dc8] ss:$48 sps:$4 sm:$0xff]  }
 0x9ac   :  { %16347 = vmatpush1.bf16.msra.mxu1 %v22362_v36  ;;  %16266 = vmatprep.subr.bf16.mxu0 %v22367_v39  ;;  %v22439_v36 = vld [vmem:[#allocation9 + $0x1e24] ss:$48 sps:$4 sm:$0xff]   ;;  %v22442_v39 = vld [vmem:[#allocation9 + $0x1e2c] ss:$48 sps:$4 sm:$0xff]  }
 0x9ad   :  { %16348 = vmatprep.subr.bf16.mxu1 %v22370_v13  ;;  %v22437_v13 = vld [vmem:[#allocation9 + $0x1e20] ss:$48 sps:$4 sm:$0xff]  }
 0x9af   :  { %16267 = vmatpush1.bf16.msra.mxu0 %v22365_v38  ;;  %v22440_v38 = vld [vmem:[#allocation9 + $0x1e28] ss:$48 sps:$4 sm:$0xff]  }
 0x9b0   :  { %16349 = vmatpush1.bf16.msra.mxu1 %v22368_v62  ;;  %16268 = vmatprep.subr.bf16.mxu0 %v22373_v59  ;;  %v22445_v62 = vld [vmem:[#allocation9 + $0x1e84] ss:$48 sps:$4 sm:$0xff]   ;;  %v22448_v59 = vld [vmem:[#allocation9 + $0x1e8c] ss:$48 sps:$4 sm:$0xff]  }
 0x9b1   :  { %16350 = vmatprep.subr.bf16.mxu1 %v22376_v61  ;;  %v22443_v61 = vld [vmem:[#allocation9 + $0x1e80] ss:$48 sps:$4 sm:$0xff]  }
 0x9b3   :  { %16269 = vmatpush1.bf16.msra.mxu0 %v22371_v55  ;;  %v22446_v55 = vld [vmem:[#allocation9 + $0x1e88] ss:$48 sps:$4 sm:$0xff]  }
 0x9b4   :  { %16351 = vmatpush1.bf16.msra.mxu1 %v22374_v45  ;;  %16270 = vmatprep.subr.bf16.mxu0 %v22379_v12  ;;  %v22451_v45 = vld [vmem:[#allocation9 + $0x1ee4] ss:$48 sps:$4 sm:$0xff]   ;;  %v22454_v12 = vld [vmem:[#allocation9 + $0x1eec] ss:$48 sps:$4 sm:$0xff]  }
 0x9b5   :  { %16352 = vmatprep.subr.bf16.mxu1 %v22382_v3  ;;  %v22449_v3 = vld [vmem:[#allocation9 + $0x1ee0] ss:$48 sps:$4 sm:$0xff]  }
 0x9b7   :  { %16271 = vmatpush1.bf16.msra.mxu0 %v22377_v4  ;;  %v22452_v4 = vld [vmem:[#allocation9 + $0x1ee8] ss:$48 sps:$4 sm:$0xff]  }
 0x9b8   :  { %16353 = vmatpush1.bf16.msra.mxu1 %v22380_v0  ;;  %16272 = vmatprep.subr.bf16.mxu0 %v22385_v2  ;;  %v22457_v0 = vld [vmem:[#allocation9 + $0x1f44] ss:$48 sps:$4 sm:$0xff]   ;;  %v22460_v2 = vld [vmem:[#allocation9 + $0x1f4c] ss:$48 sps:$4 sm:$0xff]  }
 0x9b9   :  { %16354 = vmatprep.subr.bf16.mxu1 %v22388_v52  ;;  %v22458_v52 = vld [vmem:[#allocation9 + $0x1f48] ss:$48 sps:$4 sm:$0xff]  }
 0x9bb   :  { %16273 = vmatpush1.bf16.msra.mxu0 %v22383_v6  ;;  %v22463_v6 = vld [vmem:[#allocation9 + $0x1fa4] ss:$48 sps:$4 sm:$0xff]  }
 0x9bc   :  { %16355 = vmatpush1.bf16.msra.mxu1 %v22386_v7  ;;  %16274 = vmatprep.subr.bf16.mxu0 %v22391_v50  ;;  %v22466_v7 = vld [vmem:[#allocation9 + $0x1fac] ss:$48 sps:$4 sm:$0xff]   ;;  %v22461_v50 = vld [vmem:[#allocation9 + $0x1fa0] ss:$48 sps:$4 sm:$0xff]  }
 0x9bd   :  { %16356 = vmatprep.subr.bf16.mxu1 %v22394_v5  ;;  %v22469_v5 = vld [vmem:[#allocation9 + $0x2004] ss:$48 sps:$4 sm:$0xff]  }
 0x9bf   :  { %16275 = vmatpush1.bf16.msra.mxu0 %v22389_v17  ;;  %v22472_v17 = vld [vmem:[#allocation9 + $0x200c] ss:$48 sps:$4 sm:$0xff]  }
 0x9c0   :  { %16357 = vmatpush1.bf16.msra.mxu1 %v22392_v28  ;;  %16276 = vmatprep.subr.bf16.mxu0 %v22397_v24  ;;  %v22467_v28 = vld [vmem:[#allocation9 + $0x2000] ss:$48 sps:$4 sm:$0xff]   ;;  %v22470_v24 = vld [vmem:[#allocation9 + $0x2008] ss:$48 sps:$4 sm:$0xff]  }
 0x9c1   :  { %16358 = vmatprep.subr.bf16.mxu1 %v22400_v25  ;;  %v22475_v25 = vld [vmem:[#allocation9 + $0x2064] ss:$48 sps:$4 sm:$0xff]  }
 0x9c3   :  { %16277 = vmatpush1.bf16.msra.mxu0 %v22395_v9 }
 0x9c4   :  { %16359 = vmatpush1.bf16.msra.mxu1 %v22398_v27  ;;  %16278 = vmatprep.subr.bf16.mxu0 %v22403_v15  ;;  %v22478_v27 = vld [vmem:[#allocation9 + $0x206c] ss:$48 sps:$4 sm:$0xff]  }
 0x9c5   :  { %16360 = vmatprep.subr.bf16.mxu1 %v22406_v30 }
 0x9c7   :  { %16279 = vmatpush1.bf16.msra.mxu0 %v22401_v31 }
 0x9c8   :  { %16361 = vmatpush1.bf16.msra.mxu1 %v22404_v32  ;;  %16280 = vmatprep.subr.bf16.mxu0 %v22409_v34  ;;  %v22473_v34 = vld [vmem:[#allocation9 + $0x2060] ss:$48 sps:$4 sm:$0xff]  }
 0x9c9   :  { %16362 = vmatprep.subr.bf16.mxu1 %v22412_v35 }
 0x9cb   :  { %16281 = vmatpush1.bf16.msra.mxu0 %v22407_v33 }
 0x9cc   :  { %16363 = vmatpush1.bf16.msra.mxu1 %v22410_v63  ;;  %16282 = vmatprep.subr.bf16.mxu0 %v22415_v10  ;;  %v22476_v63 = vld [vmem:[#allocation9 + $0x2068] ss:$48 sps:$4 sm:$0xff]   ;;  %v22481_v10 = vld [vmem:[#allocation9 + $0x20c4] ss:$48 sps:$4 sm:$0xff]  }
 0x9cd   :  { %16364 = vmatprep.subr.bf16.mxu1 %v22418_v40 }
 0x9cf   :  { %16283 = vmatpush1.bf16.msra.mxu0 %v22413_v47  ;;  %v22484_v47 = vld [vmem:[#allocation9 + $0x20cc] ss:$48 sps:$4 sm:$0xff]  }
 0x9d0   :  { %16365 = vmatpush1.bf16.msra.mxu1 %v22416_v46  ;;  %16284 = vmatprep.subr.bf16.mxu0 %v22421_v41  ;;  %v22479_v46 = vld [vmem:[#allocation9 + $0x20c0] ss:$48 sps:$4 sm:$0xff]   ;;  %v22482_v41 = vld [vmem:[#allocation9 + $0x20c8] ss:$48 sps:$4 sm:$0xff]  }
 0x9d1   :  { %16366 = vmatprep.subr.bf16.mxu1 %v22424_v1  ;;  %v22487_v1 = vld [vmem:[#allocation9 + $0x2124] ss:$48 sps:$4 sm:$0xff]  }
 0x9d3   :  { %16285 = vmatpush1.bf16.msra.mxu0 %v22419_v18  ;;  %v22490_v18 = vld [vmem:[#allocation9 + $0x212c] ss:$48 sps:$4 sm:$0xff]  }
 0x9d4   :  { %16367 = vmatpush1.bf16.msra.mxu1 %v22422_v42  ;;  %16286 = vmatprep.subr.bf16.mxu0 %v22427_v43  ;;  %v22485_v42 = vld [vmem:[#allocation9 + $0x2120] ss:$48 sps:$4 sm:$0xff]   ;;  %v22488_v43 = vld [vmem:[#allocation9 + $0x2128] ss:$48 sps:$4 sm:$0xff]  }
 0x9d5   :  { %16368 = vmatprep.subr.bf16.mxu1 %v22430_v49  ;;  %v22493_v49 = vld [vmem:[#allocation9 + $0x2184] ss:$48 sps:$4 sm:$0xff]  }
 0x9d7   :  { %16287 = vmatpush1.bf16.msra.mxu0 %v22425_v37  ;;  %v22496_v37 = vld [vmem:[#allocation9 + $0x218c] ss:$48 sps:$4 sm:$0xff]  }
 0x9d8   :  { %16369 = vmatpush1.bf16.msra.mxu1 %v22428_v51  ;;  %16288 = vmatprep.subr.bf16.mxu0 %v22433_v53  ;;  %v22491_v51 = vld [vmem:[#allocation9 + $0x2180] ss:$48 sps:$4 sm:$0xff]   ;;  %v22494_v53 = vld [vmem:[#allocation9 + $0x2188] ss:$48 sps:$4 sm:$0xff]  }
 0x9d9   :  { %16370 = vmatprep.subr.bf16.mxu1 %v22436_v56  ;;  %v22499_v56 = vld [vmem:[#allocation9 + $0x21e4] ss:$48 sps:$4 sm:$0xff]  }
 0x9db   :  { %16289 = vmatpush1.bf16.msra.mxu0 %v22431_v57  ;;  %v22502_v57 = vld [vmem:[#allocation9 + $0x21ec] ss:$48 sps:$4 sm:$0xff]  }
 0x9dc   :  { %16371 = vmatpush1.bf16.msra.mxu1 %v22434_v58  ;;  %16299 = vmatprep.subr.bf16.mxu0 %v22439_v36  ;;  %v22497_v58 = vld [vmem:[#allocation9 + $0x21e0] ss:$48 sps:$4 sm:$0xff]   ;;  %v22500_v36 = vld [vmem:[#allocation9 + $0x21e8] ss:$48 sps:$4 sm:$0xff]  }
 0x9dd   :  { %16381 = vmatprep.subr.bf16.mxu1 %v22442_v39  ;;  %v22505_v39 = vld [vmem:[#allocation9 + $0x2244] ss:$48 sps:$4 sm:$0xff]  }
 0x9de   :  { %16291 = vmatmul.mubr.bf16.vlgmr.msra.gmra.mrb[52].mxu0 %v23430_v60 }
 0x9df   :  { %16300 = vmatpush1.bf16.msra.mxu0 %v22437_v13  ;;  %16373 = vmatmul.mubr.bf16.vlgmr.msra.gmra.mrb[52].mxu1 %v23430_v60  ;;  %v22455_v60 = vld [vmem:[#allocation9 + $0x1f40] ss:$48 sps:$4 sm:$0xff]   ;;  %v22508_v13 = vld [vmem:[#allocation9 + $0x224c] ss:$48 sps:$4 sm:$0xff]  }
 0x9e0   :  { %16382 = vmatpush1.bf16.msra.mxu1 %v22440_v38  ;;  %16301 = vmatprep.subr.bf16.mxu0 %v22445_v62  ;;  %v22503_v38 = vld [vmem:[#allocation9 + $0x2240] ss:$48 sps:$4 sm:$0xff]   ;;  %v22506_v62 = vld [vmem:[#allocation9 + $0x2248] ss:$48 sps:$4 sm:$0xff]  }
 0x9e1   :  { %16383 = vmatprep.subr.bf16.mxu1 %v22448_v59  ;;  %16331 = vmatprep.mubr.bf16.mxu0 %v23432_v14  ;;  %v22511_v59 = vld [vmem:[#allocation9 + $0x22a4] ss:$48 sps:$4 sm:$0xff]  }
 0x9e2   :  { %16413 = vmatprep.mubr.bf16.mxu1 %v23432_v14  ;;  %v22464_v14 = vld [vmem:[#allocation9 + $0x1fa8] ss:$48 sps:$4 sm:$0xff]  }
 0x9e3   :  { %16302 = vmatpush1.bf16.msra.mxu0 %v22443_v61  ;;  %v22514_v61 = vld [vmem:[#allocation9 + $0x22ac] ss:$48 sps:$4 sm:$0xff]  }
 0x9e4   :  { %16384 = vmatpush1.bf16.msra.mxu1 %v22446_v55  ;;  %16303 = vmatprep.subr.bf16.mxu0 %v22451_v45  ;;  %v22509_v55 = vld [vmem:[#allocation9 + $0x22a0] ss:$48 sps:$4 sm:$0xff]   ;;  %v22512_v45 = vld [vmem:[#allocation9 + $0x22a8] ss:$48 sps:$4 sm:$0xff]  }
 0x9e5   :  { %16385 = vmatprep.subr.bf16.mxu1 %v22454_v12  ;;  %v22517_v12 = vld [vmem:[#allocation9 + $0x2304] ss:$48 sps:$4 sm:$0xff]  }
 0x9e7   :  { %16304 = vmatpush1.bf16.msra.mxu0 %v22449_v3  ;;  %v22520_v3 = vld [vmem:[#allocation9 + $0x230c] ss:$48 sps:$4 sm:$0xff]  }
 0x9e8   :  { %16386 = vmatpush1.bf16.msra.mxu1 %v22452_v4  ;;  %16305 = vmatprep.subr.bf16.mxu0 %v22457_v0  ;;  %v22515_v4 = vld [vmem:[#allocation9 + $0x2300] ss:$48 sps:$4 sm:$0xff]   ;;  %v22518_v0 = vld [vmem:[#allocation9 + $0x2308] ss:$48 sps:$4 sm:$0xff]  }
 0x9e9   :  { %16387 = vmatprep.subr.bf16.mxu1 %v22460_v2  ;;  %v22523_v2 = vld [vmem:[#allocation9 + $0x2364] ss:$48 sps:$4 sm:$0xff]  }
 0x9eb   :  { %16306 = vmatpush1.bf16.msra.mxu0 %v22455_v60  ;;  %v22526_v60 = vld [vmem:[#allocation9 + $0x236c] ss:$48 sps:$4 sm:$0xff]  }
 0x9ec   :  { %16388 = vmatpush1.bf16.msra.mxu1 %v22458_v52  ;;  %16307 = vmatprep.subr.bf16.mxu0 %v22463_v6  ;;  %v22521_v52 = vld [vmem:[#allocation9 + $0x2360] ss:$48 sps:$4 sm:$0xff]   ;;  %v22524_v6 = vld [vmem:[#allocation9 + $0x2368] ss:$48 sps:$4 sm:$0xff]  }
 0x9ed   :  { %16389 = vmatprep.subr.bf16.mxu1 %v22466_v7  ;;  %v22529_v7 = vld [vmem:[#allocation9 + $0x23c4] ss:$48 sps:$4 sm:$0xff]  }
 0x9ef   :  { %16308 = vmatpush1.bf16.msra.mxu0 %v22461_v50  ;;  %v22532_v50 = vld [vmem:[#allocation9 + $0x23cc] ss:$48 sps:$4 sm:$0xff]  }
 0x9f0   :  { %16390 = vmatpush1.bf16.msra.mxu1 %v22464_v14  ;;  %16309 = vmatprep.subr.bf16.mxu0 %v22469_v5  ;;  %v22527_v14 = vld [vmem:[#allocation9 + $0x23c0] ss:$48 sps:$4 sm:$0xff]   ;;  %v22530_v5 = vld [vmem:[#allocation9 + $0x23c8] ss:$48 sps:$4 sm:$0xff]  }
 0x9f1   :  { %v23478_v9 = vpop.f32.mrb[36].mxu0  ;;  %16391 = vmatprep.subr.bf16.mxu1 %v22472_v17  ;;  %v22533_v17 = vld [vmem:[#allocation12 + $0x40] sm:$0xff]  }
 0x9f2   :  { %v23480_v15 = vpop.f32.mrb[36].mxu1  ;;  %v23482_v30 = vpop.f32.mrb[37].mxu0 }
 0x9f3   :  { %v23484_v31 = vpop.f32.mrb[37].mxu1  ;;  %v16009_v32 = vpop.f32.mrb[38].mxu0  ;;  %16310 = vmatpush1.bf16.msra.mxu0 %v22467_v28  ;;  %v22534_v28 = vld [vmem:[#allocation12 + $0xc0] sm:$0xff]  }
 0x9f4   :  { %v16091_v35 = vpop.f32.mrb[38].mxu1  ;;  %16392 = vmatpush1.bf16.msra.mxu1 %v22470_v24  ;;  %v16010_v33 = vpop.f32.mrb[39].mxu0  ;;  %16311 = vmatprep.subr.bf16.mxu0 %v22475_v25  ;;  %v22535_v24 = vld [vmem:[#allocation12] sm:$0xff]   ;;  %v22538_v32 = vld [vmem:[#allocation12 + $0xc8] sm:$0xff]  }
 0x9f5   :  { %v16092_v40 = vpop.f32.mrb[39].mxu1  ;;  %16393 = vmatprep.subr.bf16.mxu1 %v22478_v27  ;;  %v22536_v25 = vld [vmem:[#allocation12 + $0x80] sm:$0xff]   ;;  %v22537_v27 = vld [vmem:[#allocation12 + $0x48] sm:$0xff]  }
 0x9f6   :  { %v22540_v35 = vld [vmem:[#allocation12 + $0x88] sm:$0xff]  }
 0x9f7   :  { %16312 = vmatpush1.bf16.msra.mxu0 %v22473_v34  ;;  %v22539_v34 = vld [vmem:[#allocation12 + $0x8] sm:$0xff]  }
 0x9f8   :  { %16394 = vmatpush1.bf16.msra.mxu1 %v22476_v63  ;;  %16313 = vmatprep.subr.bf16.mxu0 %v22481_v10 }
 0x9f9   :  { %16395 = vmatprep.subr.bf16.mxu1 %v22484_v47 }
 0x9fb   :  { %16314 = vmatpush1.bf16.msra.mxu0 %v22479_v46  ;;  %v22541_v46 = vld [vmem:[#allocation12 + $0x50] sm:$0xff]  }
 0x9fc   :  { %16396 = vmatpush1.bf16.msra.mxu1 %v22482_v41  ;;  %16315 = vmatprep.subr.bf16.mxu0 %v22487_v1  ;;  %v22542_v41 = vld [vmem:[#allocation12 + $0xd0] sm:$0xff]  }
 0x9fd   :  { %16397 = vmatprep.subr.bf16.mxu1 %v22490_v18  ;;  %v22543_v18 = vld [vmem:[#allocation12 + $0x10] sm:$0xff]  }
 0x9ff   :  { %16316 = vmatpush1.bf16.msra.mxu0 %v22485_v42  ;;  %v22544_v42 = vld [vmem:[#allocation12 + $0x90] sm:$0xff]  }
 0xa00   :  { %16398 = vmatpush1.bf16.msra.mxu1 %v22488_v43  ;;  %16317 = vmatprep.subr.bf16.mxu0 %v22493_v49  ;;  %v22545_v49 = vld [vmem:[#allocation12 + $0x58] sm:$0xff]  }
 0xa01   :  { %16399 = vmatprep.subr.bf16.mxu1 %v22496_v37  ;;  %v22546_v37 = vld [vmem:[#allocation12 + $0xd8] sm:$0xff]  }
 0xa03   :  { %16318 = vmatpush1.bf16.msra.mxu0 %v22491_v51  ;;  %v22547_v51 = vld [vmem:[#allocation12 + $0x18] sm:$0xff]  }
 0xa04   :  { %16400 = vmatpush1.bf16.msra.mxu1 %v22494_v53  ;;  %16319 = vmatprep.subr.bf16.mxu0 %v22499_v56  ;;  %v22548_v53 = vld [vmem:[#allocation12 + $0x98] sm:$0xff]   ;;  %v22549_v56 = vld [vmem:[#allocation12 + $0x60] sm:$0xff]  }
 0xa05   :  { %16401 = vmatprep.subr.bf16.mxu1 %v22502_v57  ;;  %v22550_v57 = vld [vmem:[#allocation12 + $0xe0] sm:$0xff]  }
 0xa07   :  { %16320 = vmatpush1.bf16.msra.mxu0 %v22497_v58  ;;  %v22551_v58 = vld [vmem:[#allocation12 + $0x20] sm:$0xff]  }
 0xa08   :  { %16402 = vmatpush1.bf16.msra.mxu1 %v22500_v36  ;;  %16321 = vmatprep.subr.bf16.mxu0 %v22505_v39  ;;  %v22552_v36 = vld [vmem:[#allocation12 + $0xa0] sm:$0xff]   ;;  %v22553_v39 = vld [vmem:[#allocation12 + $0x68] sm:$0xff]  }
 0xa09   :  { %16403 = vmatprep.subr.bf16.mxu1 %v22508_v13  ;;  %v22554_v13 = vld [vmem:[#allocation12 + $0xe8] sm:$0xff]  }
 0xa0b   :  { %16322 = vmatpush1.bf16.msra.mxu0 %v22503_v38  ;;  %v22555_v38 = vld [vmem:[#allocation12 + $0x28] sm:$0xff]  }
 0xa0c   :  { %16404 = vmatpush1.bf16.msra.mxu1 %v22506_v62  ;;  %16323 = vmatprep.subr.bf16.mxu0 %v22511_v59  ;;  %v22556_v62 = vld [vmem:[#allocation12 + $0xa8] sm:$0xff]   ;;  %v22557_v59 = vld [vmem:[#allocation12 + $0x70] sm:$0xff]  }
 0xa0d   :  { %16405 = vmatprep.subr.bf16.mxu1 %v22514_v61  ;;  %v22558_v61 = vld [vmem:[#allocation12 + $0xf0] sm:$0xff]  }
 0xa0f   :  { %16324 = vmatpush1.bf16.msra.mxu0 %v22509_v55  ;;  %v22559_v55 = vld [vmem:[#allocation12 + $0x30] sm:$0xff]  }
 0xa10   :  { %16406 = vmatpush1.bf16.msra.mxu1 %v22512_v45  ;;  %16325 = vmatprep.subr.bf16.mxu0 %v22517_v12  ;;  %v22560_v45 = vld [vmem:[#allocation12 + $0xb0] sm:$0xff]   ;;  %v22561_v12 = vld [vmem:[#allocation12 + $0x78] sm:$0xff]  }
 0xa11   :  { %16407 = vmatprep.subr.bf16.mxu1 %v22520_v3  ;;  %v22562_v3 = vld [vmem:[#allocation12 + $0xf8] sm:$0xff]  }
 0xa13   :  { %16326 = vmatpush1.bf16.msra.mxu0 %v22515_v4  ;;  %v22563_v4 = vld [vmem:[#allocation12 + $0x38] sm:$0xff]  }
 0xa14   :  { %16408 = vmatpush1.bf16.msra.mxu1 %v22518_v0  ;;  %16327 = vmatprep.subr.bf16.mxu0 %v22523_v2  ;;  %v22564_v0 = vld [vmem:[#allocation12 + $0xb8] sm:$0xff]   ;;  %v10982_v2 = vld [vmem:[#allocation11 + $0x30] sm:$0xff] }
 0xa15   :  { %16409 = vmatprep.subr.bf16.mxu1 %v22526_v60  ;;  %v10996_v60 = vrot.slane %v10982_v2, %v23158_v20 }
 0xa17   :  { %16328 = vmatpush1.bf16.msra.mxu0 %v22521_v52  ;;  %v13905_v52 = vrot.slane %v10982_v2, %v23154_v16 }
 0xa18   :  { %16410 = vmatpush1.bf16.msra.mxu1 %v22524_v6  ;;  %16329 = vmatprep.subr.bf16.mxu0 %v22529_v7  ;;  %v11004_v6 = vrot.slane %v10982_v2, %v23162_v22  ;;  %v13913_v7 = vrot.slane %v10982_v2, %v23156_v19 }
 0xa19   :  { %16411 = vmatprep.subr.bf16.mxu1 %v22532_v50  ;;  %v11000_v50 = vrot.slane %v10982_v2, %v23166_v48 }
 0xa1b   :  { %16330 = vmatpush1.bf16.msra.mxu0 %v22527_v14  ;;  %v13909_v14 = vrot.slane %v10982_v2, %v23160_v21 }
 0xa1c   :  { %16412 = vmatpush1.bf16.msra.mxu1 %v22530_v5  ;;  %19090 = vmatprep.subr.bf16.mxu0 %v22533_v17  ;;  %v11008_v5 = vrot.slane %v10982_v2, %v23170_v26  ;;  %v13917_v17 = vrot.slane %v10982_v2, %v23164_v23 }
 0xa1d   :  { %19112 = vmatprep.subr.bf16.mxu1 %v22534_v28  ;;  %v11056_v28 = vrot.slane %v10996_v60, %v23158_v20 }
 0xa1e   :  { %16332 = vmatmul.mubr.bf16.vlgmr.msra.gmra.mrb[52].mxu0 %v23438_v29 }
 0xa1f   :  { %16414 = vmatmul.mubr.bf16.vlgmr.msra.gmra.mrb[52].mxu1 %v23438_v29  ;;  %19091 = vmatpush3.bf16.msra.mxu0 %v22535_v24  ;;  %v13965_v24 = vrot.slane %v13905_v52, %v23154_v16 }
 0xa20   :  { %19113 = vmatpush3.bf16.msra.mxu1 %v22536_v25  ;;  %19092 = vmatprep.subr.bf16.mxu0 %v22537_v27  ;;  %v11064_v25 = vrot.slane %v11004_v6, %v23158_v20  ;;  %v13973_v27 = vrot.slane %v13913_v7, %v23154_v16 }
 0xa21   :  { %19114 = vmatprep.subr.bf16.mxu1 %v22538_v32  ;;  %v11060_v32 = vrot.slane %v11000_v50, %v23158_v20 }
 0xa23   :  { %19093 = vmatpush3.bf16.msra.mxu0 %v22539_v34  ;;  %v13969_v34 = vrot.slane %v13909_v14, %v23154_v16 }
 0xa24   :  { %19115 = vmatpush3.bf16.msra.mxu1 %v22540_v35  ;;  %19094 = vmatprep.subr.bf16.mxu0 %v22541_v46  ;;  %v11068_v35 = vrot.slane %v11008_v5, %v23158_v20  ;;  %v19174_v46 = vadd.f32 %v13965_v24, %v11056_v28 }
 0xa25   :  { %19116 = vmatprep.subr.bf16.mxu1 %v22542_v41  ;;  %v19178_v41 = vadd.f32 %v13973_v27, %v11064_v25 }
 0xa27   :  { %19095 = vmatpush3.bf16.msra.mxu0 %v22543_v18 }
 0xa28   :  { %19117 = vmatpush3.bf16.msra.mxu1 %v22544_v42  ;;  %19096 = vmatprep.subr.bf16.mxu0 %v22545_v49  ;;  %v19175_v42 = vadd.f32 %v19174_v46, %v23478_v9 }
 0xa29   :  { %19118 = vmatprep.subr.bf16.mxu1 %v22546_v37  ;;  %v19179_v37 = vadd.f32 %v19178_v41, %v23480_v15 }
 0xa2b   :  { %19097 = vmatpush3.bf16.msra.mxu0 %v22547_v51 }
 0xa2c   :  { %19119 = vmatpush3.bf16.msra.mxu1 %v22548_v53  ;;  %19098 = vmatprep.subr.bf16.mxu0 %v22549_v56 }
 0xa2d   :  { %19120 = vmatprep.subr.bf16.mxu1 %v22550_v57 }
 0xa2f   :  { %19099 = vmatpush3.bf16.msra.mxu0 %v22551_v58 }
 0xa30   :  { %19121 = vmatpush3.bf16.msra.mxu1 %v22552_v36  ;;  %19100 = vmatprep.subr.bf16.mxu0 %v22553_v39 }
 0xa31   :  { %19122 = vmatprep.subr.bf16.mxu1 %v22554_v13  ;;  %v19049_v13 = vmul.f32 -1.442695, %v19175_v42 }
 0xa33   :  { %19101 = vmatpush3.bf16.msra.mxu0 %v22555_v38  ;;  %22645 = vpow2.f32 %v19049_v13 }
 0xa34   :  { %19123 = vmatpush3.bf16.msra.mxu1 %v22556_v62  ;;  %19102 = vmatprep.subr.bf16.mxu0 %v22557_v59 }
 0xa35   :  { %19124 = vmatprep.subr.bf16.mxu1 %v22558_v61 }
 0xa37   :  { %19103 = vmatpush3.bf16.msra.mxu0 %v22559_v55 }
 0xa38   :  { %19125 = vmatpush3.bf16.msra.mxu1 %v22560_v45  ;;  %19104 = vmatprep.subr.bf16.mxu0 %v22561_v12 }
 0xa39   :  { %19126 = vmatprep.subr.bf16.mxu1 %v22562_v3 }
 0xa3b   :  { %19105 = vmatpush3.bf16.msra.mxu0 %v22563_v4 }
 0xa3c   :  { %19127 = vmatpush3.bf16.msra.mxu1 %v22564_v0 }
 0xa3d   :  { %v22646_v7 = vpop.eup %22645 }
 0xa3e   :  { %v16438_v24 = vadd.f32 1.0, %v22646_v7  ;;  %v22695_v7 = vld [vmem:[#allocation3 + $0x40] sm:$0xff] }
 0xa71   :  { %v23488_v33 = vpop.f32.mrb[40].mxu0 }
 0xa72   :  { %v23490_v63 = vpop.f32.mrb[40].mxu1  ;;  %v23492_v10 = vpop.f32.mrb[41].mxu0 }
 0xa73   :  { %v23494_v40 = vpop.f32.mrb[41].mxu1  ;;  %v16173_v47 = vpop.f32.mrb[42].mxu0 }
 0xa74   :  { %v16255_v29 = vpop.f32.mrb[42].mxu1  ;;  %v16174_v1 = vpop.f32.mrb[43].mxu0  ;;  %v13977_v47 = vrot.slane %v13917_v17, %v23154_v16 }
 0xa75   :  { %v16256_v43 = vpop.f32.mrb[43].mxu1  ;;  %v10983_v29 = vld [vmem:[#allocation11 + $0x38] sm:$0xff]  ;;  %v19176_v1 = vadd.f32 %v13969_v34, %v11060_v32 }
 0xa76   :  { %v19180_v18 = vadd.f32 %v13977_v47, %v11068_v35  ;;  %v11012_v43 = vrot.slane %v10983_v29, %v23158_v20  ;;  %v13921_v49 = vrot.slane %v10983_v29, %v23154_v16  ;;  %v11020_v51 = vrot.slane %v10983_v29, %v23162_v22 }
 0xa77   :  { %v13929_v53 = vrot.slane %v10983_v29, %v23156_v19  ;;  %v19177_v56 = vadd.f32 %v19176_v1, %v23482_v30  ;;  %v11016_v57 = vrot.slane %v10983_v29, %v23166_v48  ;;  %v13925_v58 = vrot.slane %v10983_v29, %v23160_v21 }
 0xa78   :  { %v19181_v36 = vadd.f32 %v19180_v18, %v23484_v31  ;;  %v11024_v9 = vrot.slane %v10983_v29, %v23170_v26  ;;  %v13933_v39 = vrot.slane %v10983_v29, %v23164_v23  ;;  %v11072_v38 = vrot.slane %v11012_v43, %v23158_v20 }
 0xa79   :  { %v13981_v15 = vrot.slane %v13921_v49, %v23154_v16  ;;  %v19051_v22 = vmul.f32 -1.442695, %v19179_v37  ;;  %v11080_v62 = vrot.slane %v11020_v51, %v23158_v20  ;;  %v13989_v30 = vrot.slane %v13929_v53, %v23154_v16 }
 0xa7a   :  { %v19050_v59 = vmul.f32 -1.442695, %v19177_v56  ;;  %v11076_v48 = vrot.slane %v11016_v57, %v23158_v20  ;;  %v13985_v61 = vrot.slane %v13925_v58, %v23154_v16  ;;  %v19052_v31 = vmul.f32 -1.442695, %v19181_v36 }
 0xa7b   :  { %v11084_v26 = vrot.slane %v11024_v9, %v23158_v20  ;;  %v13993_v55 = vrot.slane %v13933_v39, %v23154_v16  ;;  %v19182_v45 = vadd.f32 %v13981_v15, %v11072_v38  ;;  %22647 = vpow2.f32 %v19051_v22 }
 0xa7c   :  { %v19186_v12 = vadd.f32 %v13989_v30, %v11080_v62  ;;  %22649 = vpow2.f32 %v19050_v59  ;;  %v19184_v3 = vadd.f32 %v13985_v61, %v11076_v48 }
 0xa7d   :  { %22651 = vpow2.f32 %v19052_v31  ;;  %v19188_v4 = vadd.f32 %v13993_v55, %v11084_v26  ;;  %v19183_v0 = vadd.f32 %v19182_v45, %v23488_v33 }
 0xa7e   :  { %v19187_v2 = vadd.f32 %v19186_v12, %v23490_v63  ;;  %v19185_v60 = vadd.f32 %v19184_v3, %v23492_v10  ;;  %v22694_v10 = vld [vmem:[#allocation11 + $0x40] sm:$0xff] }
 0xa7f   :  { %v19189_v52 = vadd.f32 %v19188_v4, %v23494_v40  ;;  %v19053_v6 = vmul.f32 -1.442695, %v19183_v0  ;;  %v13937_v40 = vrot.slane %v22694_v10, %v23154_v16  ;;  %v13945_v27 = vrot.slane %v22694_v10, %v23156_v19 }
 0xa80   :  { %v19055_v20 = vmul.f32 -1.442695, %v19187_v2  ;;  %v19054_v50 = vmul.f32 -1.442695, %v19185_v60  ;;  %v13941_v32 = vrot.slane %v22694_v10, %v23160_v21  ;;  %v13949_v34 = vrot.slane %v22694_v10, %v23164_v23  ;;  %v22698_v10 = vld [vmem:[#allocation3 + $0x58] sm:$0xff] }
 0xa81   :  { %v19056_v5 = vmul.f32 -1.442695, %v19189_v52  ;;  %22653 = vpow2.f32 %v19053_v6  ;;  %v13997_v46 = vrot.slane %v13937_v40, %v23154_v16  ;;  %v14005_v29 = vrot.slane %v13945_v27, %v23154_v16 }
 0xa82   :  { %22655 = vpow2.f32 %v19055_v20  ;;  %v14001_v1 = vrot.slane %v13941_v32, %v23154_v16  ;;  %v14009_v43 = vrot.slane %v13949_v34, %v23154_v16 }
 0xa83   :  { %22657 = vpow2.f32 %v19054_v50 }
 0xa84   :  { %22659 = vpow2.f32 %v19056_v5  ;;  %v22696_v5 = vld [vmem:[#allocation3 + $0x50] sm:$0xff] }
 0xa85   :  { %v22648_v14 = vpop.eup %22647  ;;  %22661 = vrcp.f32 %v16438_v24  ;;  %v22697_v24 = vld [vmem:[#allocation3 + $0x48] sm:$0xff] }
 0xa86   :  { %v22650_v17 = vpop.eup %22649  ;;  %v16440_v25 = vadd.f32 1.0, %v22648_v14 }
 0xa87   :  { %v22652_v28 = vpop.eup %22651  ;;  %v16439_v33 = vadd.f32 1.0, %v22650_v17 }
 0xa88   :  { %v16441_v63 = vadd.f32 1.0, %v22652_v28  ;;  %22663 = vrcp.f32 %v16440_v25 }
 0xa89   :  { %22665 = vrcp.f32 %v16439_v33 }
 0xa8a   :  { %22667 = vrcp.f32 %v16441_v63 }
 0xa8b   :  { %v22654_v35 = vpop.eup %22653 }
 0xa8c   :  { %v22656_v47 = vpop.eup %22655  ;;  %v16466_v42 = vadd.f32 1.0, %v22654_v35 }
 0xa8d   :  { %v22658_v41 = vpop.eup %22657  ;;  %v16468_v49 = vadd.f32 1.0, %v22656_v47 }
 0xa8e   :  { %v22660_v18 = vpop.eup %22659  ;;  %v16467_v51 = vadd.f32 1.0, %v22658_v41  ;;  %22669 = vrcp.f32 %v16466_v42 }
 0xa8f   :  { %v22662_v19 = vpop.eup %22661  ;;  %v16469_v57 = vadd.f32 1.0, %v22660_v18  ;;  %22671 = vrcp.f32 %v16468_v49 }
 0xa90   :  { %22673 = vrcp.f32 %v16467_v51 }
 0xa91   :  { %22675 = vrcp.f32 %v16469_v57 }
 0xa92   :  { %v22664_v56 = vpop.eup %22663 }
 0xa93   :  { %v22666_v13 = vpop.eup %22665 }
 0xa94   :  { %v22668_v16 = vpop.eup %22667 }
 0xa98   :  { %v22670_v12 = vpop.eup %22669 }
 0xa99   :  { %v22672_v3 = vpop.eup %22671  ;;  %v16490_v2 = vsub.f32 1.0, %v22670_v12 }
 0xa9a   :  { %v22674_v4 = vpop.eup %22673  ;;  %v16492_v52 = vsub.f32 1.0, %v22672_v3 }
 0xa9b   :  { %v22676_v0 = vpop.eup %22675  ;;  %v16491_v6 = vsub.f32 1.0, %v22674_v4  ;;  %v16499_v25 = vmul.f32 %v22697_v24, %v22674_v4 }
 0xa9c   :  { %v16501_v40 = vmul.f32 %v22698_v10, %v22676_v0 }
 0xaf1   :  { %v16333_v37 = vpop.f32.mrb[52].mxu0 }
 0xaf2   :  { %v19190_v21 = vadd.f32 %v16333_v37, %v13997_v46  ;;  %v16415_v53 = vpop.f32.mrb[52].mxu1  ;;  %v16335_v23 = vpop.f32.mrb[53].mxu0 }
 0xaf3   :  { %v19192_v58 = vadd.f32 %v16415_v53, %v14005_v29  ;;  %v19191_v36 = vadd.f32 %v16335_v23, %v14001_v1  ;;  %v16417_v9 = vpop.f32.mrb[53].mxu1  ;;  %v16337_v39 = vpop.f32.mrb[54].mxu0 }
 0xaf4   :  { %v16478_v38 = vmul.f32 %v22662_v19, %v19190_v21  ;;  %v19193_v15 = vadd.f32 %v16417_v9, %v14009_v43  ;;  %v16419_v22 = vpop.f32.mrb[54].mxu1  ;;  %v16338_v62 = vpop.f32.mrb[55].mxu0 }
 0xaf5   :  { %v16480_v30 = vmul.f32 %v22664_v56, %v19192_v58  ;;  %v16479_v59 = vmul.f32 %v22666_v13, %v19191_v36  ;;  %v16420_v48 = vpop.f32.mrb[55].mxu1 }
 0xaf6   :  { %v16482_v61 = vadd.f32 %v16478_v38, %v23452_v8  ;;  %v16481_v31 = vmul.f32 %v22668_v16, %v19193_v15 }
 0xaf7   :  { %v16484_v26 = vadd.f32 %v16480_v30, %v23466_v44  ;;  %v16483_v55 = vadd.f32 %v16479_v59, %v23454_v11  ;;  %v16498_v44 = vmul.f32 %v22695_v7, %v22670_v12  ;;  %v16493_v11 = vsub.f32 1.0, %v22676_v0 }
 0xaf8   :  { %22677 = vtanh.f32 %v16482_v61  ;;  %v16485_v45 = vadd.f32 %v16481_v31, %v23468_v54  ;;  %v16500_v54 = vmul.f32 %v22696_v5, %v22672_v3 }
 0xaf9   :  { %22679 = vtanh.f32 %v16484_v26 }
 0xafa   :  { %22681 = vtanh.f32 %v16483_v55 }
 0xafb   :  { %22683 = vtanh.f32 %v16485_v45 }
 0xb02   :  { %v22678_v60 = vpop.eup %22677 }
 0xb03   :  { %v22680_v8 = vpop.eup %22679  ;;  %v16494_v20 = vmul.f32 %v22678_v60, %v16490_v2 }
 0xb04   :  { %v22682_v50 = vpop.eup %22681  ;;  %v16496_v14 = vmul.f32 %v22680_v8, %v16492_v52 }
 0xb05   :  { %v22684_v17 = vpop.eup %22683  ;;  %v16495_v28 = vmul.f32 %v22682_v50, %v16491_v6  ;;  %v16502_v33 = vadd.f32 %v16498_v44, %v16494_v20 }
 0xb06   :  { %v16497_v63 = vmul.f32 %v22684_v17, %v16493_v11  ;;  %v16504_v27 = vadd.f32 %v16500_v54, %v16496_v14 }
 0xb07   :  { %v16503_v32 = vadd.f32 %v16499_v25, %v16495_v28  ;;  %16881 = vst [vmem:[#allocation16 + $0x40] sm:$0xff] %v16502_v33  ;;  %v16510_v46 = vpack.c.bf16 %v16502_v33, %v16502_v33 }
 0xb08   :  { %v16505_v34 = vadd.f32 %v16501_v40, %v16497_v63  ;;  %16883 = vst [vmem:[#allocation16 + $0x50] sm:$0xff] %v16504_v27  ;;  %v16512_v41 = vpack.c.bf16 %v16504_v27, %v16504_v27 }
 0xb09   :  { %v16511_v35 = vpack.c.bf16 %v16503_v32, %v16503_v32  ;;  %16882 = vst [vmem:[#allocation16 + $0x48] sm:$0xff] %v16503_v32 }
 0xb0a   :  { %v16513_v47 = vpack.c.bf16 %v16505_v34, %v16505_v34  ;;  %16884 = vst [vmem:[#allocation16 + $0x58] sm:$0xff] %v16505_v34 }
 0xb0b   :  { %16809 = vmatprep.mubr.bf16.mxu0 %v16511_v35 }
 0xb0c   :  { %16849 = vmatprep.mubr.bf16.mxu1 %v16513_v47  ;;  %16810 = vmatmul.mubr.bf16.vlgmr.msra.gmra.mrb[56].mxu0 %v16510_v46 }
 0xb0d   :  { %16850 = vmatmul.mubr.bf16.vlgmr.msra.gmra.mrb[56].mxu1 %v16512_v41 }
 0xb0e   :  { %22864 = shalt.err (!%p22861_p4)
}
 0xb0f   :  { %s22865_s17 = scalar_lea.hbm %s23584_s9, 1536 }
 0xb10   :  { %p22866_p5 = scmp.ne.s32.totalorder %s23584_s9, %s22865_s17  ;;  %p22869_p6 = scmp.lt.u32.totalorder %s22865_s17, %s23584_s9 }
 0xb12   :  { %p22871_p7 = pnand %p22869_p6, %p22866_p5 }
 0xb14   :  { %22874 = shalt.err (!%p22871_p7)
}
 0xb15   :  { %16906 = dma.vmem_to_hbm [thread:$0]  %s16901_s10, 1536, %s23584_s9, [#allocation17], %s22917_s6, %s22917_s6, %s22918_s26   ;;  %v19057_v18 = vld [vmem:[#allocation14] ss:$0 sm:$0xff] }
 0xb16   :  { %s22925_s23 = smov [#allocation15]  }
 0xb17   :  { %s16891_s4 = sshll.u32 %s22925_s23, 4  ;;  %s16892_s4 = int_to_ptr.vmem [resolvable:$true] %s16891_s4 }
 0xb18   :  { %s22875_s24 = scalar_lea.vmem %s16892_s4, 128  ;;  %p22880_p9 = scmp.lt.s32.totalorder %s16892_s4, %s16892_s4 }
 0xb19   :  { %p22876_p8 = scmp.ne.s32.totalorder %s16892_s4, %s22875_s24  ;;  %p22881_p10 = scmp.lt.s32.totalorder %s22875_s24, %s22875_s24 }
 0xb1b   :  { %p22882_p11 = por %p22881_p10, %p22880_p9 }
 0xb1d   :  { %p22883_p12 = pnand %p22882_p11, %p22876_p8 }
 0xbdf   :  { %v19106_v29 = vpop.f32.mrb[56].mxu0 }
 0xbe0   :  { %v19128_v1 = vpop.f32.mrb[56].mxu1  ;;  %v19107_v42 = vpop.f32.mrb[57].mxu0 }
 0xbe1   :  { %v19108_v43 = vadd.f32 %v19107_v42, %v19106_v29  ;;  %v19129_v49 = vpop.f32.mrb[57].mxu1  ;;  %v19109_v37 = vpop.f32.mrb[58].mxu0 }
 0xbe2   :  { %v19130_v19 = vadd.f32 %v19129_v49, %v19128_v1  ;;  %v19131_v51 = vpop.f32.mrb[58].mxu1  ;;  %v19110_v21 = vpop.f32.mrb[59].mxu0 }
 0xbe3   :  { %v16812_v53 = vadd.f32 %v19108_v43, %v19057_v18  ;;  %v19132_v23 = vpop.f32.mrb[59].mxu1 }
 0xbe5   :  { %v16852_v56 = vadd.f32 %v19130_v19, %v16812_v53 }
 0xbe7   :  { %16857 = vst [vmem:[#allocation15] sm:$0xff] %v16852_v56 }
 0xbe8   :  { %22886 = shalt.err (!%p22883_p12)
}
 0xbe9   :  { %s22887_s26 = scalar_lea.hbm %s23583_s8, 128 }
 0xbea   :  { %p22888_p13 = scmp.ne.s32.totalorder %s23583_s8, %s22887_s26  ;;  %p22891_p0 = scmp.lt.u32.totalorder %s22887_s26, %s23583_s8 }
 0xbec   :  { %p22893_p1 = pnand %p22891_p0, %p22888_p13 }
 0xbee   :  { %22896 = shalt.err (!%p22893_p1)
}
 0xbef   :  { %16894 = dma.vmem_to_hbm [thread:$0]  %s16892_s4, 128, %s23583_s8, [#allocation5]  }
 0xbf0   :  { %22905 = dma.done.wait [#allocation5], 128  }
 0xbf1   :  { %22906 = vsyncadd [#allocation5], 4294967168 }
 0xbf2   :  { %22907 = dma.done.wait [#allocation17], 1536  }
 0xbf3   :  { %22908 = vsyncadd [#allocation17], 4294965760 }
 0xbf4   :  { %16913 = vsyncpa [#allocation4], 1 }
 0xbf5   :  { %16914 = vsyncpa [#allocation7], 1 }
 0xbf6   :  { %16915 = vsyncpa [#allocation10], 1 }
 0xbf7   :  { %16916 = vsyncpa [#allocation13], 1 }
 0xbf8   :  { %16917 = vsyncpa [#allocation5], 1 }
 0xbf9   :  { %16918 = vsyncpa [#allocation17], 1 }

</bundles_post_ra>
